<compile_context>
chip_gen: v7x
topology: tpu7x:2x2x1
jax: 0.10.0
libtpu: 0.0.40
codegen_flags: <defaults>
</compile_context>

<pallas_src>
import math
import functools

import jax
import jax.numpy as jnp
from jax.experimental import pallas as pl
from jax.experimental.pallas import tpu as pltpu


# ---------------------------------------------------------------------------
# Small helpers
# ---------------------------------------------------------------------------

def _prod(xs):
    return int(math.prod(xs)) if xs else 1


def _pick_tile(dim, candidates):
    """Largest candidate that evenly divides `dim`; else the full dim."""
    for c in candidates:
        if c <= dim and dim % c == 0:
            return c
    return dim


def _erf_f32(x):
    # Abramowitz & Stegun 7.1.26 rational approximation (max abs err ~1.5e-7,
    # i.e. float32-exact).  Uses only mul/add/div/exp/select so it lowers
    # cleanly in Mosaic (no dependence on a lax.erf lowering).
    a1, a2, a3, a4, a5 = (0.254829592, -0.284496736, 1.421413741,
                          -1.453152027, 1.061405429)
    p = 0.3275911
    ax = jnp.abs(x)
    t = 1.0 / (1.0 + p * ax)
    poly = ((((a5 * t + a4) * t + a3) * t + a2) * t + a1) * t
    y = 1.0 - poly * jnp.exp(-ax * ax)
    return jnp.where(x >= 0, y, -y)


def _gelu_exact(x):
    # Matches nn.GELU() default (approximate='none') to f32 precision.
    return 0.5 * x * (1.0 + _erf_f32(x * (1.0 / math.sqrt(2.0))))


# ---------------------------------------------------------------------------
# Kernel 1: tiled linear  (optional fused activation / residual epilogue)
# ---------------------------------------------------------------------------

def _matmul_kernel(*refs, activation, has_residual):
    if has_residual:
        x_ref, w_ref, b_ref, r_ref, o_ref, acc_ref = refs
    else:
        x_ref, w_ref, b_ref, o_ref, acc_ref = refs
        r_ref = None

    @pl.when(pl.program_id(2) == 0)
    def _():
        acc_ref[...] = jnp.zeros_like(acc_ref)

    acc_ref[...] += jnp.dot(x_ref[...].astype(jnp.float32),
                            w_ref[...].astype(jnp.float32),
                            preferred_element_type=jnp.float32)

    @pl.when(pl.program_id(2) == pl.num_programs(2) - 1)
    def _():
        y = acc_ref[...] + b_ref[...].astype(jnp.float32)
        if r_ref is not None:
            y = y + r_ref[...].astype(jnp.float32)
        if activation is not None:
            y = activation(y)
        o_ref[...] = y.astype(o_ref.dtype)


def linear(x, w, b, *, activation=None, residual=None):
    """y = act(x @ w + b [+ residual]).  x: (..., K), w: (K, N), b: (N,)."""
    *lead, K = x.shape
    M = _prod(lead)
    N = w.shape[1]
    x2 = x.reshape(M, K)

    tm = _pick_tile(M, (256, 128, 64, 56, 32, 16, 8))
    tn = _pick_tile(N, (512, 256, 128))
    tk = _pick_tile(K, (1024, 512, 256, 128))
    grid = (M // tm, N // tn, K // tk)

    has_res = residual is not None
    args = [x2, w, b.reshape(1, N)]
    in_specs = [
        pl.BlockSpec((tm, tk), lambda i, j, k: (i, k)),
        pl.BlockSpec((tk, tn), lambda i, j, k: (k, j)),
        pl.BlockSpec((1, tn), lambda i, j, k: (0, j)),
    ]
    if has_res:
        args.append(residual.reshape(M, N))
        in_specs.append(pl.BlockSpec((tm, tn), lambda i, j, k: (i, j)))

    out = pl.pallas_call(
        functools.partial(_matmul_kernel, activation=activation,
                          has_residual=has_res),
        out_shape=jax.ShapeDtypeStruct((M, N), x.dtype),
        grid=grid,
        in_specs=in_specs,
        out_specs=pl.BlockSpec((tm, tn), lambda i, j, k: (i, j)),
        scratch_shapes=[pltpu.VMEM((tm, tn), jnp.float32)],
        compiler_params=pltpu.CompilerParams(
            dimension_semantics=("parallel", "parallel", "arbitrary")),
    )(*args)
    return out.reshape(*lead, N)


# ---------------------------------------------------------------------------
# Kernel 2: fused LayerNorm -> linear (-> optional activation)
# ---------------------------------------------------------------------------

def _ln_linear_kernel(x_ref, g_ref, b_ref, w_ref, bias_ref, o_ref, *,
                      eps, activation):
    x = x_ref[...].astype(jnp.float32)
    mean = jnp.mean(x, axis=-1, keepdims=True)
    xc = x - mean
    var = jnp.mean(xc * xc, axis=-1, keepdims=True)
    h = xc * jax.lax.rsqrt(var + eps)
    h = h * g_ref[...].astype(jnp.float32) + b_ref[...].astype(jnp.float32)
    y = jnp.dot(h, w_ref[...].astype(jnp.float32),
                preferred_element_type=jnp.float32)
    y = y + bias_ref[...].astype(jnp.float32)
    if activation is not None:
        y = activation(y)
    o_ref[...] = y.astype(o_ref.dtype)


def ln_linear(x, gamma, beta, w, b, *, activation=None, eps=1e-6):
    """y = act(LayerNorm(x) @ w + b).  LN is over the last dim D (full K)."""
    *lead, D = x.shape
    M = _prod(lead)
    N = w.shape[1]
    x2 = x.reshape(M, D)

    tm = _pick_tile(M, (512, 256, 128, 64, 56, 32, 16, 8))
    tn = _pick_tile(N, (512, 256, 128))
    grid = (M // tm, N // tn)

    out = pl.pallas_call(
        functools.partial(_ln_linear_kernel, eps=eps, activation=activation),
        out_shape=jax.ShapeDtypeStruct((M, N), x.dtype),
        grid=grid,
        in_specs=[
            pl.BlockSpec((tm, D), lambda i, j: (i, 0)),
            pl.BlockSpec((1, D), lambda i, j: (0, 0)),
            pl.BlockSpec((1, D), lambda i, j: (0, 0)),
            pl.BlockSpec((D, tn), lambda i, j: (0, j)),
            pl.BlockSpec((1, tn), lambda i, j: (0, j)),
        ],
        out_specs=pl.BlockSpec((tm, tn), lambda i, j: (i, j)),
        compiler_params=pltpu.CompilerParams(
            dimension_semantics=("parallel", "parallel")),
    )(x2, gamma.reshape(1, D), beta.reshape(1, D), w, b.reshape(1, N))
    return out.reshape(*lead, N)


# ---------------------------------------------------------------------------
# Kernel 3: fused multi-head attention + out-projection + residual
# ---------------------------------------------------------------------------

def _attn_kernel(x_ref, qkv_ref, w_ref, b_ref, o_ref, *,
                 num_heads, head_dim, scale):
    D = num_heads * head_dim
    qkv = qkv_ref[0].astype(jnp.float32)          # (S, 3D)
    q = qkv[:, :D] * scale
    k = qkv[:, D:2 * D]
    v = qkv[:, 2 * D:]

    head_outs = []
    for h in range(num_heads):                     # static, unrolled (H small)
        lo = h * head_dim
        qh = q[:, lo:lo + head_dim]                # (S, Dh)
        kh = k[:, lo:lo + head_dim]
        vh = v[:, lo:lo + head_dim]
        s = jax.lax.dot_general(qh, kh, (((1,), (1,)), ((), ())),
                                preferred_element_type=jnp.float32)   # (S, S)
        s = s - jnp.max(s, axis=-1, keepdims=True)
        p = jnp.exp(s)
        p = p / jnp.sum(p, axis=-1, keepdims=True)
        head_outs.append(jnp.dot(p, vh, preferred_element_type=jnp.float32))

    o = jnp.concatenate(head_outs, axis=-1)        # (S, D) — lane concat
    out = jnp.dot(o, w_ref[...].astype(jnp.float32),
                  preferred_element_type=jnp.float32)
    out = out + b_ref[...].astype(jnp.float32) + x_ref[0].astype(jnp.float32)
    o_ref[0] = out.astype(o_ref.dtype)


def attention_block(x, qkv, w_out, b_out, *, num_heads):
    """x + OutProj(MHA(qkv)).  x: (B, S, D), qkv: (B, S, 3D)."""
    B, S, D = x.shape
    head_dim = D // num_heads
    scale = 1.0 / math.sqrt(head_dim)
    return pl.pallas_call(
        functools.partial(_attn_kernel, num_heads=num_heads,
                          head_dim=head_dim, scale=scale),
        out_shape=jax.ShapeDtypeStruct((B, S, D), x.dtype),
        grid=(B,),
        in_specs=[
            pl.BlockSpec((1, S, D), lambda b: (b, 0, 0)),
            pl.BlockSpec((1, S, 3 * D), lambda b: (b, 0, 0)),
            pl.BlockSpec((D, D), lambda b: (0, 0)),
            pl.BlockSpec((1, D), lambda b: (0, 0)),
        ],
        out_specs=pl.BlockSpec((1, S, D), lambda b: (b, 0, 0)),
        compiler_params=pltpu.CompilerParams(dimension_semantics=("parallel",)),
    )(x, qkv, w_out, b_out.reshape(1, D))


# ---------------------------------------------------------------------------
# Transformer (torchvision-style ViT Encoder: pre-LN blocks; final LN is fused
# into the downstream projection by the caller)
# ---------------------------------------------------------------------------

def encoder_block(x, p, num_heads):
    # (1) LN1 + QKV projection
    qkv = ln_linear(x, p['ln1_g'], p['ln1_b'], p['w_qkv'], p['b_qkv'])
    # (2) attention + out-proj + residual
    x = attention_block(x, qkv, p['w_out'], p['b_out'], num_heads=num_heads)
    # (3) LN2 + MLP1 + exact GELU
    h = ln_linear(x, p['ln2_g'], p['ln2_b'], p['w_mlp1'], p['b_mlp1'],
                  activation=_gelu_exact)
    # (4) MLP2 + bias + residual (K-tiled accumulator matmul)
    return linear(h, p['w_mlp2'], p['b_mlp2'], residual=x)


def transformer_blocks(x, params, num_heads):
    # torchvision Encoder adds its own positional embedding.
    x = x + params['pos_embedding']
    for lp in params['layers']:
        x = encoder_block(x, lp, num_heads)
    return x   # final LayerNorm fused into the consumer (ln_linear)


# ---------------------------------------------------------------------------
# TexTok forward
# ---------------------------------------------------------------------------

def textok_forward(params, image, text_embd, cfg):
    ps = cfg['patch_size']
    hidden = cfg['hidden_size']
    num_tokens = cfg['num_tokens']
    num_heads = cfg['num_heads']
    B, C, H, W = image.shape
    hw = H // ps
    num_patches = hw * hw

    # ----- encode -----
    # Rearrange 'b c (h p1) (w p2) -> b h w (c p1 p2)'  (pure layout glue)
    x = image.reshape(B, C, hw, ps, hw, ps).transpose(0, 2, 4, 1, 3, 5)
    x = x.reshape(B, hw, hw, C * ps * ps)
    img_patches = linear(x, params['img2tok_w'], params['img2tok_b'])
    img_patches = img_patches.reshape(B, num_patches, hidden)

    img_learnable = jnp.broadcast_to(params['image_tokens'][None],
                                     (B, num_tokens, hidden))
    text_proj_enc = linear(text_embd, params['text_proj_enc_w'],
                           params['text_proj_enc_b'])

    tok_in = jnp.concatenate([img_patches, img_learnable, text_proj_enc], axis=1)
    # TexTok's own pos_emb (the torchvision Encoder adds a second one inside).
    tok_in = tok_in + params['pos_emb'][None]
    enc_out = transformer_blocks(tok_in, params['encoder'], num_heads)

    # final encoder LN fused with token_out_proj (LN commutes with row slicing)
    enc_slice = enc_out[:, num_patches:num_patches + num_tokens, :]
    image_tokens = ln_linear(enc_slice,
                             params['encoder']['ln_g'], params['encoder']['ln_b'],
                             params['token_out_proj_w'], params['token_out_proj_b'])

    # ----- decode -----
    patch_tokens = jnp.broadcast_to(params['patch_tokens'][None],
                                    (B, num_patches, hidden))
    image_token_proj = linear(image_tokens, params['image_token_proj_w'],
                              params['image_token_proj_b'])
    text_proj_dec = linear(text_embd, params['text_proj_dec_w'],
                           params['text_proj_dec_b'])

    detok_in = jnp.concatenate([patch_tokens, image_token_proj, text_proj_dec],
                               axis=1)
    dec_out = transformer_blocks(detok_in, params['decoder'], num_heads)

    # final decoder LN fused with tokens_to_image projection
    rec_patches_in = dec_out[:, :num_patches, :]
    rec = ln_linear(rec_patches_in,
                    params['decoder']['ln_g'], params['decoder']['ln_b'],
                    params['tokens_to_image_w'], params['tokens_to_image_b'])
    # Rearrange 'b h w (c p1 p2) -> b c (h p1) (w p2)'
    rec = rec.reshape(B, hw, hw, C, ps, ps).transpose(0, 3, 1, 4, 2, 5)
    rec = rec.reshape(B, C, H, W)
    return image_tokens, rec


# ---------------------------------------------------------------------------
# Deterministic parameter initialization
# ---------------------------------------------------------------------------

def init_linear(key, in_dim, out_dim):
    w = jax.random.normal(key, (in_dim, out_dim), jnp.float32) * 0.02
    b = jnp.zeros((out_dim,), jnp.float32)
    return w, b


def init_encoder(key, seq_len, depth, hidden, mlp_dim):
    keys = jax.random.split(key, depth + 1)
    params = {
        'pos_embedding': jax.random.normal(keys[0], (1, seq_len, hidden)) * 0.02,
        'ln_g': jnp.ones((hidden,), jnp.float32),
        'ln_b': jnp.zeros((hidden,), jnp.float32),
        'layers': [],
    }
    for i in range(depth):
        lk = jax.random.split(keys[i + 1], 4)
        layer = {
            'ln1_g': jnp.ones((hidden,), jnp.float32),
            'ln1_b': jnp.zeros((hidden,), jnp.float32),
            'ln2_g': jnp.ones((hidden,), jnp.float32),
            'ln2_b': jnp.zeros((hidden,), jnp.float32),
        }
        layer['w_qkv'], layer['b_qkv'] = init_linear(lk[0], hidden, 3 * hidden)
        layer['w_out'], layer['b_out'] = init_linear(lk[1], hidden, hidden)
        layer['w_mlp1'], layer['b_mlp1'] = init_linear(lk[2], hidden, mlp_dim)
        layer['w_mlp2'], layer['b_mlp2'] = init_linear(lk[3], mlp_dim, hidden)
        params['layers'].append(layer)
    return params


def init_textok(key, cfg):
    ps = cfg['patch_size']
    hidden = cfg['hidden_size']
    latent = cfg['latent_dim']
    num_patches = (cfg['image_size'] // ps) ** 2
    seq = num_patches + cfg['num_tokens'] + cfg['num_text_tokens']
    ks = jax.random.split(key, 12)
    p = {}
    p['img2tok_w'], p['img2tok_b'] = init_linear(ks[0], 3 * ps * ps, hidden)
    p['image_tokens'] = jax.random.normal(ks[1], (cfg['num_tokens'], hidden)) * 0.02
    p['text_proj_enc_w'], p['text_proj_enc_b'] = init_linear(
        ks[2], cfg['text_token_dim'], hidden)
    p['pos_emb'] = jax.random.normal(ks[3], (seq, hidden)) * 0.02
    p['encoder'] = init_encoder(ks[4], seq, cfg['depth'], hidden, cfg['mlp_dim'])
    p['token_out_proj_w'], p['token_out_proj_b'] = init_linear(ks[5], hidden, latent)
    p['decoder'] = init_encoder(ks[6], seq, cfg['depth'], hidden, cfg['mlp_dim'])
    p['patch_tokens'] = jax.random.normal(ks[7], (num_patches, hidden)) * 0.02
    p['image_token_proj_w'], p['image_token_proj_b'] = init_linear(ks[8], latent, hidden)
    p['text_proj_dec_w'], p['text_proj_dec_b'] = init_linear(
        ks[9], cfg['text_token_dim'], hidden)
    p['tokens_to_image_w'], p['tokens_to_image_b'] = init_linear(
        ks[10], hidden, 3 * ps * ps)
    return p


# ---------------------------------------------------------------------------

if __name__ == "__main__":
    cfg = dict(
        patch_size=4,
        image_size=16,
        hidden_size=32,
        latent_dim=8,
        num_tokens=8,
        num_heads=4,
        depth=2,
        batch_size=2,
        num_text_tokens=32,   # fixed in the PyTorch module
        text_token_dim=512,   # fixed in the PyTorch module
        mlp_dim=3072,         # fixed in the PyTorch module
    )

    key = jax.random.PRNGKey(0)
    k_params, k_img, k_txt = jax.random.split(key, 3)

    params = init_textok(k_params, cfg)
    image = jax.random.normal(k_img, (cfg['batch_size'], 3,
                                      cfg['image_size'], cfg['image_size']),
                              jnp.float32)
    # TODO(synk): T5 text_embeder needs a pretrained checkpoint (no Pallas
    # equivalent); we feed a deterministic random (B, 32, 512) embedding instead.
    text_embd = jax.random.normal(k_txt, (cfg['batch_size'],
                                          cfg['num_text_tokens'],
                                          cfg['text_token_dim']), jnp.float32)

    fwd = jax.jit(lambda p, img, txt: textok_forward(p, img, txt, cfg))
    image_tokens, reconstructed = fwd(params, image, text_embd)
    jax.block_until_ready((image_tokens, reconstructed))

    assert image_tokens.shape == (cfg['batch_size'], cfg['num_tokens'],
                                  cfg['latent_dim'])
    assert reconstructed.shape == (cfg['batch_size'], 3,
                                   cfg['image_size'], cfg['image_size'])
    assert bool(jnp.all(jnp.isfinite(image_tokens)))
    assert bool(jnp.all(jnp.isfinite(reconstructed)))
    print("KERNEL_OK")
</pallas_src>

<mosaic_0001>
module attributes {stable_mosaic.version = 11 : i64} {
  func.func @_matmul_kernel(%arg0: i32, %arg1: i32, %arg2: i32, %arg3: memref<64x512xf32, #tpu.memory_space<vmem>>, %arg4: memref<512x32xf32, #tpu.memory_space<vmem>>, %arg5: memref<1x32xf32, #tpu.memory_space<vmem>>, %arg6: memref<64x32xf32, #tpu.memory_space<vmem>>, %arg7: memref<64x32xf32, #tpu.memory_space<vmem>>) attributes {dimension_semantics = [#tpu.dimension_semantics<parallel>, #tpu.dimension_semantics<parallel>, #tpu.dimension_semantics<arbitrary>], iteration_bounds = array<i64: 1, 1, 1>, scalar_prefetch = 0 : i64, scratch_operands = 1 : i64, tpu.core_type = #tpu.core_type<tc>, window_params = [{transform_indices = @transform_0, window_bounds = array<i64: 64, 512>}, {transform_indices = @transform_1, window_bounds = array<i64: 512, 32>}, {transform_indices = @transform_2, window_bounds = array<i64: 1, 32>}, {transform_indices = @transform_3, window_bounds = array<i64: 64, 32>}]} {
    %c0_i32 = arith.constant 0 : i32
    %0 = arith.cmpi eq, %arg2, %c0_i32 : i32
    %1 = arith.extui %0 : i1 to i32
    %c0_i32_0 = arith.constant 0 : i32
    %2 = arith.cmpi ne, %1, %c0_i32_0 : i32
    scf.if %2 {
      %cst_10 = arith.constant 0.000000e+00 : f32
      %12 = vector.broadcast %cst_10 : f32 to vector<64x32xf32>
      %c0_11 = arith.constant 0 : index
      %c0_12 = arith.constant 0 : index
      %13 = vector.load %arg7[%c0_11, %c0_12] : memref<64x32xf32, #tpu.memory_space<vmem>>, vector<64x32xf32>
      tpu.vector_store %arg7[%c0_11, %c0_12], %12 {strides = array<i32>} : memref<64x32xf32, #tpu.memory_space<vmem>>, vector<64x32xf32>,
    } else {
    }
    %c0 = arith.constant 0 : index
    %c0_1 = arith.constant 0 : index
    %3 = vector.load %arg7[%c0, %c0_1] : memref<64x32xf32, #tpu.memory_space<vmem>>, vector<64x32xf32>
    %c0_2 = arith.constant 0 : index
    %c0_3 = arith.constant 0 : index
    %4 = vector.load %arg3[%c0_2, %c0_3] : memref<64x512xf32, #tpu.memory_space<vmem>>, vector<64x512xf32>
    %c0_4 = arith.constant 0 : index
    %c0_5 = arith.constant 0 : index
    %5 = vector.load %arg4[%c0_4, %c0_5] : memref<512x32xf32, #tpu.memory_space<vmem>>, vector<512x32xf32>
    %cst = arith.constant dense<0.000000e+00> : vector<64x32xf32>
    %6 = tpu.matmul %4, %5, %cst {dimension_numbers = #tpu.dot_dimension_numbers<[1], [0], [0], [1], [0, 0, 1, 1], [], []>} : vector<64x512xf32>, vector<512x32xf32>, vector<64x32xf32> -> vector<64x32xf32>
    %7 = arith.addf %3, %6 : vector<64x32xf32>
    %c0_6 = arith.constant 0 : index
    %c0_7 = arith.constant 0 : index
    %8 = vector.load %arg7[%c0_6, %c0_7] : memref<64x32xf32, #tpu.memory_space<vmem>>, vector<64x32xf32>
    tpu.vector_store %arg7[%c0_6, %c0_7], %7 {strides = array<i32>} : memref<64x32xf32, #tpu.memory_space<vmem>>, vector<64x32xf32>,
    %c0_i32_8 = arith.constant 0 : i32
    %9 = arith.cmpi eq, %arg2, %c0_i32_8 : i32
    %10 = arith.extui %9 : i1 to i32
    %c0_i32_9 = arith.constant 0 : i32
    %11 = arith.cmpi ne, %10, %c0_i32_9 : i32
    scf.if %11 {
      %c0_10 = arith.constant 0 : index
      %c0_11 = arith.constant 0 : index
      %12 = vector.load %arg7[%c0_10, %c0_11] : memref<64x32xf32, #tpu.memory_space<vmem>>, vector<64x32xf32>
      %c0_12 = arith.constant 0 : index
      %c0_13 = arith.constant 0 : index
      %13 = vector.load %arg5[%c0_12, %c0_13] : memref<1x32xf32, #tpu.memory_space<vmem>>, vector<1x32xf32>
      %14 = vector.broadcast %13 : vector<1x32xf32> to vector<64x32xf32>
      %15 = arith.addf %12, %14 : vector<64x32xf32>
      %c0_14 = arith.constant 0 : index
      %c0_15 = arith.constant 0 : index
      %16 = vector.load %arg6[%c0_14, %c0_15] : memref<64x32xf32, #tpu.memory_space<vmem>>, vector<64x32xf32>
      tpu.vector_store %arg6[%c0_14, %c0_15], %15 {strides = array<i32>} : memref<64x32xf32, #tpu.memory_space<vmem>>, vector<64x32xf32>,
    } else {
    }
    return
  }
  func.func @transform_0(%arg0: i32, %arg1: i32, %arg2: i32) -> (i32, i32) {
    %c0_i32 = arith.constant 0 : i32
    return %arg0, %arg2 : i32, i32
  }
  func.func @transform_1(%arg0: i32, %arg1: i32, %arg2: i32) -> (i32, i32) {
    %c0_i32 = arith.constant 0 : i32
    return %arg2, %arg1 : i32, i32
  }
  func.func @transform_2(%arg0: i32, %arg1: i32, %arg2: i32) -> (i32, i32) {
    %c0_i32 = arith.constant 0 : i32
    %c0_i32_0 = arith.constant 0 : i32
    return %c0_i32, %arg1 : i32, i32
  }
  func.func @transform_3(%arg0: i32, %arg1: i32, %arg2: i32) -> (i32, i32) {
    %c0_i32 = arith.constant 0 : i32
    return %arg0, %arg1 : i32, i32
  }
}

module attributes {stable_mosaic.version = 11 : i64} {
  func.func @_matmul_kernel(%arg0: i32, %arg1: i32, %arg2: i32, %arg3: memref<32x48xf32, #tpu.memory_space<vmem>>, %arg4: memref<48x32xf32, #tpu.memory_space<vmem>>, %arg5: memref<1x32xf32, #tpu.memory_space<vmem>>, %arg6: memref<32x32xf32, #tpu.memory_space<vmem>>, %arg7: memref<32x32xf32, #tpu.memory_space<vmem>>) attributes {dimension_semantics = [#tpu.dimension_semantics<parallel>, #tpu.dimension_semantics<parallel>, #tpu.dimension_semantics<arbitrary>], iteration_bounds = array<i64: 1, 1, 1>, scalar_prefetch = 0 : i64, scratch_operands = 1 : i64, tpu.core_type = #tpu.core_type<tc>, window_params = [{transform_indices = @transform_0, window_bounds = array<i64: 32, 48>}, {transform_indices = @transform_1, window_bounds = array<i64: 48, 32>}, {transform_indices = @transform_2, window_bounds = array<i64: 1, 32>}, {transform_indices = @transform_3, window_bounds = array<i64: 32, 32>}]} {
    %c0_i32 = arith.constant 0 : i32
    %0 = arith.cmpi eq, %arg2, %c0_i32 : i32
    %1 = arith.extui %0 : i1 to i32
    %c0_i32_0 = arith.constant 0 : i32
    %2 = arith.cmpi ne, %1, %c0_i32_0 : i32
    scf.if %2 {
      %cst_10 = arith.constant 0.000000e+00 : f32
      %12 = vector.broadcast %cst_10 : f32 to vector<32x32xf32>
      %c0_11 = arith.constant 0 : index
      %c0_12 = arith.constant 0 : index
      %13 = vector.load %arg7[%c0_11, %c0_12] : memref<32x32xf32, #tpu.memory_space<vmem>>, vector<32x32xf32>
      tpu.vector_store %arg7[%c0_11, %c0_12], %12 {strides = array<i32>} : memref<32x32xf32, #tpu.memory_space<vmem>>, vector<32x32xf32>,
    } else {
    }
    %c0 = arith.constant 0 : index
    %c0_1 = arith.constant 0 : index
    %3 = vector.load %arg7[%c0, %c0_1] : memref<32x32xf32, #tpu.memory_space<vmem>>, vector<32x32xf32>
    %c0_2 = arith.constant 0 : index
    %c0_3 = arith.constant 0 : index
    %4 = vector.load %arg3[%c0_2, %c0_3] : memref<32x48xf32, #tpu.memory_space<vmem>>, vector<32x48xf32>
    %c0_4 = arith.constant 0 : index
    %c0_5 = arith.constant 0 : index
    %5 = vector.load %arg4[%c0_4, %c0_5] : memref<48x32xf32, #tpu.memory_space<vmem>>, vector<48x32xf32>
    %cst = arith.constant dense<0.000000e+00> : vector<32x32xf32>
    %6 = tpu.matmul %4, %5, %cst {dimension_numbers = #tpu.dot_dimension_numbers<[1], [0], [0], [1], [0, 0, 1, 1], [], []>} : vector<32x48xf32>, vector<48x32xf32>, vector<32x32xf32> -> vector<32x32xf32>
    %7 = arith.addf %3, %6 : vector<32x32xf32>
    %c0_6 = arith.constant 0 : index
    %c0_7 = arith.constant 0 : index
    %8 = vector.load %arg7[%c0_6, %c0_7] : memref<32x32xf32, #tpu.memory_space<vmem>>, vector<32x32xf32>
    tpu.vector_store %arg7[%c0_6, %c0_7], %7 {strides = array<i32>} : memref<32x32xf32, #tpu.memory_space<vmem>>, vector<32x32xf32>,
    %c0_i32_8 = arith.constant 0 : i32
    %9 = arith.cmpi eq, %arg2, %c0_i32_8 : i32
    %10 = arith.extui %9 : i1 to i32
    %c0_i32_9 = arith.constant 0 : i32
    %11 = arith.cmpi ne, %10, %c0_i32_9 : i32
    scf.if %11 {
      %c0_10 = arith.constant 0 : index
      %c0_11 = arith.constant 0 : index
      %12 = vector.load %arg7[%c0_10, %c0_11] : memref<32x32xf32, #tpu.memory_space<vmem>>, vector<32x32xf32>
      %c0_12 = arith.constant 0 : index
      %c0_13 = arith.constant 0 : index
      %13 = vector.load %arg5[%c0_12, %c0_13] : memref<1x32xf32, #tpu.memory_space<vmem>>, vector<1x32xf32>
      %14 = vector.broadcast %13 : vector<1x32xf32> to vector<32x32xf32>
      %15 = arith.addf %12, %14 : vector<32x32xf32>
      %c0_14 = arith.constant 0 : index
      %c0_15 = arith.constant 0 : index
      %16 = vector.load %arg6[%c0_14, %c0_15] : memref<32x32xf32, #tpu.memory_space<vmem>>, vector<32x32xf32>
      tpu.vector_store %arg6[%c0_14, %c0_15], %15 {strides = array<i32>} : memref<32x32xf32, #tpu.memory_space<vmem>>, vector<32x32xf32>,
    } else {
    }
    return
  }
  func.func @transform_0(%arg0: i32, %arg1: i32, %arg2: i32) -> (i32, i32) {
    %c0_i32 = arith.constant 0 : i32
    return %arg0, %arg2 : i32, i32
  }
  func.func @transform_1(%arg0: i32, %arg1: i32, %arg2: i32) -> (i32, i32) {
    %c0_i32 = arith.constant 0 : i32
    return %arg2, %arg1 : i32, i32
  }
  func.func @transform_2(%arg0: i32, %arg1: i32, %arg2: i32) -> (i32, i32) {
    %c0_i32 = arith.constant 0 : i32
    %c0_i32_0 = arith.constant 0 : i32
    return %c0_i32, %arg1 : i32, i32
  }
  func.func @transform_3(%arg0: i32, %arg1: i32, %arg2: i32) -> (i32, i32) {
    %c0_i32 = arith.constant 0 : i32
    return %arg0, %arg1 : i32, i32
  }
}

module attributes {stable_mosaic.version = 11 : i64} {
  func.func @_ln_linear_kernel(%arg0: i32, %arg1: i32, %arg2: memref<56x32xf32, #tpu.memory_space<vmem>>, %arg3: memref<1x32xf32, #tpu.memory_space<vmem>>, %arg4: memref<1x32xf32, #tpu.memory_space<vmem>>, %arg5: memref<32x96xf32, #tpu.memory_space<vmem>>, %arg6: memref<1x96xf32, #tpu.memory_space<vmem>>, %arg7: memref<56x96xf32, #tpu.memory_space<vmem>>) attributes {dimension_semantics = [#tpu.dimension_semantics<parallel>, #tpu.dimension_semantics<parallel>], iteration_bounds = array<i64: 2, 1>, scalar_prefetch = 0 : i64, scratch_operands = 0 : i64, tpu.core_type = #tpu.core_type<tc>, window_params = [{transform_indices = @transform_0, window_bounds = array<i64: 56, 32>}, {pipeline_mode = #tpu.pipeline_mode<synchronous>, transform_indices = @transform_1, window_bounds = array<i64: 1, 32>}, {pipeline_mode = #tpu.pipeline_mode<synchronous>, transform_indices = @transform_2, window_bounds = array<i64: 1, 32>}, {transform_indices = @transform_3, window_bounds = array<i64: 32, 96>}, {transform_indices = @transform_4, window_bounds = array<i64: 1, 96>}, {transform_indices = @transform_5, window_bounds = array<i64: 56, 96>}]} {
    %c0 = arith.constant 0 : index
    %c0_0 = arith.constant 0 : index
    %0 = vector.load %arg2[%c0, %c0_0] : memref<56x32xf32, #tpu.memory_space<vmem>>, vector<56x32xf32>
    %cst = arith.constant dense<0.000000e+00> : vector<56xf32>
    %1 = vector.multi_reduction <add>, %0, %cst [1] : vector<56x32xf32> to vector<56xf32>
    %2 = vector.shape_cast %1 : vector<56xf32> to vector<56x1xf32>
    %cst_1 = arith.constant 3.200000e+01 : f32
    %3 = vector.broadcast %cst_1 : f32 to vector<56x1xf32>
    %4 = arith.divf %2, %3 : vector<56x1xf32>
    %5 = vector.broadcast %4 : vector<56x1xf32> to vector<56x32xf32>
    %6 = arith.subf %0, %5 : vector<56x32xf32>
    %7 = arith.mulf %6, %6 : vector<56x32xf32>
    %cst_2 = arith.constant dense<0.000000e+00> : vector<56xf32>
    %8 = vector.multi_reduction <add>, %7, %cst_2 [1] : vector<56x32xf32> to vector<56xf32>
    %9 = vector.shape_cast %8 : vector<56xf32> to vector<56x1xf32>
    %cst_3 = arith.constant 3.200000e+01 : f32
    %10 = vector.broadcast %cst_3 : f32 to vector<56x1xf32>
    %11 = arith.divf %9, %10 : vector<56x1xf32>
    %cst_4 = arith.constant 9.99999997E-7 : f32
    %12 = vector.broadcast %cst_4 : f32 to vector<56x1xf32>
    %13 = arith.addf %11, %12 : vector<56x1xf32>
    %14 = math.rsqrt %13 : vector<56x1xf32>
    %15 = vector.broadcast %14 : vector<56x1xf32> to vector<56x32xf32>
    %16 = arith.mulf %6, %15 : vector<56x32xf32>
    %c0_5 = arith.constant 0 : index
    %c0_6 = arith.constant 0 : index
    %17 = vector.load %arg3[%c0_5, %c0_6] : memref<1x32xf32, #tpu.memory_space<vmem>>, vector<1x32xf32>
    %18 = vector.broadcast %17 : vector<1x32xf32> to vector<56x32xf32>
    %19 = arith.mulf %16, %18 : vector<56x32xf32>
    %c0_7 = arith.constant 0 : index
    %c0_8 = arith.constant 0 : index
    %20 = vector.load %arg4[%c0_7, %c0_8] : memref<1x32xf32, #tpu.memory_space<vmem>>, vector<1x32xf32>
    %21 = vector.broadcast %20 : vector<1x32xf32> to vector<56x32xf32>
    %22 = arith.addf %19, %21 : vector<56x32xf32>
    %c0_9 = arith.constant 0 : index
    %c0_10 = arith.constant 0 : index
    %23 = vector.load %arg5[%c0_9, %c0_10] : memref<32x96xf32, #tpu.memory_space<vmem>>, vector<32x96xf32>
    %cst_11 = arith.constant dense<0.000000e+00> : vector<56x96xf32>
    %24 = tpu.matmul %22, %23, %cst_11 {dimension_numbers = #tpu.dot_dimension_numbers<[1], [0], [0], [1], [0, 0, 1, 1], [], []>} : vector<56x32xf32>, vector<32x96xf32>, vector<56x96xf32> -> vector<56x96xf32>
    %c0_12 = arith.constant 0 : index
    %c0_13 = arith.constant 0 : index
    %25 = vector.load %arg6[%c0_12, %c0_13] : memref<1x96xf32, #tpu.memory_space<vmem>>, vector<1x96xf32>
    %26 = vector.broadcast %25 : vector<1x96xf32> to vector<56x96xf32>
    %27 = arith.addf %24, %26 : vector<56x96xf32>
    %c0_14 = arith.constant 0 : index
    %c0_15 = arith.constant 0 : index
    %28 = vector.load %arg7[%c0_14, %c0_15] : memref<56x96xf32, #tpu.memory_space<vmem>>, vector<56x96xf32>
    tpu.vector_store %arg7[%c0_14, %c0_15], %27 {strides = array<i32>} : memref<56x96xf32, #tpu.memory_space<vmem>>, vector<56x96xf32>,
    return
  }
  func.func @transform_0(%arg0: i32, %arg1: i32) -> (i32, i32) {
    %c0_i32 = arith.constant 0 : i32
    %c0_i32_0 = arith.constant 0 : i32
    return %arg0, %c0_i32 : i32, i32
  }
  func.func @transform_1(%arg0: i32, %arg1: i32) -> (i32, i32) {
    %c0_i32 = arith.constant 0 : i32
    %c0_i32_0 = arith.constant 0 : i32
    %c0_i32_1 = arith.constant 0 : i32
    return %c0_i32, %c0_i32_0 : i32, i32
  }
  func.func @transform_2(%arg0: i32, %arg1: i32) -> (i32, i32) {
    %c0_i32 = arith.constant 0 : i32
    %c0_i32_0 = arith.constant 0 : i32
    %c0_i32_1 = arith.constant 0 : i32
    return %c0_i32, %c0_i32_0 : i32, i32
  }
  func.func @transform_3(%arg0: i32, %arg1: i32) -> (i32, i32) {
    %c0_i32 = arith.constant 0 : i32
    %c0_i32_0 = arith.constant 0 : i32
    return %c0_i32, %arg1 : i32, i32
  }
  func.func @transform_4(%arg0: i32, %arg1: i32) -> (i32, i32) {
    %c0_i32 = arith.constant 0 : i32
    %c0_i32_0 = arith.constant 0 : i32
    return %c0_i32, %arg1 : i32, i32
  }
  func.func @transform_5(%arg0: i32, %arg1: i32) -> (i32, i32) {
    %c0_i32 = arith.constant 0 : i32
    return %arg0, %arg1 : i32, i32
  }
}

module attributes {stable_mosaic.version = 11 : i64} {
  func.func @_attn_kernel(%arg0: i32, %arg1: memref<1x56x32xf32, #tpu.memory_space<vmem>>, %arg2: memref<1x56x96xf32, #tpu.memory_space<vmem>>, %arg3: memref<32x32xf32, #tpu.memory_space<vmem>>, %arg4: memref<1x32xf32, #tpu.memory_space<vmem>>, %arg5: memref<1x56x32xf32, #tpu.memory_space<vmem>>) attributes {dimension_semantics = [#tpu.dimension_semantics<parallel>], iteration_bounds = array<i64: 2>, scalar_prefetch = 0 : i64, scratch_operands = 0 : i64, tpu.core_type = #tpu.core_type<tc>, window_params = [{transform_indices = @transform_0, window_bounds = array<i64: 1, 56, 32>}, {transform_indices = @transform_1, window_bounds = array<i64: 1, 56, 96>}, {pipeline_mode = #tpu.pipeline_mode<synchronous>, transform_indices = @transform_2, window_bounds = array<i64: 32, 32>}, {pipeline_mode = #tpu.pipeline_mode<synchronous>, transform_indices = @transform_3, window_bounds = array<i64: 1, 32>}, {transform_indices = @transform_4, window_bounds = array<i64: 1, 56, 32>}]} {
    %c0 = arith.constant 0 : index
    %c0_0 = arith.constant 0 : index
    %c0_1 = arith.constant 0 : index
    %0 = vector.load %arg2[%c0, %c0_0, %c0_1] : memref<1x56x96xf32, #tpu.memory_space<vmem>>, vector<1x56x96xf32>
    %1 = vector.shape_cast %0 : vector<1x56x96xf32> to vector<56x96xf32>
    %2 = vector.extract_strided_slice %1 {offsets = [0, 0], sizes = [56, 32], strides = [1, 1]} : vector<56x96xf32> to vector<56x32xf32>
    %cst = arith.constant 0.353553385 : f32
    %3 = vector.broadcast %cst : f32 to vector<56x32xf32>
    %4 = arith.mulf %2, %3 : vector<56x32xf32>
    %5 = vector.extract_strided_slice %1 {offsets = [0, 32], sizes = [56, 32], strides = [1, 1]} : vector<56x96xf32> to vector<56x32xf32>
    %6 = vector.extract_strided_slice %1 {offsets = [0, 64], sizes = [56, 32], strides = [1, 1]} : vector<56x96xf32> to vector<56x32xf32>
    %7 = vector.extract_strided_slice %4 {offsets = [0, 0], sizes = [56, 8], strides = [1, 1]} : vector<56x32xf32> to vector<56x8xf32>
    %8 = vector.extract_strided_slice %5 {offsets = [0, 0], sizes = [56, 8], strides = [1, 1]} : vector<56x32xf32> to vector<56x8xf32>
    %9 = vector.extract_strided_slice %6 {offsets = [0, 0], sizes = [56, 8], strides = [1, 1]} : vector<56x32xf32> to vector<56x8xf32>
    %cst_2 = arith.constant dense<0.000000e+00> : vector<56x56xf32>
    %10 = tpu.matmul %7, %8, %cst_2 {dimension_numbers = #tpu.dot_dimension_numbers<[1], [1], [0], [0], [0, 0, 1, 0], [], []>} : vector<56x8xf32>, vector<56x8xf32>, vector<56x56xf32> -> vector<56x56xf32>
    %cst_3 = arith.constant dense<0xFF800000> : vector<56xf32>
    %11 = vector.multi_reduction <maximumf>, %10, %cst_3 [1] : vector<56x56xf32> to vector<56xf32>
    %12 = vector.shape_cast %11 : vector<56xf32> to vector<56x1xf32>
    %13 = vector.broadcast %12 : vector<56x1xf32> to vector<56x56xf32>
    %14 = arith.subf %10, %13 : vector<56x56xf32>
    %15 = math.exp %14 : vector<56x56xf32>
    %cst_4 = arith.constant dense<0.000000e+00> : vector<56xf32>
    %16 = vector.multi_reduction <add>, %15, %cst_4 [1] : vector<56x56xf32> to vector<56xf32>
    %17 = vector.shape_cast %16 : vector<56xf32> to vector<56x1xf32>
    %18 = vector.broadcast %17 : vector<56x1xf32> to vector<56x56xf32>
    %19 = arith.divf %15, %18 : vector<56x56xf32>
    %cst_5 = arith.constant dense<0.000000e+00> : vector<56x8xf32>
    %20 = tpu.matmul %19, %9, %cst_5 {dimension_numbers = #tpu.dot_dimension_numbers<[1], [0], [0], [1], [0, 0, 1, 1], [], []>} : vector<56x56xf32>, vector<56x8xf32>, vector<56x8xf32> -> vector<56x8xf32>
    %21 = vector.extract_strided_slice %4 {offsets = [0, 8], sizes = [56, 8], strides = [1, 1]} : vector<56x32xf32> to vector<56x8xf32>
    %22 = vector.extract_strided_slice %5 {offsets = [0, 8], sizes = [56, 8], strides = [1, 1]} : vector<56x32xf32> to vector<56x8xf32>
    %23 = vector.extract_strided_slice %6 {offsets = [0, 8], sizes = [56, 8], strides = [1, 1]} : vector<56x32xf32> to vector<56x8xf32>
    %cst_6 = arith.constant dense<0.000000e+00> : vector<56x56xf32>
    %24 = tpu.matmul %21, %22, %cst_6 {dimension_numbers = #tpu.dot_dimension_numbers<[1], [1], [0], [0], [0, 0, 1, 0], [], []>} : vector<56x8xf32>, vector<56x8xf32>, vector<56x56xf32> -> vector<56x56xf32>
    %cst_7 = arith.constant dense<0xFF800000> : vector<56xf32>
    %25 = vector.multi_reduction <maximumf>, %24, %cst_7 [1] : vector<56x56xf32> to vector<56xf32>
    %26 = vector.shape_cast %25 : vector<56xf32> to vector<56x1xf32>
    %27 = vector.broadcast %26 : vector<56x1xf32> to vector<56x56xf32>
    %28 = arith.subf %24, %27 : vector<56x56xf32>
    %29 = math.exp %28 : vector<56x56xf32>
    %cst_8 = arith.constant dense<0.000000e+00> : vector<56xf32>
    %30 = vector.multi_reduction <add>, %29, %cst_8 [1] : vector<56x56xf32> to vector<56xf32>
    %31 = vector.shape_cast %30 : vector<56xf32> to vector<56x1xf32>
    %32 = vector.broadcast %31 : vector<56x1xf32> to vector<56x56xf32>
    %33 = arith.divf %29, %32 : vector<56x56xf32>
    %cst_9 = arith.constant dense<0.000000e+00> : vector<56x8xf32>
    %34 = tpu.matmul %33, %23, %cst_9 {dimension_numbers = #tpu.dot_dimension_numbers<[1], [0], [0], [1], [0, 0, 1, 1], [], []>} : vector<56x56xf32>, vector<56x8xf32>, vector<56x8xf32> -> vector<56x8xf32>
    %35 = vector.extract_strided_slice %4 {offsets = [0, 16], sizes = [56, 8], strides = [1, 1]} : vector<56x32xf32> to vector<56x8xf32>
    %36 = vector.extract_strided_slice %5 {offsets = [0, 16], sizes = [56, 8], strides = [1, 1]} : vector<56x32xf32> to vector<56x8xf32>
    %37 = vector.extract_strided_slice %6 {offsets = [0, 16], sizes = [56, 8], strides = [1, 1]} : vector<56x32xf32> to vector<56x8xf32>
    %cst_10 = arith.constant dense<0.000000e+00> : vector<56x56xf32>
    %38 = tpu.matmul %35, %36, %cst_10 {dimension_numbers = #tpu.dot_dimension_numbers<[1], [1], [0], [0], [0, 0, 1, 0], [], []>} : vector<56x8xf32>, vector<56x8xf32>, vector<56x56xf32> -> vector<56x56xf32>
    %cst_11 = arith.constant dense<0xFF800000> : vector<56xf32>
    %39 = vector.multi_reduction <maximumf>, %38, %cst_11 [1] : vector<56x56xf32> to vector<56xf32>
    %40 = vector.shape_cast %39 : vector<56xf32> to vector<56x1xf32>
    %41 = vector.broadcast %40 : vector<56x1xf32> to vector<56x56xf32>
    %42 = arith.subf %38, %41 : vector<56x56xf32>
    %43 = math.exp %42 : vector<56x56xf32>
    %cst_12 = arith.constant dense<0.000000e+00> : vector<56xf32>
    %44 = vector.multi_reduction <add>, %43, %cst_12 [1] : vector<56x56xf32> to vector<56xf32>
    %45 = vector.shape_cast %44 : vector<56xf32> to vector<56x1xf32>
    %46 = vector.broadcast %45 : vector<56x1xf32> to vector<56x56xf32>
    %47 = arith.divf %43, %46 : vector<56x56xf32>
    %cst_13 = arith.constant dense<0.000000e+00> : vector<56x8xf32>
    %48 = tpu.matmul %47, %37, %cst_13 {dimension_numbers = #tpu.dot_dimension_numbers<[1], [0], [0], [1], [0, 0, 1, 1], [], []>} : vector<56x56xf32>, vector<56x8xf32>, vector<56x8xf32> -> vector<56x8xf32>
    %49 = vector.extract_strided_slice %4 {offsets = [0, 24], sizes = [56, 8], strides = [1, 1]} : vector<56x32xf32> to vector<56x8xf32>
    %50 = vector.extract_strided_slice %5 {offsets = [0, 24], sizes = [56, 8], strides = [1, 1]} : vector<56x32xf32> to vector<56x8xf32>
    %51 = vector.extract_strided_slice %6 {offsets = [0, 24], sizes = [56, 8], strides = [1, 1]} : vector<56x32xf32> to vector<56x8xf32>
    %cst_14 = arith.constant dense<0.000000e+00> : vector<56x56xf32>
    %52 = tpu.matmul %49, %50, %cst_14 {dimension_numbers = #tpu.dot_dimension_numbers<[1], [1], [0], [0], [0, 0, 1, 0], [], []>} : vector<56x8xf32>, vector<56x8xf32>, vector<56x56xf32> -> vector<56x56xf32>
    %cst_15 = arith.constant dense<0xFF800000> : vector<56xf32>
    %53 = vector.multi_reduction <maximumf>, %52, %cst_15 [1] : vector<56x56xf32> to vector<56xf32>
    %54 = vector.shape_cast %53 : vector<56xf32> to vector<56x1xf32>
    %55 = vector.broadcast %54 : vector<56x1xf32> to vector<56x56xf32>
    %56 = arith.subf %52, %55 : vector<56x56xf32>
    %57 = math.exp %56 : vector<56x56xf32>
    %cst_16 = arith.constant dense<0.000000e+00> : vector<56xf32>
    %58 = vector.multi_reduction <add>, %57, %cst_16 [1] : vector<56x56xf32> to vector<56xf32>
    %59 = vector.shape_cast %58 : vector<56xf32> to vector<56x1xf32>
    %60 = vector.broadcast %59 : vector<56x1xf32> to vector<56x56xf32>
    %61 = arith.divf %57, %60 : vector<56x56xf32>
    %cst_17 = arith.constant dense<0.000000e+00> : vector<56x8xf32>
    %62 = tpu.matmul %61, %51, %cst_17 {dimension_numbers = #tpu.dot_dimension_numbers<[1], [0], [0], [1], [0, 0, 1, 1], [], []>} : vector<56x56xf32>, vector<56x8xf32>, vector<56x8xf32> -> vector<56x8xf32>
    %63 = tpu.concatenate %20, %34, %48, %62 in 1 : vector<56x8xf32>, vector<56x8xf32>, vector<56x8xf32>, vector<56x8xf32> -> vector<56x32xf32>
    %c0_18 = arith.constant 0 : index
    %c0_19 = arith.constant 0 : index
    %64 = vector.load %arg3[%c0_18, %c0_19] : memref<32x32xf32, #tpu.memory_space<vmem>>, vector<32x32xf32>
    %cst_20 = arith.constant dense<0.000000e+00> : vector<56x32xf32>
    %65 = tpu.matmul %63, %64, %cst_20 {dimension_numbers = #tpu.dot_dimension_numbers<[1], [0], [0], [1], [0, 0, 1, 1], [], []>} : vector<56x32xf32>, vector<32x32xf32>, vector<56x32xf32> -> vector<56x32xf32>
    %c0_21 = arith.constant 0 : index
    %c0_22 = arith.constant 0 : index
    %66 = vector.load %arg4[%c0_21, %c0_22] : memref<1x32xf32, #tpu.memory_space<vmem>>, vector<1x32xf32>
    %67 = vector.broadcast %66 : vector<1x32xf32> to vector<56x32xf32>
    %68 = arith.addf %65, %67 : vector<56x32xf32>
    %c0_23 = arith.constant 0 : index
    %c0_24 = arith.constant 0 : index
    %c0_25 = arith.constant 0 : index
    %69 = vector.load %arg1[%c0_23, %c0_24, %c0_25] : memref<1x56x32xf32, #tpu.memory_space<vmem>>, vector<1x56x32xf32>
    %70 = vector.shape_cast %69 : vector<1x56x32xf32> to vector<56x32xf32>
    %71 = arith.addf %68, %70 : vector<56x32xf32>
    %c0_26 = arith.constant 0 : index
    %c0_27 = arith.constant 0 : index
    %c0_28 = arith.constant 0 : index
    %72 = vector.load %arg5[%c0_26, %c0_27, %c0_28] : memref<1x56x32xf32, #tpu.memory_space<vmem>>, vector<1x56x32xf32>
    %73 = vector.shape_cast %72 : vector<1x56x32xf32> to vector<56x32xf32>
    %74 = vector.shape_cast %71 : vector<56x32xf32> to vector<1x56x32xf32>
    tpu.vector_store %arg5[%c0_26, %c0_27, %c0_28], %74 {strides = array<i32>} : memref<1x56x32xf32, #tpu.memory_space<vmem>>, vector<1x56x32xf32>,
    return
  }
  func.func @transform_0(%arg0: i32) -> (i32, i32, i32) {
    %c0_i32 = arith.constant 0 : i32
    %c0_i32_0 = arith.constant 0 : i32
    %c0_i32_1 = arith.constant 0 : i32
    return %arg0, %c0_i32, %c0_i32_0 : i32, i32, i32
  }
  func.func @transform_1(%arg0: i32) -> (i32, i32, i32) {
    %c0_i32 = arith.constant 0 : i32
    %c0_i32_0 = arith.constant 0 : i32
    %c0_i32_1 = arith.constant 0 : i32
    return %arg0, %c0_i32, %c0_i32_0 : i32, i32, i32
  }
  func.func @transform_2(%arg0: i32) -> (i32, i32) {
    %c0_i32 = arith.constant 0 : i32
    %c0_i32_0 = arith.constant 0 : i32
    %c0_i32_1 = arith.constant 0 : i32
    return %c0_i32, %c0_i32_0 : i32, i32
  }
  func.func @transform_3(%arg0: i32) -> (i32, i32) {
    %c0_i32 = arith.constant 0 : i32
    %c0_i32_0 = arith.constant 0 : i32
    %c0_i32_1 = arith.constant 0 : i32
    return %c0_i32, %c0_i32_0 : i32, i32
  }
  func.func @transform_4(%arg0: i32) -> (i32, i32, i32) {
    %c0_i32 = arith.constant 0 : i32
    %c0_i32_0 = arith.constant 0 : i32
    %c0_i32_1 = arith.constant 0 : i32
    return %arg0, %c0_i32, %c0_i32_0 : i32, i32, i32
  }
}

module attributes {stable_mosaic.version = 11 : i64} {
  func.func @_ln_linear_kernel(%arg0: i32, %arg1: i32, %arg2: memref<56x32xf32, #tpu.memory_space<vmem>>, %arg3: memref<1x32xf32, #tpu.memory_space<vmem>>, %arg4: memref<1x32xf32, #tpu.memory_space<vmem>>, %arg5: memref<32x512xf32, #tpu.memory_space<vmem>>, %arg6: memref<1x512xf32, #tpu.memory_space<vmem>>, %arg7: memref<56x512xf32, #tpu.memory_space<vmem>>) attributes {dimension_semantics = [#tpu.dimension_semantics<parallel>, #tpu.dimension_semantics<parallel>], iteration_bounds = array<i64: 2, 6>, scalar_prefetch = 0 : i64, scratch_operands = 0 : i64, tpu.core_type = #tpu.core_type<tc>, window_params = [{transform_indices = @transform_0, window_bounds = array<i64: 56, 32>}, {pipeline_mode = #tpu.pipeline_mode<synchronous>, transform_indices = @transform_1, window_bounds = array<i64: 1, 32>}, {pipeline_mode = #tpu.pipeline_mode<synchronous>, transform_indices = @transform_2, window_bounds = array<i64: 1, 32>}, {transform_indices = @transform_3, window_bounds = array<i64: 32, 512>}, {transform_indices = @transform_4, window_bounds = array<i64: 1, 512>}, {transform_indices = @transform_5, window_bounds = array<i64: 56, 512>}]} {
    %c0 = arith.constant 0 : index
    %c0_0 = arith.constant 0 : index
    %0 = vector.load %arg2[%c0, %c0_0] : memref<56x32xf32, #tpu.memory_space<vmem>>, vector<56x32xf32>
    %cst = arith.constant dense<0.000000e+00> : vector<56xf32>
    %1 = vector.multi_reduction <add>, %0, %cst [1] : vector<56x32xf32> to vector<56xf32>
    %2 = vector.shape_cast %1 : vector<56xf32> to vector<56x1xf32>
    %cst_1 = arith.constant 3.200000e+01 : f32
    %3 = vector.broadcast %cst_1 : f32 to vector<56x1xf32>
    %4 = arith.divf %2, %3 : vector<56x1xf32>
    %5 = vector.broadcast %4 : vector<56x1xf32> to vector<56x32xf32>
    %6 = arith.subf %0, %5 : vector<56x32xf32>
    %7 = arith.mulf %6, %6 : vector<56x32xf32>
    %cst_2 = arith.constant dense<0.000000e+00> : vector<56xf32>
    %8 = vector.multi_reduction <add>, %7, %cst_2 [1] : vector<56x32xf32> to vector<56xf32>
    %9 = vector.shape_cast %8 : vector<56xf32> to vector<56x1xf32>
    %cst_3 = arith.constant 3.200000e+01 : f32
    %10 = vector.broadcast %cst_3 : f32 to vector<56x1xf32>
    %11 = arith.divf %9, %10 : vector<56x1xf32>
    %cst_4 = arith.constant 9.99999997E-7 : f32
    %12 = vector.broadcast %cst_4 : f32 to vector<56x1xf32>
    %13 = arith.addf %11, %12 : vector<56x1xf32>
    %14 = math.rsqrt %13 : vector<56x1xf32>
    %15 = vector.broadcast %14 : vector<56x1xf32> to vector<56x32xf32>
    %16 = arith.mulf %6, %15 : vector<56x32xf32>
    %c0_5 = arith.constant 0 : index
    %c0_6 = arith.constant 0 : index
    %17 = vector.load %arg3[%c0_5, %c0_6] : memref<1x32xf32, #tpu.memory_space<vmem>>, vector<1x32xf32>
    %18 = vector.broadcast %17 : vector<1x32xf32> to vector<56x32xf32>
    %19 = arith.mulf %16, %18 : vector<56x32xf32>
    %c0_7 = arith.constant 0 : index
    %c0_8 = arith.constant 0 : index
    %20 = vector.load %arg4[%c0_7, %c0_8] : memref<1x32xf32, #tpu.memory_space<vmem>>, vector<1x32xf32>
    %21 = vector.broadcast %20 : vector<1x32xf32> to vector<56x32xf32>
    %22 = arith.addf %19, %21 : vector<56x32xf32>
    %c0_9 = arith.constant 0 : index
    %c0_10 = arith.constant 0 : index
    %23 = vector.load %arg5[%c0_9, %c0_10] : memref<32x512xf32, #tpu.memory_space<vmem>>, vector<32x512xf32>
    %cst_11 = arith.constant dense<0.000000e+00> : vector<56x512xf32>
    %24 = tpu.matmul %22, %23, %cst_11 {dimension_numbers = #tpu.dot_dimension_numbers<[1], [0], [0], [1], [0, 0, 1, 1], [], []>} : vector<56x32xf32>, vector<32x512xf32>, vector<56x512xf32> -> vector<56x512xf32>
    %c0_12 = arith.constant 0 : index
    %c0_13 = arith.constant 0 : index
    %25 = vector.load %arg6[%c0_12, %c0_13] : memref<1x512xf32, #tpu.memory_space<vmem>>, vector<1x512xf32>
    %26 = vector.broadcast %25 : vector<1x512xf32> to vector<56x512xf32>
    %27 = arith.addf %24, %26 : vector<56x512xf32>
    %cst_14 = arith.constant 5.000000e-01 : f32
    %28 = vector.broadcast %cst_14 : f32 to vector<56x512xf32>
    %29 = arith.mulf %28, %27 : vector<56x512xf32>
    %cst_15 = arith.constant 0.707106769 : f32
    %30 = vector.broadcast %cst_15 : f32 to vector<56x512xf32>
    %31 = arith.mulf %27, %30 : vector<56x512xf32>
    %32 = math.absf %31 : vector<56x512xf32>
    %cst_16 = arith.constant 0.327591091 : f32
    %33 = vector.broadcast %cst_16 : f32 to vector<56x512xf32>
    %34 = arith.mulf %33, %32 : vector<56x512xf32>
    %cst_17 = arith.constant 1.000000e+00 : f32
    %35 = vector.broadcast %cst_17 : f32 to vector<56x512xf32>
    %36 = arith.addf %35, %34 : vector<56x512xf32>
    %cst_18 = arith.constant 1.000000e+00 : f32
    %37 = vector.broadcast %cst_18 : f32 to vector<56x512xf32>
    %38 = arith.divf %37, %36 : vector<56x512xf32>
    %cst_19 = arith.constant 1.06140542 : f32
    %39 = vector.broadcast %cst_19 : f32 to vector<56x512xf32>
    %40 = arith.mulf %39, %38 : vector<56x512xf32>
    %cst_20 = arith.constant -1.45315206 : f32
    %41 = vector.broadcast %cst_20 : f32 to vector<56x512xf32>
    %42 = arith.addf %40, %41 : vector<56x512xf32>
    %43 = arith.mulf %42, %38 : vector<56x512xf32>
    %cst_21 = arith.constant 1.42141378 : f32
    %44 = vector.broadcast %cst_21 : f32 to vector<56x512xf32>
    %45 = arith.addf %43, %44 : vector<56x512xf32>
    %46 = arith.mulf %45, %38 : vector<56x512xf32>
    %cst_22 = arith.constant -0.284496725 : f32
    %47 = vector.broadcast %cst_22 : f32 to vector<56x512xf32>
    %48 = arith.addf %46, %47 : vector<56x512xf32>
    %49 = arith.mulf %48, %38 : vector<56x512xf32>
    %cst_23 = arith.constant 0.254829586 : f32
    %50 = vector.broadcast %cst_23 : f32 to vector<56x512xf32>
    %51 = arith.addf %49, %50 : vector<56x512xf32>
    %52 = arith.mulf %51, %38 : vector<56x512xf32>
    %cst_24 = arith.constant 0.000000e+00 : f32
    %53 = vector.broadcast %cst_24 : f32 to vector<56x512xf32>
    %54 = arith.subf %53, %32 : vector<56x512xf32>
    %55 = arith.mulf %54, %32 : vector<56x512xf32>
    %56 = math.exp %55 : vector<56x512xf32>
    %57 = arith.mulf %52, %56 : vector<56x512xf32>
    %cst_25 = arith.constant 1.000000e+00 : f32
    %58 = vector.broadcast %cst_25 : f32 to vector<56x512xf32>
    %59 = arith.subf %58, %57 : vector<56x512xf32>
    %cst_26 = arith.constant 0.000000e+00 : f32
    %60 = vector.broadcast %cst_26 : f32 to vector<56x512xf32>
    %61 = arith.cmpf oge, %31, %60 : vector<56x512xf32>
    %cst_27 = arith.constant 0.000000e+00 : f32
    %62 = vector.broadcast %cst_27 : f32 to vector<56x512xf32>
    %63 = arith.subf %62, %59 : vector<56x512xf32>
    %64 = arith.select %61, %59, %63 : vector<56x512xi1>, vector<56x512xf32>
    %cst_28 = arith.constant 1.000000e+00 : f32
    %65 = vector.broadcast %cst_28 : f32 to vector<56x512xf32>
    %66 = arith.addf %65, %64 : vector<56x512xf32>
    %67 = arith.mulf %29, %66 : vector<56x512xf32>
    %c0_29 = arith.constant 0 : index
    %c0_30 = arith.constant 0 : index
    %68 = vector.load %arg7[%c0_29, %c0_30] : memref<56x512xf32, #tpu.memory_space<vmem>>, vector<56x512xf32>
    tpu.vector_store %arg7[%c0_29, %c0_30], %67 {strides = array<i32>} : memref<56x512xf32, #tpu.memory_space<vmem>>, vector<56x512xf32>,
    return
  }
  func.func @transform_0(%arg0: i32, %arg1: i32) -> (i32, i32) {
    %c0_i32 = arith.constant 0 : i32
    %c0_i32_0 = arith.constant 0 : i32
    return %arg0, %c0_i32 : i32, i32
  }
  func.func @transform_1(%arg0: i32, %arg1: i32) -> (i32, i32) {
    %c0_i32 = arith.constant 0 : i32
    %c0_i32_0 = arith.constant 0 : i32
    %c0_i32_1 = arith.constant 0 : i32
    return %c0_i32, %c0_i32_0 : i32, i32
  }
  func.func @transform_2(%arg0: i32, %arg1: i32) -> (i32, i32) {
    %c0_i32 = arith.constant 0 : i32
    %c0_i32_0 = arith.constant 0 : i32
    %c0_i32_1 = arith.constant 0 : i32
    return %c0_i32, %c0_i32_0 : i32, i32
  }
  func.func @transform_3(%arg0: i32, %arg1: i32) -> (i32, i32) {
    %c0_i32 = arith.constant 0 : i32
    %c0_i32_0 = arith.constant 0 : i32
    return %c0_i32, %arg1 : i32, i32
  }
  func.func @transform_4(%arg0: i32, %arg1: i32) -> (i32, i32) {
    %c0_i32 = arith.constant 0 : i32
    %c0_i32_0 = arith.constant 0 : i32
    return %c0_i32, %arg1 : i32, i32
  }
  func.func @transform_5(%arg0: i32, %arg1: i32) -> (i32, i32) {
    %c0_i32 = arith.constant 0 : i32
    return %arg0, %arg1 : i32, i32
  }
}

module attributes {stable_mosaic.version = 11 : i64} {
  func.func @_matmul_kernel(%arg0: i32, %arg1: i32, %arg2: i32, %arg3: memref<56x1024xf32, #tpu.memory_space<vmem>>, %arg4: memref<1024x32xf32, #tpu.memory_space<vmem>>, %arg5: memref<1x32xf32, #tpu.memory_space<vmem>>, %arg6: memref<56x32xf32, #tpu.memory_space<vmem>>, %arg7: memref<56x32xf32, #tpu.memory_space<vmem>>, %arg8: memref<56x32xf32, #tpu.memory_space<vmem>>) attributes {dimension_semantics = [#tpu.dimension_semantics<parallel>, #tpu.dimension_semantics<parallel>, #tpu.dimension_semantics<arbitrary>], iteration_bounds = array<i64: 2, 1, 3>, scalar_prefetch = 0 : i64, scratch_operands = 1 : i64, tpu.core_type = #tpu.core_type<tc>, window_params = [{transform_indices = @transform_0, window_bounds = array<i64: 56, 1024>}, {transform_indices = @transform_1, window_bounds = array<i64: 1024, 32>}, {transform_indices = @transform_2, window_bounds = array<i64: 1, 32>}, {transform_indices = @transform_3, window_bounds = array<i64: 56, 32>}, {transform_indices = @transform_4, window_bounds = array<i64: 56, 32>}]} {
    %c0_i32 = arith.constant 0 : i32
    %0 = arith.cmpi eq, %arg2, %c0_i32 : i32
    %1 = arith.extui %0 : i1 to i32
    %c0_i32_0 = arith.constant 0 : i32
    %2 = arith.cmpi ne, %1, %c0_i32_0 : i32
    scf.if %2 {
      %cst_9 = arith.constant 0.000000e+00 : f32
      %12 = vector.broadcast %cst_9 : f32 to vector<56x32xf32>
      %c0_10 = arith.constant 0 : index
      %c0_11 = arith.constant 0 : index
      %13 = vector.load %arg8[%c0_10, %c0_11] : memref<56x32xf32, #tpu.memory_space<vmem>>, vector<56x32xf32>
      tpu.vector_store %arg8[%c0_10, %c0_11], %12 {strides = array<i32>} : memref<56x32xf32, #tpu.memory_space<vmem>>, vector<56x32xf32>,
    } else {
    }
    %c0 = arith.constant 0 : index
    %c0_1 = arith.constant 0 : index
    %3 = vector.load %arg8[%c0, %c0_1] : memref<56x32xf32, #tpu.memory_space<vmem>>, vector<56x32xf32>
    %c0_2 = arith.constant 0 : index
    %c0_3 = arith.constant 0 : index
    %4 = vector.load %arg3[%c0_2, %c0_3] : memref<56x1024xf32, #tpu.memory_space<vmem>>, vector<56x1024xf32>
    %c0_4 = arith.constant 0 : index
    %c0_5 = arith.constant 0 : index
    %5 = vector.load %arg4[%c0_4, %c0_5] : memref<1024x32xf32, #tpu.memory_space<vmem>>, vector<1024x32xf32>
    %cst = arith.constant dense<0.000000e+00> : vector<56x32xf32>
    %6 = tpu.matmul %4, %5, %cst {dimension_numbers = #tpu.dot_dimension_numbers<[1], [0], [0], [1], [0, 0, 1, 1], [], []>} : vector<56x1024xf32>, vector<1024x32xf32>, vector<56x32xf32> -> vector<56x32xf32>
    %7 = arith.addf %3, %6 : vector<56x32xf32>
    %c0_6 = arith.constant 0 : index
    %c0_7 = arith.constant 0 : index
    %8 = vector.load %arg8[%c0_6, %c0_7] : memref<56x32xf32, #tpu.memory_space<vmem>>, vector<56x32xf32>
    tpu.vector_store %arg8[%c0_6, %c0_7], %7 {strides = array<i32>} : memref<56x32xf32, #tpu.memory_space<vmem>>, vector<56x32xf32>,
    %c2_i32 = arith.constant 2 : i32
    %9 = arith.cmpi eq, %arg2, %c2_i32 : i32
    %10 = arith.extui %9 : i1 to i32
    %c0_i32_8 = arith.constant 0 : i32
    %11 = arith.cmpi ne, %10, %c0_i32_8 : i32
    scf.if %11 {
      %c0_9 = arith.constant 0 : index
      %c0_10 = arith.constant 0 : index
      %12 = vector.load %arg8[%c0_9, %c0_10] : memref<56x32xf32, #tpu.memory_space<vmem>>, vector<56x32xf32>
      %c0_11 = arith.constant 0 : index
      %c0_12 = arith.constant 0 : index
      %13 = vector.load %arg5[%c0_11, %c0_12] : memref<1x32xf32, #tpu.memory_space<vmem>>, vector<1x32xf32>
      %14 = vector.broadcast %13 : vector<1x32xf32> to vector<56x32xf32>
      %15 = arith.addf %12, %14 : vector<56x32xf32>
      %c0_13 = arith.constant 0 : index
      %c0_14 = arith.constant 0 : index
      %16 = vector.load %arg6[%c0_13, %c0_14] : memref<56x32xf32, #tpu.memory_space<vmem>>, vector<56x32xf32>
      %17 = arith.addf %15, %16 : vector<56x32xf32>
      %c0_15 = arith.constant 0 : index
      %c0_16 = arith.constant 0 : index
      %18 = vector.load %arg7[%c0_15, %c0_16] : memref<56x32xf32, #tpu.memory_space<vmem>>, vector<56x32xf32>
      tpu.vector_store %arg7[%c0_15, %c0_16], %17 {strides = array<i32>} : memref<56x32xf32, #tpu.memory_space<vmem>>, vector<56x32xf32>,
    } else {
    }
    return
  }
  func.func @transform_0(%arg0: i32, %arg1: i32, %arg2: i32) -> (i32, i32) {
    %c0_i32 = arith.constant 0 : i32
    return %arg0, %arg2 : i32, i32
  }
  func.func @transform_1(%arg0: i32, %arg1: i32, %arg2: i32) -> (i32, i32) {
    %c0_i32 = arith.constant 0 : i32
    return %arg2, %arg1 : i32, i32
  }
  func.func @transform_2(%arg0: i32, %arg1: i32, %arg2: i32) -> (i32, i32) {
    %c0_i32 = arith.constant 0 : i32
    %c0_i32_0 = arith.constant 0 : i32
    return %c0_i32, %arg1 : i32, i32
  }
  func.func @transform_3(%arg0: i32, %arg1: i32, %arg2: i32) -> (i32, i32) {
    %c0_i32 = arith.constant 0 : i32
    return %arg0, %arg1 : i32, i32
  }
  func.func @transform_4(%arg0: i32, %arg1: i32, %arg2: i32) -> (i32, i32) {
    %c0_i32 = arith.constant 0 : i32
    return %arg0, %arg1 : i32, i32
  }
}

module attributes {stable_mosaic.version = 11 : i64} {
  func.func @_ln_linear_kernel(%arg0: i32, %arg1: i32, %arg2: memref<16x32xf32, #tpu.memory_space<vmem>>, %arg3: memref<1x32xf32, #tpu.memory_space<vmem>>, %arg4: memref<1x32xf32, #tpu.memory_space<vmem>>, %arg5: memref<32x8xf32, #tpu.memory_space<vmem>>, %arg6: memref<1x8xf32, #tpu.memory_space<vmem>>, %arg7: memref<16x8xf32, #tpu.memory_space<vmem>>) attributes {dimension_semantics = [#tpu.dimension_semantics<parallel>, #tpu.dimension_semantics<parallel>], iteration_bounds = array<i64: 1, 1>, scalar_prefetch = 0 : i64, scratch_operands = 0 : i64, tpu.core_type = #tpu.core_type<tc>, window_params = [{transform_indices = @transform_0, window_bounds = array<i64: 16, 32>}, {pipeline_mode = #tpu.pipeline_mode<synchronous>, transform_indices = @transform_1, window_bounds = array<i64: 1, 32>}, {pipeline_mode = #tpu.pipeline_mode<synchronous>, transform_indices = @transform_2, window_bounds = array<i64: 1, 32>}, {transform_indices = @transform_3, window_bounds = array<i64: 32, 8>}, {transform_indices = @transform_4, window_bounds = array<i64: 1, 8>}, {transform_indices = @transform_5, window_bounds = array<i64: 16, 8>}]} {
    %c0 = arith.constant 0 : index
    %c0_0 = arith.constant 0 : index
    %0 = vector.load %arg2[%c0, %c0_0] : memref<16x32xf32, #tpu.memory_space<vmem>>, vector<16x32xf32>
    %cst = arith.constant dense<0.000000e+00> : vector<16xf32>
    %1 = vector.multi_reduction <add>, %0, %cst [1] : vector<16x32xf32> to vector<16xf32>
    %2 = vector.shape_cast %1 : vector<16xf32> to vector<16x1xf32>
    %cst_1 = arith.constant 3.200000e+01 : f32
    %3 = vector.broadcast %cst_1 : f32 to vector<16x1xf32>
    %4 = arith.divf %2, %3 : vector<16x1xf32>
    %5 = vector.broadcast %4 : vector<16x1xf32> to vector<16x32xf32>
    %6 = arith.subf %0, %5 : vector<16x32xf32>
    %7 = arith.mulf %6, %6 : vector<16x32xf32>
    %cst_2 = arith.constant dense<0.000000e+00> : vector<16xf32>
    %8 = vector.multi_reduction <add>, %7, %cst_2 [1] : vector<16x32xf32> to vector<16xf32>
    %9 = vector.shape_cast %8 : vector<16xf32> to vector<16x1xf32>
    %cst_3 = arith.constant 3.200000e+01 : f32
    %10 = vector.broadcast %cst_3 : f32 to vector<16x1xf32>
    %11 = arith.divf %9, %10 : vector<16x1xf32>
    %cst_4 = arith.constant 9.99999997E-7 : f32
    %12 = vector.broadcast %cst_4 : f32 to vector<16x1xf32>
    %13 = arith.addf %11, %12 : vector<16x1xf32>
    %14 = math.rsqrt %13 : vector<16x1xf32>
    %15 = vector.broadcast %14 : vector<16x1xf32> to vector<16x32xf32>
    %16 = arith.mulf %6, %15 : vector<16x32xf32>
    %c0_5 = arith.constant 0 : index
    %c0_6 = arith.constant 0 : index
    %17 = vector.load %arg3[%c0_5, %c0_6] : memref<1x32xf32, #tpu.memory_space<vmem>>, vector<1x32xf32>
    %18 = vector.broadcast %17 : vector<1x32xf32> to vector<16x32xf32>
    %19 = arith.mulf %16, %18 : vector<16x32xf32>
    %c0_7 = arith.constant 0 : index
    %c0_8 = arith.constant 0 : index
    %20 = vector.load %arg4[%c0_7, %c0_8] : memref<1x32xf32, #tpu.memory_space<vmem>>, vector<1x32xf32>
    %21 = vector.broadcast %20 : vector<1x32xf32> to vector<16x32xf32>
    %22 = arith.addf %19, %21 : vector<16x32xf32>
    %c0_9 = arith.constant 0 : index
    %c0_10 = arith.constant 0 : index
    %23 = vector.load %arg5[%c0_9, %c0_10] : memref<32x8xf32, #tpu.memory_space<vmem>>, vector<32x8xf32>
    %cst_11 = arith.constant dense<0.000000e+00> : vector<16x8xf32>
    %24 = tpu.matmul %22, %23, %cst_11 {dimension_numbers = #tpu.dot_dimension_numbers<[1], [0], [0], [1], [0, 0, 1, 1], [], []>} : vector<16x32xf32>, vector<32x8xf32>, vector<16x8xf32> -> vector<16x8xf32>
    %c0_12 = arith.constant 0 : index
    %c0_13 = arith.constant 0 : index
    %25 = vector.load %arg6[%c0_12, %c0_13] : memref<1x8xf32, #tpu.memory_space<vmem>>, vector<1x8xf32>
    %26 = vector.broadcast %25 : vector<1x8xf32> to vector<16x8xf32>
    %27 = arith.addf %24, %26 : vector<16x8xf32>
    %c0_14 = arith.constant 0 : index
    %c0_15 = arith.constant 0 : index
    %28 = vector.load %arg7[%c0_14, %c0_15] : memref<16x8xf32, #tpu.memory_space<vmem>>, vector<16x8xf32>
    tpu.vector_store %arg7[%c0_14, %c0_15], %27 {strides = array<i32>} : memref<16x8xf32, #tpu.memory_space<vmem>>, vector<16x8xf32>,
    return
  }
  func.func @transform_0(%arg0: i32, %arg1: i32) -> (i32, i32) {
    %c0_i32 = arith.constant 0 : i32
    %c0_i32_0 = arith.constant 0 : i32
    return %arg0, %c0_i32 : i32, i32
  }
  func.func @transform_1(%arg0: i32, %arg1: i32) -> (i32, i32) {
    %c0_i32 = arith.constant 0 : i32
    %c0_i32_0 = arith.constant 0 : i32
    %c0_i32_1 = arith.constant 0 : i32
    return %c0_i32, %c0_i32_0 : i32, i32
  }
  func.func @transform_2(%arg0: i32, %arg1: i32) -> (i32, i32) {
    %c0_i32 = arith.constant 0 : i32
    %c0_i32_0 = arith.constant 0 : i32
    %c0_i32_1 = arith.constant 0 : i32
    return %c0_i32, %c0_i32_0 : i32, i32
  }
  func.func @transform_3(%arg0: i32, %arg1: i32) -> (i32, i32) {
    %c0_i32 = arith.constant 0 : i32
    %c0_i32_0 = arith.constant 0 : i32
    return %c0_i32, %arg1 : i32, i32
  }
  func.func @transform_4(%arg0: i32, %arg1: i32) -> (i32, i32) {
    %c0_i32 = arith.constant 0 : i32
    %c0_i32_0 = arith.constant 0 : i32
    return %c0_i32, %arg1 : i32, i32
  }
  func.func @transform_5(%arg0: i32, %arg1: i32) -> (i32, i32) {
    %c0_i32 = arith.constant 0 : i32
    return %arg0, %arg1 : i32, i32
  }
}

module attributes {stable_mosaic.version = 11 : i64} {
  func.func @_matmul_kernel(%arg0: i32, %arg1: i32, %arg2: i32, %arg3: memref<16x8xf32, #tpu.memory_space<vmem>>, %arg4: memref<8x32xf32, #tpu.memory_space<vmem>>, %arg5: memref<1x32xf32, #tpu.memory_space<vmem>>, %arg6: memref<16x32xf32, #tpu.memory_space<vmem>>, %arg7: memref<16x32xf32, #tpu.memory_space<vmem>>) attributes {dimension_semantics = [#tpu.dimension_semantics<parallel>, #tpu.dimension_semantics<parallel>, #tpu.dimension_semantics<arbitrary>], iteration_bounds = array<i64: 1, 1, 1>, scalar_prefetch = 0 : i64, scratch_operands = 1 : i64, tpu.core_type = #tpu.core_type<tc>, window_params = [{transform_indices = @transform_0, window_bounds = array<i64: 16, 8>}, {transform_indices = @transform_1, window_bounds = array<i64: 8, 32>}, {transform_indices = @transform_2, window_bounds = array<i64: 1, 32>}, {transform_indices = @transform_3, window_bounds = array<i64: 16, 32>}]} {
    %c0_i32 = arith.constant 0 : i32
    %0 = arith.cmpi eq, %arg2, %c0_i32 : i32
    %1 = arith.extui %0 : i1 to i32
    %c0_i32_0 = arith.constant 0 : i32
    %2 = arith.cmpi ne, %1, %c0_i32_0 : i32
    scf.if %2 {
      %cst_10 = arith.constant 0.000000e+00 : f32
      %12 = vector.broadcast %cst_10 : f32 to vector<16x32xf32>
      %c0_11 = arith.constant 0 : index
      %c0_12 = arith.constant 0 : index
      %13 = vector.load %arg7[%c0_11, %c0_12] : memref<16x32xf32, #tpu.memory_space<vmem>>, vector<16x32xf32>
      tpu.vector_store %arg7[%c0_11, %c0_12], %12 {strides = array<i32>} : memref<16x32xf32, #tpu.memory_space<vmem>>, vector<16x32xf32>,
    } else {
    }
    %c0 = arith.constant 0 : index
    %c0_1 = arith.constant 0 : index
    %3 = vector.load %arg7[%c0, %c0_1] : memref<16x32xf32, #tpu.memory_space<vmem>>, vector<16x32xf32>
    %c0_2 = arith.constant 0 : index
    %c0_3 = arith.constant 0 : index
    %4 = vector.load %arg3[%c0_2, %c0_3] : memref<16x8xf32, #tpu.memory_space<vmem>>, vector<16x8xf32>
    %c0_4 = arith.constant 0 : index
    %c0_5 = arith.constant 0 : index
    %5 = vector.load %arg4[%c0_4, %c0_5] : memref<8x32xf32, #tpu.memory_space<vmem>>, vector<8x32xf32>
    %cst = arith.constant dense<0.000000e+00> : vector<16x32xf32>
    %6 = tpu.matmul %4, %5, %cst {dimension_numbers = #tpu.dot_dimension_numbers<[1], [0], [0], [1], [0, 0, 1, 1], [], []>} : vector<16x8xf32>, vector<8x32xf32>, vector<16x32xf32> -> vector<16x32xf32>
    %7 = arith.addf %3, %6 : vector<16x32xf32>
    %c0_6 = arith.constant 0 : index
    %c0_7 = arith.constant 0 : index
    %8 = vector.load %arg7[%c0_6, %c0_7] : memref<16x32xf32, #tpu.memory_space<vmem>>, vector<16x32xf32>
    tpu.vector_store %arg7[%c0_6, %c0_7], %7 {strides = array<i32>} : memref<16x32xf32, #tpu.memory_space<vmem>>, vector<16x32xf32>,
    %c0_i32_8 = arith.constant 0 : i32
    %9 = arith.cmpi eq, %arg2, %c0_i32_8 : i32
    %10 = arith.extui %9 : i1 to i32
    %c0_i32_9 = arith.constant 0 : i32
    %11 = arith.cmpi ne, %10, %c0_i32_9 : i32
    scf.if %11 {
      %c0_10 = arith.constant 0 : index
      %c0_11 = arith.constant 0 : index
      %12 = vector.load %arg7[%c0_10, %c0_11] : memref<16x32xf32, #tpu.memory_space<vmem>>, vector<16x32xf32>
      %c0_12 = arith.constant 0 : index
      %c0_13 = arith.constant 0 : index
      %13 = vector.load %arg5[%c0_12, %c0_13] : memref<1x32xf32, #tpu.memory_space<vmem>>, vector<1x32xf32>
      %14 = vector.broadcast %13 : vector<1x32xf32> to vector<16x32xf32>
      %15 = arith.addf %12, %14 : vector<16x32xf32>
      %c0_14 = arith.constant 0 : index
      %c0_15 = arith.constant 0 : index
      %16 = vector.load %arg6[%c0_14, %c0_15] : memref<16x32xf32, #tpu.memory_space<vmem>>, vector<16x32xf32>
      tpu.vector_store %arg6[%c0_14, %c0_15], %15 {strides = array<i32>} : memref<16x32xf32, #tpu.memory_space<vmem>>, vector<16x32xf32>,
    } else {
    }
    return
  }
  func.func @transform_0(%arg0: i32, %arg1: i32, %arg2: i32) -> (i32, i32) {
    %c0_i32 = arith.constant 0 : i32
    return %arg0, %arg2 : i32, i32
  }
  func.func @transform_1(%arg0: i32, %arg1: i32, %arg2: i32) -> (i32, i32) {
    %c0_i32 = arith.constant 0 : i32
    return %arg2, %arg1 : i32, i32
  }
  func.func @transform_2(%arg0: i32, %arg1: i32, %arg2: i32) -> (i32, i32) {
    %c0_i32 = arith.constant 0 : i32
    %c0_i32_0 = arith.constant 0 : i32
    return %c0_i32, %arg1 : i32, i32
  }
  func.func @transform_3(%arg0: i32, %arg1: i32, %arg2: i32) -> (i32, i32) {
    %c0_i32 = arith.constant 0 : i32
    return %arg0, %arg1 : i32, i32
  }
}

module attributes {stable_mosaic.version = 11 : i64} {
  func.func @_matmul_kernel(%arg0: i32, %arg1: i32, %arg2: i32, %arg3: memref<64x512xf32, #tpu.memory_space<vmem>>, %arg4: memref<512x32xf32, #tpu.memory_space<vmem>>, %arg5: memref<1x32xf32, #tpu.memory_space<vmem>>, %arg6: memref<64x32xf32, #tpu.memory_space<vmem>>, %arg7: memref<64x32xf32, #tpu.memory_space<vmem>>) attributes {dimension_semantics = [#tpu.dimension_semantics<parallel>, #tpu.dimension_semantics<parallel>, #tpu.dimension_semantics<arbitrary>], iteration_bounds = array<i64: 1, 1, 1>, scalar_prefetch = 0 : i64, scratch_operands = 1 : i64, tpu.core_type = #tpu.core_type<tc>, window_params = [{transform_indices = @transform_0, window_bounds = array<i64: 64, 512>}, {transform_indices = @transform_1, window_bounds = array<i64: 512, 32>}, {transform_indices = @transform_2, window_bounds = array<i64: 1, 32>}, {transform_indices = @transform_3, window_bounds = array<i64: 64, 32>}]} {
    %c0_i32 = arith.constant 0 : i32
    %0 = arith.cmpi eq, %arg2, %c0_i32 : i32
    %1 = arith.extui %0 : i1 to i32
    %c0_i32_0 = arith.constant 0 : i32
    %2 = arith.cmpi ne, %1, %c0_i32_0 : i32
    scf.if %2 {
      %cst_10 = arith.constant 0.000000e+00 : f32
      %12 = vector.broadcast %cst_10 : f32 to vector<64x32xf32>
      %c0_11 = arith.constant 0 : index
      %c0_12 = arith.constant 0 : index
      %13 = vector.load %arg7[%c0_11, %c0_12] : memref<64x32xf32, #tpu.memory_space<vmem>>, vector<64x32xf32>
      tpu.vector_store %arg7[%c0_11, %c0_12], %12 {strides = array<i32>} : memref<64x32xf32, #tpu.memory_space<vmem>>, vector<64x32xf32>,
    } else {
    }
    %c0 = arith.constant 0 : index
    %c0_1 = arith.constant 0 : index
    %3 = vector.load %arg7[%c0, %c0_1] : memref<64x32xf32, #tpu.memory_space<vmem>>, vector<64x32xf32>
    %c0_2 = arith.constant 0 : index
    %c0_3 = arith.constant 0 : index
    %4 = vector.load %arg3[%c0_2, %c0_3] : memref<64x512xf32, #tpu.memory_space<vmem>>, vector<64x512xf32>
    %c0_4 = arith.constant 0 : index
    %c0_5 = arith.constant 0 : index
    %5 = vector.load %arg4[%c0_4, %c0_5] : memref<512x32xf32, #tpu.memory_space<vmem>>, vector<512x32xf32>
    %cst = arith.constant dense<0.000000e+00> : vector<64x32xf32>
    %6 = tpu.matmul %4, %5, %cst {dimension_numbers = #tpu.dot_dimension_numbers<[1], [0], [0], [1], [0, 0, 1, 1], [], []>} : vector<64x512xf32>, vector<512x32xf32>, vector<64x32xf32> -> vector<64x32xf32>
    %7 = arith.addf %3, %6 : vector<64x32xf32>
    %c0_6 = arith.constant 0 : index
    %c0_7 = arith.constant 0 : index
    %8 = vector.load %arg7[%c0_6, %c0_7] : memref<64x32xf32, #tpu.memory_space<vmem>>, vector<64x32xf32>
    tpu.vector_store %arg7[%c0_6, %c0_7], %7 {strides = array<i32>} : memref<64x32xf32, #tpu.memory_space<vmem>>, vector<64x32xf32>,
    %c0_i32_8 = arith.constant 0 : i32
    %9 = arith.cmpi eq, %arg2, %c0_i32_8 : i32
    %10 = arith.extui %9 : i1 to i32
    %c0_i32_9 = arith.constant 0 : i32
    %11 = arith.cmpi ne, %10, %c0_i32_9 : i32
    scf.if %11 {
      %c0_10 = arith.constant 0 : index
      %c0_11 = arith.constant 0 : index
      %12 = vector.load %arg7[%c0_10, %c0_11] : memref<64x32xf32, #tpu.memory_space<vmem>>, vector<64x32xf32>
      %c0_12 = arith.constant 0 : index
      %c0_13 = arith.constant 0 : index
      %13 = vector.load %arg5[%c0_12, %c0_13] : memref<1x32xf32, #tpu.memory_space<vmem>>, vector<1x32xf32>
      %14 = vector.broadcast %13 : vector<1x32xf32> to vector<64x32xf32>
      %15 = arith.addf %12, %14 : vector<64x32xf32>
      %c0_14 = arith.constant 0 : index
      %c0_15 = arith.constant 0 : index
      %16 = vector.load %arg6[%c0_14, %c0_15] : memref<64x32xf32, #tpu.memory_space<vmem>>, vector<64x32xf32>
      tpu.vector_store %arg6[%c0_14, %c0_15], %15 {strides = array<i32>} : memref<64x32xf32, #tpu.memory_space<vmem>>, vector<64x32xf32>,
    } else {
    }
    return
  }
  func.func @transform_0(%arg0: i32, %arg1: i32, %arg2: i32) -> (i32, i32) {
    %c0_i32 = arith.constant 0 : i32
    return %arg0, %arg2 : i32, i32
  }
  func.func @transform_1(%arg0: i32, %arg1: i32, %arg2: i32) -> (i32, i32) {
    %c0_i32 = arith.constant 0 : i32
    return %arg2, %arg1 : i32, i32
  }
  func.func @transform_2(%arg0: i32, %arg1: i32, %arg2: i32) -> (i32, i32) {
    %c0_i32 = arith.constant 0 : i32
    %c0_i32_0 = arith.constant 0 : i32
    return %c0_i32, %arg1 : i32, i32
  }
  func.func @transform_3(%arg0: i32, %arg1: i32, %arg2: i32) -> (i32, i32) {
    %c0_i32 = arith.constant 0 : i32
    return %arg0, %arg1 : i32, i32
  }
}

module attributes {stable_mosaic.version = 11 : i64} {
  func.func @_ln_linear_kernel(%arg0: i32, %arg1: i32, %arg2: memref<32x32xf32, #tpu.memory_space<vmem>>, %arg3: memref<1x32xf32, #tpu.memory_space<vmem>>, %arg4: memref<1x32xf32, #tpu.memory_space<vmem>>, %arg5: memref<32x48xf32, #tpu.memory_space<vmem>>, %arg6: memref<1x48xf32, #tpu.memory_space<vmem>>, %arg7: memref<32x48xf32, #tpu.memory_space<vmem>>) attributes {dimension_semantics = [#tpu.dimension_semantics<parallel>, #tpu.dimension_semantics<parallel>], iteration_bounds = array<i64: 1, 1>, scalar_prefetch = 0 : i64, scratch_operands = 0 : i64, tpu.core_type = #tpu.core_type<tc>, window_params = [{transform_indices = @transform_0, window_bounds = array<i64: 32, 32>}, {pipeline_mode = #tpu.pipeline_mode<synchronous>, transform_indices = @transform_1, window_bounds = array<i64: 1, 32>}, {pipeline_mode = #tpu.pipeline_mode<synchronous>, transform_indices = @transform_2, window_bounds = array<i64: 1, 32>}, {transform_indices = @transform_3, window_bounds = array<i64: 32, 48>}, {transform_indices = @transform_4, window_bounds = array<i64: 1, 48>}, {transform_indices = @transform_5, window_bounds = array<i64: 32, 48>}]} {
    %c0 = arith.constant 0 : index
    %c0_0 = arith.constant 0 : index
    %0 = vector.load %arg2[%c0, %c0_0] : memref<32x32xf32, #tpu.memory_space<vmem>>, vector<32x32xf32>
    %cst = arith.constant dense<0.000000e+00> : vector<32xf32>
    %1 = vector.multi_reduction <add>, %0, %cst [1] : vector<32x32xf32> to vector<32xf32>
    %2 = vector.shape_cast %1 : vector<32xf32> to vector<32x1xf32>
    %cst_1 = arith.constant 3.200000e+01 : f32
    %3 = vector.broadcast %cst_1 : f32 to vector<32x1xf32>
    %4 = arith.divf %2, %3 : vector<32x1xf32>
    %5 = vector.broadcast %4 : vector<32x1xf32> to vector<32x32xf32>
    %6 = arith.subf %0, %5 : vector<32x32xf32>
    %7 = arith.mulf %6, %6 : vector<32x32xf32>
    %cst_2 = arith.constant dense<0.000000e+00> : vector<32xf32>
    %8 = vector.multi_reduction <add>, %7, %cst_2 [1] : vector<32x32xf32> to vector<32xf32>
    %9 = vector.shape_cast %8 : vector<32xf32> to vector<32x1xf32>
    %cst_3 = arith.constant 3.200000e+01 : f32
    %10 = vector.broadcast %cst_3 : f32 to vector<32x1xf32>
    %11 = arith.divf %9, %10 : vector<32x1xf32>
    %cst_4 = arith.constant 9.99999997E-7 : f32
    %12 = vector.broadcast %cst_4 : f32 to vector<32x1xf32>
    %13 = arith.addf %11, %12 : vector<32x1xf32>
    %14 = math.rsqrt %13 : vector<32x1xf32>
    %15 = vector.broadcast %14 : vector<32x1xf32> to vector<32x32xf32>
    %16 = arith.mulf %6, %15 : vector<32x32xf32>
    %c0_5 = arith.constant 0 : index
    %c0_6 = arith.constant 0 : index
    %17 = vector.load %arg3[%c0_5, %c0_6] : memref<1x32xf32, #tpu.memory_space<vmem>>, vector<1x32xf32>
    %18 = vector.broadcast %17 : vector<1x32xf32> to vector<32x32xf32>
    %19 = arith.mulf %16, %18 : vector<32x32xf32>
    %c0_7 = arith.constant 0 : index
    %c0_8 = arith.constant 0 : index
    %20 = vector.load %arg4[%c0_7, %c0_8] : memref<1x32xf32, #tpu.memory_space<vmem>>, vector<1x32xf32>
    %21 = vector.broadcast %20 : vector<1x32xf32> to vector<32x32xf32>
    %22 = arith.addf %19, %21 : vector<32x32xf32>
    %c0_9 = arith.constant 0 : index
    %c0_10 = arith.constant 0 : index
    %23 = vector.load %arg5[%c0_9, %c0_10] : memref<32x48xf32, #tpu.memory_space<vmem>>, vector<32x48xf32>
    %cst_11 = arith.constant dense<0.000000e+00> : vector<32x48xf32>
    %24 = tpu.matmul %22, %23, %cst_11 {dimension_numbers = #tpu.dot_dimension_numbers<[1], [0], [0], [1], [0, 0, 1, 1], [], []>} : vector<32x32xf32>, vector<32x48xf32>, vector<32x48xf32> -> vector<32x48xf32>
    %c0_12 = arith.constant 0 : index
    %c0_13 = arith.constant 0 : index
    %25 = vector.load %arg6[%c0_12, %c0_13] : memref<1x48xf32, #tpu.memory_space<vmem>>, vector<1x48xf32>
    %26 = vector.broadcast %25 : vector<1x48xf32> to vector<32x48xf32>
    %27 = arith.addf %24, %26 : vector<32x48xf32>
    %c0_14 = arith.constant 0 : index
    %c0_15 = arith.constant 0 : index
    %28 = vector.load %arg7[%c0_14, %c0_15] : memref<32x48xf32, #tpu.memory_space<vmem>>, vector<32x48xf32>
    tpu.vector_store %arg7[%c0_14, %c0_15], %27 {strides = array<i32>} : memref<32x48xf32, #tpu.memory_space<vmem>>, vector<32x48xf32>,
    return
  }
  func.func @transform_0(%arg0: i32, %arg1: i32) -> (i32, i32) {
    %c0_i32 = arith.constant 0 : i32
    %c0_i32_0 = arith.constant 0 : i32
    return %arg0, %c0_i32 : i32, i32
  }
  func.func @transform_1(%arg0: i32, %arg1: i32) -> (i32, i32) {
    %c0_i32 = arith.constant 0 : i32
    %c0_i32_0 = arith.constant 0 : i32
    %c0_i32_1 = arith.constant 0 : i32
    return %c0_i32, %c0_i32_0 : i32, i32
  }
  func.func @transform_2(%arg0: i32, %arg1: i32) -> (i32, i32) {
    %c0_i32 = arith.constant 0 : i32
    %c0_i32_0 = arith.constant 0 : i32
    %c0_i32_1 = arith.constant 0 : i32
    return %c0_i32, %c0_i32_0 : i32, i32
  }
  func.func @transform_3(%arg0: i32, %arg1: i32) -> (i32, i32) {
    %c0_i32 = arith.constant 0 : i32
    %c0_i32_0 = arith.constant 0 : i32
    return %c0_i32, %arg1 : i32, i32
  }
  func.func @transform_4(%arg0: i32, %arg1: i32) -> (i32, i32) {
    %c0_i32 = arith.constant 0 : i32
    %c0_i32_0 = arith.constant 0 : i32
    return %c0_i32, %arg1 : i32, i32
  }
  func.func @transform_5(%arg0: i32, %arg1: i32) -> (i32, i32) {
    %c0_i32 = arith.constant 0 : i32
    return %arg0, %arg1 : i32, i32
  }
}

</mosaic_0001>

<bundles_post_ra>
// kernel: _lambda_.22
= control target key start
LH: loop header
LB: loop body
LE: loop exit
PB: predicated region body
PF: predicated region fallthrough
CT: control target
= control target key end

     0   :  { %vm18_vm0 = vcmask 261120   ;;  %v222_v3 = vmov 0.0   ;;  %vm37_vm1 = vcmask 392192   ;;  %s304_s1 = inlined_call_operand.vmem [shape: f32[48,32], index: 1, kind: input, shape index: {}]   ;;  %s305_s0 = inlined_call_operand.vmem [shape: f32[32,48], index: 0, kind: input, shape index: {}]   ;;  %s306_s2 = inlined_call_operand.vmem [shape: f32[1,32], index: 2, kind: input, shape index: {}]   ;;  %s307_s3 = inlined_call_operand.vmem [shape: f32[32,32], index: 3, kind: output, shape index: {}]  }
   0x1   :  { %v31_v0 = vld [vmem:[%s304_s1] sm:$0xff]  ;;  %v32_v1 = vld [vmem:[%s304_s1 + $0x8] sm:$0xff]  ;;  %v33_v2 = vld [vmem:[%s304_s1 + $0x10] sm:$0xff]  ;;  %20 = vst.msk [vmem:[#allocation2 + $0x8] sm:$0xff] %vm18_vm0, %v222_v3 }
   0x2   :  { %19 = vst.msk [vmem:[#allocation2] sm:$0xff] %vm18_vm0, %v222_v3  ;;  %21 = vst.msk [vmem:[#allocation2 + $0x10] sm:$0xff] %vm18_vm0, %v222_v3  ;;  %v203_v4 = vpack.c.bf16 %v32_v1, %v31_v0  ;;  %v34_v5 = vld [vmem:[%s304_s1 + $0x18] sm:$0xff]  ;;  %v35_v7 = vld [vmem:[%s304_s1 + $0x20] sm:$0xff] }
   0x3   :  { %22 = vst.msk [vmem:[#allocation2 + $0x18] sm:$0xff] %vm18_vm0, %v222_v3  ;;  %v207_v6 = vpack.c.bf16 %v34_v5, %v33_v2  ;;  %v36_v8 = vld [vmem:[%s304_s1 + $0x28] sm:$0xff]  ;;  %v27_v9 = vld [vmem:[%s305_s0] sm:$0xff]  ;;  %v29_v10 = vld [vmem:[%s305_s0 + $0x10] sm:$0xff] }
   0x4   :  { %204 = vmatprep.subr.bf16.mxu0 %v203_v4  ;;  %215 = vmatprep.subr.bf16.mxu1 %v203_v4  ;;  %v211_v11 = vpack.c.bf16 %v36_v8, %v35_v7  ;;  %v28_v12 = vld [vmem:[%s305_s0 + $0x8] sm:$0xff]  ;;  %v30_v13 = vld [vmem:[%s305_s0 + $0x18] sm:$0xff]  ;;  %v174_v26 = vld [vmem:[%s306_s2] ss:$0 sm:$0xff] }
   0x5   :  { %206 = vmatpush3.bf16.msra.mxu0 %v203_v4  ;;  %218 = vmatpush3.bf16.msra.mxu1 %v203_v4 }
   0x6   :  { %208 = vmatprep.subr.bf16.mxu0 %v207_v6  ;;  %216 = vmatprep.subr.bf16.mxu1 %v207_v6 }
   0x7   :  { %197 = vmatprep.mubr.msk.f32.mxu0 %vm37_vm1, %v27_v9  ;;  %200 = vmatprep.mubr.msk.f32.mxu1 %vm37_vm1, %v29_v10 }
   0x8   :  { %v24_v14 = vld [vmem:[#allocation2 + $0x8] sm:$0xff] }
   0x9   :  { %210 = vmatpush3.bf16.msra.mxu0 %v207_v6  ;;  %219 = vmatpush3.bf16.msra.mxu1 %v207_v6  ;;  %v23_v16 = vld [vmem:[#allocation2] sm:$0xff]  ;;  %v25_v17 = vld [vmem:[#allocation2 + $0x10] sm:$0xff] }
   0xa   :  { %212 = vmatprep.subr.bf16.mxu0 %v211_v11  ;;  %217 = vmatprep.subr.bf16.mxu1 %v211_v11  ;;  %v26_v15 = vld [vmem:[#allocation2 + $0x18] sm:$0xff] }
   0xd   :  { %214 = vmatpush3.bf16.msra.mxu0 %v211_v11  ;;  %220 = vmatpush3.bf16.msra.mxu1 %v211_v11 }
  0x10   :  { %198 = vmatmul.mubr.msk.f32.vlgmr.msra.gmra.mrb[0].mxu0 %vm37_vm1, %v28_v12  ;;  %201 = vmatmul.mubr.msk.f32.vlgmr.msra.gmra.mrb[0].mxu1 %vm37_vm1, %v30_v13 }
  0xe3   :  { %v199_v18 = vpop.f32.mrb[0].mxu0  ;;  %v202_v19 = vpop.f32.mrb[0].mxu1 }
  0xe4   :  { %v136_v20 = vadd.f32 %v199_v18, %v24_v14  ;;  %v138_v21 = vadd.f32 %v202_v19, %v26_v15  ;;  %v116_v22 = vpop.f32.mrb[1].mxu0  ;;  %v126_v23 = vpop.f32.mrb[1].mxu1 }
  0xe5   :  { %v135_v24 = vadd.f32 %v116_v22, %v23_v16  ;;  %v137_v25 = vadd.f32 %v126_v23, %v25_v17 }
  0xe6   :  { %141 = vst.msk [vmem:[#allocation2 + $0x8] sm:$0xff] %vm18_vm0, %v136_v20  ;;  %143 = vst.msk [vmem:[#allocation2 + $0x18] sm:$0xff] %vm18_vm0, %v138_v21 }
  0xe7   :  { %140 = vst.msk [vmem:[#allocation2] sm:$0xff] %vm18_vm0, %v135_v24  ;;  %142 = vst.msk [vmem:[#allocation2 + $0x10] sm:$0xff] %vm18_vm0, %v137_v25 }
  0xed   :  { %v148_v27 = vld [vmem:[#allocation2 + $0x8] sm:$0xff]  ;;  %v150_v28 = vld [vmem:[#allocation2 + $0x18] sm:$0xff] }
  0xee   :  { %v159_v29 = vadd.f32 %v174_v26, %v148_v27  ;;  %v161_v30 = vadd.f32 %v174_v26, %v150_v28  ;;  %v147_v31 = vld [vmem:[#allocation2] sm:$0xff]  ;;  %v149_v32 = vld [vmem:[#allocation2 + $0x10] sm:$0xff] }
  0xef   :  { %v158_v33 = vadd.f32 %v174_v26, %v147_v31  ;;  %v160_v34 = vadd.f32 %v174_v26, %v149_v32 }
  0xf0   :  { %163 = vst.msk [vmem:[%s307_s3 + $0x8] sm:$0xff] %vm18_vm0, %v159_v29  ;;  %165 = vst.msk [vmem:[%s307_s3 + $0x18] sm:$0xff] %vm18_vm0, %v161_v30 }
  0xf1   :  { %162 = vst.msk [vmem:[%s307_s3] sm:$0xff] %vm18_vm0, %v158_v33  ;;  %164 = vst.msk [vmem:[%s307_s3 + $0x10] sm:$0xff] %vm18_vm0, %v160_v34 }

// kernel: _lambda_.23
= control target key start
LH: loop header
LB: loop body
LE: loop exit
PB: predicated region body
PF: predicated region fallthrough
CT: control target
= control target key end

     0   :  { %8 = vsyncpa [#allocation4], 0  ;;  %s953_s0 = inlined_call_operand.hbm [shape: f32[64,512], index: 0, kind: input, shape index: {}]   ;;  %s954_s1 = inlined_call_operand.vmem [shape: f32[512,32], index: 1, kind: input, shape index: {}]   ;;  %s955_s2 = inlined_call_operand.hbm [shape: f32[1,32], index: 2, kind: input, shape index: {}]   ;;  %s956_s3 = inlined_call_operand.vmem [shape: f32[64,32], index: 3, kind: output, shape index: {}]  }
   0x1   :  { %9 = vsyncpa [#allocation6], 0  ;;  %s654_s12 = smov [#allocation3]   ;;  %s606_s16 = scalar_lea.hbm %s953_s0, 4096 }
   0x2   :  { %s15_s13 = sshll.u32 %s654_s12, 4  ;;  %p607_p0 = scmp.ne.s32.totalorder %s953_s0, %s606_s16  ;;  %s16_s13 = int_to_ptr.vmem [resolvable:$true] %s15_s13 }
   0x3   :  { %p610_p1 = scmp.lt.u32.totalorder %s606_s16, %s953_s0 }
   0x5   :  { %p612_p2 = pnand %p610_p1, %p607_p0 }
   0x7   :  { %615 = shalt.err (!%p612_p2)
}
   0x8   :  { %s616_s21 = scalar_lea.vmem %s16_s13, 4096  ;;  %p621_p4 = scmp.lt.s32.totalorder %s16_s13, %s16_s13 }
   0x9   :  { %p617_p3 = scmp.ne.s32.totalorder %s16_s13, %s616_s21  ;;  %p622_p5 = scmp.lt.s32.totalorder %s616_s21, %s616_s21 }
   0xb   :  { %p623_p6 = por %p622_p5, %p621_p4 }
   0xd   :  { %p624_p7 = pnand %p623_p6, %p617_p3 }
   0xf   :  { %627 = shalt.err (!%p624_p7)
}
  0x10   :  { %s655_s22 = smov 512   ;;  %s656_s23 = smov 32  }
  0x11   :  { %21 = dma.hbm_to_vmem [thread:$0]  %s953_s0, 4096, %s16_s13, [#allocation4], %s655_s22, %s655_s22, %s656_s23  }
  0x12   :  { %s657_s26 = smov [#allocation5]   ;;  %s628_s30 = scalar_lea.hbm %s955_s2, 16 }
  0x13   :  { %s30_s27 = sshll.u32 %s657_s26, 4  ;;  %p629_p8 = scmp.ne.s32.totalorder %s955_s2, %s628_s30  ;;  %s31_s27 = int_to_ptr.vmem [resolvable:$true] %s30_s27 }
  0x14   :  { %p632_p9 = scmp.lt.u32.totalorder %s628_s30, %s955_s2 }
  0x16   :  { %p634_p10 = pnand %p632_p9, %p629_p8 }
  0x18   :  { %637 = shalt.err (!%p634_p10)
}
  0x19   :  { %s638_s8 = scalar_lea.vmem %s31_s27, 16  ;;  %s642_s0 = scalar_lea.vmem %s31_s27, 32 }
  0x1a   :  { %p639_p11 = scmp.ne.s32.totalorder %s31_s27, %s638_s8  ;;  %p643_p12 = scmp.lt.s32.totalorder %s31_s27, %s31_s27 }
  0x1b   :  { %p644_p13 = scmp.lt.s32.totalorder %s642_s0, %s638_s8 }
  0x1d   :  { %p645_p0 = por %p644_p13, %p643_p12 }
  0x1f   :  { %p646_p1 = pnand %p645_p0, %p639_p11 }
  0x21   :  { %649 = shalt.err (!%p646_p1)
}
  0x22   :  { %33 = dma.hbm_to_vmem [thread:$0]  %s955_s2, 16, %s31_s27, [#allocation6]  }
  0x23   :  { %650 = dma.done.wait [#allocation4], 4096  }
  0x24   :  { %651 = vsyncadd [#allocation4], 4294963200 }
  0x25   :  { %652 = dma.done.wait [#allocation6], 16  }
  0x26   :  { %653 = vsyncadd [#allocation6], 4294967280  ;;  %v109_v0 = vld [vmem:[%s954_s1 + $0x80] sm:$0xff]  ;;  %v110_v1 = vld [vmem:[%s954_s1 + $0x88] sm:$0xff]  ;;  %vm44_vm0 = vcmask 261120  }
  0x27   :  { %v141_v2 = vld [vmem:[%s954_s1 + $0x180] sm:$0xff]  ;;  %v537_v3 = vpack.c.bf16 %v110_v1, %v109_v0  ;;  %v142_v4 = vld [vmem:[%s954_s1 + $0x188] sm:$0xff]  ;;  %v111_v11 = vld [vmem:[%s954_s1 + $0x90] sm:$0xff] }
  0x28   :  { %v93_v5 = vld [vmem:[%s954_s1] sm:$0xff]  ;;  %v94_v6 = vld [vmem:[%s954_s1 + $0x8] sm:$0xff]  ;;  %v569_v7 = vpack.c.bf16 %v142_v4, %v141_v2  ;;  %v112_v13 = vld [vmem:[%s954_s1 + $0x98] sm:$0xff] }
  0x29   :  { %v539_v8 = vpack.c.bf16 %v94_v6, %v93_v5  ;;  %v125_v9 = vld [vmem:[%s954_s1 + $0x100] sm:$0xff]  ;;  %v126_v10 = vld [vmem:[%s954_s1 + $0x108] sm:$0xff]  ;;  %538 = vmatprep.subr.bf16.mxu0 %v537_v3  ;;  %v143_v14 = vld [vmem:[%s954_s1 + $0x190] sm:$0xff]  ;;  %v541_v16 = vpack.c.bf16 %v112_v13, %v111_v11 }
  0x2a   :  { %v571_v12 = vpack.c.bf16 %v126_v10, %v125_v9  ;;  %v144_v15 = vld [vmem:[%s954_s1 + $0x198] sm:$0xff]  ;;  %570 = vmatprep.subr.bf16.mxu1 %v569_v7  ;;  %v95_v18 = vld [vmem:[%s954_s1 + $0x10] sm:$0xff]  ;;  %v113_v23 = vld [vmem:[%s954_s1 + $0xa0] sm:$0xff] }
  0x2b   :  { %540 = vmatpush3.bf16.msra.mxu0 %v539_v8  ;;  %v573_v17 = vpack.c.bf16 %v144_v15, %v143_v14  ;;  %v96_v19 = vld [vmem:[%s954_s1 + $0x18] sm:$0xff]  ;;  %v127_v20 = vld [vmem:[%s954_s1 + $0x110] sm:$0xff]  ;;  %v114_v24 = vld [vmem:[%s954_s1 + $0xa8] sm:$0xff] }
  0x2c   :  { %572 = vmatpush3.bf16.msra.mxu1 %v571_v12  ;;  %v543_v21 = vpack.c.bf16 %v96_v19, %v95_v18  ;;  %v128_v22 = vld [vmem:[%s954_s1 + $0x118] sm:$0xff]  ;;  %542 = vmatprep.subr.bf16.mxu0 %v541_v16  ;;  %v545_v26 = vpack.c.bf16 %v114_v24, %v113_v23  ;;  %v145_v27 = vld [vmem:[%s954_s1 + $0x1a0] sm:$0xff]  ;;  %v146_v28 = vld [vmem:[%s954_s1 + $0x1a8] sm:$0xff] }
  0x2d   :  { %574 = vmatprep.subr.bf16.mxu1 %v573_v17  ;;  %v575_v25 = vpack.c.bf16 %v128_v22, %v127_v20  ;;  %v97_v29 = vld [vmem:[%s954_s1 + $0x20] sm:$0xff]  ;;  %v577_v30 = vpack.c.bf16 %v146_v28, %v145_v27  ;;  %v98_v31 = vld [vmem:[%s954_s1 + $0x28] sm:$0xff]  ;;  %v115_v35 = vld [vmem:[%s954_s1 + $0xb0] sm:$0xff] }
  0x2e   :  { %v129_v32 = vld [vmem:[%s954_s1 + $0x120] sm:$0xff]  ;;  %v130_v33 = vld [vmem:[%s954_s1 + $0x128] sm:$0xff]  ;;  %v547_v34 = vpack.c.bf16 %v98_v31, %v97_v29  ;;  %v116_v36 = vld [vmem:[%s954_s1 + $0xb8] sm:$0xff] }
  0x2f   :  { %544 = vmatpush3.bf16.msra.mxu0 %v543_v21  ;;  %v147_v37 = vld [vmem:[%s954_s1 + $0x1b0] sm:$0xff]  ;;  %v579_v38 = vpack.c.bf16 %v130_v33, %v129_v32  ;;  %v549_v39 = vpack.c.bf16 %v116_v36, %v115_v35  ;;  %v148_v40 = vld [vmem:[%s954_s1 + $0x1b8] sm:$0xff]  ;;  %v117_v46 = vld [vmem:[%s954_s1 + $0xc0] sm:$0xff] }
  0x30   :  { %576 = vmatpush3.bf16.msra.mxu1 %v575_v25  ;;  %546 = vmatprep.subr.bf16.mxu0 %v545_v26  ;;  %v99_v41 = vld [vmem:[%s954_s1 + $0x30] sm:$0xff]  ;;  %v100_v42 = vld [vmem:[%s954_s1 + $0x38] sm:$0xff]  ;;  %v581_v43 = vpack.c.bf16 %v148_v40, %v147_v37  ;;  %v118_v47 = vld [vmem:[%s954_s1 + $0xc8] sm:$0xff] }
  0x31   :  { %578 = vmatprep.subr.bf16.mxu1 %v577_v30  ;;  %v131_v44 = vld [vmem:[%s954_s1 + $0x130] sm:$0xff]  ;;  %v132_v45 = vld [vmem:[%s954_s1 + $0x138] sm:$0xff]  ;;  %v149_v48 = vld [vmem:[%s954_s1 + $0x1c0] sm:$0xff]  ;;  %v551_v50 = vpack.c.bf16 %v100_v42, %v99_v41  ;;  %v553_v52 = vpack.c.bf16 %v118_v47, %v117_v46 }
  0x32   :  { %v150_v49 = vld [vmem:[%s954_s1 + $0x1c8] sm:$0xff]  ;;  %v583_v51 = vpack.c.bf16 %v132_v45, %v131_v44  ;;  %v101_v53 = vld [vmem:[%s954_s1 + $0x40] sm:$0xff]  ;;  %v119_v58 = vld [vmem:[%s954_s1 + $0xd0] sm:$0xff] }
  0x33   :  { %548 = vmatpush3.bf16.msra.mxu0 %v547_v34  ;;  %v102_v54 = vld [vmem:[%s954_s1 + $0x48] sm:$0xff]  ;;  %v133_v55 = vld [vmem:[%s954_s1 + $0x140] sm:$0xff]  ;;  %v585_v56 = vpack.c.bf16 %v150_v49, %v149_v48  ;;  %v120_v59 = vld [vmem:[%s954_s1 + $0xd8] sm:$0xff] }
  0x34   :  { %580 = vmatpush3.bf16.msra.mxu1 %v579_v38  ;;  %550 = vmatprep.subr.bf16.mxu0 %v549_v39  ;;  %v134_v57 = vld [vmem:[%s954_s1 + $0x148] sm:$0xff]  ;;  %v151_v60 = vld [vmem:[%s954_s1 + $0x1d0] sm:$0xff]  ;;  %v152_v61 = vld [vmem:[%s954_s1 + $0x1d8] sm:$0xff]  ;;  %v555_v62 = vpack.c.bf16 %v102_v54, %v101_v53  ;;  %v557_v0 = vpack.c.bf16 %v120_v59, %v119_v58 }
  0x35   :  { %582 = vmatprep.subr.bf16.mxu1 %v581_v43  ;;  %v587_v63 = vpack.c.bf16 %v134_v57, %v133_v55  ;;  %v103_v1 = vld [vmem:[%s954_s1 + $0x50] sm:$0xff]  ;;  %v104_v2 = vld [vmem:[%s954_s1 + $0x58] sm:$0xff]  ;;  %v589_v4 = vpack.c.bf16 %v152_v61, %v151_v60  ;;  %v121_v6 = vld [vmem:[%s954_s1 + $0xe0] sm:$0xff] }
  0x36   :  { %v135_v3 = vld [vmem:[%s954_s1 + $0x150] sm:$0xff]  ;;  %v136_v5 = vld [vmem:[%s954_s1 + $0x158] sm:$0xff]  ;;  %v122_v7 = vld [vmem:[%s954_s1 + $0xe8] sm:$0xff]  ;;  %v559_v10 = vpack.c.bf16 %v104_v2, %v103_v1 }
  0x37   :  { %552 = vmatpush3.bf16.msra.mxu0 %v551_v50  ;;  %v153_v8 = vld [vmem:[%s954_s1 + $0x1e0] sm:$0xff]  ;;  %v154_v9 = vld [vmem:[%s954_s1 + $0x1e8] sm:$0xff]  ;;  %v591_v13 = vpack.c.bf16 %v136_v5, %v135_v3  ;;  %v561_v14 = vpack.c.bf16 %v122_v7, %v121_v6  ;;  %v64_v17 = vld [vmem:[#allocation3 + $0x18] sm:$0xff] }
  0x38   :  { %584 = vmatpush3.bf16.msra.mxu1 %v583_v51  ;;  %554 = vmatprep.subr.bf16.mxu0 %v553_v52  ;;  %v105_v11 = vld [vmem:[%s954_s1 + $0x60] sm:$0xff]  ;;  %v106_v12 = vld [vmem:[%s954_s1 + $0x68] sm:$0xff]  ;;  %v593_v18 = vpack.c.bf16 %v154_v9, %v153_v8  ;;  %v123_v20 = vld [vmem:[%s954_s1 + $0xf0] sm:$0xff] }
  0x39   :  { %586 = vmatprep.subr.bf16.mxu1 %v585_v56  ;;  %v137_v15 = vld [vmem:[%s954_s1 + $0x160] sm:$0xff]  ;;  %v62_v16 = vld [vmem:[#allocation3 + $0x8] sm:$0xff]  ;;  %v124_v21 = vld [vmem:[%s954_s1 + $0xf8] sm:$0xff]  ;;  %326 = vmatprep.mubr.f32.mxu1 %v64_v17  ;;  %v563_v24 = vpack.c.bf16 %v106_v12, %v105_v11 }
  0x3a   :  { %v138_v19 = vld [vmem:[%s954_s1 + $0x168] sm:$0xff]  ;;  %221 = vmatprep.mubr.f32.mxu0 %v62_v16  ;;  %v155_v22 = vld [vmem:[%s954_s1 + $0x1f0] sm:$0xff]  ;;  %v156_v23 = vld [vmem:[%s954_s1 + $0x1f8] sm:$0xff]  ;;  %v565_v26 = vpack.c.bf16 %v124_v21, %v123_v20 }
  0x3b   :  { %556 = vmatpush3.bf16.msra.mxu0 %v555_v62  ;;  %v595_v25 = vpack.c.bf16 %v138_v19, %v137_v15  ;;  %v107_v27 = vld [vmem:[%s954_s1 + $0x70] sm:$0xff]  ;;  %v108_v28 = vld [vmem:[%s954_s1 + $0x78] sm:$0xff]  ;;  %v597_v29 = vpack.c.bf16 %v156_v23, %v155_v22  ;;  %v61_v34 = vld [vmem:[#allocation3] sm:$0xff] }
  0x3c   :  { %588 = vmatpush3.bf16.msra.mxu1 %v587_v63  ;;  %558 = vmatprep.subr.bf16.mxu0 %v557_v0  ;;  %v139_v30 = vld [vmem:[%s954_s1 + $0x170] sm:$0xff]  ;;  %v140_v31 = vld [vmem:[%s954_s1 + $0x178] sm:$0xff]  ;;  %v567_v32 = vpack.c.bf16 %v108_v28, %v107_v27  ;;  %v66_v36 = vld [vmem:[#allocation3 + $0x28] sm:$0xff]  ;;  %v658_v0 = vmov 0.0  }
  0x3d   :  { %590 = vmatprep.subr.bf16.mxu1 %v589_v4  ;;  %v599_v33 = vpack.c.bf16 %v140_v31, %v139_v30  ;;  %v63_v35 = vld [vmem:[#allocation3 + $0x10] sm:$0xff]  ;;  %v68_v37 = vld [vmem:[#allocation3 + $0x38] sm:$0xff]  ;;  %v65_v38 = vld [vmem:[#allocation3 + $0x20] sm:$0xff]  ;;  %45 = vst.msk [vmem:[#allocation2] sm:$0xff] %vm44_vm0, %v658_v0 }
  0x3e   :  { %v67_v39 = vld [vmem:[#allocation3 + $0x30] sm:$0xff]  ;;  %v70_v40 = vld [vmem:[#allocation3 + $0x48] sm:$0xff]  ;;  %v72_v41 = vld [vmem:[#allocation3 + $0x58] sm:$0xff]  ;;  %46 = vst.msk [vmem:[#allocation2 + $0x8] sm:$0xff] %vm44_vm0, %v658_v0 }
  0x3f   :  { %560 = vmatpush3.bf16.msra.mxu0 %v559_v10  ;;  %v69_v42 = vld [vmem:[#allocation3 + $0x40] sm:$0xff]  ;;  %v71_v43 = vld [vmem:[#allocation3 + $0x50] sm:$0xff]  ;;  %v74_v44 = vld [vmem:[#allocation3 + $0x68] sm:$0xff]  ;;  %47 = vst.msk [vmem:[#allocation2 + $0x10] sm:$0xff] %vm44_vm0, %v658_v0 }
  0x40   :  { %592 = vmatpush3.bf16.msra.mxu1 %v591_v13  ;;  %562 = vmatprep.subr.bf16.mxu0 %v561_v14  ;;  %v76_v45 = vld [vmem:[#allocation3 + $0x78] sm:$0xff]  ;;  %v73_v46 = vld [vmem:[#allocation3 + $0x60] sm:$0xff]  ;;  %v75_v47 = vld [vmem:[#allocation3 + $0x70] sm:$0xff]  ;;  %48 = vst.msk [vmem:[#allocation2 + $0x18] sm:$0xff] %vm44_vm0, %v658_v0 }
  0x41   :  { %594 = vmatprep.subr.bf16.mxu1 %v593_v18  ;;  %v78_v48 = vld [vmem:[#allocation3 + $0x88] sm:$0xff]  ;;  %v80_v49 = vld [vmem:[#allocation3 + $0x98] sm:$0xff]  ;;  %v77_v50 = vld [vmem:[#allocation3 + $0x80] sm:$0xff]  ;;  %49 = vst.msk [vmem:[#allocation2 + $0x20] sm:$0xff] %vm44_vm0, %v658_v0 }
  0x42   :  { %v79_v51 = vld [vmem:[#allocation3 + $0x90] sm:$0xff]  ;;  %v82_v52 = vld [vmem:[#allocation3 + $0xa8] sm:$0xff]  ;;  %v84_v53 = vld [vmem:[#allocation3 + $0xb8] sm:$0xff]  ;;  %50 = vst.msk [vmem:[#allocation2 + $0x28] sm:$0xff] %vm44_vm0, %v658_v0 }
  0x43   :  { %564 = vmatpush3.bf16.msra.mxu0 %v563_v24  ;;  %v81_v54 = vld [vmem:[#allocation3 + $0xa0] sm:$0xff]  ;;  %v83_v55 = vld [vmem:[#allocation3 + $0xb0] sm:$0xff]  ;;  %v86_v56 = vld [vmem:[#allocation3 + $0xc8] sm:$0xff]  ;;  %51 = vst.msk [vmem:[#allocation2 + $0x30] sm:$0xff] %vm44_vm0, %v658_v0 }
  0x44   :  { %596 = vmatpush3.bf16.msra.mxu1 %v595_v25  ;;  %566 = vmatprep.subr.bf16.mxu0 %v565_v26  ;;  %v88_v57 = vld [vmem:[#allocation3 + $0xd8] sm:$0xff]  ;;  %v85_v58 = vld [vmem:[#allocation3 + $0xc0] sm:$0xff]  ;;  %v87_v59 = vld [vmem:[#allocation3 + $0xd0] sm:$0xff]  ;;  %52 = vst.msk [vmem:[#allocation2 + $0x38] sm:$0xff] %vm44_vm0, %v658_v0 }
  0x45   :  { %598 = vmatprep.subr.bf16.mxu1 %v597_v29  ;;  %v90_v60 = vld [vmem:[#allocation3 + $0xe8] sm:$0xff]  ;;  %v92_v61 = vld [vmem:[#allocation3 + $0xf8] sm:$0xff]  ;;  %v89_v62 = vld [vmem:[#allocation3 + $0xe0] sm:$0xff] }
  0x46   :  { %v91_v63 = vld [vmem:[#allocation3 + $0xf0] sm:$0xff]  ;;  %v53_v7 = vld [vmem:[#allocation2] sm:$0xff]  ;;  %v54_v16 = vld [vmem:[#allocation2 + $0x8] sm:$0xff] }
  0x47   :  { %568 = vmatpush3.bf16.msra.mxu0 %v567_v32  ;;  %v55_v25 = vld [vmem:[#allocation2 + $0x10] sm:$0xff]  ;;  %v905_v30 = vld [vmem:[#allocation5] ss:$0 sm:$0xff] }
  0x48   :  { %600 = vmatpush3.bf16.msra.mxu1 %v599_v33 }
  0x4a   :  { %222 = vmatmul.mubr.f32.vlgmr.msra.gmra.mrb[0].mxu0 %v61_v34 }
  0x4b   :  { %327 = vmatmul.mubr.f32.vlgmr.msra.gmra.mrb[0].mxu1 %v63_v35  ;;  %226 = vmatprep.mubr.f32.mxu0 %v66_v36  ;;  %v56_v36 = vld [vmem:[#allocation2 + $0x18] sm:$0xff] }
  0x4c   :  { %331 = vmatprep.mubr.f32.mxu1 %v68_v37 }
  0x4e   :  { %227 = vmatmul.mubr.f32.gmra.mrb[2].mxu0 %v65_v38 }
  0x4f   :  { %332 = vmatmul.mubr.f32.gmra.mrb[2].mxu1 %v67_v39  ;;  %231 = vmatprep.mubr.f32.mxu0 %v70_v40 }
  0x50   :  { %336 = vmatprep.mubr.f32.mxu1 %v72_v41 }
  0x52   :  { %232 = vmatmul.mubr.f32.gmra.mrb[4].mxu0 %v69_v42 }
  0x53   :  { %337 = vmatmul.mubr.f32.gmra.mrb[4].mxu1 %v71_v43  ;;  %236 = vmatprep.mubr.f32.mxu0 %v74_v44 }
  0x54   :  { %341 = vmatprep.mubr.f32.mxu1 %v76_v45 }
  0x56   :  { %237 = vmatmul.mubr.f32.gmra.mrb[6].mxu0 %v73_v46 }
  0x57   :  { %342 = vmatmul.mubr.f32.gmra.mrb[6].mxu1 %v75_v47  ;;  %241 = vmatprep.mubr.f32.mxu0 %v78_v48  ;;  %v57_v47 = vld [vmem:[#allocation2 + $0x20] sm:$0xff] }
  0x58   :  { %346 = vmatprep.mubr.f32.mxu1 %v80_v49 }
  0x5a   :  { %242 = vmatmul.mubr.f32.gmra.mrb[8].mxu0 %v77_v50 }
  0x5b   :  { %347 = vmatmul.mubr.f32.gmra.mrb[8].mxu1 %v79_v51  ;;  %246 = vmatprep.mubr.f32.mxu0 %v82_v52 }
  0x5c   :  { %351 = vmatprep.mubr.f32.mxu1 %v84_v53 }
  0x5e   :  { %247 = vmatmul.mubr.f32.gmra.mrb[10].mxu0 %v81_v54 }
  0x5f   :  { %352 = vmatmul.mubr.f32.gmra.mrb[10].mxu1 %v83_v55  ;;  %251 = vmatprep.mubr.f32.mxu0 %v86_v56 }
  0x60   :  { %356 = vmatprep.mubr.f32.mxu1 %v88_v57 }
  0x62   :  { %252 = vmatmul.mubr.f32.gmra.mrb[12].mxu0 %v85_v58  ;;  %v58_v58 = vld [vmem:[#allocation2 + $0x28] sm:$0xff] }
  0x63   :  { %357 = vmatmul.mubr.f32.gmra.mrb[12].mxu1 %v87_v59  ;;  %256 = vmatprep.mubr.f32.mxu0 %v90_v60 }
  0x64   :  { %361 = vmatprep.mubr.f32.mxu1 %v92_v61 }
  0x66   :  { %257 = vmatmul.mubr.f32.gmra.mrb[14].mxu0 %v89_v62 }
  0x67   :  { %362 = vmatmul.mubr.f32.gmra.mrb[14].mxu1 %v91_v63 }
 0x11d   :  { %v457_v1 = vpop.f32.mrb[0].mxu0 }
 0x11e   :  { %v513_v2 = vpop.f32.mrb[0].mxu1  ;;  %v458_v3 = vpop.f32.mrb[1].mxu0 }
 0x11f   :  { %v459_v4 = vadd.f32 %v458_v3, %v457_v1  ;;  %v514_v5 = vpop.f32.mrb[1].mxu1 }
 0x120   :  { %v515_v6 = vadd.f32 %v514_v5, %v513_v2  ;;  %v59_v5 = vld [vmem:[#allocation2 + $0x30] sm:$0xff] }
 0x121   :  { %v460_v8 = vpop.f32.mrb[2].mxu0 }
 0x122   :  { %v329_v9 = vadd.f32 %v515_v6, %v459_v4  ;;  %v516_v10 = vpop.f32.mrb[2].mxu1  ;;  %v461_v11 = vpop.f32.mrb[3].mxu0 }
 0x123   :  { %v462_v12 = vadd.f32 %v461_v11, %v460_v8  ;;  %v517_v13 = vpop.f32.mrb[3].mxu1 }
 0x124   :  { %v367_v14 = vadd.f32 %v329_v9, %v53_v7  ;;  %v518_v15 = vadd.f32 %v517_v13, %v516_v10 }
 0x125   :  { %v463_v17 = vpop.f32.mrb[4].mxu0 }
 0x126   :  { %376 = vst.msk [vmem:[#allocation2] sm:$0xff] %vm44_vm0, %v367_v14  ;;  %v334_v18 = vadd.f32 %v518_v15, %v462_v12  ;;  %v519_v19 = vpop.f32.mrb[4].mxu1  ;;  %v464_v20 = vpop.f32.mrb[5].mxu0 }
 0x127   :  { %v465_v21 = vadd.f32 %v464_v20, %v463_v17  ;;  %v520_v22 = vpop.f32.mrb[5].mxu1 }
 0x128   :  { %v368_v23 = vadd.f32 %v334_v18, %v54_v16  ;;  %v521_v24 = vadd.f32 %v520_v22, %v519_v19  ;;  %v60_v16 = vld [vmem:[#allocation2 + $0x38] sm:$0xff] }
 0x129   :  { %v466_v26 = vpop.f32.mrb[6].mxu0 }
 0x12a   :  { %377 = vst.msk [vmem:[#allocation2 + $0x8] sm:$0xff] %vm44_vm0, %v368_v23  ;;  %v339_v27 = vadd.f32 %v521_v24, %v465_v21  ;;  %v522_v28 = vpop.f32.mrb[6].mxu1  ;;  %v467_v29 = vpop.f32.mrb[7].mxu0 }
 0x12b   :  { %v468_v31 = vadd.f32 %v467_v29, %v466_v26  ;;  %v523_v32 = vpop.f32.mrb[7].mxu1 }
 0x12c   :  { %v369_v33 = vadd.f32 %v339_v27, %v55_v25  ;;  %v524_v34 = vadd.f32 %v523_v32, %v522_v28 }
 0x12d   :  { %v387_v35 = vld [vmem:[#allocation2] sm:$0xff]  ;;  %v469_v37 = vpop.f32.mrb[8].mxu0 }
 0x12e   :  { %v402_v38 = vadd.f32 %v905_v30, %v387_v35  ;;  %378 = vst.msk [vmem:[#allocation2 + $0x10] sm:$0xff] %vm44_vm0, %v369_v33  ;;  %v344_v39 = vadd.f32 %v524_v34, %v468_v31  ;;  %v525_v40 = vpop.f32.mrb[8].mxu1  ;;  %v470_v41 = vpop.f32.mrb[9].mxu0 }
 0x12f   :  { %v471_v42 = vadd.f32 %v470_v41, %v469_v37  ;;  %v526_v43 = vpop.f32.mrb[9].mxu1 }
 0x130   :  { %410 = vst.msk [vmem:[%s956_s3] sm:$0xff] %vm44_vm0, %v402_v38  ;;  %v370_v44 = vadd.f32 %v344_v39, %v56_v36  ;;  %v527_v45 = vadd.f32 %v526_v43, %v525_v40 }
 0x131   :  { %v388_v46 = vld [vmem:[#allocation2 + $0x8] sm:$0xff]  ;;  %v472_v48 = vpop.f32.mrb[10].mxu0 }
 0x132   :  { %v403_v49 = vadd.f32 %v905_v30, %v388_v46  ;;  %379 = vst.msk [vmem:[#allocation2 + $0x18] sm:$0xff] %vm44_vm0, %v370_v44  ;;  %v349_v50 = vadd.f32 %v527_v45, %v471_v42  ;;  %v528_v51 = vpop.f32.mrb[10].mxu1  ;;  %v473_v52 = vpop.f32.mrb[11].mxu0 }
 0x133   :  { %v474_v53 = vadd.f32 %v473_v52, %v472_v48  ;;  %v529_v54 = vpop.f32.mrb[11].mxu1 }
 0x134   :  { %411 = vst.msk [vmem:[%s956_s3 + $0x8] sm:$0xff] %vm44_vm0, %v403_v49  ;;  %v371_v55 = vadd.f32 %v349_v50, %v57_v47  ;;  %v530_v56 = vadd.f32 %v529_v54, %v528_v51 }
 0x135   :  { %v389_v57 = vld [vmem:[#allocation2 + $0x10] sm:$0xff]  ;;  %v475_v59 = vpop.f32.mrb[12].mxu0 }
 0x136   :  { %v404_v60 = vadd.f32 %v905_v30, %v389_v57  ;;  %380 = vst.msk [vmem:[#allocation2 + $0x20] sm:$0xff] %vm44_vm0, %v371_v55  ;;  %v354_v61 = vadd.f32 %v530_v56, %v474_v53  ;;  %v531_v62 = vpop.f32.mrb[12].mxu1  ;;  %v476_v63 = vpop.f32.mrb[13].mxu0 }
 0x137   :  { %v477_v0 = vadd.f32 %v476_v63, %v475_v59  ;;  %v532_v1 = vpop.f32.mrb[13].mxu1 }
 0x138   :  { %412 = vst.msk [vmem:[%s956_s3 + $0x10] sm:$0xff] %vm44_vm0, %v404_v60  ;;  %v372_v2 = vadd.f32 %v354_v61, %v58_v58  ;;  %v533_v3 = vadd.f32 %v532_v1, %v531_v62 }
 0x139   :  { %v390_v4 = vld [vmem:[#allocation2 + $0x18] sm:$0xff]  ;;  %v478_v6 = vpop.f32.mrb[14].mxu0 }
 0x13a   :  { %v405_v7 = vadd.f32 %v905_v30, %v390_v4  ;;  %381 = vst.msk [vmem:[#allocation2 + $0x28] sm:$0xff] %vm44_vm0, %v372_v2  ;;  %v359_v8 = vadd.f32 %v533_v3, %v477_v0  ;;  %v534_v9 = vpop.f32.mrb[14].mxu1  ;;  %v479_v10 = vpop.f32.mrb[15].mxu0 }
 0x13b   :  { %v480_v11 = vadd.f32 %v479_v10, %v478_v6  ;;  %v535_v12 = vpop.f32.mrb[15].mxu1 }
 0x13c   :  { %413 = vst.msk [vmem:[%s956_s3 + $0x18] sm:$0xff] %vm44_vm0, %v405_v7  ;;  %v373_v13 = vadd.f32 %v359_v8, %v59_v5  ;;  %v536_v14 = vadd.f32 %v535_v12, %v534_v9 }
 0x13d   :  { %v391_v15 = vld [vmem:[#allocation2 + $0x20] sm:$0xff] }
 0x13e   :  { %v406_v17 = vadd.f32 %v905_v30, %v391_v15  ;;  %382 = vst.msk [vmem:[#allocation2 + $0x30] sm:$0xff] %vm44_vm0, %v373_v13  ;;  %v364_v18 = vadd.f32 %v536_v14, %v480_v11 }
 0x140   :  { %414 = vst.msk [vmem:[%s956_s3 + $0x20] sm:$0xff] %vm44_vm0, %v406_v17  ;;  %v374_v19 = vadd.f32 %v364_v18, %v60_v16 }
 0x141   :  { %v392_v20 = vld [vmem:[#allocation2 + $0x28] sm:$0xff] }
 0x142   :  { %v407_v21 = vadd.f32 %v905_v30, %v392_v20  ;;  %383 = vst.msk [vmem:[#allocation2 + $0x38] sm:$0xff] %vm44_vm0, %v374_v19 }
 0x144   :  { %415 = vst.msk [vmem:[%s956_s3 + $0x28] sm:$0xff] %vm44_vm0, %v407_v21 }
 0x145   :  { %v393_v22 = vld [vmem:[#allocation2 + $0x30] sm:$0xff] }
 0x146   :  { %v408_v23 = vadd.f32 %v905_v30, %v393_v22 }
 0x148   :  { %416 = vst.msk [vmem:[%s956_s3 + $0x30] sm:$0xff] %vm44_vm0, %v408_v23 }
 0x149   :  { %v394_v24 = vld [vmem:[#allocation2 + $0x38] sm:$0xff] }
 0x14a   :  { %v409_v25 = vadd.f32 %v905_v30, %v394_v24 }
 0x14c   :  { %417 = vst.msk [vmem:[%s956_s3 + $0x38] sm:$0xff] %vm44_vm0, %v409_v25 }
 0x14d   :  { %422 = vsyncpa [#allocation4], 1 }
 0x14e   :  { %423 = vsyncpa [#allocation6], 1 }

// kernel: _lambda_.24
= control target key start
LH: loop header
LB: loop body
LE: loop exit
PB: predicated region body
PF: predicated region fallthrough
CT: control target
= control target key end

     0   :  { %s818_s18 = smov 0   ;;  %s820_s19 = smov 0   ;;  %s956_s0 = inlined_call_operand.vmem [shape: f32[112,32], index: 0, kind: input, shape index: {}]   ;;  %s957_s1 = inlined_call_operand.vmem [shape: f32[1,32], index: 1, kind: input, shape index: {}]   ;;  %s958_s2 = inlined_call_operand.vmem [shape: f32[1,32], index: 2, kind: input, shape index: {}]   ;;  %s959_s3 = inlined_call_operand.vmem [shape: f32[32,96], index: 3, kind: input, shape index: {}]   ;;  %s960_s4 = inlined_call_operand.vmem [shape: f32[1,96], index: 4, kind: input, shape index: {}]   ;;  %s961_s5 = inlined_call_operand.vmem [shape: f32[112,96], index: 5, kind: output, shape index: {}]  }
   0x1   :  { %s822_s20 = smov 0  }
   0x2 LB: > { %s27_s21 = sadd.s32 1, %s779_s19  ;;  %p655_p0 = scmp.ge.s32.totalorder %s783_s20, 1  ;;  %s783_s20 = sphi %s822_s20, %s15_s20   ;;  %s779_s19 = sphi %s820_s19, %s963_s19   ;;  %s775_s18 = sphi %s818_s18, %s962_s18  }
   0x3   : > { %p29_p1 = scmp.ge.s32.totalorder %s27_s21, 2  ;;  %p219_p2 = scmp.lt.s32.totalorder %s783_s20, 3 }
   0x5   : > { %s965_s21 = smov (%p29_p1, %s27_s21), 0  ;;  %p220_p3 = pnand %p655_p0, %p219_p2 }
   0x6   : > { %s257_s22 = smul.u32 (!%p220_p3), 7, %s775_s18  ;;  %vm286_vm0 = vcmask (!%p220_p3), 261120   ;;  %v407_v49 = vld [vmem:[%s959_s3] sm:$0xff] (!%p220_p3)  ;;  %v408_v50 = vld [vmem:[%s959_s3 + $0x8] sm:$0xff] (!%p220_p3)  ;;  %v785_v52 = vmov (!%p220_p3), 0.0|0.0   ;;  %v409_v53 = vld [vmem:[%s959_s3 + $0x10] sm:$0xff] (!%p220_p3) }
   0x7   : > { %223 = sbr.rel (%p220_p3) target bundleno = 559 (0x22f), region = 40  ;;  %v711_v51 = vpack.c.bf16 (!%p220_p3), %v408_v50, %v407_v49  ;;  %710 = vmatprep.subr.bf16.mxu0 (!%p220_p3), %v785_v52  ;;  %716 = vmatprep.subr.bf16.mxu1 (!%p220_p3), %v785_v52  ;;  %v410_v54 = vld [vmem:[%s959_s3 + $0x18] sm:$0xff] (!%p220_p3)  ;;  %vm786_vm1 = vmmov (!%p220_p3), 0   ;;  %v787_v56 = vmov (!%p220_p3), 0.0   ;;  %vm539_vm2 = vcmask (!%p220_p3), 785408  }
   0x8   : > { %p258_p4 = scmp.lt.s32.totalorder (!%p220_p3), %s257_s22, 13  ;;  %v714_v55 = vpack.c.bf16 (!%p220_p3), %v410_v54, %v409_v53  ;;  %689 = vmatprep.mubr.msk.f32.mxu0 (!%p220_p3), %vm786_vm1, %v787_v56  ;;  %701 = vmatprep.mubr.msk.f32.mxu1 (!%p220_p3), %vm786_vm1, %v787_v56 }
   0x9   : > { %712 = vmatpush3.bf16.msra.mxu0 (!%p220_p3), %v711_v51  ;;  %718 = vmatpush3.bf16.msra.mxu1 (!%p220_p3), %v711_v51 }
   0xa   : > { %713 = vmatprep.subr.bf16.mxu0 (!%p220_p3), %v785_v52  ;;  %717 = vmatprep.subr.bf16.mxu1 (!%p220_p3), %v785_v52 }
   0xd   : > { %715 = vmatpush3.bf16.msra.mxu0 (!%p220_p3), %v714_v55  ;;  %719 = vmatpush3.bf16.msra.mxu1 (!%p220_p3), %v714_v55 }
   0xe   : > { %s967_s22 = smov (!%p258_p4, %s257_s22), 13 }
   0xf   : > { %s656_s23 = sshll.u32 %s967_s22, 3 }
  0x10   : > { %s261_s26 = scalar_lea.vmem %s956_s0, %s656_s23  ;;  %s277_s18 = scalar_lea.vmem %s961_s5, %s656_s23 }
  0x11   : > { %v279_v0 = vld [vmem:[%s261_s26] sm:$0xff]  ;;  %v280_v2 = vld [vmem:[%s261_s26 + $0x8] sm:$0xff]  ;;  %v281_v5 = vld [vmem:[%s261_s26 + $0x10] sm:$0xff] }
  0x12   : > { %v283_v1 = vld [vmem:[%s261_s26 + $0x20] sm:$0xff]  ;;  %v287_v3 = vsel %vm286_vm0, %v279_v0, 0.0  ;;  %v290_v6 = vsel %vm286_vm0, %v280_v2, 0.0  ;;  %v293_v7 = vsel %vm286_vm0, %v281_v5, 0.0  ;;  %v284_v8 = vld [vmem:[%s261_s26 + $0x28] sm:$0xff]  ;;  %v282_v9 = vld [vmem:[%s261_s26 + $0x18] sm:$0xff] }
  0x13   : > { %v299_v4 = vsel %vm286_vm0, %v283_v1, 0.0  ;;  %288 = vadd.xlane.f32.xlu0 %v287_v3  ;;  %v302_v10 = vsel %vm286_vm0, %v284_v8, 0.0  ;;  %v296_v11 = vsel %vm286_vm0, %v282_v9, 0.0  ;;  %v285_v12 = vld [vmem:[%s261_s26 + $0x30] sm:$0xff] }
  0x14   : > { %300 = vadd.xlane.f32.xlu1 %v299_v4  ;;  %v305_v13 = vsel %vm286_vm0, %v285_v12, 0.0 }
  0x17   : > { %291 = vadd.xlane.f32.xlu0 %v290_v6 }
  0x18   : > { %294 = vadd.xlane.f32.xlu1 %v293_v7 }
  0x1b   : > { %303 = vadd.xlane.f32.xlu0 %v302_v10 }
  0x1c   : > { %297 = vadd.xlane.f32.xlu1 %v296_v11 }
  0x1f   : > { %306 = vadd.xlane.f32.xlu0 %v305_v13 }
  0xa0   : > { %v289_v14 = vpop.xlane.xlu0 %288 }
  0xa1   : > { %v301_v15 = vpop.xlane.xlu1 %300  ;;  %v309_v16 = vmul.f32 0.03125, %v289_v14 }
  0xa2   : > { %v313_v17 = vmul.f32 0.03125, %v301_v15  ;;  %v658_v15 = vld [vmem:[%s957_s1] ss:$0 sm:$0xff] }
  0xa3   : > { %v851_v18 = vsub.f32 %v279_v0, %v309_v16 }
  0xa4   : > { %v853_v19 = vsub.f32 %v283_v1, %v313_v17  ;;  %v292_v20 = vpop.xlane.xlu0 %291  ;;  %v659_v17 = vld [vmem:[%s958_s2] ss:$0 sm:$0xff] }
  0xa5   : > { %v295_v21 = vpop.xlane.xlu1 %294  ;;  %v310_v22 = vmul.f32 0.03125, %v292_v20  ;;  %v323_v24 = vmul.f32 %v851_v18, %v851_v18 }
  0xa6   : > { %v311_v23 = vmul.f32 0.03125, %v295_v21  ;;  %v327_v25 = vmul.f32 %v853_v19, %v853_v19 }
  0xa7   : > { %v859_v26 = vsub.f32 %v280_v2, %v310_v22  ;;  %v330_v28 = vsel %vm286_vm0, %v323_v24, 0.0 }
  0xa8   : > { %v861_v27 = vsub.f32 %v281_v5, %v311_v23  ;;  %331 = vadd.xlane.f32.xlu1 %v330_v28  ;;  %v304_v29 = vpop.xlane.xlu0 %303  ;;  %v342_v31 = vsel %vm286_vm0, %v327_v25, 0.0 }
  0xa9   : > { %v298_v30 = vpop.xlane.xlu1 %297  ;;  %v314_v32 = vmul.f32 0.03125, %v304_v29  ;;  %v324_v34 = vmul.f32 %v859_v26, %v859_v26 }
  0xaa   : > { %v312_v33 = vmul.f32 0.03125, %v298_v30  ;;  %v325_v35 = vmul.f32 %v861_v27, %v861_v27 }
  0xab   : > { %v869_v36 = vsub.f32 %v284_v8, %v314_v32  ;;  %v333_v38 = vsel %vm286_vm0, %v324_v34, 0.0 }
  0xac   : > { %v871_v37 = vsub.f32 %v282_v9, %v312_v33  ;;  %343 = vadd.xlane.f32.xlu1 %v342_v31  ;;  %334 = vadd.xlane.f32.xlu0 %v333_v38  ;;  %v307_v39 = vpop.xlane.xlu0 %306  ;;  %v336_v41 = vsel %vm286_vm0, %v325_v35, 0.0 }
  0xad   : > { %v315_v40 = vmul.f32 0.03125, %v307_v39  ;;  %v328_v42 = vmul.f32 %v869_v36, %v869_v36 }
  0xae   : > { %v326_v43 = vmul.f32 %v871_v37, %v871_v37 }
  0xaf   : > { %v879_v44 = vsub.f32 %v285_v12, %v315_v40  ;;  %v345_v45 = vsel %vm286_vm0, %v328_v42, 0.0 }
  0xb0   : > { %337 = vadd.xlane.f32.xlu0 %v336_v41  ;;  %346 = vadd.xlane.f32.xlu1 %v345_v45  ;;  %v339_v46 = vsel %vm286_vm0, %v326_v43, 0.0 }
  0xb1   : > { %v329_v47 = vmul.f32 %v879_v44, %v879_v44 }
  0xb3   : > { %v348_v48 = vsel %vm286_vm0, %v329_v47, 0.0 }
  0xb4   : > { %340 = vadd.xlane.f32.xlu0 %v339_v46  ;;  %349 = vadd.xlane.f32.xlu1 %v348_v48 }
 0x135   : > { %v332_v57 = vpop.xlane.xlu1 %331 }
 0x136   : > { %v351_v58 = vmul.f32 0.03125, %v332_v57 }
 0x138   : > { %v358_v59 = vadd.f32 1e-06, %v351_v58 }
 0x139   : > { %v344_v60 = vpop.xlane.xlu1 %343  ;;  %v335_v61 = vpop.xlane.xlu0 %334 }
 0x13a   : > { %747 = vrsqrt.f32 %v358_v59  ;;  %v355_v62 = vmul.f32 0.03125, %v344_v60  ;;  %v352_v63 = vmul.f32 0.03125, %v335_v61 }
 0x13c   : > { %v362_v0 = vadd.f32 1e-06, %v355_v62  ;;  %v359_v1 = vadd.f32 1e-06, %v352_v63 }
 0x13d   : > { %v347_v2 = vpop.xlane.xlu1 %346  ;;  %v338_v3 = vpop.xlane.xlu0 %337 }
 0x13e   : > { %749 = vrsqrt.f32 %v362_v0  ;;  %v356_v4 = vmul.f32 0.03125, %v347_v2  ;;  %v353_v5 = vmul.f32 0.03125, %v338_v3 }
 0x13f   : > { %751 = vrsqrt.f32 %v359_v1 }
 0x140   : > { %v363_v6 = vadd.f32 1e-06, %v356_v4  ;;  %v360_v7 = vadd.f32 1e-06, %v353_v5 }
 0x141   : > { %v350_v8 = vpop.xlane.xlu1 %349  ;;  %v341_v9 = vpop.xlane.xlu0 %340 }
 0x142   : > { %753 = vrsqrt.f32 %v363_v6  ;;  %v357_v10 = vmul.f32 0.03125, %v350_v8  ;;  %v354_v11 = vmul.f32 0.03125, %v341_v9 }
 0x143   : > { %755 = vrsqrt.f32 %v360_v7 }
 0x144   : > { %v748_v12 = vpop.eup %747  ;;  %v364_v13 = vadd.f32 1e-06, %v357_v10  ;;  %v361_v14 = vadd.f32 1e-06, %v354_v11 }
 0x145   : > { %v372_v16 = vmul.f32 %v748_v12, %v851_v18 }
 0x146   : > { %757 = vrsqrt.f32 %v364_v13 }
 0x147   : > { %759 = vrsqrt.f32 %v361_v14  ;;  %v386_v20 = vmul.f32 %v658_v15, %v372_v16 }
 0x148   : > { %v750_v21 = vpop.eup %749 }
 0x149   : > { %v752_v22 = vpop.eup %751  ;;  %v400_v23 = vadd.f32 %v659_v17, %v386_v20  ;;  %v376_v24 = vmul.f32 %v750_v21, %v853_v19 }
 0x14a   : > { %v373_v25 = vmul.f32 %v752_v22, %v859_v26 }
 0x14b   : > { %690 = vmatmul.mubr.msk.f32.vlgmr.msra.gmra.mrb[0].mxu0 %vm286_vm0, %v400_v23  ;;  %v390_v28 = vmul.f32 %v658_v15, %v376_v24 }
 0x14c   : > { %v754_v29 = vpop.eup %753  ;;  %692 = vmatprep.mubr.msk.f32.mxu0 %vm786_vm1, %v787_v56  ;;  %v387_v18 = vmul.f32 %v658_v15, %v373_v25 }
 0x14d   : > { %v756_v30 = vpop.eup %755  ;;  %v404_v31 = vadd.f32 %v659_v17, %v390_v28  ;;  %v377_v32 = vmul.f32 %v754_v29, %v869_v36 }
 0x14e   : > { %v401_v33 = vadd.f32 %v659_v17, %v387_v18  ;;  %v374_v34 = vmul.f32 %v756_v30, %v861_v27 }
 0x14f   : > { %702 = vmatmul.mubr.msk.f32.vlgmr.msra.gmra.mrb[0].mxu1 %vm286_vm0, %v404_v31  ;;  %v391_v19 = vmul.f32 %v658_v15, %v377_v32 }
 0x150   : > { %v758_v35 = vpop.eup %757  ;;  %693 = vmatmul.mubr.msk.f32.gmra.mrb[2].mxu0 %vm286_vm0, %v401_v33  ;;  %704 = vmatprep.mubr.msk.f32.mxu1 %vm786_vm1, %v787_v56  ;;  %v388_v26 = vmul.f32 %v658_v15, %v374_v34 }
 0x151   : > { %v760_v38 = vpop.eup %759  ;;  %695 = vmatprep.mubr.msk.f32.mxu0 %vm786_vm1, %v787_v56  ;;  %v405_v39 = vadd.f32 %v659_v17, %v391_v19  ;;  %v378_v36 = vmul.f32 %v758_v35, %v879_v44 }
 0x152   : > { %v402_v40 = vadd.f32 %v659_v17, %v388_v26  ;;  %v375_v27 = vmul.f32 %v760_v38, %v871_v37  ;;  %v660_v37 = vld [vmem:[%s960_s4] ss:$0 sm:$0xff] }
 0x153   : > { %705 = vmatmul.mubr.msk.f32.gmra.mrb[2].mxu1 %vm286_vm0, %v405_v39  ;;  %v392_v41 = vmul.f32 %v658_v15, %v378_v36 }
 0x154   : > { %696 = vmatmul.mubr.msk.f32.gmra.mrb[4].mxu0 %vm286_vm0, %v402_v40  ;;  %707 = vmatprep.mubr.msk.f32.mxu1 %vm786_vm1, %v787_v56  ;;  %v389_v42 = vmul.f32 %v658_v15, %v375_v27 }
 0x155   : > { %698 = vmatprep.mubr.msk.f32.mxu0 %vm786_vm1, %v787_v56  ;;  %v406_v43 = vadd.f32 %v659_v17, %v392_v41 }
 0x156   : > { %v403_v45 = vadd.f32 %v659_v17, %v389_v42 }
 0x157   : > { %708 = vmatmul.mubr.msk.f32.gmra.mrb[4].mxu1 %vm286_vm0, %v406_v43 }
 0x158   : > { %699 = vmatmul.mubr.msk.f32.gmra.mrb[6].mxu0 %vm286_vm0, %v403_v45 }
 0x21e   : > { %v505_v44 = vpop.f32.mrb[0].mxu0 }
 0x21f   : > { %v506_v46 = vadd.f32 %v660_v37, %v505_v44  ;;  %v691_v47 = vpop.f32.mrb[1].mxu0 }
 0x221   : > { %540 = vst.msk [vmem:[%s277_s18] sm:$0xff] %vm539_vm2, %v506_v46 }
 0x222   : > { %v525_v48 = vpop.f32.mrb[0].mxu1 }
 0x223   : > { %v510_v49 = vpop.f32.mrb[2].mxu0  ;;  %v526_v50 = vadd.f32 %v660_v37, %v525_v48  ;;  %v703_v51 = vpop.f32.mrb[1].mxu1 }
 0x224   : > { %v511_v52 = vadd.f32 %v660_v37, %v510_v49  ;;  %v694_v53 = vpop.f32.mrb[3].mxu0 }
 0x225   : > { %544 = vst.msk [vmem:[%s277_s18 + $0x20] sm:$0xff] %vm539_vm2, %v526_v50 }
 0x226   : > { %541 = vst.msk [vmem:[%s277_s18 + $0x8] sm:$0xff] %vm539_vm2, %v511_v52  ;;  %v530_v54 = vpop.f32.mrb[2].mxu1 }
 0x227   : > { %v515_v55 = vpop.f32.mrb[4].mxu0  ;;  %v531_v56 = vadd.f32 %v660_v37, %v530_v54  ;;  %v706_v57 = vpop.f32.mrb[3].mxu1 }
 0x228   : > { %v516_v58 = vadd.f32 %v660_v37, %v515_v55  ;;  %v697_v59 = vpop.f32.mrb[5].mxu0 }
 0x229   : > { %545 = vst.msk [vmem:[%s277_s18 + $0x28] sm:$0xff] %vm539_vm2, %v531_v56 }
 0x22a   : > { %542 = vst.msk [vmem:[%s277_s18 + $0x10] sm:$0xff] %vm539_vm2, %v516_v58  ;;  %v535_v60 = vpop.f32.mrb[4].mxu1 }
 0x22b   : > { %v520_v61 = vpop.f32.mrb[6].mxu0  ;;  %v536_v62 = vadd.f32 %v660_v37, %v535_v60  ;;  %v709_v63 = vpop.f32.mrb[5].mxu1 }
 0x22c   : > { %v521_v0 = vadd.f32 %v660_v37, %v520_v61  ;;  %v700_v1 = vpop.f32.mrb[7].mxu0 }
 0x22d   : > { %546 = vst.msk [vmem:[%s277_s18 + $0x30] sm:$0xff] %vm539_vm2, %v536_v62 }
 0x22e   : > { %543 = vst.msk [vmem:[%s277_s18 + $0x18] sm:$0xff] %vm539_vm2, %v521_v0 }
 0x22f PF: > { %s15_s20 = sadd.s32 1, %s783_s20   ;;  %s962_s18 = smov %s779_s19 }
 0x230   : > { %p12_p5 = scmp.ge.s32.totalorder %s15_s20, 4   ;;  %s963_s19 = smov %s965_s21 }
 0x232   :  { %14 = sbr.rel (!%p12_p5) target bundleno = 2 (0x2), region = 76 }

// kernel: _lambda_.25
= control target key start
LH: loop header
LB: loop body
LE: loop exit
PB: predicated region body
PF: predicated region fallthrough
CT: control target
= control target key end

     0   :  { %s3005_s15 = smov 0   ;;  %s3763_s0 = inlined_call_operand.vmem [shape: f32[2,56,32], index: 0, kind: input, shape index: {}]   ;;  %s3764_s1 = inlined_call_operand.vmem [shape: f32[2,56,96], index: 1, kind: input, shape index: {}]   ;;  %s3765_s2 = inlined_call_operand.vmem [shape: f32[32,32], index: 2, kind: input, shape index: {}]   ;;  %s3766_s3 = inlined_call_operand.vmem [shape: f32[1,32], index: 3, kind: input, shape index: {}]   ;;  %s3767_s4 = inlined_call_operand.vmem [shape: f32[2,56,32], index: 4, kind: output, shape index: {}]  }
   0x1 LB: > { %s2062_s16 = sadd.s32 4294967295, %s2961_s15   ;;  %p2066_p0 = scmp.ge.s32.totalorder %s2961_s15, 1  ;;  %s2961_s15 = sphi %s3005_s15, %s14_s15  }
   0x2   : > { %p172_p1 = scmp.lt.s32.totalorder %s2961_s15, 3 }
   0x4   : > { %p173_p2 = pnand %p2066_p0, %p172_p1 }
   0x5   : > { %p203_p3 = scmp.lt.s32.totalorder (!%p173_p2), %s2062_s16, 1  ;;  %v2963_v0 = vmov (!%p173_p2), 0.0|0.0   ;;  %s2964_s21 = smov (!%p173_p2), 96   ;;  %vm2965_vm0 = vmmov (!%p173_p2), 0   ;;  %v2966_v11 = vmov (!%p173_p2), 0.0   ;;  %vm253_vm1 = vcmask (!%p173_p2), 64512  }
   0x6   : > { %176 = sbr.rel (%p173_p2) target bundleno = 1973 (0x7b5), region = 36  ;;  %2596 = vmatprep.subr.bf16.mxu0 (!%p173_p2), %v2963_v0  ;;  %2608 = vmatprep.subr.bf16.mxu1 (!%p173_p2), %v2963_v0  ;;  %s2967_s22 = smov (!%p173_p2), 64   ;;  %vm3054_vm2 = vmpackc.low (!%p173_p2), %vm253_vm1, %vm253_vm1  ;;  %vm389_vm3 = vcmask (!%p173_p2), 457728   ;;  %vm1825_vm4 = vcmask (!%p173_p2), 130048   ;;  %vm1833_vm5 = vcmask (!%p173_p2), 195584   ;;  %vm1852_vm6 = vcmask (!%p173_p2), 261120  }
   0x7   : > { %2301 = vmatprep.mubr.msk.f32.mxu0 (!%p173_p2), %vm2965_vm0, %v2966_v11  ;;  %2336 = vmatprep.mubr.msk.f32.mxu1 (!%p173_p2), %vm2965_vm0, %v2966_v11  ;;  %s2968_s23 = smov (!%p173_p2), 88   ;;  %s2969_s24 = smov (!%p173_p2), 80  }
   0x8   : > { %s2970_s25 = smov (!%p173_p2), 120   ;;  %s2971_s26 = smov (!%p173_p2), 72  }
   0x9   : > { %s2972_s27 = smov (!%p173_p2), 112   ;;  %s2973_s28 = smov (!%p173_p2), 104  }
   0xa   : > { %s2974_s29 = smov (!%p173_p2), 56   ;;  %s2975_s30 = smov (!%p173_p2), 48  }
   0xb   : > { %s2976_s5 = smov (!%p173_p2), 40   ;;  %s2977_s6 = smov (!%p173_p2), 8  }
   0xc   : > { %s2978_s7 = smov (!%p173_p2), 16   ;;  %s2979_s18 = smov (!%p173_p2), 24  }
   0xd   : > { %s3771_s16 = smov (!%p203_p3, %s2062_s16), 1 }
   0xe   : > { %s3015_s17 = smul.u32 56, %s3771_s16 }
  0x10   : > { %s3021_s20 = scalar_lea.vmem %s3764_s1, %s3015_s17 }
  0x11   : > { %v218_v1 = vld [vmem:[%s3021_s20] sm:$0xff]  ;;  %v219_v2 = vld [vmem:[%s3021_s20 + $0x8] sm:$0xff]  ;;  %v220_v3 = vld [vmem:[%s3021_s20 + $0x10] sm:$0xff] }
  0x12   : > { %v3026_v4 = vpack.i.bf16 %v219_v2, %v218_v1  ;;  %v221_v5 = vld [vmem:[%s3021_s20 + $0x18] sm:$0xff]  ;;  %v222_v6 = vld [vmem:[%s3021_s20 + $0x20] sm:$0xff]  ;;  %v223_v7 = vld [vmem:[%s3021_s20 + $0x28] sm:$0xff]  ;;  %v3067_v26 = vmul.f32 0.35355338, %v218_v1 }
  0x13   : > { %v3031_v8 = vpack.i.bf16 %v223_v7, %v222_v6  ;;  %v3034_v9 = vpack.i.bf16 %v221_v5, %v220_v3  ;;  %v3038_v10 = vld [vmem:[%s3021_s20 + $0x30] sm:$0xff]  ;;  %v3073_v27 = vmul.f32 0.35355338, %v219_v2  ;;  %v3079_v28 = vmul.f32 0.35355338, %v220_v3 }
  0x14   : > { %2717 = vrot.lane.b32.xlu0 %v3026_v4, %s2964_s21  ;;  %v3085_v29 = vmul.f32 0.35355338, %v221_v5  ;;  %v3091_v30 = vmul.f32 0.35355338, %v222_v6  ;;  %v3097_v31 = vmul.f32 0.35355338, %v223_v7 }
  0x15   : > { %2727 = vrot.lane.b32.xlu1 %v3031_v8, %s2964_s21  ;;  %v3104_v32 = vmul.f32 0.35355338, %v3038_v10 }
  0x18   : > { %2722 = vrot.lane.b32.xlu0 %v3034_v9, %s2964_s21 }
  0x19   : > { %251 = vrot.lane.b32.xlu1 %v3038_v10, %s2964_s21  ;;  %s3728_s21 = scalar_lea.vmem %s3763_s0, %s3015_s17 }
  0x1c   : > { %2732 = vrot.lane.b32.xlu0 %v3026_v4, %s2967_s22 }
  0x1d   : > { %2737 = vrot.lane.b32.xlu1 %v3034_v9, %s2967_s22 }
  0x21   : > { %2742 = vrot.lane.b32.xlu1 %v3031_v8, %s2967_s22 }
  0x86   : > { %v2718_v12 = vpop.permute.xlu0 %2717 }
  0x87   : > { %v2720_v13 = vunpack.i.h.bf16 %v2718_v12  ;;  %v2719_v14 = vunpack.i.l.bf16 %v2718_v12  ;;  %v2728_v21 = vpop.permute.xlu1 %2727 }
  0x88   : > { %v2730_v22 = vunpack.i.h.bf16 %v2728_v21  ;;  %v2729_v23 = vunpack.i.l.bf16 %v2728_v21 }
  0x89   : > { %v2597_v16 = vpack.c.bf16 %v2720_v13, %v2719_v14 }
  0x8a   : > { %v2723_v17 = vpop.permute.xlu0 %2722  ;;  %v2605_v24 = vpack.c.bf16 %v2730_v22, %v2729_v23 }
  0x8b   : > { %2599 = vmatpush3.bf16.xpose.msk.msra.mxu0 %vm3054_vm2, %v2597_v16  ;;  %v2725_v18 = vunpack.i.h.bf16 %v2723_v17  ;;  %v2724_v19 = vunpack.i.l.bf16 %v2723_v17  ;;  %v252_v25 = vpop.permute.xlu1 %251 }
  0x8c   : > { %2600 = vmatprep.subr.bf16.mxu0 %v2963_v0 }
  0x8d   : > { %v2601_v20 = vpack.c.bf16 %v2725_v18, %v2724_v19 }
  0x8e   : > { %v2733_v33 = vpop.permute.xlu0 %2732 }
  0x8f   : > { %v2738_v34 = vpop.permute.xlu1 %2737  ;;  %v2735_v37 = vunpack.i.h.bf16 %v2733_v33  ;;  %v2734_v38 = vunpack.i.l.bf16 %v2733_v33 }
  0x90   : > { %v2740_v35 = vunpack.i.h.bf16 %v2738_v34  ;;  %v2739_v36 = vunpack.i.l.bf16 %v2738_v34 }
  0x91   : > { %v2609_v39 = vpack.c.bf16 %v2735_v37, %v2734_v38 }
  0x92   : > { %v2612_v43 = vpack.c.bf16 %v2740_v35, %v2739_v36 }
  0x93   : > { %2603 = vmatpush3.bf16.xpose.msk.msra.mxu0 %vm3054_vm2, %v2601_v20  ;;  %v2743_v40 = vpop.permute.xlu1 %2742  ;;  %2610 = vmatpush3.bf16.msra.mxu1 %v2609_v39 }
  0x94   : > { %2604 = vmatprep.subr.bf16.mxu0 %v2963_v0  ;;  %v2745_v41 = vunpack.i.h.bf16 %v2743_v40  ;;  %v2744_v42 = vunpack.i.l.bf16 %v2743_v40  ;;  %2611 = vmatprep.subr.bf16.mxu1 %v2963_v0 }
  0x96   : > { %v2615_v44 = vpack.c.bf16 %v2745_v41, %v2744_v42 }
  0x97   : > { %2613 = vmatpush3.bf16.msra.mxu1 %v2612_v43 }
  0x98   : > { %2614 = vmatprep.subr.bf16.mxu1 %v2963_v0 }
  0x9b   : > { %2607 = vmatpush3.bf16.xpose.msk.msra.mxu0 %vm3054_vm2, %v2605_v24  ;;  %2616 = vmatpush3.bf16.msra.mxu1 %v2615_v44 }
  0x9c   : > { %2299 = vmatprep.subr.mxu0 %v2966_v11  ;;  %2334 = vmatprep.subr.mxu1 %v2966_v11 }
  0xa3   : > { %2300 = vmatpush3.xpose.msk.msra.mxu0 %vm253_vm1, %v252_v25 }
  0xa4   : > { %2629 = vmatprep.subr.bf16.mxu0 %v2963_v0 }
  0xa6   : > { %2302 = vmatmul.mubr.msk.f32.vlgmr.msra.gmra.mrb[0].mxu0 %vm253_vm1, %v3067_v26 }
  0xa7   : > { %2304 = vmatprep.mubr.msk.f32.mxu0 %vm2965_vm0, %v2966_v11 }
  0xaa   : > { %2305 = vmatmul.mubr.msk.f32.gmra.mrb[2].mxu0 %vm253_vm1, %v3073_v27 }
  0xab   : > { %2307 = vmatprep.mubr.msk.f32.mxu0 %vm2965_vm0, %v2966_v11 }
  0xae   : > { %2308 = vmatmul.mubr.msk.f32.gmra.mrb[4].mxu0 %vm253_vm1, %v3079_v28 }
  0xaf   : > { %2310 = vmatprep.mubr.msk.f32.mxu0 %vm2965_vm0, %v2966_v11 }
  0xb2   : > { %2311 = vmatmul.mubr.msk.f32.gmra.mrb[6].mxu0 %vm253_vm1, %v3085_v29 }
  0xb3   : > { %2313 = vmatprep.mubr.msk.f32.mxu0 %vm2965_vm0, %v2966_v11 }
  0xb6   : > { %2314 = vmatmul.mubr.msk.f32.gmra.mrb[8].mxu0 %vm253_vm1, %v3091_v30 }
  0xb7   : > { %2316 = vmatprep.mubr.msk.f32.mxu0 %vm2965_vm0, %v2966_v11 }
  0xba   : > { %2317 = vmatmul.mubr.msk.f32.gmra.mrb[10].mxu0 %vm253_vm1, %v3097_v31 }
  0xbb   : > { %2319 = vmatprep.mubr.msk.f32.mxu0 %vm2965_vm0, %v2966_v11 }
  0xbe   : > { %2320 = vmatmul.mubr.msk.f32.gmra.mrb[12].mxu0 %vm253_vm1, %v3104_v32 }
  0xbf   : > { %2406 = vmatprep.mubr.msk.f32.mxu0 %vm2965_vm0, %v2966_v11 }
 0x179   : > { %v355_v45 = vpop.f32.mrb[0].mxu0 }
 0x17a   : > { %v2303_v46 = vpop.f32.mrb[1].mxu0  ;;  %v390_v47 = vsel %vm389_vm3, %v355_v45, -inf }
 0x17b   : > { %391 = vmax.xlane.f32.xlu0 %v390_v47 }
 0x17d   : > { %v360_v48 = vpop.f32.mrb[2].mxu0 }
 0x17e   : > { %v2306_v49 = vpop.f32.mrb[3].mxu0  ;;  %v393_v50 = vsel %vm389_vm3, %v360_v48, -inf }
 0x17f   : > { %394 = vmax.xlane.f32.xlu1 %v393_v50 }
 0x181   : > { %v365_v51 = vpop.f32.mrb[4].mxu0 }
 0x182   : > { %v2309_v52 = vpop.f32.mrb[5].mxu0  ;;  %v396_v53 = vsel %vm389_vm3, %v365_v51, -inf }
 0x183   : > { %397 = vmax.xlane.f32.xlu0 %v396_v53 }
 0x185   : > { %v370_v54 = vpop.f32.mrb[6].mxu0 }
 0x186   : > { %v2312_v55 = vpop.f32.mrb[7].mxu0  ;;  %v399_v56 = vsel %vm389_vm3, %v370_v54, -inf }
 0x187   : > { %400 = vmax.xlane.f32.xlu0 %v399_v56 }
 0x189   : > { %v375_v57 = vpop.f32.mrb[8].mxu0 }
 0x18a   : > { %v2315_v58 = vpop.f32.mrb[9].mxu0  ;;  %v402_v59 = vsel %vm389_vm3, %v375_v57, -inf }
 0x18b   : > { %403 = vmax.xlane.f32.xlu1 %v402_v59 }
 0x18d   : > { %v380_v60 = vpop.f32.mrb[10].mxu0 }
 0x18e   : > { %v405_v61 = vsel %vm389_vm3, %v380_v60, -inf  ;;  %v2318_v62 = vpop.f32.mrb[11].mxu0 }
 0x18f   : > { %406 = vmax.xlane.f32.xlu0 %v405_v61 }
 0x191   : > { %v385_v63 = vpop.f32.mrb[12].mxu0 }
 0x192   : > { %v408_v1 = vsel %vm389_vm3, %v385_v63, -inf  ;;  %v2321_v2 = vpop.f32.mrb[13].mxu0 }
 0x193   : > { %409 = vmax.xlane.f32.xlu1 %v408_v1 }
 0x1a4   : > { %2747 = vrot.lane.b32.xlu1 %v3026_v4, %s2968_s23 }
 0x1a5   : > { %479 = vrot.lane.b32.xlu0 %v3038_v10, %s2967_s22 }
 0x208   : > { %v392_v3 = vpop.xlane.xlu0 %391 }
 0x209   : > { %v411_v5 = vsub.f32 %v355_v45, %v392_v3 }
 0x20b   : > { %v418_v6 = vmul.f32 1.442695, %v411_v5 }
 0x20c   : > { %v395_v7 = vpop.xlane.xlu1 %394 }
 0x20d   : > { %2836 = vpow2.f32 %v418_v6  ;;  %v412_v12 = vsub.f32 %v360_v48, %v395_v7 }
 0x20f   : > { %v420_v13 = vmul.f32 1.442695, %v412_v12 }
 0x210   : > { %v398_v14 = vpop.xlane.xlu0 %397 }
 0x211   : > { %2838 = vpow2.f32 %v420_v13  ;;  %v413_v16 = vsub.f32 %v365_v51, %v398_v14 }
 0x213   : > { %v422_v17 = vmul.f32 1.442695, %v413_v16 }
 0x214   : > { %v401_v19 = vpop.xlane.xlu0 %400 }
 0x215   : > { %2840 = vpow2.f32 %v422_v17  ;;  %v414_v39 = vsub.f32 %v370_v54, %v401_v19 }
 0x217   : > { %v3126_v18 = vpop.eup %2836  ;;  %v424_v40 = vmul.f32 1.442695, %v414_v39 }
 0x218   : > { %v404_v20 = vpop.xlane.xlu1 %403  ;;  %v432_v21 = vsel %vm389_vm3, %v3126_v18, 0.0 }
 0x219   : > { %v415_v22 = vsub.f32 %v375_v57, %v404_v20  ;;  %433 = vadd.xlane.f32.xlu0 %v432_v21 }
 0x21b   : > { %v3130_v23 = vpop.eup %2838  ;;  %v426_v24 = vmul.f32 1.442695, %v415_v22 }
 0x21c   : > { %v407_v25 = vpop.xlane.xlu0 %406  ;;  %v435_v33 = vsel %vm389_vm3, %v3130_v23, 0.0 }
 0x21d   : > { %2842 = vpow2.f32 %v426_v24  ;;  %436 = vadd.xlane.f32.xlu1 %v435_v33  ;;  %v416_v41 = vsub.f32 %v380_v60, %v407_v25 }
 0x21e   : > { %2844 = vpow2.f32 %v424_v40 }
 0x21f   : > { %v3134_v34 = vpop.eup %2840  ;;  %v428_v42 = vmul.f32 1.442695, %v416_v41 }
 0x220   : > { %v438_v35 = vsel %vm389_vm3, %v3134_v34, 0.0  ;;  %v480_v36 = vpop.permute.xlu0 %479  ;;  %v410_v43 = vpop.xlane.xlu1 %409 }
 0x221   : > { %439 = vadd.xlane.f32.xlu1 %v438_v35  ;;  %2335 = vmatpush3.msra.mxu1 %v480_v36  ;;  %2846 = vpow2.f32 %v428_v42  ;;  %v417_v44 = vsub.f32 %v385_v63, %v410_v43 }
 0x222   : > { %2617 = vmatprep.subr.bf16.mxu1 %v2963_v0 }
 0x223   : > { %v430_v46 = vmul.f32 1.442695, %v417_v44 }
 0x224   : > { %v2748_v52 = vpop.permute.xlu1 %2747 }
 0x225   : > { %2848 = vpow2.f32 %v430_v46  ;;  %v2750_v56 = vunpack.i.h.bf16 %v2748_v52 }
 0x227   : > { %v3139_v37 = vpop.eup %2842 }
 0x228   : > { %v444_v38 = vsel %vm389_vm3, %v3139_v37, 0.0  ;;  %v3147_v45 = vpop.eup %2844 }
 0x229   : > { %445 = vadd.xlane.f32.xlu1 %v444_v38  ;;  %v441_v47 = vsel %vm389_vm3, %v3147_v45, 0.0 }
 0x22b   : > { %v3151_v48 = vpop.eup %2846 }
 0x22c   : > { %v447_v49 = vsel %vm389_vm3, %v3151_v48, 0.0 }
 0x22f   : > { %2752 = vrot.lane.b32.xlu0 %v3034_v9, %s2968_s23  ;;  %v3155_v50 = vpop.eup %2848 }
 0x230   : > { %v450_v51 = vsel %vm389_vm3, %v3155_v50, 0.0 }
 0x23a   : > { %635 = vrot.lane.b32.xlu1 %v3038_v10, %s2968_s23 }
 0x24e   : > { %442 = vadd.xlane.f32.xlu0 %v441_v47 }
 0x252   : > { %448 = vadd.xlane.f32.xlu0 %v447_v49 }
 0x25e   : > { %451 = vadd.xlane.f32.xlu1 %v450_v51 }
 0x268   : > { %2757 = vrot.lane.b32.xlu0 %v3031_v8, %s2968_s23 }
 0x26c   : > { %2762 = vrot.lane.b32.xlu0 %v3026_v4, %s2969_s24 }
 0x26f   : > { %609 = vrot.lane.b32.xlu1 %v3067_v26, %s2970_s25 }
 0x270   : > { %611 = vrot.lane.b32.xlu0 %v3073_v27, %s2970_s25 }
 0x273   : > { %2767 = vrot.lane.b32.xlu1 %v3034_v9, %s2969_s24 }
 0x274   : > { %613 = vrot.lane.b32.xlu0 %v3079_v28, %s2970_s25 }
 0x277   : > { %615 = vrot.lane.b32.xlu1 %v3085_v29, %s2970_s25 }
 0x278   : > { %2772 = vrot.lane.b32.xlu0 %v3031_v8, %s2969_s24 }
 0x27b   : > { %617 = vrot.lane.b32.xlu1 %v3091_v30, %s2970_s25 }
 0x27c   : > { %619 = vrot.lane.b32.xlu0 %v3097_v31, %s2970_s25 }
 0x27f   : > { %621 = vrot.lane.b32.xlu1 %v3104_v32, %s2970_s25 }
 0x280   : > { %1010 = vrot.lane.b32.xlu0 %v3038_v10, %s2969_s24 }
 0x283   : > { %2777 = vrot.lane.b32.xlu1 %v3026_v4, %s2971_s26 }
 0x284   : > { %984 = vrot.lane.b32.xlu0 %v3067_v26, %s2972_s27 }
 0x287   : > { %986 = vrot.lane.b32.xlu1 %v3073_v27, %s2972_s27 }
 0x288   : > { %2782 = vrot.lane.b32.xlu0 %v3034_v9, %s2971_s26 }
 0x28b   : > { %988 = vrot.lane.b32.xlu1 %v3079_v28, %s2972_s27 }
 0x28c   : > { %990 = vrot.lane.b32.xlu0 %v3085_v29, %s2972_s27 }
 0x28f   : > { %2787 = vrot.lane.b32.xlu1 %v3031_v8, %s2971_s26 }
 0x290   : > { %992 = vrot.lane.b32.xlu0 %v3091_v30, %s2972_s27 }
 0x293   : > { %994 = vrot.lane.b32.xlu1 %v3097_v31, %s2972_s27 }
 0x294   : > { %996 = vrot.lane.b32.xlu0 %v3104_v32, %s2972_s27 }
 0x297   : > { %1385 = vrot.lane.b32.xlu1 %v3038_v10, %s2971_s26  ;;  %s3738_s26 = scalar_lea.vmem %s3767_s4, %s3015_s17 }
 0x298   : > { %1359 = vrot.lane.b32.xlu0 %v3067_v26, %s2973_s28  ;;  %v2749_v26 = vunpack.i.l.bf16 %v2748_v52 }
 0x29a   : > { %v2618_v57 = vpack.c.bf16 %v2750_v56, %v2749_v26 }
 0x29b   : > { %1361 = vrot.lane.b32.xlu1 %v3073_v27, %s2973_s28 }
 0x29c   : > { %1363 = vrot.lane.b32.xlu0 %v3079_v28, %s2973_s28 }
 0x29f   : > { %1365 = vrot.lane.b32.xlu1 %v3085_v29, %s2973_s28 }
 0x2a0   : > { %1367 = vrot.lane.b32.xlu0 %v3091_v30, %s2973_s28 }
 0x2a3   : > { %1369 = vrot.lane.b32.xlu1 %v3097_v31, %s2973_s28 }
 0x2a4   : > { %1371 = vrot.lane.b32.xlu0 %v3104_v32, %s2973_s28 }
 0x2a6   : > { %v434_v53 = vpop.xlane.xlu0 %433 }
 0x2a7   : > { %2850 = vrcp.f32 %v434_v53  ;;  %2792 = vrot.lane.b32.xlu1 %v3026_v4, %s2974_s29 }
 0x2a8   : > { %2797 = vrot.lane.b32.xlu0 %v3034_v9, %s2974_s29 }
 0x2aa   : > { %v437_v54 = vpop.xlane.xlu1 %436  ;;  %v2753_v29 = vpop.permute.xlu0 %2752 }
 0x2ab   : > { %2852 = vrcp.f32 %v437_v54  ;;  %v2755_v32 = vunpack.i.h.bf16 %v2753_v29  ;;  %v2754_v58 = vunpack.i.l.bf16 %v2753_v29  ;;  %854 = vrot.lane.b32.xlu1 %v3038_v10, %s2974_s29 }
 0x2ac   : > { %2802 = vrot.lane.b32.xlu0 %v3031_v8, %s2974_s29 }
 0x2ad   : > { %v2622_v61 = vpack.c.bf16 %v2755_v32, %v2754_v58 }
 0x2ae   : > { %v440_v55 = vpop.xlane.xlu1 %439 }
 0x2af   : > { %2854 = vrcp.f32 %v440_v55 }
 0x2b0   : > { %2807 = vrot.lane.b32.xlu0 %v3026_v4, %s2975_s30 }
 0x2b1   : > { %v2851_v27 = vpop.eup %2850 }
 0x2b2   : > { %v454_v28 = vmul.f32 %v2851_v27, %v3126_v18 }
 0x2b4   : > { %2337 = vmatmul.mubr.msk.f32.vlgmr.msra.gmra.mrb[0].mxu1 %vm389_vm3, %v454_v28 }
 0x2b5   : > { %v2853_v30 = vpop.eup %2852  ;;  %2620 = vmatpush3.bf16.xpose.msk.msra.mxu1 %vm3054_vm2, %v2618_v57  ;;  %2339 = vmatprep.mubr.msk.f32.mxu1 %vm2965_vm0, %v2966_v11 }
 0x2b6   : > { %v456_v31 = vmul.f32 %v2853_v30, %v3130_v23  ;;  %2621 = vmatprep.subr.bf16.mxu1 %v2963_v0  ;;  %v446_v62 = vpop.xlane.xlu1 %445 }
 0x2b8   : > { %2340 = vmatmul.mubr.msk.f32.gmra.mrb[2].mxu1 %vm389_vm3, %v456_v31 }
 0x2b9   : > { %v2855_v59 = vpop.eup %2854  ;;  %2342 = vmatprep.mubr.msk.f32.mxu1 %vm2965_vm0, %v2966_v11 }
 0x2ba   : > { %v458_v60 = vmul.f32 %v2855_v59, %v3134_v34  ;;  %v636_v12 = vpop.permute.xlu1 %635 }
 0x2bc   : > { %2343 = vmatmul.mubr.msk.f32.gmra.mrb[4].mxu1 %vm389_vm3, %v458_v60 }
 0x2bd   : > { %2624 = vmatpush3.bf16.xpose.msk.msra.mxu1 %vm3054_vm2, %v2622_v61  ;;  %2345 = vmatprep.mubr.msk.f32.mxu1 %vm2965_vm0, %v2966_v11 }
 0x2be   : > { %2625 = vmatprep.subr.bf16.mxu1 %v2963_v0 }
 0x2db   : > { %v443_v63 = vpop.xlane.xlu0 %442 }
 0x2dc   : > { %2856 = vrcp.f32 %v443_v63 }
 0x2dd   : > { %2858 = vrcp.f32 %v446_v62 }
 0x2df   : > { %v449_v1 = vpop.xlane.xlu0 %448 }
 0x2e0   : > { %2860 = vrcp.f32 %v449_v1 }
 0x2e3   : > { %v2758_v2 = vpop.permute.xlu0 %2757 }
 0x2e4   : > { %v2760_v3 = vunpack.i.h.bf16 %v2758_v2  ;;  %v2759_v5 = vunpack.i.l.bf16 %v2758_v2 }
 0x2e6   : > { %v2857_v6 = vpop.eup %2856  ;;  %v2626_v7 = vpack.c.bf16 %v2760_v3, %v2759_v5 }
 0x2e7   : > { %v460_v13 = vmul.f32 %v2857_v6, %v3147_v45  ;;  %v2859_v14 = vpop.eup %2858  ;;  %v2763_v20 = vpop.permute.xlu0 %2762 }
 0x2e8   : > { %2628 = vmatpush3.bf16.xpose.msk.msra.mxu1 %vm3054_vm2, %v2626_v7  ;;  %v462_v17 = vmul.f32 %v2859_v14, %v3139_v37  ;;  %v2765_v24 = vunpack.i.h.bf16 %v2763_v20  ;;  %v2764_v25 = vunpack.i.l.bf16 %v2763_v20 }
 0x2e9   : > { %2346 = vmatmul.mubr.msk.f32.gmra.mrb[6].mxu1 %vm389_vm3, %v460_v13  ;;  %2369 = vmatprep.subr.mxu1 %v2966_v11 }
 0x2ea   : > { %2348 = vmatprep.mubr.msk.f32.mxu1 %vm2965_vm0, %v2966_v11  ;;  %v2861_v18 = vpop.eup %2860  ;;  %v2639_v35 = vpack.c.bf16 %v2765_v24, %v2764_v25 }
 0x2eb   : > { %v452_v16 = vpop.xlane.xlu1 %451  ;;  %v464_v19 = vmul.f32 %v2861_v18, %v3151_v48  ;;  %v612_v22 = vpop.permute.xlu0 %611 }
 0x2ec   : > { %2862 = vrcp.f32 %v452_v16 }
 0x2ed   : > { %2349 = vmatmul.mubr.msk.f32.gmra.mrb[8].mxu1 %vm389_vm3, %v462_v17 }
 0x2ee   : > { %2351 = vmatprep.mubr.msk.f32.mxu1 %vm2965_vm0, %v2966_v11 }
 0x2ef   : > { %v610_v21 = vpop.permute.xlu1 %609  ;;  %v614_v36 = vpop.permute.xlu0 %613 }
 0x2f0   : > { %2370 = vmatpush3.xpose.msk.msra.mxu1 %vm253_vm1, %v636_v12 }
 0x2f1   : > { %2352 = vmatmul.mubr.msk.f32.gmra.mrb[10].mxu1 %vm389_vm3, %v464_v19  ;;  %2638 = vmatprep.subr.bf16.mxu1 %v2963_v0 }
 0x2f2   : > { %2354 = vmatprep.mubr.msk.f32.mxu1 %vm2965_vm0, %v2966_v11 }
 0x2f3   : > { %v2768_v34 = vpop.permute.xlu1 %2767  ;;  %v2773_v40 = vpop.permute.xlu0 %2772 }
 0x2f4   : > { %v2770_v38 = vunpack.i.h.bf16 %v2768_v34  ;;  %v2769_v39 = vunpack.i.l.bf16 %v2768_v34  ;;  %v2775_v44 = vunpack.i.h.bf16 %v2773_v40  ;;  %v2774_v45 = vunpack.i.l.bf16 %v2773_v40 }
 0x2f6   : > { %v2863_v23 = vpop.eup %2862  ;;  %v2643_v41 = vpack.c.bf16 %v2770_v38, %v2769_v39  ;;  %v2647_v47 = vpack.c.bf16 %v2775_v44, %v2774_v45 }
 0x2f7   : > { %v466_v33 = vmul.f32 %v2863_v23, %v3155_v50  ;;  %v616_v37 = vpop.permute.xlu1 %615  ;;  %v620_v43 = vpop.permute.xlu0 %619 }
 0x2f9   : > { %2355 = vmatmul.mubr.msk.f32.gmra.mrb[12].mxu1 %vm389_vm3, %v466_v33 }
 0x2fa   : > { %2371 = vmatprep.mubr.msk.f32.mxu1 %vm2965_vm0, %v2966_v11 }
 0x2fb   : > { %v618_v42 = vpop.permute.xlu1 %617  ;;  %v1011_v48 = vpop.permute.xlu0 %1010 }
 0x2fd   : > { %2372 = vmatmul.mubr.msk.f32.vlgmr.msra.gmra.mrb[14].mxu1 %vm253_vm1, %v610_v21 }
 0x2fe   : > { %2641 = vmatpush3.bf16.xpose.msk.msra.mxu1 %vm3054_vm2, %v2639_v35  ;;  %2374 = vmatprep.mubr.msk.f32.mxu1 %vm2965_vm0, %v2966_v11 }
 0x2ff   : > { %2642 = vmatprep.subr.bf16.mxu1 %v2963_v0  ;;  %v622_v46 = vpop.permute.xlu1 %621  ;;  %v985_v50 = vpop.permute.xlu0 %984 }
 0x301   : > { %2375 = vmatmul.mubr.msk.f32.gmra.mrb[16].mxu1 %vm253_vm1, %v612_v22 }
 0x302   : > { %2377 = vmatprep.mubr.msk.f32.mxu1 %vm2965_vm0, %v2966_v11 }
 0x303   : > { %v2778_v49 = vpop.permute.xlu1 %2777  ;;  %v2783_v55 = vpop.permute.xlu0 %2782 }
 0x304   : > { %v2780_v51 = vunpack.i.h.bf16 %v2778_v49  ;;  %v2779_v52 = vunpack.i.l.bf16 %v2778_v49  ;;  %v2785_v26 = vunpack.i.h.bf16 %v2783_v55  ;;  %v2784_v27 = vunpack.i.l.bf16 %v2783_v55 }
 0x305   : > { %2378 = vmatmul.mubr.msk.f32.gmra.mrb[18].mxu1 %vm253_vm1, %v614_v36 }
 0x306   : > { %2645 = vmatpush3.bf16.xpose.msk.msra.mxu1 %vm3054_vm2, %v2643_v41  ;;  %2380 = vmatprep.mubr.msk.f32.mxu1 %vm2965_vm0, %v2966_v11  ;;  %v2660_v54 = vpack.c.bf16 %v2780_v51, %v2779_v52  ;;  %v2664_v10 = vpack.c.bf16 %v2785_v26, %v2784_v27 }
 0x307   : > { %2646 = vmatprep.subr.bf16.mxu1 %v2963_v0  ;;  %v987_v53 = vpop.permute.xlu1 %986  ;;  %v991_v57 = vpop.permute.xlu0 %990 }
 0x309   : > { %2381 = vmatmul.mubr.msk.f32.gmra.mrb[20].mxu1 %vm253_vm1, %v616_v37 }
 0x30a   : > { %2383 = vmatprep.mubr.msk.f32.mxu1 %vm2965_vm0, %v2966_v11 }
 0x30b   : > { %v989_v56 = vpop.permute.xlu1 %988  ;;  %v993_v31 = vpop.permute.xlu0 %992 }
 0x30d   : > { %2384 = vmatmul.mubr.msk.f32.gmra.mrb[22].mxu1 %vm253_vm1, %v618_v42 }
 0x30e   : > { %2649 = vmatpush3.bf16.xpose.msk.msra.mxu1 %vm3054_vm2, %v2647_v47  ;;  %2386 = vmatprep.mubr.msk.f32.mxu1 %vm2965_vm0, %v2966_v11 }
 0x30f   : > { %2439 = vmatprep.subr.mxu1 %v2966_v11  ;;  %v2788_v28 = vpop.permute.xlu1 %2787  ;;  %v997_v58 = vpop.permute.xlu0 %996 }
 0x310   : > { %v2790_v29 = vunpack.i.h.bf16 %v2788_v28  ;;  %v2789_v30 = vunpack.i.l.bf16 %v2788_v28 }
 0x311   : > { %2387 = vmatmul.mubr.msk.f32.gmra.mrb[24].mxu1 %vm253_vm1, %v620_v43 }
 0x312   : > { %2389 = vmatprep.mubr.msk.f32.mxu1 %vm2965_vm0, %v2966_v11  ;;  %v2668_v4 = vpack.c.bf16 %v2790_v29, %v2789_v30 }
 0x313   : > { %v995_v32 = vpop.permute.xlu1 %994  ;;  %v1360_v60 = vpop.permute.xlu0 %1359 }
 0x315   : > { %2390 = vmatmul.mubr.msk.f32.gmra.mrb[26].mxu1 %vm253_vm1, %v622_v46 }
 0x316   : > { %2440 = vmatpush3.xpose.msk.msra.mxu1 %vm253_vm1, %v1011_v48  ;;  %2441 = vmatprep.mubr.msk.f32.mxu1 %vm2965_vm0, %v2966_v11 }
 0x317   : > { %2659 = vmatprep.subr.bf16.mxu1 %v2963_v0  ;;  %v1386_v59 = vpop.permute.xlu1 %1385  ;;  %v1364_v61 = vpop.permute.xlu0 %1363 }
 0x319   : > { %2442 = vmatmul.mubr.msk.f32.vlgmr.msra.gmra.mrb[28].mxu1 %vm253_vm1, %v985_v50 }
 0x31a   : > { %2662 = vmatpush3.bf16.xpose.msk.msra.mxu1 %vm3054_vm2, %v2660_v54  ;;  %2444 = vmatprep.mubr.msk.f32.mxu1 %vm2965_vm0, %v2966_v11 }
 0x31b   : > { %2663 = vmatprep.subr.bf16.mxu1 %v2963_v0  ;;  %v1362_v15 = vpop.permute.xlu1 %1361  ;;  %v1368_v63 = vpop.permute.xlu0 %1367 }
 0x31d   : > { %2445 = vmatmul.mubr.msk.f32.gmra.mrb[30].mxu1 %vm253_vm1, %v987_v53 }
 0x31e   : > { %2447 = vmatprep.mubr.msk.f32.mxu1 %vm2965_vm0, %v2966_v11 }
 0x31f   : > { %v1366_v62 = vpop.permute.xlu1 %1365  ;;  %v1372_v2 = vpop.permute.xlu0 %1371 }
 0x321   : > { %2448 = vmatmul.mubr.msk.f32.gmra.mrb[32].mxu1 %vm253_vm1, %v989_v56 }
 0x322   : > { %2666 = vmatpush3.bf16.xpose.msk.msra.mxu1 %vm3054_vm2, %v2664_v10  ;;  %2450 = vmatprep.mubr.msk.f32.mxu1 %vm2965_vm0, %v2966_v11 }
 0x323   : > { %2667 = vmatprep.subr.bf16.mxu1 %v2963_v0  ;;  %v1370_v1 = vpop.permute.xlu1 %1369  ;;  %v2798_v16 = vpop.permute.xlu0 %2797 }
 0x324   : > { %v2800_v19 = vunpack.i.h.bf16 %v2798_v16  ;;  %v2799_v20 = vunpack.i.l.bf16 %v2798_v16 }
 0x325   : > { %2451 = vmatmul.mubr.msk.f32.gmra.mrb[34].mxu1 %vm253_vm1, %v991_v57 }
 0x326   : > { %2453 = vmatprep.mubr.msk.f32.mxu1 %vm2965_vm0, %v2966_v11  ;;  %v2633_v23 = vpack.c.bf16 %v2800_v19, %v2799_v20 }
 0x327   : > { %v2793_v14 = vpop.permute.xlu1 %2792  ;;  %v2803_v22 = vpop.permute.xlu0 %2802 }
 0x328   : > { %v2795_v17 = vunpack.i.h.bf16 %v2793_v14  ;;  %v2794_v18 = vunpack.i.l.bf16 %v2793_v14  ;;  %v2805_v24 = vunpack.i.h.bf16 %v2803_v22  ;;  %v2804_v25 = vunpack.i.l.bf16 %v2803_v22 }
 0x329   : > { %2454 = vmatmul.mubr.msk.f32.gmra.mrb[36].mxu1 %vm253_vm1, %v993_v31 }
 0x32a   : > { %2670 = vmatpush3.bf16.xpose.msk.msra.mxu1 %vm3054_vm2, %v2668_v4  ;;  %2456 = vmatprep.mubr.msk.f32.mxu1 %vm2965_vm0, %v2966_v11  ;;  %v2630_v21 = vpack.c.bf16 %v2795_v17, %v2794_v18  ;;  %v2636_v33 = vpack.c.bf16 %v2805_v24, %v2804_v25 }
 0x32b   : > { %2509 = vmatprep.subr.mxu1 %v2966_v11  ;;  %v855_v34 = vpop.permute.xlu1 %854 }
 0x32c   : > { %2631 = vmatpush3.bf16.msra.mxu0 %v2630_v21 }
 0x32d   : > { %2457 = vmatmul.mubr.msk.f32.gmra.mrb[38].mxu1 %vm253_vm1, %v995_v32  ;;  %2632 = vmatprep.subr.bf16.mxu0 %v2963_v0 }
 0x32e   : > { %2459 = vmatprep.mubr.msk.f32.mxu1 %vm2965_vm0, %v2966_v11 }
 0x330   : > { %2634 = vmatpush3.bf16.msra.mxu0 %v2633_v23 }
 0x331   : > { %2460 = vmatmul.mubr.msk.f32.gmra.mrb[40].mxu1 %vm253_vm1, %v997_v58  ;;  %2635 = vmatprep.subr.bf16.mxu0 %v2963_v0 }
 0x332   : > { %2510 = vmatpush3.xpose.msk.msra.mxu1 %vm253_vm1, %v1386_v59  ;;  %2511 = vmatprep.mubr.msk.f32.mxu1 %vm2965_vm0, %v2966_v11 }
 0x333   : > { %2686 = vmatprep.subr.bf16.mxu1 %v2963_v0 }
 0x334   : > { %2637 = vmatpush3.bf16.msra.mxu0 %v2636_v33 }
 0x335   : > { %2512 = vmatmul.mubr.msk.f32.vlgmr.msra.gmra.mrb[42].mxu1 %vm253_vm1, %v1360_v60  ;;  %2404 = vmatprep.subr.mxu0 %v2966_v11 }
 0x336   : > { %2514 = vmatprep.mubr.msk.f32.mxu1 %vm2965_vm0, %v2966_v11 }
 0x338   : > { %2405 = vmatpush3.msra.mxu0 %v855_v34 }
 0x339   : > { %2515 = vmatmul.mubr.msk.f32.gmra.mrb[44].mxu1 %vm253_vm1, %v1362_v15  ;;  %2650 = vmatprep.subr.bf16.mxu0 %v2963_v0 }
 0x33a   : > { %2517 = vmatprep.mubr.msk.f32.mxu1 %vm2965_vm0, %v2966_v11 }
 0x33d   : > { %2518 = vmatmul.mubr.msk.f32.gmra.mrb[46].mxu1 %vm253_vm1, %v1364_v61 }
 0x33e   : > { %2520 = vmatprep.mubr.msk.f32.mxu1 %vm2965_vm0, %v2966_v11 }
 0x341   : > { %2521 = vmatmul.mubr.msk.f32.gmra.mrb[48].mxu1 %vm253_vm1, %v1366_v62 }
 0x342   : > { %2523 = vmatprep.mubr.msk.f32.mxu1 %vm2965_vm0, %v2966_v11 }
 0x345   : > { %2524 = vmatmul.mubr.msk.f32.gmra.mrb[50].mxu1 %vm253_vm1, %v1368_v63 }
 0x346   : > { %2526 = vmatprep.mubr.msk.f32.mxu1 %vm2965_vm0, %v2966_v11 }
 0x349   : > { %2527 = vmatmul.mubr.msk.f32.gmra.mrb[52].mxu1 %vm253_vm1, %v1370_v1 }
 0x34a   : > { %2529 = vmatprep.mubr.msk.f32.mxu1 %vm2965_vm0, %v2966_v11 }
 0x34d   : > { %2530 = vmatmul.mubr.msk.f32.gmra.mrb[54].mxu1 %vm253_vm1, %v1372_v2 }
 0x34e   : > { %2578 = vmatprep.mubr.msk.f32.mxu1 %vm2965_vm0, %v2966_v11 }
 0x387   : > { %v3320_v3 = vpop.f32.mrb[0].mxu1 }
 0x388   : > { %v2338_v5 = vpop.f32.mrb[1].mxu1 }
 0x38b   : > { %v3322_v6 = vpop.f32.mrb[2].mxu1 }
 0x38c   : > { %v2341_v7 = vpop.f32.mrb[3].mxu1 }
 0x38f   : > { %v3324_v12 = vpop.f32.mrb[4].mxu1 }
 0x390   : > { %v2344_v13 = vpop.f32.mrb[5].mxu1 }
 0x3bc   : > { %v3330_v35 = vpop.f32.mrb[6].mxu1 }
 0x3bd   : > { %v2347_v36 = vpop.f32.mrb[7].mxu1 }
 0x3c0   : > { %v3332_v37 = vpop.f32.mrb[8].mxu1 }
 0x3c1   : > { %v2350_v38 = vpop.f32.mrb[9].mxu1 }
 0x3c4   : > { %v3334_v39 = vpop.f32.mrb[10].mxu1 }
 0x3c5   : > { %v2353_v40 = vpop.f32.mrb[11].mxu1 }
 0x3cc   : > { %v3336_v41 = vpop.f32.mrb[12].mxu1 }
 0x3cd   : > { %v2356_v42 = vpop.f32.mrb[13].mxu1 }
 0x3d0   : > { %v3338_v43 = vpop.f32.mrb[14].mxu1 }
 0x3d1   : > { %v2373_v44 = vpop.f32.mrb[15].mxu1  ;;  %v765_v45 = vsel %vm389_vm3, %v3338_v43, -inf }
 0x3d2   : > { %766 = vmax.xlane.f32.xlu1 %v765_v45 }
 0x3d4   : > { %v3342_v46 = vpop.f32.mrb[16].mxu1 }
 0x3d5   : > { %v2376_v47 = vpop.f32.mrb[17].mxu1  ;;  %v768_v48 = vsel %vm389_vm3, %v3342_v46, -inf }
 0x3d6   : > { %769 = vmax.xlane.f32.xlu0 %v768_v48 }
 0x3d8   : > { %v3346_v49 = vpop.f32.mrb[18].mxu1 }
 0x3d9   : > { %v2379_v50 = vpop.f32.mrb[19].mxu1  ;;  %v771_v51 = vsel %vm389_vm3, %v3346_v49, -inf }
 0x3da   : > { %772 = vmax.xlane.f32.xlu0 %v771_v51 }
 0x3dc   : > { %v3350_v52 = vpop.f32.mrb[20].mxu1 }
 0x3dd   : > { %v2382_v53 = vpop.f32.mrb[21].mxu1  ;;  %v774_v54 = vsel %vm389_vm3, %v3350_v52, -inf }
 0x3de   : > { %775 = vmax.xlane.f32.xlu1 %v774_v54 }
 0x3e0   : > { %v3354_v55 = vpop.f32.mrb[22].mxu1 }
 0x3e1   : > { %v2385_v56 = vpop.f32.mrb[23].mxu1  ;;  %v777_v26 = vsel %vm389_vm3, %v3354_v55, -inf }
 0x3e2   : > { %778 = vmax.xlane.f32.xlu0 %v777_v26  ;;  %v3426_v56 = vpop.permute.xlu0 %2807 }
 0x3e4   : > { %v3358_v27 = vpop.f32.mrb[24].mxu1 }
 0x3e5   : > { %v2388_v10 = vpop.f32.mrb[25].mxu1  ;;  %v780_v28 = vsel %vm389_vm3, %v3358_v27, -inf }
 0x3e6   : > { %781 = vmax.xlane.f32.xlu1 %v780_v28 }
 0x3e8   : > { %v3362_v57 = vpop.f32.mrb[26].mxu1 }
 0x3e9   : > { %v2391_v29 = vpop.f32.mrb[27].mxu1  ;;  %v783_v30 = vsel %vm389_vm3, %v3362_v57, -inf }
 0x3ea   : > { %784 = vmax.xlane.f32.xlu0 %v783_v30 }
 0x3ec   : > { %v3366_v4 = vpop.f32.mrb[28].mxu1 }
 0x3ed   : > { %v2443_v31 = vpop.f32.mrb[29].mxu1  ;;  %v1140_v32 = vsel %vm389_vm3, %v3366_v4, -inf }
 0x3ee   : > { %1141 = vmax.xlane.f32.xlu1 %v1140_v32 }
 0x3f0   : > { %v3370_v58 = vpop.f32.mrb[30].mxu1 }
 0x3f1   : > { %v2446_v59 = vpop.f32.mrb[31].mxu1  ;;  %v1143_v60 = vsel %vm389_vm3, %v3370_v58, -inf }
 0x3f2   : > { %1144 = vmax.xlane.f32.xlu0 %v1143_v60 }
 0x3f4   : > { %v3374_v15 = vpop.f32.mrb[32].mxu1 }
 0x3f5   : > { %v2449_v61 = vpop.f32.mrb[33].mxu1  ;;  %v1146_v62 = vsel %vm389_vm3, %v3374_v15, -inf }
 0x3f6   : > { %1147 = vmax.xlane.f32.xlu1 %v1146_v62 }
 0x3f8   : > { %v3378_v63 = vpop.f32.mrb[34].mxu1 }
 0x3f9   : > { %v2452_v1 = vpop.f32.mrb[35].mxu1  ;;  %v1149_v2 = vsel %vm389_vm3, %v3378_v63, -inf }
 0x3fa   : > { %1150 = vmax.xlane.f32.xlu0 %v1149_v2 }
 0x3fc   : > { %v3382_v5 = vpop.f32.mrb[36].mxu1 }
 0x3fd   : > { %v2455_v7 = vpop.f32.mrb[37].mxu1  ;;  %v1152_v13 = vsel %vm389_vm3, %v3382_v5, -inf }
 0x3fe   : > { %1153 = vmax.xlane.f32.xlu1 %v1152_v13 }
 0x400   : > { %v3386_v14 = vpop.f32.mrb[38].mxu1 }
 0x401   : > { %v2458_v16 = vpop.f32.mrb[39].mxu1  ;;  %v1155_v17 = vsel %vm389_vm3, %v3386_v14, -inf }
 0x402   : > { %1156 = vmax.xlane.f32.xlu0 %v1155_v17 }
 0x404   : > { %v3390_v18 = vpop.f32.mrb[40].mxu1 }
 0x405   : > { %v2461_v19 = vpop.f32.mrb[41].mxu1  ;;  %v1158_v20 = vsel %vm389_vm3, %v3390_v18, -inf }
 0x406   : > { %1159 = vmax.xlane.f32.xlu1 %v1158_v20 }
 0x408   : > { %v3394_v21 = vpop.f32.mrb[42].mxu1 }
 0x409   : > { %v1515_v22 = vsel %vm389_vm3, %v3394_v21, -inf  ;;  %v2513_v23 = vpop.f32.mrb[43].mxu1 }
 0x40a   : > { %1516 = vmax.xlane.f32.xlu0 %v1515_v22 }
 0x40c   : > { %v3398_v24 = vpop.f32.mrb[44].mxu1 }
 0x40d   : > { %v1518_v25 = vsel %vm389_vm3, %v3398_v24, -inf  ;;  %v2516_v33 = vpop.f32.mrb[45].mxu1 }
 0x40e   : > { %1519 = vmax.xlane.f32.xlu1 %v1518_v25 }
 0x410   : > { %v3402_v34 = vpop.f32.mrb[46].mxu1 }
 0x411   : > { %v2519_v36 = vpop.f32.mrb[47].mxu1  ;;  %v1521_v51 = vsel %vm389_vm3, %v3402_v34, -inf }
 0x414   : > { %v3404_v38 = vpop.f32.mrb[48].mxu1 }
 0x415   : > { %v2522_v40 = vpop.f32.mrb[49].mxu1  ;;  %v1524_v53 = vsel %vm389_vm3, %v3404_v38, -inf }
 0x418   : > { %v3406_v42 = vpop.f32.mrb[50].mxu1 }
 0x419   : > { %v2525_v44 = vpop.f32.mrb[51].mxu1  ;;  %v1527_v54 = vsel %vm389_vm3, %v3406_v42, -inf }
 0x41c   : > { %v3408_v45 = vpop.f32.mrb[52].mxu1 }
 0x41d   : > { %v2528_v47 = vpop.f32.mrb[53].mxu1 }
 0x41f   : > { %2812 = vrot.lane.b32.xlu1 %v3034_v9, %s2975_s30  ;;  %v1530_v9 = vsel %vm389_vm3, %v3408_v45, -inf }
 0x420   : > { %2817 = vrot.lane.b32.xlu0 %v3031_v8, %s2975_s30  ;;  %v3414_v48 = vpop.f32.mrb[54].mxu1 }
 0x421   : > { %v2531_v50 = vpop.f32.mrb[55].mxu1  ;;  %v1533_v8 = vsel %vm389_vm3, %v3414_v48, -inf }
 0x43f   : > { %1522 = vmax.xlane.f32.xlu0 %v1521_v51 }
 0x443   : > { %1525 = vmax.xlane.f32.xlu1 %v1524_v53  ;;  %1528 = vmax.xlane.f32.xlu0 %v1527_v54 }
 0x447   : > { %1531 = vmax.xlane.f32.xlu1 %v1530_v9  ;;  %1534 = vmax.xlane.f32.xlu0 %v1533_v8 }
 0x45f   : > { %v767_v26 = vpop.xlane.xlu1 %766 }
 0x460   : > { %v786_v10 = vsub.f32 %v3338_v43, %v767_v26 }
 0x462   : > { %v793_v28 = vmul.f32 1.442695, %v786_v10 }
 0x463   : > { %v770_v29 = vpop.xlane.xlu0 %769 }
 0x464   : > { %2864 = vpow2.f32 %v793_v28  ;;  %v787_v30 = vsub.f32 %v3342_v46, %v770_v29 }
 0x466   : > { %v795_v31 = vmul.f32 1.442695, %v787_v30 }
 0x467   : > { %v773_v32 = vpop.xlane.xlu0 %772 }
 0x468   : > { %2866 = vpow2.f32 %v795_v31  ;;  %v788_v59 = vsub.f32 %v3346_v49, %v773_v32 }
 0x46a   : > { %v797_v60 = vmul.f32 1.442695, %v788_v59 }
 0x46b   : > { %v776_v61 = vpop.xlane.xlu1 %775 }
 0x46c   : > { %2868 = vpow2.f32 %v797_v60  ;;  %v789_v62 = vsub.f32 %v3350_v52, %v776_v61 }
 0x46e   : > { %v3432_v1 = vpop.eup %2864  ;;  %v799_v2 = vmul.f32 1.442695, %v789_v62 }
 0x46f   : > { %v779_v7 = vpop.xlane.xlu0 %778  ;;  %v807_v43 = vsel %vm389_vm3, %v3432_v1, 0.0 }
 0x470   : > { %2870 = vpow2.f32 %v799_v2  ;;  %v790_v46 = vsub.f32 %v3354_v55, %v779_v7  ;;  %808 = vadd.xlane.f32.xlu1 %v807_v43 }
 0x472   : > { %v3437_v13 = vpop.eup %2866  ;;  %v801_v16 = vmul.f32 1.442695, %v790_v46 }
 0x473   : > { %v782_v49 = vpop.xlane.xlu1 %781  ;;  %v810_v17 = vsel %vm389_vm3, %v3437_v13, 0.0 }
 0x474   : > { %2872 = vpow2.f32 %v801_v16  ;;  %v791_v52 = vsub.f32 %v3358_v27, %v782_v49  ;;  %811 = vadd.xlane.f32.xlu0 %v810_v17 }
 0x476   : > { %v3442_v19 = vpop.eup %2868  ;;  %v803_v20 = vmul.f32 1.442695, %v791_v52 }
 0x477   : > { %v785_v22 = vpop.xlane.xlu0 %784  ;;  %v813_v23 = vsel %vm389_vm3, %v3442_v19, 0.0 }
 0x478   : > { %2874 = vpow2.f32 %v803_v20  ;;  %v792_v55 = vsub.f32 %v3362_v57, %v785_v22  ;;  %814 = vadd.xlane.f32.xlu1 %v813_v23 }
 0x47a   : > { %v3447_v25 = vpop.eup %2870  ;;  %v805_v33 = vmul.f32 1.442695, %v792_v55 }
 0x47b   : > { %v1142_v36 = vpop.xlane.xlu1 %1141  ;;  %v816_v40 = vsel %vm389_vm3, %v3447_v25, 0.0 }
 0x47c   : > { %2876 = vpow2.f32 %v805_v33  ;;  %v1161_v27 = vsub.f32 %v3366_v4, %v1142_v36  ;;  %817 = vadd.xlane.f32.xlu0 %v816_v40  ;;  %v3499_v33 = vld [vmem:[%s3021_s20 + $0x30] sm:$0xff]  ;;  %v2949_v36 = vld [vmem:[%s3021_s20] sm:$0xff]  ;;  %v2950_v40 = vld [vmem:[%s3021_s20 + $0x8] sm:$0xff] }
 0x47e   : > { %v3452_v44 = vpop.eup %2872  ;;  %v1168_v47 = vmul.f32 1.442695, %v1161_v27  ;;  %v2821_v27 = vpack.i.bf16 %v2950_v40, %v2949_v36 }
 0x47f   : > { %v1145_v50 = vpop.xlane.xlu0 %1144  ;;  %v819_v51 = vsel %vm389_vm3, %v3452_v44, 0.0 }
 0x480   : > { %2878 = vpow2.f32 %v1168_v47  ;;  %v1162_v57 = vsub.f32 %v3370_v58, %v1145_v50  ;;  %820 = vadd.xlane.f32.xlu0 %v819_v51  ;;  %v2951_v47 = vld [vmem:[%s3021_s20 + $0x10] sm:$0xff]  ;;  %v2952_v50 = vld [vmem:[%s3021_s20 + $0x18] sm:$0xff] }
 0x481   : > { %v2826_v51 = vpack.i.bf16 %v2952_v50, %v2951_v47 }
 0x482   : > { %v3457_v53 = vpop.eup %2874  ;;  %v1170_v54 = vmul.f32 1.442695, %v1162_v57 }
 0x483   : > { %v1148_v9 = vpop.xlane.xlu1 %1147  ;;  %v822_v8 = vsel %vm389_vm3, %v3457_v53, 0.0 }
 0x484   : > { %2880 = vpow2.f32 %v1170_v54  ;;  %v1163_v4 = vsub.f32 %v3374_v15, %v1148_v9  ;;  %823 = vadd.xlane.f32.xlu1 %v822_v8  ;;  %v2953_v54 = vld [vmem:[%s3021_s20 + $0x20] sm:$0xff]  ;;  %v2954_v9 = vld [vmem:[%s3021_s20 + $0x28] sm:$0xff] }
 0x485   : > { %v2831_v8 = vpack.i.bf16 %v2954_v9, %v2953_v54 }
 0x486   : > { %v3462_v26 = vpop.eup %2876  ;;  %v1172_v10 = vmul.f32 1.442695, %v1163_v4 }
 0x487   : > { %v1151_v28 = vpop.xlane.xlu0 %1150  ;;  %v825_v29 = vsel %vm389_vm3, %v3462_v26, 0.0 }
 0x488   : > { %2882 = vpow2.f32 %v1172_v10  ;;  %v1164_v58 = vsub.f32 %v3378_v63, %v1151_v28  ;;  %826 = vadd.xlane.f32.xlu0 %v825_v29 }
 0x48a   : > { %v3467_v30 = vpop.eup %2878  ;;  %v1174_v31 = vmul.f32 1.442695, %v1164_v58 }
 0x48b   : > { %v1154_v32 = vpop.xlane.xlu1 %1153  ;;  %v1182_v59 = vsel %vm389_vm3, %v3467_v30, 0.0 }
 0x48c   : > { %2884 = vpow2.f32 %v1174_v31  ;;  %v1165_v15 = vsub.f32 %v3382_v5, %v1154_v32  ;;  %1183 = vadd.xlane.f32.xlu0 %v1182_v59 }
 0x48e   : > { %v3472_v60 = vpop.eup %2880  ;;  %v1176_v61 = vmul.f32 1.442695, %v1165_v15 }
 0x48f   : > { %v1157_v62 = vpop.xlane.xlu0 %1156  ;;  %v1185_v2 = vsel %vm389_vm3, %v3472_v60, 0.0 }
 0x490   : > { %2886 = vpow2.f32 %v1176_v61  ;;  %v1166_v63 = vsub.f32 %v3386_v14, %v1157_v62  ;;  %1186 = vadd.xlane.f32.xlu0 %v1185_v2 }
 0x492   : > { %v3477_v7 = vpop.eup %2882  ;;  %v1178_v43 = vmul.f32 1.442695, %v1166_v63 }
 0x493   : > { %v1160_v46 = vpop.xlane.xlu1 %1159  ;;  %v1188_v16 = vsel %vm389_vm3, %v3477_v7, 0.0 }
 0x494   : > { %2888 = vpow2.f32 %v1178_v43  ;;  %v1167_v5 = vsub.f32 %v3390_v18, %v1160_v46  ;;  %1189 = vadd.xlane.f32.xlu1 %v1188_v16 }
 0x496   : > { %v3482_v49 = vpop.eup %2884  ;;  %v1180_v17 = vmul.f32 1.442695, %v1167_v5 }
 0x497   : > { %v1191_v14 = vsel %vm389_vm3, %v3482_v49, 0.0  ;;  %v1517_v57 = vpop.xlane.xlu0 %1516 }
 0x498   : > { %2890 = vpow2.f32 %v1180_v17  ;;  %1192 = vadd.xlane.f32.xlu0 %v1191_v14  ;;  %v1536_v4 = vsub.f32 %v3394_v21, %v1517_v57 }
 0x49a   : > { %v3486_v52 = vpop.eup %2886  ;;  %v1543_v10 = vmul.f32 1.442695, %v1536_v4  ;;  %v2810_v4 = vunpack.i.h.bf16 %v3426_v56 }
 0x49b   : > { %v1194_v20 = vsel %vm389_vm3, %v3486_v52, 0.0  ;;  %v1520_v28 = vpop.xlane.xlu1 %1519  ;;  %v3513_v29 = vpop.permute.xlu0 %2817 }
 0x49c   : > { %1195 = vadd.xlane.f32.xlu0 %v1194_v20  ;;  %2892 = vpow2.f32 %v1543_v10  ;;  %v1537_v58 = vsub.f32 %v3398_v24, %v1520_v28  ;;  %v2809_v10 = vunpack.i.l.bf16 %v3426_v56 }
 0x49e   : > { %v3490_v18 = vpop.eup %2888  ;;  %v1545_v59 = vmul.f32 1.442695, %v1537_v58 }
 0x49f   : > { %v1197_v22 = vsel %vm389_vm3, %v3490_v18, 0.0  ;;  %v3516_v31 = vpop.permute.xlu1 %2812 }
 0x4a0   : > { %1198 = vadd.xlane.f32.xlu1 %v1197_v22  ;;  %2894 = vpow2.f32 %v1545_v59  ;;  %v2651_v59 = vpack.c.bf16 %v2810_v4, %v2809_v10 }
 0x4a2   : > { %v3494_v23 = vpop.eup %2890 }
 0x4a3   : > { %v1200_v55 = vsel %vm389_vm3, %v3494_v23, 0.0 }
 0x4a4   : > { %1201 = vadd.xlane.f32.xlu0 %v1200_v55 }
 0x4a6   : > { %v3519_v2 = vpop.eup %2892 }
 0x4a7   : > { %v1557_v24 = vsel %vm389_vm3, %v3519_v2, 0.0 }
 0x4b1   : > { %1229 = vrot.lane.b32.xlu1 %v3499_v33, %s2975_s30 }
 0x4ba   : > { %2822 = vrot.lane.b32.xlu0 %v2821_v27, %s2976_s5 }
 0x4be   : > { %2827 = vrot.lane.b32.xlu0 %v2826_v51, %s2976_s5 }
 0x4c2   : > { %2832 = vrot.lane.b32.xlu0 %v2831_v8, %s2976_s5 }
 0x4cc   : > { %v1523_v32 = vpop.xlane.xlu0 %1522 }
 0x4cd   : > { %v1538_v15 = vsub.f32 %v3402_v34, %v1523_v32 }
 0x4cf   : > { %v1547_v63 = vmul.f32 1.442695, %v1538_v15  ;;  %v2815_v15 = vunpack.i.h.bf16 %v3516_v31 }
 0x4d0   : > { %v1526_v61 = vpop.xlane.xlu1 %1525  ;;  %v1529_v62 = vpop.xlane.xlu0 %1528 }
 0x4d1   : > { %v1540_v21 = vsub.f32 %v3406_v42, %v1529_v62  ;;  %v1539_v43 = vsub.f32 %v3404_v38, %v1526_v61  ;;  %v3527_v38 = vpop.eup %2894  ;;  %v2814_v61 = vunpack.i.l.bf16 %v3516_v31 }
 0x4d2   : > { %v1560_v55 = vsel %vm389_vm3, %v3527_v38, 0.0 }
 0x4d3   : > { %v1551_v46 = vmul.f32 1.442695, %v1540_v21  ;;  %v1549_v14 = vmul.f32 1.442695, %v1539_v43  ;;  %v2819_v21 = vunpack.i.l.bf16 %v3513_v29 }
 0x4d4   : > { %v1532_v16 = vpop.xlane.xlu1 %1531  ;;  %v1535_v5 = vpop.xlane.xlu0 %1534 }
 0x4d5   : > { %v1541_v17 = vsub.f32 %v3408_v45, %v1532_v16  ;;  %v1542_v34 = vsub.f32 %v3414_v48, %v1535_v5  ;;  %1558 = vadd.xlane.f32.xlu1 %v1557_v24  ;;  %2896 = vpow2.f32 %v1551_v46 }
 0x4d6   : > { %2898 = vpow2.f32 %v1547_v63  ;;  %v2654_v63 = vpack.c.bf16 %v2815_v15, %v2814_v61 }
 0x4d7   : > { %v1553_v20 = vmul.f32 1.442695, %v1541_v17  ;;  %v1555_v42 = vmul.f32 1.442695, %v1542_v34 }
 0x4d9   : > { %2900 = vpow2.f32 %v1553_v20 }
 0x4da   : > { %2902 = vpow2.f32 %v1549_v14 }
 0x4db   : > { %2904 = vpow2.f32 %v1555_v42 }
 0x4df   : > { %v3529_v22 = vpop.eup %2896 }
 0x4e0   : > { %v3533_v36 = vpop.eup %2898  ;;  %v1569_v45 = vsel %vm389_vm3, %v3529_v22, 0.0 }
 0x4e1   : > { %1561 = vadd.xlane.f32.xlu0 %v1560_v55  ;;  %1570 = vadd.xlane.f32.xlu1 %v1569_v45  ;;  %v1563_v27 = vsel %vm389_vm3, %v3533_v36, 0.0 }
 0x4e3   : > { %v3537_v48 = vpop.eup %2900 }
 0x4e4   : > { %v1572_v40 = vsel %vm389_vm3, %v3537_v48, 0.0  ;;  %v3543_v47 = vpop.eup %2902 }
 0x4e5   : > { %1564 = vadd.xlane.f32.xlu0 %v1563_v27  ;;  %v3545_v50 = vpop.eup %2904  ;;  %1573 = vadd.xlane.f32.xlu1 %v1572_v40  ;;  %v1566_v51 = vsel %vm389_vm3, %v3543_v47, 0.0 }
 0x4e6   : > { %v1575_v57 = vsel %vm389_vm3, %v3545_v50, 0.0 }
 0x4e9   : > { %1567 = vadd.xlane.f32.xlu0 %v1566_v51  ;;  %1576 = vadd.xlane.f32.xlu1 %v1575_v57 }
 0x4fd   : > { %v809_v54 = vpop.xlane.xlu1 %808 }
 0x4fe   : > { %2906 = vrcp.f32 %v809_v54 }
 0x4ff   : > { %1604 = vrot.lane.b32.xlu0 %v3499_v33, %s2976_s5 }
 0x501   : > { %v812_v9 = vpop.xlane.xlu0 %811 }
 0x502   : > { %2908 = vrcp.f32 %v812_v9 }
 0x505   : > { %v815_v8 = vpop.xlane.xlu1 %814 }
 0x506   : > { %2910 = vrcp.f32 %v815_v8 }
 0x508   : > { %v2907_v28 = vpop.eup %2906 }
 0x509   : > { %v829_v58 = vmul.f32 %v2907_v28, %v3432_v1  ;;  %v818_v32 = vpop.xlane.xlu0 %817  ;;  %v2820_v1 = vunpack.i.h.bf16 %v3513_v29 }
 0x50a   : > { %2912 = vrcp.f32 %v818_v32 }
 0x50b   : > { %2407 = vmatmul.mubr.msk.f32.vlgmr.msra.gmra.mrb[14].mxu0 %vm389_vm3, %v829_v58  ;;  %v2657_v16 = vpack.c.bf16 %v2820_v1, %v2819_v21 }
 0x50c   : > { %v2909_v33 = vpop.eup %2908  ;;  %2652 = vmatpush3.bf16.msra.mxu0 %v2651_v59  ;;  %2409 = vmatprep.mubr.msk.f32.mxu0 %vm2965_vm0, %v2966_v11 }
 0x50d   : > { %v821_v62 = vpop.xlane.xlu0 %820  ;;  %2653 = vmatprep.subr.bf16.mxu0 %v2963_v0  ;;  %v831_v56 = vmul.f32 %v2909_v33, %v3437_v13 }
 0x50e   : > { %2914 = vrcp.f32 %v821_v62 }
 0x50f   : > { %2410 = vmatmul.mubr.msk.f32.gmra.mrb[16].mxu0 %vm389_vm3, %v831_v56 }
 0x510   : > { %v2911_v31 = vpop.eup %2910  ;;  %2655 = vmatpush3.bf16.msra.mxu0 %v2654_v63  ;;  %2412 = vmatprep.mubr.msk.f32.mxu0 %vm2965_vm0, %v2966_v11 }
 0x511   : > { %v824_v43 = vpop.xlane.xlu1 %823  ;;  %2656 = vmatprep.subr.bf16.mxu0 %v2963_v0  ;;  %v833_v46 = vmul.f32 %v2911_v31, %v3442_v19 }
 0x512   : > { %2916 = vrcp.f32 %v824_v43 }
 0x513   : > { %2413 = vmatmul.mubr.msk.f32.gmra.mrb[18].mxu0 %vm389_vm3, %v833_v46 }
 0x514   : > { %v2913_v13 = vpop.eup %2912  ;;  %2658 = vmatpush3.bf16.msra.mxu0 %v2657_v16  ;;  %2415 = vmatprep.mubr.msk.f32.mxu0 %vm2965_vm0, %v2966_v11 }
 0x515   : > { %v827_v29 = vpop.xlane.xlu0 %826  ;;  %v835_v5 = vmul.f32 %v2913_v13, %v3447_v25  ;;  %2474 = vmatprep.subr.mxu0 %v2966_v11 }
 0x516   : > { %2918 = vrcp.f32 %v827_v29 }
 0x517   : > { %2416 = vmatmul.mubr.msk.f32.gmra.mrb[20].mxu0 %vm389_vm3, %v835_v5 }
 0x518   : > { %v2915_v24 = vpop.eup %2914  ;;  %2418 = vmatprep.mubr.msk.f32.mxu0 %vm2965_vm0, %v2966_v11 }
 0x519   : > { %v837_v19 = vmul.f32 %v2915_v24, %v3452_v44  ;;  %v1184_v34 = vpop.xlane.xlu0 %1183 }
 0x51a   : > { %2920 = vrcp.f32 %v1184_v34 }
 0x51b   : > { %2419 = vmatmul.mubr.msk.f32.gmra.mrb[22].mxu0 %vm389_vm3, %v837_v19 }
 0x51c   : > { %v2917_v17 = vpop.eup %2916  ;;  %2421 = vmatprep.mubr.msk.f32.mxu0 %vm2965_vm0, %v2966_v11 }
 0x51d   : > { %v839_v25 = vmul.f32 %v2917_v17, %v3457_v53  ;;  %v1187_v42 = vpop.xlane.xlu0 %1186 }
 0x51e   : > { %2922 = vrcp.f32 %v1187_v42 }
 0x51f   : > { %2422 = vmatmul.mubr.msk.f32.gmra.mrb[24].mxu0 %vm389_vm3, %v839_v25 }
 0x520   : > { %v2919_v14 = vpop.eup %2918  ;;  %2424 = vmatprep.mubr.msk.f32.mxu0 %vm2965_vm0, %v2966_v11 }
 0x521   : > { %v841_v20 = vmul.f32 %v2919_v14, %v3462_v26  ;;  %v1190_v55 = vpop.xlane.xlu1 %1189 }
 0x522   : > { %2924 = vrcp.f32 %v1190_v55 }
 0x523   : > { %2425 = vmatmul.mubr.msk.f32.gmra.mrb[26].mxu0 %vm389_vm3, %v841_v20 }
 0x524   : > { %2476 = vmatprep.mubr.msk.f32.mxu0 %vm2965_vm0, %v2966_v11  ;;  %v2921_v40 = vpop.eup %2920 }
 0x525   : > { %v1193_v44 = vpop.xlane.xlu0 %1192  ;;  %v1204_v27 = vmul.f32 %v2921_v40, %v3467_v30 }
 0x526   : > { %2926 = vrcp.f32 %v1193_v44 }
 0x528   : > { %v2923_v26 = vpop.eup %2922 }
 0x529   : > { %v1196_v53 = vpop.xlane.xlu0 %1195  ;;  %v1206_v9 = vmul.f32 %v2923_v26, %v3472_v60 }
 0x52a   : > { %2928 = vrcp.f32 %v1196_v53 }
 0x52c   : > { %v2925_v8 = vpop.eup %2924 }
 0x52d   : > { %v1199_v45 = vpop.xlane.xlu1 %1198  ;;  %v1208_v58 = vmul.f32 %v2925_v8, %v3477_v7 }
 0x52e   : > { %2930 = vrcp.f32 %v1199_v45 }
 0x530   : > { %v2927_v32 = vpop.eup %2926 }
 0x531   : > { %v1230_v51 = vpop.permute.xlu1 %1229  ;;  %v1202_v57 = vpop.xlane.xlu0 %1201  ;;  %v1210_v33 = vmul.f32 %v2927_v32, %v3482_v49 }
 0x532   : > { %2475 = vmatpush3.msra.mxu0 %v1230_v51  ;;  %2932 = vrcp.f32 %v1202_v57 }
 0x533   : > { %2477 = vmatmul.mubr.msk.f32.vlgmr.msra.gmra.mrb[28].mxu0 %vm389_vm3, %v1204_v27  ;;  %2671 = vmatprep.subr.bf16.mxu0 %v2963_v0 }
 0x534   : > { %2479 = vmatprep.mubr.msk.f32.mxu0 %vm2965_vm0, %v2966_v11  ;;  %v2929_v62 = vpop.eup %2928 }
 0x535   : > { %v2823_v54 = vpop.permute.xlu0 %2822  ;;  %v1212_v21 = vmul.f32 %v2929_v62, %v3486_v52  ;;  %v1844_v62 = vld [vmem:[%s3765_s2 + $0x18] sm:$0xff] }
 0x536   : > { %v2825_v4 = vunpack.i.h.bf16 %v2823_v54  ;;  %v2824_v10 = vunpack.i.l.bf16 %v2823_v54 }
 0x537   : > { %2480 = vmatmul.mubr.msk.f32.gmra.mrb[30].mxu0 %vm389_vm3, %v1206_v9 }
 0x538   : > { %v2672_v30 = vpack.c.bf16 %v2825_v4, %v2824_v10  ;;  %2482 = vmatprep.mubr.msk.f32.mxu0 %vm2965_vm0, %v2966_v11  ;;  %v2931_v63 = vpop.eup %2930 }
 0x539   : > { %v2828_v28 = vpop.permute.xlu0 %2827  ;;  %v1214_v49 = vmul.f32 %v2931_v63, %v3490_v18 }
 0x53a   : > { %v2830_v59 = vunpack.i.h.bf16 %v2828_v28  ;;  %v2829_v15 = vunpack.i.l.bf16 %v2828_v28  ;;  %2673 = vmatpush3.bf16.msra.mxu0 %v2672_v30 }
 0x53b   : > { %2483 = vmatmul.mubr.msk.f32.gmra.mrb[32].mxu0 %vm389_vm3, %v1208_v58  ;;  %2674 = vmatprep.subr.bf16.mxu0 %v2963_v0 }
 0x53c   : > { %v2675_v60 = vpack.c.bf16 %v2830_v59, %v2829_v15  ;;  %2485 = vmatprep.mubr.msk.f32.mxu0 %vm2965_vm0, %v2966_v11  ;;  %v2933_v31 = vpop.eup %2932  ;;  %v1841_v59 = vld [vmem:[%s3765_s2] sm:$0xff]  ;;  %v1842_v15 = vld [vmem:[%s3765_s2 + $0x8] sm:$0xff] }
 0x53d   : > { %v2833_v61 = vpop.permute.xlu0 %2832  ;;  %v1216_v43 = vmul.f32 %v2933_v31, %v3494_v23 }
 0x53e   : > { %v2835_v56 = vunpack.i.h.bf16 %v2833_v61  ;;  %v2834_v1 = vunpack.i.l.bf16 %v2833_v61  ;;  %2676 = vmatpush3.bf16.msra.mxu0 %v2675_v60  ;;  %v1843_v60 = vld [vmem:[%s3765_s2 + $0x10] sm:$0xff] }
 0x53f   : > { %2486 = vmatmul.mubr.msk.f32.gmra.mrb[34].mxu0 %vm389_vm3, %v1210_v33  ;;  %2677 = vmatprep.subr.bf16.mxu0 %v2963_v0  ;;  %v2681_v33 = vpack.c.bf16 %v1842_v15, %v1841_v59 }
 0x540   : > { %v2678_v7 = vpack.c.bf16 %v2835_v56, %v2834_v1  ;;  %2488 = vmatprep.mubr.msk.f32.mxu0 %vm2965_vm0, %v2966_v11  ;;  %v2684_v56 = vpack.c.bf16 %v1844_v62, %v1843_v60 }
 0x541   : > { %2688 = vmatpush3.bf16.msra.mxu1 %v2681_v33 }
 0x542   : > { %2679 = vmatpush3.bf16.msra.mxu0 %v2678_v7  ;;  %2687 = vmatprep.subr.bf16.mxu1 %v2963_v0 }
 0x543   : > { %2489 = vmatmul.mubr.msk.f32.gmra.mrb[36].mxu0 %vm389_vm3, %v1212_v21  ;;  %2544 = vmatprep.subr.mxu0 %v2966_v11 }
 0x544   : > { %2491 = vmatprep.mubr.msk.f32.mxu0 %vm2965_vm0, %v2966_v11 }
 0x545   : > { %2689 = vmatpush3.bf16.msra.mxu1 %v2684_v56 }
 0x547   : > { %2492 = vmatmul.mubr.msk.f32.gmra.mrb[38].mxu0 %vm389_vm3, %v1214_v49 }
 0x548   : > { %2494 = vmatprep.mubr.msk.f32.mxu0 %vm2965_vm0, %v2966_v11 }
 0x54b   : > { %2495 = vmatmul.mubr.msk.f32.gmra.mrb[40].mxu0 %vm389_vm3, %v1216_v43 }
 0x54c   : > { %2546 = vmatprep.mubr.msk.f32.mxu0 %vm2965_vm0, %v2966_v11 }
 0x562   : > { %v1559_v52 = vpop.xlane.xlu1 %1558 }
 0x563   : > { %2934 = vrcp.f32 %v1559_v52 }
 0x56d   : > { %v2935_v29 = vpop.eup %2934 }
 0x56e   : > { %v1562_v46 = vpop.xlane.xlu0 %1561  ;;  %v1571_v18 = vpop.xlane.xlu1 %1570  ;;  %v1579_v5 = vmul.f32 %v2935_v29, %v3519_v2 }
 0x56f   : > { %2936 = vrcp.f32 %v1562_v46 }
 0x572   : > { %v1565_v16 = vpop.xlane.xlu0 %1564  ;;  %v1574_v23 = vpop.xlane.xlu1 %1573 }
 0x573   : > { %2938 = vrcp.f32 %v1565_v16 }
 0x576   : > { %v1568_v13 = vpop.xlane.xlu0 %1567  ;;  %v1577_v2 = vpop.xlane.xlu1 %1576 }
 0x577   : > { %2940 = vrcp.f32 %v1568_v13 }
 0x578   : > { %2942 = vrcp.f32 %v1571_v18 }
 0x579   : > { %v2937_v19 = vpop.eup %2936  ;;  %2944 = vrcp.f32 %v1574_v23 }
 0x57a   : > { %v1605_v24 = vpop.permute.xlu0 %1604  ;;  %v1581_v17 = vmul.f32 %v2937_v19, %v3527_v38  ;;  %2946 = vrcp.f32 %v1577_v2 }
 0x57b   : > { %2545 = vmatpush3.msra.mxu0 %v1605_v24 }
 0x57c   : > { %2547 = vmatmul.mubr.msk.f32.vlgmr.msra.gmra.mrb[42].mxu0 %vm389_vm3, %v1579_v5  ;;  %2680 = vmatprep.subr.bf16.mxu0 %v2963_v0 }
 0x57d   : > { %2549 = vmatprep.mubr.msk.f32.mxu0 %vm2965_vm0, %v2966_v11  ;;  %v2939_v34 = vpop.eup %2938  ;;  %2682 = vmatpush3.bf16.msra.mxu0 %v2681_v33 }
 0x57e   : > { %v1583_v25 = vmul.f32 %v2939_v34, %v3533_v36  ;;  %2683 = vmatprep.subr.bf16.mxu0 %v2963_v0 }
 0x580   : > { %2550 = vmatmul.mubr.msk.f32.gmra.mrb[44].mxu0 %vm389_vm3, %v1581_v17 }
 0x581   : > { %2552 = vmatprep.mubr.msk.f32.mxu0 %vm2965_vm0, %v2966_v11  ;;  %v2941_v14 = vpop.eup %2940  ;;  %2685 = vmatpush3.bf16.msra.mxu0 %v2684_v56 }
 0x582   : > { %v1585_v20 = vmul.f32 %v2941_v14, %v3543_v47  ;;  %v2943_v38 = vpop.eup %2942 }
 0x583   : > { %v1587_v42 = vmul.f32 %v2943_v38, %v3529_v22  ;;  %v2945_v44 = vpop.eup %2944 }
 0x584   : > { %2553 = vmatmul.mubr.msk.f32.gmra.mrb[46].mxu0 %vm389_vm3, %v1583_v25  ;;  %v1589_v36 = vmul.f32 %v2945_v44, %v3537_v48  ;;  %v2947_v55 = vpop.eup %2946 }
 0x585   : > { %2555 = vmatprep.mubr.msk.f32.mxu0 %vm2965_vm0, %v2966_v11  ;;  %v1591_v47 = vmul.f32 %v2947_v55, %v3545_v50 }
 0x588   : > { %2556 = vmatmul.mubr.msk.f32.gmra.mrb[48].mxu0 %vm389_vm3, %v1585_v20 }
 0x589   : > { %2558 = vmatprep.mubr.msk.f32.mxu0 %vm2965_vm0, %v2966_v11 }
 0x58c   : > { %2559 = vmatmul.mubr.msk.f32.gmra.mrb[50].mxu0 %vm389_vm3, %v1587_v42 }
 0x58d   : > { %2561 = vmatprep.mubr.msk.f32.mxu0 %vm2965_vm0, %v2966_v11 }
 0x590   : > { %2562 = vmatmul.mubr.msk.f32.gmra.mrb[52].mxu0 %vm389_vm3, %v1589_v36 }
 0x591   : > { %2564 = vmatprep.mubr.msk.f32.mxu0 %vm2965_vm0, %v2966_v11 }
 0x594   : > { %2565 = vmatmul.mubr.msk.f32.gmra.mrb[54].mxu0 %vm389_vm3, %v1591_v47 }
 0x595   : > { %2575 = vmatprep.mubr.msk.f32.mxu0 %vm2965_vm0, %v2966_v11 }
 0x5de   : > { %v950_v22 = vpop.f32.mrb[14].mxu0 }
 0x5df   : > { %v2408_v53 = vpop.f32.mrb[15].mxu0 }
 0x5e2   : > { %v955_v45 = vpop.f32.mrb[16].mxu0 }
 0x5e3   : > { %1743 = vrot.lane.b32.xlu1 %v955_v45, %s2977_s6  ;;  %v2411_v48 = vpop.f32.mrb[17].mxu0 }
 0x5e6   : > { %v960_v40 = vpop.f32.mrb[18].mxu0 }
 0x5e7   : > { %1745 = vrot.lane.b32.xlu0 %v960_v40, %s2977_s6  ;;  %v2414_v27 = vpop.f32.mrb[19].mxu0 }
 0x5ea   : > { %v965_v51 = vpop.f32.mrb[20].mxu0 }
 0x5eb   : > { %1747 = vrot.lane.b32.xlu0 %v965_v51, %s2977_s6  ;;  %v2417_v50 = vpop.f32.mrb[21].mxu0 }
 0x5ee   : > { %v970_v57 = vpop.f32.mrb[22].mxu0 }
 0x5ef   : > { %1749 = vrot.lane.b32.xlu1 %v970_v57, %s2977_s6  ;;  %v2420_v26 = vpop.f32.mrb[23].mxu0 }
 0x5f2   : > { %v975_v54 = vpop.f32.mrb[24].mxu0 }
 0x5f3   : > { %1751 = vrot.lane.b32.xlu0 %v975_v54, %s2977_s6  ;;  %v2423_v9 = vpop.f32.mrb[25].mxu0 }
 0x5f6   : > { %v980_v8 = vpop.f32.mrb[26].mxu0 }
 0x5f7   : > { %v2426_v4 = vpop.f32.mrb[27].mxu0 }
 0x606   : > { %v1325_v10 = vpop.f32.mrb[28].mxu0 }
 0x607   : > { %v2478_v30 = vpop.f32.mrb[29].mxu0 }
 0x60a   : > { %v1330_v28 = vpop.f32.mrb[30].mxu0 }
 0x60b   : > { %1771 = vrot.lane.b32.xlu0 %v1330_v28, %s2978_s7  ;;  %v2481_v58 = vpop.f32.mrb[31].mxu0 }
 0x60e   : > { %v1335_v32 = vpop.f32.mrb[32].mxu0 }
 0x60f   : > { %1773 = vrot.lane.b32.xlu0 %v1335_v32, %s2978_s7  ;;  %v2484_v61 = vpop.f32.mrb[33].mxu0 }
 0x612   : > { %v1340_v1 = vpop.f32.mrb[34].mxu0 }
 0x613   : > { %1775 = vrot.lane.b32.xlu1 %v1340_v1, %s2978_s7  ;;  %v2487_v7 = vpop.f32.mrb[35].mxu0 }
 0x616   : > { %v1345_v21 = vpop.f32.mrb[36].mxu0 }
 0x617   : > { %1777 = vrot.lane.b32.xlu0 %v1345_v21, %s2978_s7  ;;  %v2490_v63 = vpop.f32.mrb[37].mxu0 }
 0x61a   : > { %v1350_v49 = vpop.f32.mrb[38].mxu0 }
 0x61b   : > { %1779 = vrot.lane.b32.xlu1 %v1350_v49, %s2978_s7  ;;  %v2493_v31 = vpop.f32.mrb[39].mxu0 }
 0x61e   : > { %v1355_v43 = vpop.f32.mrb[40].mxu0 }
 0x61f   : > { %v2496_v52 = vpop.f32.mrb[41].mxu0 }
 0x620   : > { %v1976_v52 = vld [vmem:[%s3728_s21 + $0x10] sm:$0xff] }
 0x64f   : > { %v1700_v46 = vpop.f32.mrb[42].mxu0 }
 0x650   : > { %v2548_v16 = vpop.f32.mrb[43].mxu0 }
 0x653   : > { %v1705_v18 = vpop.f32.mrb[44].mxu0 }
 0x654   : > { %1799 = vrot.lane.b32.xlu0 %v1705_v18, %s2979_s18  ;;  %v2551_v0 = vpop.f32.mrb[45].mxu0 }
 0x655   : > { %v1744_v44 = vpop.permute.xlu1 %1743 }
 0x656   : > { %v1819_v53 = vsel %vm253_vm1, %v3322_v6, %v1744_v44 }
 0x657   : > { %v1710_v13 = vpop.f32.mrb[46].mxu0 }
 0x658   : > { %1753 = vrot.lane.b32.xlu0 %v980_v8, %s2977_s6  ;;  %1801 = vrot.lane.b32.xlu1 %v1710_v13, %s2979_s18  ;;  %v2554_v29 = vpop.f32.mrb[47].mxu0  ;;  %v1977_v13 = vld [vmem:[%s3728_s21 + $0x18] sm:$0xff] }
 0x659   : > { %v1746_v14 = vpop.permute.xlu0 %1745 }
 0x65a   : > { %v1820_v51 = vsel %vm253_vm1, %v3324_v12, %v1746_v14  ;;  %v1979_v14 = vld [vmem:[%s3728_s21 + $0x28] sm:$0xff] }
 0x65b   : > { %v1715_v5 = vpop.f32.mrb[48].mxu0 }
 0x65c   : > { %1741 = vrot.lane.b32.xlu1 %v950_v22, %s2977_s6  ;;  %1803 = vrot.lane.b32.xlu0 %v1715_v5, %s2979_s18  ;;  %v2557_v24 = vpop.f32.mrb[49].mxu0 }
 0x65d   : > { %v1748_v20 = vpop.permute.xlu0 %1747 }
 0x65e   : > { %v1821_v54 = vsel %vm253_vm1, %v3330_v35, %v1748_v20 }
 0x65f   : > { %v1720_v19 = vpop.f32.mrb[50].mxu0 }
 0x660   : > { %1781 = vrot.lane.b32.xlu0 %v1355_v43, %s2978_s7  ;;  %1805 = vrot.lane.b32.xlu1 %v1720_v19, %s2979_s18  ;;  %v2560_v23 = vpop.f32.mrb[51].mxu0 }
 0x661   : > { %v1750_v36 = vpop.permute.xlu1 %1749  ;;  %v1978_v23 = vld [vmem:[%s3728_s21 + $0x20] sm:$0xff] }
 0x663   : > { %v1725_v17 = vpop.f32.mrb[52].mxu0 }
 0x664   : > { %1769 = vrot.lane.b32.xlu1 %v1325_v10, %s2978_s7  ;;  %1807 = vrot.lane.b32.xlu0 %v1725_v17, %s2979_s18  ;;  %v2563_v34 = vpop.f32.mrb[53].mxu0  ;;  %v1822_v10 = vsel %vm253_vm1, %v3332_v37, %v1750_v36  ;;  %v1974_v36 = vld [vmem:[%s3728_s21] sm:$0xff] }
 0x665   : > { %v1752_v38 = vpop.permute.xlu0 %1751 }
 0x666   : > { %v1823_v32 = vsel %vm253_vm1, %v3334_v39, %v1752_v38 }
 0x667   : > { %v1730_v2 = vpop.f32.mrb[54].mxu0 }
 0x668   : > { %1797 = vrot.lane.b32.xlu1 %v1700_v46, %s2979_s18  ;;  %1809 = vrot.lane.b32.xlu0 %v1730_v2, %s2979_s18  ;;  %v2566_v25 = vpop.f32.mrb[55].mxu0 }
 0x67d   : > { %v1772_v42 = vpop.permute.xlu0 %1771 }
 0x67e   : > { %v1827_v45 = vsel %vm1825_vm4, %v1819_v53, %v1772_v42 }
 0x681   : > { %v1774_v55 = vpop.permute.xlu0 %1773 }
 0x682   : > { %v1828_v50 = vsel %vm1825_vm4, %v1820_v51, %v1774_v55 }
 0x685   : > { %v1776_v47 = vpop.permute.xlu1 %1775 }
 0x686   : > { %v1829_v9 = vsel %vm1825_vm4, %v1821_v54, %v1776_v47  ;;  %v1980_v47 = vld [vmem:[%s3728_s21 + $0x30] sm:$0xff] }
 0x689   : > { %v1778_v22 = vpop.permute.xlu0 %1777 }
 0x68a   : > { %v1830_v30 = vsel %vm1825_vm4, %v1822_v10, %v1778_v22 }
 0x68d   : > { %v1780_v48 = vpop.permute.xlu1 %1779 }
 0x68e   : > { %v1831_v59 = vsel %vm1825_vm4, %v1823_v32, %v1780_v48 }
 0x6c6   : > { %v1800_v40 = vpop.permute.xlu0 %1799 }
 0x6c7   : > { %v1835_v27 = vsel %vm1833_vm5, %v1827_v45, %v1800_v40 }
 0x6c8   : > { %2579 = vmatmul.mubr.msk.f32.vlgmr.msra.gmra.mrb[56].mxu1 %vm1852_vm6, %v1835_v27 }
 0x6c9   : > { %2581 = vmatprep.mubr.msk.f32.mxu1 %vm2965_vm0, %v2966_v11 }
 0x6ca   : > { %v1754_v57 = vpop.permute.xlu0 %1753  ;;  %v1802_v26 = vpop.permute.xlu1 %1801 }
 0x6cb   : > { %v1836_v6 = vsel %vm1833_vm5, %v1828_v50, %v1802_v26  ;;  %v1824_v61 = vsel %vm253_vm1, %v3336_v41, %v1754_v57  ;;  %v1975_v41 = vld [vmem:[%s3728_s21 + $0x8] sm:$0xff] }
 0x6cc   : > { %2582 = vmatmul.mubr.msk.f32.gmra.mrb[58].mxu1 %vm1852_vm6, %v1836_v6 }
 0x6cd   : > { %2584 = vmatprep.mubr.msk.f32.mxu1 %vm2965_vm0, %v2966_v11 }
 0x6ce   : > { %v1742_v12 = vpop.permute.xlu1 %1741  ;;  %v1804_v8 = vpop.permute.xlu0 %1803 }
 0x6cf   : > { %v1837_v4 = vsel %vm1833_vm5, %v1829_v9, %v1804_v8  ;;  %v1818_v33 = vsel %vm253_vm1, %v3320_v3, %v1742_v12 }
 0x6d0   : > { %2585 = vmatmul.mubr.msk.f32.gmra.mrb[60].mxu1 %vm1852_vm6, %v1837_v4 }
 0x6d1   : > { %2587 = vmatprep.mubr.msk.f32.mxu1 %vm2965_vm0, %v2966_v11 }
 0x6d2   : > { %v1782_v35 = vpop.permute.xlu0 %1781  ;;  %v1806_v28 = vpop.permute.xlu1 %1805 }
 0x6d3   : > { %v1838_v58 = vsel %vm1833_vm5, %v1830_v30, %v1806_v28  ;;  %v1832_v39 = vsel %vm1825_vm4, %v1824_v61, %v1782_v35 }
 0x6d4   : > { %2588 = vmatmul.mubr.msk.f32.gmra.mrb[62].mxu1 %vm1852_vm6, %v1838_v58 }
 0x6d5   : > { %2590 = vmatprep.mubr.msk.f32.mxu1 %vm2965_vm0, %v2966_v11 }
 0x6d6   : > { %v1770_v37 = vpop.permute.xlu1 %1769  ;;  %v1808_v15 = vpop.permute.xlu0 %1807 }
 0x6d7   : > { %v1839_v60 = vsel %vm1833_vm5, %v1831_v59, %v1808_v15  ;;  %v1826_v62 = vsel %vm1825_vm4, %v1818_v33, %v1770_v37 }
 0x6d8   : > { %2591 = vmatmul.mubr.msk.f32.gmra.mrb[64].mxu1 %vm1852_vm6, %v1839_v60 }
 0x6d9   : > { %2593 = vmatprep.mubr.msk.f32.mxu1 %vm2965_vm0, %v2966_v11  ;;  %v2154_v11 = vld [vmem:[%s3766_s3] ss:$0 sm:$0xff] }
 0x6da   : > { %v1798_v56 = vpop.permute.xlu1 %1797  ;;  %v1810_v1 = vpop.permute.xlu0 %1809 }
 0x6db   : > { %v1834_v7 = vsel %vm1833_vm5, %v1826_v62, %v1798_v56  ;;  %v1840_v21 = vsel %vm1833_vm5, %v1832_v39, %v1810_v1 }
 0x6dc   : > { %2576 = vmatmul.mubr.msk.f32.vlgmr.msra.gmra.mrb[56].mxu0 %vm1852_vm6, %v1834_v7  ;;  %2594 = vmatmul.mubr.msk.f32.gmra.mrb[66].mxu1 %vm1852_vm6, %v1840_v21 }
 0x79b   : > { %v1945_v3 = vpop.f32.mrb[56].mxu1 }
 0x79c   : > { %v1946_v63 = vadd.f32 %v2154_v11, %v1945_v3  ;;  %v2580_v49 = vpop.f32.mrb[57].mxu1 }
 0x79e   : > { %v1982_v31 = vadd.f32 %v1975_v41, %v1946_v63 }
 0x79f   : > { %v1950_v43 = vpop.f32.mrb[58].mxu1 }
 0x7a0   : > { %1989 = vst.msk [vmem:[%s3738_s26 + $0x8] sm:$0xff] %vm1852_vm6, %v1982_v31  ;;  %v1951_v46 = vadd.f32 %v2154_v11, %v1950_v43  ;;  %v2583_v16 = vpop.f32.mrb[59].mxu1 }
 0x7a2   : > { %v1983_v18 = vadd.f32 %v1976_v52, %v1951_v46 }
 0x7a3   : > { %v1955_v0 = vpop.f32.mrb[60].mxu1 }
 0x7a4   : > { %1990 = vst.msk [vmem:[%s3738_s26 + $0x10] sm:$0xff] %vm1852_vm6, %v1983_v18  ;;  %v1956_v29 = vadd.f32 %v2154_v11, %v1955_v0  ;;  %v2586_v5 = vpop.f32.mrb[61].mxu1 }
 0x7a6   : > { %v1984_v24 = vadd.f32 %v1977_v13, %v1956_v29 }
 0x7a7   : > { %v1960_v19 = vpop.f32.mrb[62].mxu1 }
 0x7a8   : > { %1991 = vst.msk [vmem:[%s3738_s26 + $0x18] sm:$0xff] %vm1852_vm6, %v1984_v24  ;;  %v1961_v17 = vadd.f32 %v2154_v11, %v1960_v19  ;;  %v2589_v34 = vpop.f32.mrb[63].mxu1 }
 0x7aa   : > { %v1985_v2 = vadd.f32 %v1978_v23, %v1961_v17 }
 0x7ab   : > { %v1965_v25 = vpop.f32.mrb[64].mxu1 }
 0x7ac   : > { %1992 = vst.msk [vmem:[%s3738_s26 + $0x20] sm:$0xff] %vm1852_vm6, %v1985_v2  ;;  %v1966_v20 = vadd.f32 %v2154_v11, %v1965_v25  ;;  %v2592_v38 = vpop.f32.mrb[65].mxu1 }
 0x7ae   : > { %v1986_v42 = vadd.f32 %v1979_v14, %v1966_v20 }
 0x7af   : > { %v1940_v44 = vpop.f32.mrb[56].mxu0  ;;  %v1970_v55 = vpop.f32.mrb[66].mxu1 }
 0x7b0   : > { %1993 = vst.msk [vmem:[%s3738_s26 + $0x28] sm:$0xff] %vm1852_vm6, %v1986_v42  ;;  %v1941_v22 = vadd.f32 %v2154_v11, %v1940_v44  ;;  %v1971_v53 = vadd.f32 %v2154_v11, %v1970_v55  ;;  %v2577_v45 = vpop.f32.mrb[57].mxu0  ;;  %v2595_v48 = vpop.f32.mrb[67].mxu1 }
 0x7b2   : > { %v1981_v40 = vadd.f32 %v1974_v36, %v1941_v22  ;;  %v1987_v27 = vadd.f32 %v1980_v47, %v1971_v53 }
 0x7b4   : > { %1988 = vst.msk [vmem:[%s3738_s26] sm:$0xff] %vm1852_vm6, %v1981_v40  ;;  %1994 = vst.msk [vmem:[%s3738_s26 + $0x30] sm:$0xff] %vm1852_vm6, %v1987_v27 }
 0x7b5 PF: > { %s14_s15 = sadd.s32 1, %s2961_s15  }
 0x7b6   : > { %p11_p4 = scmp.ge.s32.totalorder %s14_s15, 4  }
 0x7b8   :  { %13 = sbr.rel (!%p11_p4) target bundleno = 1 (0x1), region = 69 }

// kernel: _lambda_.26
= control target key start
LH: loop header
LB: loop body
LE: loop exit
PB: predicated region body
PF: predicated region fallthrough
CT: control target
= control target key end

     0   :  { %s2041_s18 = smov 0   ;;  %s2043_s19 = smov 0   ;;  %s2966_s0 = inlined_call_operand.vmem [shape: f32[112,32], index: 0, kind: input, shape index: {}]   ;;  %s2967_s1 = inlined_call_operand.vmem [shape: f32[1,32], index: 1, kind: input, shape index: {}]   ;;  %s2968_s2 = inlined_call_operand.vmem [shape: f32[1,32], index: 2, kind: input, shape index: {}]   ;;  %s2969_s3 = inlined_call_operand.vmem [shape: f32[32,3072], index: 3, kind: input, shape index: {}]   ;;  %s2970_s4 = inlined_call_operand.vmem [shape: f32[1,3072], index: 4, kind: input, shape index: {}]   ;;  %s2971_s5 = inlined_call_operand.vmem [shape: f32[112,3072], index: 5, kind: output, shape index: {}]  }
   0x1   :  { %s2045_s20 = smov 0   ;;  %s2047_s21 = smov 0  }
   0x2   :  { %s2049_s22 = smov 0   ;;  %s2051_s23 = smov 0  }
   0x3   :  { %s2053_s24 = smov 0   ;;  %s2055_s25 = smov 0  }
   0x4   :  { %s2057_s26 = smov 0  }
   0x5 LB: > { %s1688_s27 = sadd.s32 4294967295, %s2008_s26   ;;  %s24_s28 = sadd.s32 1, %s2000_s24  ;;  %s2008_s26 = sphi %s2057_s26, %s15_s26   ;;  %s2004_s25 = sphi %s2055_s25, %s3002_s25   ;;  %s2000_s24 = sphi %s2053_s24, %s3001_s24   ;;  %s1996_s23 = sphi %s2051_s23, %s3000_s23   ;;  %s1992_s22 = sphi %s2049_s22, %s2999_s22   ;;  %s1988_s21 = sphi %s2047_s21, %s2998_s21   ;;  %s1984_s20 = sphi %s2045_s20, %s2997_s20   ;;  %s1980_s19 = sphi %s2043_s19, %s2996_s19   ;;  %s1976_s18 = sphi %s2041_s18, %s2995_s18  }
   0x6   : > { %p25_p0 = scmp.ge.s32.totalorder %s24_s28, 6  ;;  %s27_s29 = sadd.s32 1, %s2004_s25 }
   0x7   : > { %s102_s30 = sadd.s32 1, %s1988_s21  ;;  %p109_p1 = scmp.ne.s32.totalorder %s1988_s21, %s1984_s20 }
   0x8   : > { %s3004_s28 = smov (%p25_p0, %s24_s28), 0  ;;  %s3006_s29 = smov (!%p25_p0, %s27_s29), %s2004_s25 }
   0x9   : > { %s99_s6 = ssub.s32 %s2000_s24, %s3004_s28  ;;  %p110_p2 = scmp.eq.s32.totalorder %s2008_s26, 0 }
   0xa   : > { %p29_p3 = scmp.ge.s32.totalorder %s3006_s29, 2  ;;  %p100_p4 = scmp.eq.s32.totalorder %s99_s6, 0 }
   0xb   : > { %p111_p5 = por %p110_p2, %p109_p1  ;;  %s156_s7 = sadd.s32 1, %s1980_s19 }
   0xc   : > { %s3008_s29 = smov (%p29_p3, %s3006_s29), 0  ;;  %p166_p6 = scmp.ne.s32.totalorder %s1980_s19, %s1976_s18 }
   0xd   : > { %s2102_s8 = scalar_select %p100_p4, %s1988_s21, %s102_s30  }
   0xe   : > { %s151_s9 = ssub.s32 %s2004_s25, %s3008_s29  ;;  %p167_p7 = scmp.eq.s32.totalorder %s1688_s27, 11 }
   0xf   : > { %s153_s10 = sor.u32 %s151_s9, %s99_s6  ;;  %p1691_p10 = scmp.ge.s32.totalorder %s2008_s26, 12 }
  0x10   : > { %p154_p8 = scmp.eq.s32.totalorder %s153_s10, 0  ;;  %p2108_p9 = por %p167_p7, %p166_p6 }
  0x11   : > { %195 = sbr.rel (%p1691_p10) target bundleno = 36 (0x24), region = 24 }
  0x12   : > { %s2113_s12 = scalar_select %p154_p8, %s1980_s19, %s156_s7  }
  0x18   : > { %207 = sbr.rel (!%p111_p5) target bundleno = 36 (0x24), region = 32  ;;  %s209_s13 = sand.u32 (%p111_p5), 1, %s1988_s21  }
  0x19   : > { %s1719_s14 = sshll.u32 (%p111_p5), %s2000_s24, 5  ;;  %s1692_s15 = sshll.u32 (%p111_p5), %s209_s13, 7 }
  0x1a   : > { %s2121_s27 = scalar_lea.vmem (%p111_p5), %s2969_s3, %s1719_s14  ;;  %s211_s30 = scalar_lea.vmem (%p111_p5), [#allocation2], %s1692_s15 }
  0x1b   : > { %v227_v0 = vld [vmem:[%s2121_s27] sm:$0xff] (%p111_p5)  ;;  %v229_v1 = vld [vmem:[%s2121_s27 + $0x8] sm:$0xff] (%p111_p5)  ;;  %v231_v2 = vld [vmem:[%s2121_s27 + $0x10] sm:$0xff] (%p111_p5) }
  0x1c   : > { %228 = vst [vmem:[%s211_s30] sm:$0xff] (%p111_p5), %v227_v0  ;;  %230 = vst [vmem:[%s211_s30 + $0x8] sm:$0xff] (%p111_p5), %v229_v1  ;;  %v233_v3 = vld [vmem:[%s2121_s27 + $0x18] sm:$0xff] (%p111_p5)  ;;  %v235_v4 = vld [vmem:[%s2121_s27 + $0xc0] sm:$0xff] (%p111_p5) }
  0x1d   : > { %232 = vst [vmem:[%s211_s30 + $0x10] sm:$0xff] (%p111_p5), %v231_v2  ;;  %v237_v5 = vld [vmem:[%s2121_s27 + $0xc8] sm:$0xff] (%p111_p5)  ;;  %234 = vst [vmem:[%s211_s30 + $0x18] sm:$0xff] (%p111_p5), %v233_v3  ;;  %v239_v6 = vld [vmem:[%s2121_s27 + $0xd0] sm:$0xff] (%p111_p5) }
  0x1e   : > { %236 = vst [vmem:[%s211_s30 + $0x20] sm:$0xff] (%p111_p5), %v235_v4  ;;  %238 = vst [vmem:[%s211_s30 + $0x28] sm:$0xff] (%p111_p5), %v237_v5  ;;  %v241_v7 = vld [vmem:[%s2121_s27 + $0xd8] sm:$0xff] (%p111_p5)  ;;  %v243_v8 = vld [vmem:[%s2121_s27 + $0x180] sm:$0xff] (%p111_p5) }
  0x1f   : > { %240 = vst [vmem:[%s211_s30 + $0x30] sm:$0xff] %v239_v6  ;;  %242 = vst [vmem:[%s211_s30 + $0x38] sm:$0xff] %v241_v7  ;;  %v245_v9 = vld [vmem:[%s2121_s27 + $0x188] sm:$0xff]  ;;  %v247_v10 = vld [vmem:[%s2121_s27 + $0x190] sm:$0xff] }
  0x20   : > { %244 = vst [vmem:[%s211_s30 + $0x40] sm:$0xff] %v243_v8  ;;  %v249_v11 = vld [vmem:[%s2121_s27 + $0x198] sm:$0xff]  ;;  %246 = vst [vmem:[%s211_s30 + $0x48] sm:$0xff] %v245_v9  ;;  %v251_v12 = vld [vmem:[%s2121_s27 + $0x240] sm:$0xff] }
  0x21   : > { %248 = vst [vmem:[%s211_s30 + $0x50] sm:$0xff] %v247_v10  ;;  %250 = vst [vmem:[%s211_s30 + $0x58] sm:$0xff] %v249_v11  ;;  %v253_v13 = vld [vmem:[%s2121_s27 + $0x248] sm:$0xff]  ;;  %v255_v14 = vld [vmem:[%s2121_s27 + $0x250] sm:$0xff] }
  0x22   : > { %252 = vst [vmem:[%s211_s30 + $0x60] sm:$0xff] %v251_v12  ;;  %254 = vst [vmem:[%s211_s30 + $0x68] sm:$0xff] %v253_v13  ;;  %v257_v15 = vld [vmem:[%s2121_s27 + $0x258] sm:$0xff] }
  0x23   : > { %256 = vst [vmem:[%s211_s30 + $0x70] sm:$0xff] %v255_v14  ;;  %258 = vst [vmem:[%s211_s30 + $0x78] sm:$0xff] %v257_v15 }
  0x24 PF: > { %p1695_p11 = scmp.ge.s32.totalorder %s2008_s26, 1  ;;  %p271_p12 = scmp.lt.s32.totalorder %s2008_s26, 13 }
  0x26   : > { %p272_p13 = pnand %p1695_p11, %p271_p12 }
  0x28   : > { %275 = sbr.rel (%p272_p13) target bundleno = 800 (0x320), region = 59 }
  0x2f   : > { %s313_s6 = smul.u32 7, %s1996_s23  ;;  %vm334_vm0 = vcmask 261120   ;;  %s278_s14 = sand.u32 1, %s1984_s20  }
  0x30   : > { %s1696_s15 = sshll.u32 %s278_s14, 7 }
  0x31   : > { %p314_p0 = scmp.lt.s32.totalorder %s313_s6, 13  ;;  %s280_s16 = scalar_lea.vmem [#allocation2], %s1696_s15 }
  0x32   : > { %v456_v1 = vld [vmem:[%s280_s16 + $0x8] sm:$0xff]  ;;  %v458_v3 = vld [vmem:[%s280_s16 + $0x18] sm:$0xff]  ;;  %v455_v6 = vld [vmem:[%s280_s16] sm:$0xff]  ;;  %s1738_s15 = smul.u32 (%p2108_p9), 168, %s1996_s23 }
  0x33   : > { %s3010_s6 = smov (!%p314_p0, %s313_s6), 13  ;;  %v460_v2 = vld [vmem:[%s280_s16 + $0x28] sm:$0xff]  ;;  %v462_v5 = vld [vmem:[%s280_s16 + $0x38] sm:$0xff]  ;;  %v459_v7 = vld [vmem:[%s280_s16 + $0x20] sm:$0xff] }
  0x34   : > { %s1697_s7 = sshll.u32 %s3010_s6, 3  ;;  %v1720_v4 = vpack.c.bf16 %v460_v2, %v456_v1  ;;  %v1728_v8 = vpack.c.bf16 %v462_v5, %v458_v3  ;;  %v1722_v9 = vpack.c.bf16 %v459_v7, %v455_v6  ;;  %v457_v10 = vld [vmem:[%s280_s16 + $0x10] sm:$0xff]  ;;  %v464_v13 = vld [vmem:[%s280_s16 + $0x48] sm:$0xff]  ;;  %v466_v15 = vld [vmem:[%s280_s16 + $0x58] sm:$0xff]  ;;  %s2230_s6 = sshll.u32 %s1992_s22, 2 }
  0x35   : > { %s317_s13 = scalar_lea.vmem %s2966_s0, %s1697_s7  ;;  %v461_v11 = vld [vmem:[%s280_s16 + $0x30] sm:$0xff]  ;;  %v468_v14 = vld [vmem:[%s280_s16 + $0x68] sm:$0xff]  ;;  %p321_p1 = scmp.lt.s32.totalorder %s2230_s6, 23 }
  0x36   : > { %v327_v16 = vld [vmem:[%s317_s13] sm:$0xff]  ;;  %v329_v17 = vld [vmem:[%s317_s13 + $0x10] sm:$0xff]  ;;  %v328_v18 = vld [vmem:[%s317_s13 + $0x8] sm:$0xff]  ;;  %1721 = vmatprep.subr.bf16.mxu0 %v1720_v4  ;;  %v1730_v12 = vpack.c.bf16 %v461_v11, %v457_v10  ;;  %1729 = vmatprep.subr.bf16.mxu1 %v1728_v8  ;;  %s310_s22 = sand.u32 1, %s1976_s18   ;;  %s1522_s11 = sadd.s32 (%p2108_p9), %s1738_s15, %s2230_s6 }
  0x37   : > { %v335_v19 = vsel %vm334_vm0, %v327_v16, 0.0  ;;  %v341_v20 = vsel %vm334_vm0, %v329_v17, 0.0  ;;  %v330_v21 = vld [vmem:[%s317_s13 + $0x18] sm:$0xff]  ;;  %v338_v22 = vsel %vm334_vm0, %v328_v18, 0.0  ;;  %v331_v24 = vld [vmem:[%s317_s13 + $0x20] sm:$0xff]  ;;  %v332_v25 = vld [vmem:[%s317_s13 + $0x28] sm:$0xff]  ;;  %1723 = vmatpush1.bf16.msra.mxu0 %v1722_v9 }
  0x38   : > { %336 = vadd.xlane.f32.xlu0 %v335_v19  ;;  %342 = vadd.xlane.f32.xlu1 %v341_v20  ;;  %v344_v23 = vsel %vm334_vm0, %v330_v21, 0.0  ;;  %v347_v26 = vsel %vm334_vm0, %v331_v24, 0.0  ;;  %v350_v27 = vsel %vm334_vm0, %v332_v25, 0.0  ;;  %v333_v28 = vld [vmem:[%s317_s13 + $0x30] sm:$0xff]  ;;  %v467_v19 = vld [vmem:[%s280_s16 + $0x60] sm:$0xff]  ;;  %s322_s7 = scalar_select %p321_p1, %s2230_s6, 23 }
  0x39   : > { %v353_v29 = vsel %vm334_vm0, %v333_v28, 0.0  ;;  %1731 = vmatpush1.bf16.msra.mxu1 %v1730_v12  ;;  %s2407_s18 = smul.u32 224, %s310_s22 }
  0x3a   : > { %s323_s13 = scalar_lea.vmem %s2970_s4, %s322_s7 }
  0x3b   : > { %s2433_s14 = scalar_lea.vmem [#allocation3], %s2407_s18 }
  0x3c   : > { %339 = vadd.xlane.f32.xlu0 %v338_v22  ;;  %345 = vadd.xlane.f32.xlu1 %v344_v23  ;;  %v465_v22 = vld [vmem:[%s280_s16 + $0x50] sm:$0xff] }
  0x3d   : > { %v469_v23 = vld [vmem:[%s280_s16 + $0x70] sm:$0xff] }
  0x40   : > { %348 = vadd.xlane.f32.xlu0 %v347_v26  ;;  %351 = vadd.xlane.f32.xlu1 %v350_v27 }
  0x44   : > { %354 = vadd.xlane.f32.xlu0 %v353_v29 }
  0xc5   : > { %v337_v30 = vpop.xlane.xlu0 %336  ;;  %v343_v31 = vpop.xlane.xlu1 %342 }
  0xc6   : > { %v357_v32 = vmul.f32 0.03125, %v337_v30  ;;  %v359_v33 = vmul.f32 0.03125, %v343_v31 }
  0xc8   : > { %v2152_v34 = vsub.f32 %v327_v16, %v357_v32  ;;  %v2154_v35 = vsub.f32 %v329_v17, %v359_v33  ;;  %v1724_v16 = vpack.c.bf16 %v468_v14, %v464_v13  ;;  %v470_v17 = vld [vmem:[%s280_s16 + $0x78] sm:$0xff] }
  0xc9   : > { %v340_v36 = vpop.xlane.xlu0 %339  ;;  %v346_v37 = vpop.xlane.xlu1 %345  ;;  %v1732_v20 = vpack.c.bf16 %v470_v17, %v466_v15  ;;  %v471_v17 = vld [vmem:[%s323_s13] sm:$0xf] }
  0xca   : > { %v358_v38 = vmul.f32 0.03125, %v340_v36  ;;  %v360_v39 = vmul.f32 0.03125, %v346_v37  ;;  %v371_v40 = vmul.f32 %v2152_v34, %v2152_v34  ;;  %v373_v41 = vmul.f32 %v2154_v35, %v2154_v35  ;;  %1725 = vmatprep.subr.bf16.mxu0 %v1724_v16 }
  0xcb   : > { %1733 = vmatprep.subr.bf16.mxu1 %v1732_v20 }
  0xcc   : > { %v2160_v42 = vsub.f32 %v328_v18, %v358_v38  ;;  %v2162_v43 = vsub.f32 %v330_v21, %v360_v39  ;;  %v378_v44 = vsel %vm334_vm0, %v371_v40, 0.0  ;;  %v384_v47 = vsel %vm334_vm0, %v373_v41, 0.0  ;;  %v463_v18 = vld [vmem:[%s280_s16 + $0x40] sm:$0xff]  ;;  %s1716_s16 = sshll.u32 (%p2108_p9), %s1522_s11, 3 }
  0xcd   : > { %379 = vadd.xlane.f32.xlu1 %v378_v44  ;;  %v349_v45 = vpop.xlane.xlu0 %348  ;;  %v352_v46 = vpop.xlane.xlu1 %351  ;;  %v1726_v21 = vpack.c.bf16 %v467_v19, %v463_v18  ;;  %s2893_s23 = scalar_lea.vmem (%p2108_p9), %s2971_s5, %s1716_s16 }
  0xce   : > { %v361_v48 = vmul.f32 0.03125, %v349_v45  ;;  %v362_v49 = vmul.f32 0.03125, %v352_v46  ;;  %v372_v50 = vmul.f32 %v2160_v42, %v2160_v42  ;;  %v374_v51 = vmul.f32 %v2162_v43, %v2162_v43 }
  0xcf   : > { %1727 = vmatpush1.bf16.msra.mxu0 %v1726_v21 }
  0xd0   : > { %v2170_v52 = vsub.f32 %v331_v24, %v361_v48  ;;  %v2172_v53 = vsub.f32 %v332_v25, %v362_v49  ;;  %v381_v54 = vsel %vm334_vm0, %v372_v50, 0.0  ;;  %v387_v57 = vsel %vm334_vm0, %v374_v51, 0.0  ;;  %v1699_v49 = vld [vmem:[%s2967_s1] ss:$0 sm:$0xff] }
  0xd1   : > { %385 = vadd.xlane.f32.xlu1 %v384_v47  ;;  %382 = vadd.xlane.f32.xlu0 %v381_v54  ;;  %v355_v55 = vpop.xlane.xlu0 %354  ;;  %v1734_v24 = vpack.c.bf16 %v469_v23, %v465_v22  ;;  %v2010_v25 = vmov 0.0  }
  0xd2   : > { %v363_v56 = vmul.f32 0.03125, %v355_v55  ;;  %v375_v58 = vmul.f32 %v2170_v52, %v2170_v52  ;;  %v376_v59 = vmul.f32 %v2172_v53, %v2172_v53  ;;  %578 = vmatprep.mubr.f32.mxu0 %v2010_v25  ;;  %685 = vmatprep.mubr.f32.mxu1 %v2010_v25  ;;  %v1700_v55 = vld [vmem:[%s2968_s2] ss:$0 sm:$0xff] }
  0xd3   : > { %1735 = vmatpush1.bf16.msra.mxu1 %v1734_v24 }
  0xd4   : > { %v2180_v60 = vsub.f32 %v333_v28, %v363_v56  ;;  %v390_v61 = vsel %vm334_vm0, %v375_v58, 0.0  ;;  %v393_v62 = vsel %vm334_vm0, %v376_v59, 0.0 }
  0xd5   : > { %388 = vadd.xlane.f32.xlu0 %v387_v57  ;;  %391 = vadd.xlane.f32.xlu1 %v390_v61 }
  0xd6   : > { %v377_v63 = vmul.f32 %v2180_v60, %v2180_v60 }
  0xd8   : > { %v396_v0 = vsel %vm334_vm0, %v377_v63, 0.0 }
  0xd9   : > { %394 = vadd.xlane.f32.xlu0 %v393_v62  ;;  %397 = vadd.xlane.f32.xlu1 %v396_v0 }
 0x15a   : > { %v380_v26 = vpop.xlane.xlu1 %379 }
 0x15b   : > { %v399_v27 = vmul.f32 0.03125, %v380_v26 }
 0x15d   : > { %v406_v28 = vadd.f32 1e-06, %v399_v27 }
 0x15e   : > { %v386_v29 = vpop.xlane.xlu1 %385  ;;  %v383_v30 = vpop.xlane.xlu0 %382 }
 0x15f   : > { %1812 = vrsqrt.f32 %v406_v28  ;;  %v401_v31 = vmul.f32 0.03125, %v386_v29  ;;  %v400_v32 = vmul.f32 0.03125, %v383_v30 }
 0x161   : > { %v408_v33 = vadd.f32 1e-06, %v401_v31  ;;  %v407_v36 = vadd.f32 1e-06, %v400_v32 }
 0x162   : > { %v392_v37 = vpop.xlane.xlu1 %391  ;;  %v389_v38 = vpop.xlane.xlu0 %388 }
 0x163   : > { %1814 = vrsqrt.f32 %v408_v33  ;;  %v403_v39 = vmul.f32 0.03125, %v392_v37  ;;  %v402_v40 = vmul.f32 0.03125, %v389_v38 }
 0x164   : > { %1816 = vrsqrt.f32 %v407_v36 }
 0x165   : > { %v409_v41 = vadd.f32 1e-06, %v402_v40  ;;  %v410_v44 = vadd.f32 1e-06, %v403_v39 }
 0x166   : > { %v395_v45 = vpop.xlane.xlu0 %394  ;;  %v398_v46 = vpop.xlane.xlu1 %397 }
 0x167   : > { %v404_v47 = vmul.f32 0.03125, %v395_v45  ;;  %1818 = vrsqrt.f32 %v409_v41  ;;  %v405_v50 = vmul.f32 0.03125, %v398_v46 }
 0x168   : > { %1820 = vrsqrt.f32 %v410_v44 }
 0x169   : > { %v1813_v48 = vpop.eup %1812  ;;  %v411_v51 = vadd.f32 1e-06, %v404_v47  ;;  %v412_v59 = vadd.f32 1e-06, %v405_v50 }
 0x16a   : > { %v420_v54 = vmul.f32 %v1813_v48, %v2152_v34 }
 0x16b   : > { %1822 = vrsqrt.f32 %v411_v51 }
 0x16c   : > { %v434_v56 = vmul.f32 %v1699_v49, %v420_v54  ;;  %1824 = vrsqrt.f32 %v412_v59 }
 0x16d   : > { %v1815_v57 = vpop.eup %1814 }
 0x16e   : > { %v1817_v58 = vpop.eup %1816  ;;  %v448_v61 = vadd.f32 %v1700_v55, %v434_v56  ;;  %v422_v63 = vmul.f32 %v1815_v57, %v2154_v35 }
 0x16f   : > { %v421_v62 = vmul.f32 %v1817_v58, %v2160_v42 }
 0x170   : > { %1701 = vmatmul.mubr.msk.f32.vlgmr.msra.gmra.mrb[0].mxu0 %vm334_vm0, %v448_v61  ;;  %1708 = vmatmul.mubr.msk.f32.vlgmr.msra.gmra.mrb[0].mxu1 %vm334_vm0, %v448_v61  ;;  %v436_v2 = vmul.f32 %v1699_v49, %v422_v63 }
 0x171   : > { %584 = vmatprep.mubr.f32.mxu0 %v2010_v25  ;;  %691 = vmatprep.mubr.f32.mxu1 %v2010_v25  ;;  %v435_v34 = vmul.f32 %v1699_v49, %v421_v62  ;;  %v1819_v0 = vpop.eup %1818 }
 0x172   : > { %v423_v3 = vmul.f32 %v1819_v0, %v2162_v43  ;;  %v1821_v4 = vpop.eup %1820  ;;  %v450_v35 = vadd.f32 %v1700_v55, %v436_v2 }
 0x173   : > { %v449_v1 = vadd.f32 %v1700_v55, %v435_v34  ;;  %v424_v5 = vmul.f32 %v1821_v4, %v2170_v52 }
 0x174   : > { %v437_v42 = vmul.f32 %v1699_v49, %v423_v3 }
 0x175   : > { %1702 = vmatmul.mubr.msk.f32.gmra.mrb[2].mxu0 %vm334_vm0, %v449_v1  ;;  %1709 = vmatmul.mubr.msk.f32.gmra.mrb[2].mxu1 %vm334_vm0, %v449_v1  ;;  %v1823_v6 = vpop.eup %1822  ;;  %v438_v7 = vmul.f32 %v1699_v49, %v424_v5 }
 0x176   : > { %590 = vmatprep.mubr.f32.mxu0 %v2010_v25  ;;  %697 = vmatprep.mubr.f32.mxu1 %v2010_v25  ;;  %v451_v43 = vadd.f32 %v1700_v55, %v437_v42  ;;  %v425_v8 = vmul.f32 %v1823_v6, %v2172_v53  ;;  %v1825_v9 = vpop.eup %1824 }
 0x177   : > { %v452_v52 = vadd.f32 %v1700_v55, %v438_v7  ;;  %v426_v11 = vmul.f32 %v1825_v9, %v2180_v60  ;;  %v473_v60 = vlaneseq }
 0x178   : > { %v439_v10 = vmul.f32 %v1699_v49, %v425_v8 }
 0x179   : > { %1703 = vmatmul.mubr.msk.f32.gmra.mrb[4].mxu0 %vm334_vm0, %v450_v35  ;;  %1710 = vmatmul.mubr.msk.f32.gmra.mrb[4].mxu1 %vm334_vm0, %v450_v35  ;;  %v440_v12 = vmul.f32 %v1699_v49, %v426_v11  ;;  %v474_v14 = vshrl.u32 %v473_v60, 7 }
 0x17a   : > { %596 = vmatprep.mubr.f32.mxu0 %v2010_v25  ;;  %703 = vmatprep.mubr.f32.mxu1 %v2010_v25  ;;  %v453_v53 = vadd.f32 %v1700_v55, %v439_v10 }
 0x17b   : > { %v454_v13 = vadd.f32 %v1700_v55, %v440_v12  ;;  %v475_v15 = vsub.s32 0, %v474_v14  ;;  %v483_v16 = vsub.s32 2, %v474_v14  ;;  %v479_v18 = vsub.s32 1, %v474_v14 }
 0x17c   : > { %v487_v19 = vsub.s32 3, %v474_v14 }
 0x17d   : > { %1704 = vmatmul.mubr.msk.f32.gmra.mrb[6].mxu0 %vm334_vm0, %v451_v43  ;;  %1711 = vmatmul.mubr.msk.f32.gmra.mrb[6].mxu1 %vm334_vm0, %v451_v43  ;;  %v2237_v20 = vrot.slane %v471_v17, %v475_v15  ;;  %v2239_v21 = vrot.slane %v471_v17, %v483_v16  ;;  %v2241_v22 = vrot.slane %v471_v17, %v479_v18 }
 0x17e   : > { %602 = vmatprep.mubr.f32.mxu0 %v2010_v25  ;;  %709 = vmatprep.mubr.f32.mxu1 %v2010_v25  ;;  %v2243_v23 = vrot.slane %v471_v17, %v487_v19 }
 0x181   : > { %1705 = vmatmul.mubr.msk.f32.gmra.mrb[8].mxu0 %vm334_vm0, %v452_v52  ;;  %1712 = vmatmul.mubr.msk.f32.gmra.mrb[8].mxu1 %vm334_vm0, %v452_v52 }
 0x182   : > { %608 = vmatprep.mubr.f32.mxu0 %v2010_v25  ;;  %715 = vmatprep.mubr.f32.mxu1 %v2010_v25 }
 0x185   : > { %1706 = vmatmul.mubr.msk.f32.gmra.mrb[10].mxu0 %vm334_vm0, %v453_v53  ;;  %1713 = vmatmul.mubr.msk.f32.gmra.mrb[10].mxu1 %vm334_vm0, %v453_v53 }
 0x186   : > { %614 = vmatprep.mubr.f32.mxu0 %v2010_v25  ;;  %721 = vmatprep.mubr.f32.mxu1 %v2010_v25 }
 0x189   : > { %1707 = vmatmul.mubr.msk.f32.gmra.mrb[12].mxu0 %vm334_vm0, %v454_v13  ;;  %1714 = vmatmul.mubr.msk.f32.gmra.mrb[12].mxu1 %vm334_vm0, %v454_v13 }
 0x243   : > { %v580_v24 = vpop.f32.mrb[0].mxu0  ;;  %v687_v25 = vpop.f32.mrb[0].mxu1 }
 0x244   : > { %v581_v26 = vadd.f32 %v580_v24, %v2237_v20  ;;  %v688_v27 = vadd.f32 %v687_v25, %v2239_v21  ;;  %v582_v28 = vpop.f32.mrb[1].mxu0  ;;  %v689_v29 = vpop.f32.mrb[1].mxu1 }
 0x245   : > { %v583_v30 = vadd.f32 %v582_v28, %v2241_v22  ;;  %v690_v31 = vadd.f32 %v689_v29, %v2243_v23 }
 0x246   : > { %v2249_v32 = vmul.f32 0.70710677, %v581_v26  ;;  %v2251_v33 = vmul.f32 0.70710677, %v688_v27  ;;  %v2261_v57 = vmul.f32 0.5, %v581_v26  ;;  %v2268_v3 = vmul.f32 0.5, %v688_v27 }
 0x247   : > { %v2253_v36 = vmul.f32 0.70710677, %v583_v30  ;;  %v2255_v37 = vmul.f32 0.70710677, %v690_v31  ;;  %v2277_v6 = vmul.f32 0.5, %v583_v30  ;;  %v2303_v19 = vmul.f32 0.5, %v690_v31 }
 0x248   : > { %v784_v38 = vand.u32 2147483647, %v2249_v32  ;;  %v786_v39 = vand.u32 2147483647, %v2251_v33  ;;  %v586_v55 = vpop.f32.mrb[2].mxu0  ;;  %v693_v56 = vpop.f32.mrb[2].mxu1 }
 0x249   : > { %v785_v40 = vand.u32 2147483647, %v2253_v36  ;;  %v787_v41 = vand.u32 2147483647, %v2255_v37  ;;  %v588_v61 = vpop.f32.mrb[3].mxu0  ;;  %v695_v62 = vpop.f32.mrb[3].mxu1  ;;  %v587_v0 = vadd.f32 %v586_v55, %v2237_v20  ;;  %v2271_v35 = vadd.f32 %v693_v56, %v2239_v21 }
 0x24a   : > { %v812_v44 = vmul.f32 0.3275911, %v784_v38  ;;  %v1176_v45 = vsub.f32 0.0, %v784_v38  ;;  %v814_v46 = vmul.f32 0.3275911, %v786_v39  ;;  %v1178_v47 = vsub.f32 0.0, %v786_v39 }
 0x24b   : > { %v813_v48 = vmul.f32 0.3275911, %v785_v40  ;;  %v1177_v49 = vsub.f32 0.0, %v785_v40  ;;  %v815_v54 = vmul.f32 0.3275911, %v787_v41  ;;  %v1179_v59 = vsub.f32 0.0, %v787_v41 }
 0x24c   : > { %v840_v50 = vadd.f32 1.0, %v812_v44  ;;  %v842_v51 = vadd.f32 1.0, %v814_v46  ;;  %v1204_v58 = vmul.f32 %v1176_v45, %v784_v38  ;;  %v1206_v63 = vmul.f32 %v1178_v47, %v786_v39  ;;  %v2264_v1 = vpop.f32.mrb[4].mxu0  ;;  %v2266_v2 = vpop.f32.mrb[4].mxu1 }
 0x24d   : > { %v841_v34 = vadd.f32 1.0, %v813_v48  ;;  %v1205_v4 = vmul.f32 %v1177_v49, %v785_v40  ;;  %v2273_v42 = vpop.f32.mrb[5].mxu0  ;;  %v2275_v5 = vpop.f32.mrb[5].mxu1  ;;  %v843_v43 = vadd.f32 1.0, %v815_v54  ;;  %v2279_v7 = vmul.f32 0.70710677, %v587_v0 }
 0x24e   : > { %1826 = vrcp.f32 %v840_v50  ;;  %v2282_v8 = vadd.f32 %v588_v61, %v2241_v22  ;;  %v1232_v10 = vmul.f32 1.442695, %v1204_v58  ;;  %v1207_v11 = vmul.f32 %v1179_v59, %v787_v41 }
 0x24f   : > { %1828 = vrcp.f32 %v842_v51  ;;  %v2289_v53 = vmul.f32 0.70710677, %v2271_v35  ;;  %v1236_v60 = vmul.f32 1.442695, %v1206_v63  ;;  %v788_v14 = vand.u32 2147483647, %v2279_v7 }
 0x250   : > { %v2284_v9 = vpop.f32.mrb[6].mxu0  ;;  %v2286_v52 = vpop.f32.mrb[6].mxu1  ;;  %1830 = vrcp.f32 %v841_v34  ;;  %v2297_v15 = vadd.f32 %v695_v62, %v2243_v23  ;;  %v1234_v16 = vmul.f32 1.442695, %v1205_v4  ;;  %v2301_v18 = vmul.f32 0.70710677, %v2282_v8 }
 0x251   : > { %v2291_v12 = vpop.f32.mrb[7].mxu0  ;;  %v2293_v13 = vpop.f32.mrb[7].mxu1  ;;  %v790_v17 = vand.u32 2147483647, %v2289_v53  ;;  %1832 = vrcp.f32 %v843_v43  ;;  %v816_v24 = vmul.f32 0.3275911, %v788_v14 }
 0x252   : > { %v1180_v25 = vsub.f32 0.0, %v788_v14  ;;  %v789_v30 = vand.u32 2147483647, %v2301_v18  ;;  %v1238_v39 = vmul.f32 1.442695, %v1207_v11  ;;  %1834 = vpow2.f32 %v1232_v10 }
 0x253   : > { %v818_v28 = vmul.f32 0.3275911, %v790_v17  ;;  %v1182_v29 = vsub.f32 0.0, %v790_v17  ;;  %v844_v40 = vadd.f32 1.0, %v816_v24  ;;  %v2313_v44 = vmul.f32 0.70710677, %v2297_v15 }
 0x254   : > { %v2305_v26 = vpop.f32.mrb[8].mxu0  ;;  %v2307_v27 = vpop.f32.mrb[8].mxu1  ;;  %v1208_v41 = vmul.f32 %v1180_v25, %v788_v14  ;;  %v817_v46 = vmul.f32 0.3275911, %v789_v30  ;;  %v1181_v47 = vsub.f32 0.0, %v789_v30  ;;  %v2319_v49 = vmul.f32 0.5, %v587_v0 }
 0x255   : > { %2973 = vst [vmem:[#allocation4_spill] sm:$0xff] %v2307_v27  ;;  %v2310_v38 = vpop.f32.mrb[9].mxu0  ;;  %v2315_v31 = vpop.f32.mrb[9].mxu1  ;;  %v846_v45 = vadd.f32 1.0, %v818_v28  ;;  %1836 = vrcp.f32 %v844_v40  ;;  %v1210_v50 = vmul.f32 %v1182_v29, %v790_v17  ;;  %v791_v51 = vand.u32 2147483647, %v2313_v44 }
 0x256   : > { %2974 = vst [vmem:[#allocation5_spill] sm:$0xff] %v2310_v38  ;;  %2975 = vst [vmem:[#allocation6_spill] sm:$0xff] %v2315_v31  ;;  %v1240_v58 = vmul.f32 1.442695, %v1208_v41  ;;  %v845_v59 = vadd.f32 1.0, %v817_v46  ;;  %v1209_v63 = vmul.f32 %v1181_v47, %v789_v30  ;;  %v2336_v11 = vadd.f32 %v2264_v1, %v2237_v20 }
 0x257   : > { %1838 = vrcp.f32 %v846_v45  ;;  %v819_v34 = vmul.f32 0.3275911, %v791_v51  ;;  %v1183_v10 = vsub.f32 0.0, %v791_v51  ;;  %v1244_v24 = vmul.f32 1.442695, %v1210_v50 }
 0x258   : > { %v2317_v48 = vpop.eup %1826  ;;  %v2322_v54 = vpop.f32.mrb[10].mxu0  ;;  %1840 = vpow2.f32 %v1236_v60  ;;  %v1242_v30 = vmul.f32 1.442695, %v1209_v63  ;;  %v2352_v46 = vmul.f32 0.70710677, %v2336_v11  ;;  %vm1344_vm1 = vcmp.ge.f32.partialorder %v2249_v32, 0.0 }
 0x259   : > { %2976 = vst [vmem:[#allocation7_spill] sm:$0xff] %v2322_v54  ;;  %v2324_v55 = vpop.eup %1828  ;;  %v924_v56 = vmul.f32 1.0614054, %v2317_v48  ;;  %v2327_v61 = vpop.f32.mrb[10].mxu1  ;;  %1842 = vpow2.f32 %v1234_v16  ;;  %v847_v25 = vadd.f32 1.0, %v819_v34  ;;  %v1211_v45 = vmul.f32 %v1183_v10, %v791_v51 }
 0x25a   : > { %2977 = vst [vmem:[#allocation8_spill] sm:$0xff] %v2327_v61  ;;  %v926_v62 = vmul.f32 1.0614054, %v2324_v55  ;;  %v2330_v0 = vpop.f32.mrb[11].mxu0  ;;  %v2332_v4 = vpop.f32.mrb[11].mxu1  ;;  %1844 = vrcp.f32 %v845_v59  ;;  %v2356_v59 = vmul.f32 0.5, %v2271_v35 }
 0x25b   : > { %2978 = vst [vmem:[#allocation9_spill] sm:$0xff] %v2330_v0  ;;  %2979 = vst [vmem:[#allocation10_spill] sm:$0xff] %v2332_v4  ;;  %v952_v43 = vadd.f32 -1.4531521, %v924_v56  ;;  %v2338_v14 = vpop.eup %1830  ;;  %1846 = vpow2.f32 %v1238_v39  ;;  %vm1346_vm2 = vcmp.ge.f32.partialorder %v2251_v33, 0.0  ;;  %vm1345_vm3 = vcmp.ge.f32.partialorder %v2253_v36, 0.0 }
 0x25c   : > { %v954_v17 = vadd.f32 -1.4531521, %v926_v62  ;;  %v2340_v60 = vpop.f32.mrb[12].mxu0  ;;  %v925_v29 = vmul.f32 1.0614054, %v2338_v14  ;;  %v2344_v16 = vpop.f32.mrb[12].mxu1  ;;  %1848 = vpow2.f32 %v1240_v58 }
 0x25d   : > { %2980 = vst [vmem:[#allocation11_spill] sm:$0xff] %v2340_v60  ;;  %v980_v28 = vmul.f32 %v2317_v48, %v952_v43  ;;  %2981 = vst [vmem:[#allocation12_spill] sm:$0xff] %v2344_v16  ;;  %v2346_v40 = vpop.f32.mrb[13].mxu0  ;;  %v2348_v1 = vpop.eup %1832  ;;  %1850 = vrcp.f32 %v847_v25  ;;  %v792_v62 = vand.u32 2147483647, %v2352_v46  ;;  %vm1347_vm4 = vcmp.ge.f32.partialorder %v2255_v37, 0.0 }
 0x25e   : > { %2982 = vst [vmem:[#allocation13_spill] sm:$0xff] %v2346_v40  ;;  %v982_v41 = vmul.f32 %v2324_v55, %v954_v17  ;;  %v953_v50 = vadd.f32 -1.4531521, %v925_v29  ;;  %v927_v56 = vmul.f32 1.0614054, %v2348_v1  ;;  %1852 = vpow2.f32 %v1244_v24  ;;  %v1835_v63 = vpop.eup %1834  ;;  %v2364_v29 = vpop.f32.mrb[13].mxu1 }
 0x25f   : > { %v1008_v47 = vadd.f32 1.4214138, %v980_v28  ;;  %1854 = vpow2.f32 %v1242_v30  ;;  %v2361_v43 = vpop.eup %1836  ;;  %v1246_v17 = vmul.f32 1.442695, %v1211_v45  ;;  %v820_v25 = vmul.f32 0.3275911, %v792_v62 }
 0x260   : > { %v1010_v39 = vadd.f32 1.4214138, %v982_v41  ;;  %v981_v51 = vmul.f32 %v2338_v14, %v953_v50  ;;  %v955_v58 = vadd.f32 -1.4531521, %v927_v56  ;;  %v1184_v28 = vsub.f32 0.0, %v792_v62  ;;  %2983 = vst [vmem:[#allocation14_spill] sm:$0xff] %v2364_v29 }
 0x261   : > { %v1036_v34 = vmul.f32 %v2317_v48, %v1008_v47  ;;  %v2366_v35 = vpop.eup %1838  ;;  %v928_v47 = vmul.f32 1.0614054, %v2361_v43  ;;  %v848_v16 = vadd.f32 1.0, %v820_v25  ;;  %v2373_v45 = vadd.f32 %v2266_v2, %v2239_v21 }
 0x262   : > { %v1038_v10 = vmul.f32 %v2324_v55, %v1010_v39  ;;  %v1009_v41 = vadd.f32 1.4214138, %v981_v51  ;;  %v983_v40 = vmul.f32 %v2348_v1, %v955_v58  ;;  %v1841_v50 = vpop.eup %1840  ;;  %v930_v30 = vmul.f32 1.0614054, %v2366_v35 }
 0x263   : > { %v1064_v24 = vadd.f32 -0.28449672, %v1036_v34  ;;  %v1843_v39 = vpop.eup %1842  ;;  %v956_v51 = vadd.f32 -1.4531521, %v928_v47  ;;  %1856 = vpow2.f32 %v1246_v17  ;;  %vm1348_vm5 = vcmp.ge.f32.partialorder %v2279_v7, 0.0 }
 0x264   : > { %v1066_v56 = vadd.f32 -0.28449672, %v1038_v10  ;;  %v1037_v60 = vmul.f32 %v2338_v14, %v1009_v41  ;;  %v1011_v34 = vadd.f32 1.4214138, %v983_v40  ;;  %v2377_v4 = vpop.eup %1844  ;;  %v958_v0 = vadd.f32 -1.4531521, %v930_v30 }
 0x265   : > { %v1092_v29 = vmul.f32 %v2317_v48, %v1064_v24  ;;  %v2380_v10 = vmul.f32 %v1184_v28, %v792_v62  ;;  %v1847_v25 = vpop.eup %1846  ;;  %v984_v31 = vmul.f32 %v2361_v43, %v956_v51  ;;  %v929_v47 = vmul.f32 1.0614054, %v2377_v4 }
 0x266   : > { %v1094_v58 = vmul.f32 %v2324_v55, %v1066_v56  ;;  %v1065_v54 = vadd.f32 -0.28449672, %v1037_v60  ;;  %v1039_v2 = vmul.f32 %v2348_v1, %v1011_v34  ;;  %v2384_v24 = vpop.eup %1848  ;;  %v986_v41 = vmul.f32 %v2366_v35, %v958_v0 }
 0x267   : > { %v1120_v61 = vadd.f32 0.2548296, %v1092_v29  ;;  %1858 = vrcp.f32 %v848_v16  ;;  %v2389_v17 = vpop.eup %1850  ;;  %v1012_v29 = vadd.f32 1.4214138, %v984_v31  ;;  %v957_v51 = vadd.f32 -1.4531521, %v929_v47 }
 0x268   : > { %v1122_v40 = vadd.f32 0.2548296, %v1094_v58  ;;  %v1093_v60 = vmul.f32 %v2338_v14, %v1065_v54  ;;  %v1067_v28 = vadd.f32 -0.28449672, %v1039_v2  ;;  %v1853_v56 = vpop.eup %1852  ;;  %v1014_v34 = vadd.f32 1.4214138, %v986_v41 }
 0x269   : > { %v1148_v62 = vmul.f32 %v2317_v48, %v1120_v61  ;;  %v931_v0 = vmul.f32 1.0614054, %v2389_v17  ;;  %v2396_v58 = vpop.eup %1854  ;;  %v1040_v48 = vmul.f32 %v2361_v43, %v1012_v29  ;;  %v985_v54 = vmul.f32 %v2377_v4, %v957_v51 }
 0x26a   : > { %v1150_v30 = vmul.f32 %v2324_v55, %v1122_v40  ;;  %v1121_v38 = vadd.f32 0.2548296, %v1093_v60  ;;  %v1095_v27 = vmul.f32 %v2348_v1, %v1067_v28  ;;  %v1042_v31 = vmul.f32 %v2366_v35, %v1014_v34 }
 0x26b   : > { %v1288_v16 = vmul.f32 %v1835_v63, %v1148_v62  ;;  %v959_v55 = vadd.f32 -1.4531521, %v931_v0  ;;  %v1068_v47 = vadd.f32 -0.28449672, %v1040_v48  ;;  %v1013_v60 = vadd.f32 1.4214138, %v985_v54 }
 0x26c   : > { %v1290_v61 = vmul.f32 %v1841_v50, %v1150_v30  ;;  %v1149_v40 = vmul.f32 %v2338_v14, %v1121_v38  ;;  %v1123_v41 = vadd.f32 0.2548296, %v1095_v27  ;;  %v1070_v62 = vadd.f32 -0.28449672, %v1042_v31 }
 0x26d   : > { %v1316_v2 = vsub.f32 1.0, %v1288_v16  ;;  %v987_v28 = vmul.f32 %v2389_v17, %v959_v55  ;;  %v1096_v34 = vmul.f32 %v2361_v43, %v1068_v47  ;;  %v2411_v51 = vpop.eup %1856  ;;  %v1041_v14 = vmul.f32 %v2377_v4, %v1013_v60 }
 0x26e   : > { %v1318_v63 = vsub.f32 1.0, %v1290_v61  ;;  %v1289_v29 = vmul.f32 %v1843_v39, %v1149_v40  ;;  %v1151_v30 = vmul.f32 %v2348_v1, %v1123_v41  ;;  %v1098_v27 = vmul.f32 %v2366_v35, %v1070_v62 }
 0x26f   : > { %v1372_v50 = vsub.f32 0.0, %v1316_v2  ;;  %v1015_v0 = vadd.f32 1.4214138, %v987_v28  ;;  %v1124_v31 = vadd.f32 0.2548296, %v1096_v34  ;;  %vm1350_vm6 = vcmp.ge.f32.partialorder %v2289_v53, 0.0 }
 0x270   : > { %v1374_v38 = vsub.f32 0.0, %v1318_v63  ;;  %v1317_v48 = vsub.f32 1.0, %v1289_v29  ;;  %v1291_v61 = vmul.f32 %v1847_v25, %v1151_v30  ;;  %v1126_v55 = vadd.f32 0.2548296, %v1098_v27 }
 0x271   : > { %v1400_v16 = vsel %vm1344_vm1, %v1316_v2, %v1372_v50  ;;  %v2417_v54 = vpop.eup %1858  ;;  %v1069_v40 = vadd.f32 -0.28449672, %v1041_v14  ;;  %v1152_v32 = vmul.f32 %v2361_v43, %v1124_v31  ;;  %v1043_v33 = vmul.f32 %v2389_v17, %v1015_v0 }
 0x272   : > { %v1428_v39 = vadd.f32 1.0, %v1400_v16  ;;  %v1402_v1 = vsel %vm1346_vm2, %v1318_v63, %v1374_v38  ;;  %v1373_v47 = vsub.f32 0.0, %v1317_v48  ;;  %v1319_v62 = vsub.f32 1.0, %v1291_v61 }
 0x273   : > { %v1430_v41 = vadd.f32 1.0, %v1402_v1  ;;  %v1154_v2 = vmul.f32 %v2366_v35, %v1126_v55  ;;  %v1097_v60 = vmul.f32 %v2377_v4, %v1069_v40  ;;  %v1292_v29 = vmul.f32 %v2384_v24, %v1152_v32 }
 0x274   : > { %v1456_v25 = vmul.f32 %v1428_v39, %v2261_v57  ;;  %v1401_v28 = vsel %vm1345_vm3, %v1317_v48, %v1373_v47  ;;  %v1375_v50 = vsub.f32 0.0, %v1319_v62  ;;  %v1071_v30 = vadd.f32 -0.28449672, %v1043_v33 }
 0x275   : > { %v1458_v63 = vmul.f32 %v1430_v41, %v2268_v3  ;;  %v1429_v57 = vadd.f32 1.0, %v1401_v28  ;;  %v1294_v43 = vmul.f32 %v1853_v56, %v1154_v2  ;;  %v1125_v35 = vadd.f32 0.2548296, %v1097_v60 }
 0x276   : > { %1484 = vst [vmem:[%s2433_s14] sm:$0xff] %v1456_v25  ;;  %v1403_v3 = vsel %vm1347_vm4, %v1319_v62, %v1375_v50  ;;  %v1320_v34 = vsub.f32 1.0, %v1292_v29  ;;  %v932_v36 = vmul.f32 1.0614054, %v2417_v54  ;;  %v2442_v24 = vadd.f32 %v2273_v42, %v2241_v22 }
 0x277   : > { %1486 = vst [vmem:[%s2433_s14 + $0x10] sm:$0xff] %v1458_v63  ;;  %v1457_v38 = vmul.f32 %v1429_v57, %v2277_v6  ;;  %v1431_v27 = vadd.f32 1.0, %v1403_v3  ;;  %v1322_v14 = vsub.f32 1.0, %v1294_v43  ;;  %v1153_v56 = vmul.f32 %v2377_v4, %v1125_v35 }
 0x278   : > { %v1376_v0 = vsub.f32 0.0, %v1320_v34  ;;  %v1099_v16 = vmul.f32 %v2389_v17, %v1071_v30  ;;  %v960_v48 = vadd.f32 -1.4531521, %v932_v36  ;;  %v2448_v37 = vmul.f32 0.70710677, %v2373_v45 }
 0x279   : > { %1485 = vst [vmem:[%s2433_s14 + $0x8] sm:$0xff] %v1457_v38  ;;  %v1459_v61 = vmul.f32 %v1431_v27, %v2303_v19  ;;  %v1378_v31 = vsub.f32 0.0, %v1322_v14  ;;  %v1293_v42 = vmul.f32 %v2396_v58, %v1153_v56  ;;  %v1248_v6 = vmul.f32 1.442695, %v2380_v10 }
 0x27a   : > { %v1404_v39 = vsel %vm1348_vm5, %v1320_v34, %v1376_v0  ;;  %v1127_v1 = vadd.f32 0.2548296, %v1099_v16  ;;  %v988_v4 = vmul.f32 %v2417_v54, %v960_v48  ;;  %v794_v55 = vand.u32 2147483647, %v2448_v37 }
 0x27b   : > { %1487 = vst [vmem:[%s2433_s14 + $0x18] sm:$0xff] %v1459_v61  ;;  %v1432_v40 = vadd.f32 1.0, %v1404_v39  ;;  %v1406_v41 = vsel %vm1350_vm6, %v1322_v14, %v1378_v31  ;;  %v1321_v19 = vsub.f32 1.0, %v1293_v42  ;;  %vm1349_vm7 = vcmp.ge.f32.partialorder %v2301_v18, 0.0 }
 0x27c   : > { %v1434_v58 = vadd.f32 1.0, %v1406_v41  ;;  %v1155_v10 = vmul.f32 %v2389_v17, %v1127_v1  ;;  %v1016_v7 = vadd.f32 1.4214138, %v988_v4  ;;  %v822_v47 = vmul.f32 0.3275911, %v794_v55 }
 0x27d   : > { %v1460_v62 = vmul.f32 %v1432_v40, %v2319_v49  ;;  %v1377_v32 = vsub.f32 0.0, %v1321_v19  ;;  %1860 = vpow2.f32 %v1248_v6  ;;  %v2465_v25 = vmul.f32 0.70710677, %v2442_v24 }
 0x27e   : > { %v1462_v53 = vmul.f32 %v1434_v58, %v2356_v59  ;;  %v1295_v2 = vmul.f32 %v2411_v51, %v1155_v10  ;;  %v1044_v60 = vmul.f32 %v2417_v54, %v1016_v7  ;;  %v850_v18 = vadd.f32 1.0, %v822_v47 }
 0x27f   : > { %1488 = vst [vmem:[%s2433_s14 + $0x20] sm:$0xff] %v1460_v62  ;;  %v733_v33 = vmul.f32 0.5, %v2282_v8  ;;  %v1405_v17 = vsel %vm1349_vm7, %v1321_v19, %v1377_v32  ;;  %v793_v63 = vand.u32 2147483647, %v2465_v25  ;;  %v1186_v29 = vsub.f32 0.0, %v794_v55 }
 0x280   : > { %1490 = vst [vmem:[%s2433_s14 + $0x30] sm:$0xff] %v1462_v53  ;;  %v1433_v49 = vadd.f32 1.0, %v1405_v17  ;;  %v1323_v28 = vsub.f32 1.0, %v1295_v2  ;;  %v1072_v50 = vadd.f32 -0.28449672, %v1044_v60  ;;  %1862 = vrcp.f32 %v850_v18 }
 0x281   : > { %v821_v57 = vmul.f32 0.3275911, %v793_v63  ;;  %v2476_v59 = vadd.f32 %v2275_v5, %v2243_v23  ;;  %v2481_v8 = vadd.f32 %v2284_v9, %v2237_v20  ;;  %vm1351_vm8 = vcmp.ge.f32.partialorder %v2313_v44, 0.0 }
 0x282   : > { %v1461_v51 = vmul.f32 %v1433_v49, %v733_v33  ;;  %v1379_v43 = vsub.f32 0.0, %v1323_v28  ;;  %v1100_v35 = vmul.f32 %v2417_v54, %v1072_v50  ;;  %v735_v3 = vmul.f32 0.5, %v2297_v15 }
 0x283   : > { %v849_v30 = vadd.f32 1.0, %v821_v57  ;;  %v2487_v5 = vmul.f32 0.70710677, %v2476_v59  ;;  %v1214_v27 = vmul.f32 %v1186_v29, %v794_v55  ;;  %v2490_v14 = vmul.f32 0.70710677, %v2481_v8 }
 0x284   : > { %1489 = vst [vmem:[%s2433_s14 + $0x28] sm:$0xff] %v1461_v51  ;;  %v1407_v34 = vsel %vm1351_vm8, %v1323_v28, %v1379_v43  ;;  %v1128_v36 = vadd.f32 0.2548296, %v1100_v35  ;;  %v1185_v56 = vsub.f32 0.0, %v793_v63  ;;  %v2496_v15 = vadd.f32 %v2286_v52, %v2239_v21 }
 0x285   : > { %v1435_v38 = vadd.f32 1.0, %v1407_v34  ;;  %1864 = vrcp.f32 %v849_v30  ;;  %v795_v44 = vand.u32 2147483647, %v2487_v5  ;;  %v796_v48 = vand.u32 2147483647, %v2490_v14 }
 0x286   : > { %v1156_v9 = vmul.f32 %v2417_v54, %v1128_v36  ;;  %v736_v61 = vmul.f32 0.5, %v2336_v11  ;;  %vm1352_vm9 = vcmp.ge.f32.partialorder %v2352_v46, 0.0  ;;  %v2503_v54 = vmul.f32 0.5, %v2373_v45 }
 0x287   : > { %v1861_v0 = vpop.eup %1860  ;;  %v1463_v16 = vmul.f32 %v1435_v38, %v735_v3  ;;  %v823_v42 = vmul.f32 0.3275911, %v795_v44  ;;  %v824_v6 = vmul.f32 0.3275911, %v796_v48  ;;  %v2506_v39 = vmul.f32 0.70710677, %v2496_v15 }
 0x288   : > { %v1296_v31 = vmul.f32 %v1861_v0, %v1156_v9  ;;  %v1252_v4 = vmul.f32 1.442695, %v1214_v27  ;;  %v1213_v55 = vmul.f32 %v1185_v56, %v793_v63  ;;  %v1187_v41 = vsub.f32 0.0, %v795_v44 }
 0x289   : > { %1491 = vst [vmem:[%s2433_s14 + $0x38] sm:$0xff] %v1463_v16  ;;  %v851_v40 = vadd.f32 1.0, %v823_v42  ;;  %v852_v19 = vadd.f32 1.0, %v824_v6  ;;  %v798_v58 = vand.u32 2147483647, %v2506_v39  ;;  %v1188_v45 = vsub.f32 0.0, %v796_v48 }
 0x28a   : > { %v2508_v52 = vpop.eup %1862  ;;  %v1324_v1 = vsub.f32 1.0, %v1296_v31  ;;  %v2514_v7 = vadd.f32 %v2291_v12, %v2241_v22  ;;  %v2518_v32 = vadd.f32 %v2293_v13, %v2243_v23  ;;  %v2523_v2 = vmul.f32 0.5, %v2442_v24 }
 0x28b   : > { %v934_v11 = vmul.f32 1.0614054, %v2508_v52  ;;  %1866 = vrcp.f32 %v851_v40  ;;  %v826_v62 = vmul.f32 0.3275911, %v798_v58  ;;  %v1250_v60 = vmul.f32 1.442695, %v1213_v55 }
 0x28c   : > { %v1380_v10 = vsub.f32 0.0, %v1324_v1  ;;  %1868 = vrcp.f32 %v852_v19  ;;  %v1215_v17 = vmul.f32 %v1187_v41, %v795_v44  ;;  %v1216_v13 = vmul.f32 %v1188_v45, %v796_v48 }
 0x28d   : > { %v962_v47 = vadd.f32 -1.4531521, %v934_v11  ;;  %1870 = vpow2.f32 %v1252_v4  ;;  %v854_v63 = vadd.f32 1.0, %v826_v62  ;;  %v1190_v28 = vsub.f32 0.0, %v798_v58 }
 0x28e   : > { %v1408_v53 = vsel %vm1352_vm9, %v1324_v1, %v1380_v10  ;;  %v2530_v46 = vmul.f32 0.70710677, %v2514_v7  ;;  %v2533_v24 = vmul.f32 0.70710677, %v2518_v32  ;;  %v2536_v51 = vmul.f32 0.5, %v2476_v59 }
 0x28f   : > { %v2525_v18 = vpop.eup %1864  ;;  %v1436_v33 = vadd.f32 1.0, %v1408_v53  ;;  %v990_v12 = vmul.f32 %v2508_v52, %v962_v47  ;;  %1872 = vrcp.f32 %v854_v63  ;;  %v2541_v35 = vadd.f32 %v2305_v26, %v2237_v20 }
 0x290   : > { %v933_v49 = vmul.f32 1.0614054, %v2525_v18  ;;  %v797_v43 = vand.u32 2147483647, %v2530_v46  ;;  %v1254_v3 = vmul.f32 1.442695, %v1215_v17  ;;  %v1218_v27 = vmul.f32 %v1190_v28, %v798_v58 }
 0x291   : > { %v1464_v50 = vmul.f32 %v1436_v33, %v736_v61  ;;  %v1018_v29 = vadd.f32 1.4214138, %v990_v12  ;;  %v2546_v34 = vmul.f32 0.5, %v2481_v8  ;;  %v799_v36 = vand.u32 2147483647, %v2533_v24 }
 0x292   : > { %v961_v57 = vadd.f32 -1.4531521, %v933_v49  ;;  %v825_v59 = vmul.f32 0.3275911, %v797_v43  ;;  %v1189_v9 = vsub.f32 0.0, %v797_v43  ;;  %1874 = vpow2.f32 %v1250_v60 }
 0x293   : > { %1492 = vst [vmem:[%s2433_s14 + $0x40] sm:$0xff] %v1464_v50  ;;  %v1046_v30 = vmul.f32 %v2508_v52, %v1018_v29  ;;  %v1256_v44 = vmul.f32 1.442695, %v1216_v13  ;;  %v827_v0 = vmul.f32 0.3275911, %v799_v36  ;;  %v2553_v48 = vmul.f32 0.5, %v2496_v15 }
 0x294   : > { %v989_v38 = vmul.f32 %v2525_v18, %v961_v57  ;;  %v853_v61 = vadd.f32 1.0, %v825_v59  ;;  %v2556_v8 = vmul.f32 0.70710677, %v2541_v35  ;;  %v1217_v1 = vmul.f32 %v1189_v9, %v797_v43 }
 0x295   : > { %v1074_v56 = vadd.f32 -0.28449672, %v1046_v30  ;;  %v2550_v26 = vpop.eup %1866  ;;  %v855_v4 = vadd.f32 1.0, %v827_v0  ;;  %v1260_v41 = vmul.f32 1.442695, %v1218_v27  ;;  %v1191_v58 = vsub.f32 0.0, %v799_v36 }
 0x296   : > { %v1017_v16 = vadd.f32 1.4214138, %v989_v38  ;;  %v2558_v31 = vpop.eup %1868  ;;  %v935_v6 = vmul.f32 1.0614054, %v2550_v26  ;;  %1876 = vrcp.f32 %v853_v61  ;;  %vm1354_vm10 = vcmp.ge.f32.partialorder %v2448_v37, 0.0  ;;  %v2984_v27 = vld [vmem:[#allocation4_spill] sm:$0xff] }
 0x297   : > { %v1102_v42 = vmul.f32 %v2508_v52, %v1074_v56  ;;  %v1871_v55 = vpop.eup %1870  ;;  %v936_v11 = vmul.f32 1.0614054, %v2558_v31  ;;  %1878 = vrcp.f32 %v855_v4  ;;  %v2566_v47 = vand.u32 2147483647, %v2556_v8 }
 0x298   : > { %v1045_v40 = vmul.f32 %v2525_v18, %v1017_v16  ;;  %v963_v19 = vadd.f32 -1.4531521, %v935_v6  ;;  %1880 = vpow2.f32 %v1254_v3  ;;  %v1258_v33 = vmul.f32 1.442695, %v1217_v1 }
 0x299   : > { %v1130_v15 = vadd.f32 0.2548296, %v1102_v42  ;;  %v964_v45 = vadd.f32 -1.4531521, %v936_v11  ;;  %v2568_v62 = vpop.eup %1872  ;;  %v828_v49 = vmul.f32 0.3275911, %v2566_v47  ;;  %1882 = vpow2.f32 %v1256_v44 }
 0x29a   : > { %v1073_v10 = vadd.f32 -0.28449672, %v1045_v40  ;;  %v991_v60 = vmul.f32 %v2550_v26, %v963_v19  ;;  %v938_v63 = vmul.f32 1.0614054, %v2568_v62  ;;  %v1219_v50 = vmul.f32 %v1191_v58, %v799_v36 }
 0x29b   : > { %v1158_v53 = vmul.f32 %v2508_v52, %v1130_v15  ;;  %v992_v17 = vmul.f32 %v2558_v31, %v964_v45  ;;  %1884 = vpow2.f32 %v1260_v41  ;;  %vm1353_vm11 = vcmp.ge.f32.partialorder %v2465_v25, 0.0  ;;  %v2985_v25 = vld [vmem:[#allocation5_spill] sm:$0xff] }
 0x29c   : > { %v1101_v12 = vmul.f32 %v2525_v18, %v1073_v10  ;;  %v1019_v28 = vadd.f32 1.4214138, %v991_v60  ;;  %v966_v43 = vadd.f32 -1.4531521, %v938_v63  ;;  %v1875_v52 = vpop.eup %1874  ;;  %v856_v38 = vadd.f32 1.0, %v828_v49 }
 0x29d   : > { %v1298_v13 = vmul.f32 %v1871_v55, %v1158_v53  ;;  %v1020_v57 = vadd.f32 1.4214138, %v992_v17  ;;  %v2580_v59 = vadd.f32 %v2984_v27, %v2239_v21  ;;  %1886 = vpow2.f32 %v1258_v33 }
 0x29e   : > { %v1129_v29 = vadd.f32 0.2548296, %v1101_v12  ;;  %v1047_v3 = vmul.f32 %v2550_v26, %v1019_v28  ;;  %v994_v36 = vmul.f32 %v2568_v62, %v966_v43  ;;  %v1262_v16 = vmul.f32 1.442695, %v1219_v50 }
 0x29f   : > { %v1326_v30 = vsub.f32 1.0, %v1298_v13  ;;  %v1048_v56 = vmul.f32 %v2558_v31, %v1020_v57  ;;  %1888 = vrcp.f32 %v856_v38  ;;  %v1192_v4 = vsub.f32 0.0, %v2566_v47 }
 0x2a0   : > { %v1157_v9 = vmul.f32 %v2525_v18, %v1129_v29  ;;  %v1075_v0 = vadd.f32 -0.28449672, %v1047_v3  ;;  %v2585_v61 = vpop.eup %1876  ;;  %v1022_v1 = vadd.f32 1.4214138, %v994_v36  ;;  %v2595_v41 = vmul.f32 0.70710677, %v2580_v59 }
 0x2a1   : > { %v1382_v44 = vsub.f32 0.0, %v1326_v30  ;;  %v1076_v6 = vadd.f32 -0.28449672, %v1048_v56  ;;  %v2588_v55 = vpop.eup %1878  ;;  %v937_v11 = vmul.f32 1.0614054, %v2585_v61  ;;  %1890 = vpow2.f32 %v1262_v16 }
 0x2a2   : > { %v1297_v42 = vmul.f32 %v1875_v52, %v1157_v9  ;;  %v1103_v40 = vmul.f32 %v2550_v26, %v1075_v0  ;;  %v1050_v10 = vmul.f32 %v2568_v62, %v1022_v1  ;;  %v1881_v45 = vpop.eup %1880  ;;  %v939_v37 = vmul.f32 1.0614054, %v2588_v55 }
 0x2a3   : > { %v1410_v18 = vsel %vm1354_vm10, %v1326_v30, %v1382_v44  ;;  %v1104_v58 = vmul.f32 %v2558_v31, %v1076_v6  ;;  %v965_v60 = vadd.f32 -1.4531521, %v937_v11  ;;  %vm1355_vm12 = vcmp.ge.f32.partialorder %v2487_v5, 0.0  ;;  %v1883_v49 = vpop.eup %1882 }
 0x2a4   : > { %v1438_v15 = vadd.f32 1.0, %v1410_v18  ;;  %v1325_v19 = vsub.f32 1.0, %v1297_v42  ;;  %v1131_v53 = vadd.f32 0.2548296, %v1103_v40  ;;  %v1078_v63 = vadd.f32 -0.28449672, %v1050_v10 }
 0x2a5   : > { %v1132_v17 = vadd.f32 0.2548296, %v1104_v58  ;;  %vm1356_vm13 = vcmp.ge.f32.partialorder %v2490_v14, 0.0  ;;  %v993_v28 = vmul.f32 %v2585_v61, %v965_v60  ;;  %v967_v50 = vadd.f32 -1.4531521, %v939_v37  ;;  %v1885_v57 = vpop.eup %1884 }
 0x2a6   : > { %v1466_v33 = vmul.f32 %v1438_v15, %v2503_v54  ;;  %v1381_v12 = vsub.f32 0.0, %v1325_v19  ;;  %v1159_v13 = vmul.f32 %v2550_v26, %v1131_v53  ;;  %v2606_v29 = vand.u32 2147483647, %v2595_v41 }
 0x2a7   : > { %v1160_v43 = vmul.f32 %v2558_v31, %v1132_v17  ;;  %v1106_v52 = vmul.f32 %v2568_v62, %v1078_v63  ;;  %v1220_v30 = vmul.f32 %v1192_v4, %v2566_v47  ;;  %v1021_v38 = vadd.f32 1.4214138, %v993_v28  ;;  %v1887_v9 = vpop.eup %1886 }
 0x2a8   : > { %1494 = vst [vmem:[%s2433_s14 + $0x50] sm:$0xff] %v1466_v33  ;;  %v1409_v54 = vsel %vm1353_vm11, %v1325_v19, %v1381_v12  ;;  %v1299_v3 = vmul.f32 %v1881_v45, %v1159_v13  ;;  %v995_v27 = vmul.f32 %v2588_v55, %v967_v50  ;;  %v830_v44 = vmul.f32 0.3275911, %v2606_v29  ;;  %v2986_v33 = vld [vmem:[#allocation6_spill] sm:$0xff] }
 0x2a9   : > { %v1437_v26 = vadd.f32 1.0, %v1409_v54  ;;  %v1300_v56 = vmul.f32 %v1883_v49, %v1160_v43  ;;  %v1134_v36 = vadd.f32 0.2548296, %v1106_v52  ;;  %v2618_v0 = vadd.f32 %v2985_v25, %v2241_v22  ;;  %v2620_v31 = vpop.eup %1888 }
 0x2aa   : > { %v1327_v47 = vsub.f32 1.0, %v1299_v3  ;;  %v1049_v42 = vmul.f32 %v2585_v61, %v1021_v38  ;;  %v1023_v6 = vadd.f32 1.4214138, %v995_v27  ;;  %v940_v18 = vmul.f32 1.0614054, %v2620_v31 }
 0x2ab   : > { %v1465_v16 = vmul.f32 %v1437_v26, %v2523_v2  ;;  %v1328_v1 = vsub.f32 1.0, %v1300_v56  ;;  %v1162_v4 = vmul.f32 %v2568_v62, %v1134_v36  ;;  %v858_v40 = vadd.f32 1.0, %v830_v44  ;;  %v1891_v2 = vpop.eup %1890 }
 0x2ac   : > { %v1383_v11 = vsub.f32 0.0, %v1327_v47  ;;  %v1077_v15 = vadd.f32 -0.28449672, %v1049_v42  ;;  %v1051_v19 = vmul.f32 %v2588_v55, %v1023_v6  ;;  %v1264_v58 = vmul.f32 1.442695, %v1220_v30 }
 0x2ad   : > { %1493 = vst [vmem:[%s2433_s14 + $0x48] sm:$0xff] %v1465_v16  ;;  %v1384_v10 = vsub.f32 0.0, %v1328_v1  ;;  %v1302_v45 = vmul.f32 %v1885_v57, %v1162_v4  ;;  %v968_v53 = vadd.f32 -1.4531521, %v940_v18  ;;  %1892 = vrcp.f32 %v858_v40 }
 0x2ae   : > { %v1411_v60 = vsel %vm1355_vm12, %v1327_v47, %v1383_v11  ;;  %v1105_v37 = vmul.f32 %v2585_v61, %v1077_v15  ;;  %v1079_v62 = vadd.f32 -0.28449672, %v1051_v19  ;;  %v2633_v12 = vadd.f32 %v2986_v33, %v2243_v23 }
 0x2af   : > { %v1439_v17 = vadd.f32 1.0, %v1411_v60  ;;  %v1412_v63 = vsel %vm1356_vm13, %v1328_v1, %v1384_v10  ;;  %v1330_v49 = vsub.f32 1.0, %v1302_v45  ;;  %v996_v13 = vmul.f32 %v2620_v31, %v968_v53 }
 0x2b0   : > { %v1440_v28 = vadd.f32 1.0, %v1412_v63  ;;  %vm1358_vm14 = vcmp.ge.f32.partialorder %v2506_v39, 0.0  ;;  %v1133_v5 = vadd.f32 0.2548296, %v1105_v37  ;;  %v1107_v50 = vmul.f32 %v2588_v55, %v1079_v62 }
 0x2b1   : > { %v1467_v57 = vmul.f32 %v1439_v17, %v2536_v51  ;;  %v1386_v54 = vsub.f32 0.0, %v1330_v49  ;;  %v1024_v43 = vadd.f32 1.4214138, %v996_v13  ;;  %1894 = vpow2.f32 %v1264_v58 }
 0x2b2   : > { %v1468_v52 = vmul.f32 %v1440_v28, %v2546_v34  ;;  %v1161_v14 = vmul.f32 %v2585_v61, %v1133_v5  ;;  %v1135_v30 = vadd.f32 0.2548296, %v1107_v50  ;;  %v2644_v26 = vmul.f32 0.70710677, %v2618_v0 }
 0x2b3   : > { %1495 = vst [vmem:[%s2433_s14 + $0x58] sm:$0xff] %v1467_v57  ;;  %v1414_v3 = vsel %vm1358_vm14, %v1330_v49, %v1386_v54  ;;  %v1052_v39 = vmul.f32 %v2620_v31, %v1024_v43  ;;  %v1194_v38 = vsub.f32 0.0, %v2606_v29  ;;  %v2650_v27 = vmul.f32 0.70710677, %v2633_v12  ;;  %v2989_v43 = vld [vmem:[#allocation9_spill] sm:$0xff] }
 0x2b4   : > { %1496 = vst [vmem:[%s2433_s14 + $0x60] sm:$0xff] %v1468_v52  ;;  %v1442_v51 = vadd.f32 1.0, %v1414_v3  ;;  %v1301_v56 = vmul.f32 %v1887_v9, %v1161_v14  ;;  %v1163_v34 = vmul.f32 %v2588_v55, %v1135_v30  ;;  %v801_v61 = vand.u32 2147483647, %v2644_v26 }
 0x2b5   : > { %v1080_v36 = vadd.f32 -0.28449672, %v1052_v39  ;;  %v2656_v44 = vand.u32 2147483647, %v2650_v27  ;;  %v741_v1 = vmul.f32 0.5, %v2514_v7  ;;  %v1222_v9 = vmul.f32 %v1194_v38, %v2606_v29 }
 0x2b6   : > { %v1470_v25 = vmul.f32 %v1442_v51, %v2553_v48  ;;  %v1329_v16 = vsub.f32 1.0, %v1301_v56  ;;  %v1303_v47 = vmul.f32 %v1891_v2, %v1163_v34  ;;  %v829_v42 = vmul.f32 0.3275911, %v801_v61 }
 0x2b7   : > { %v2659_v6 = vpop.eup %1892  ;;  %v1108_v4 = vmul.f32 %v2620_v31, %v1080_v36  ;;  %v831_v55 = vmul.f32 0.3275911, %v2656_v44  ;;  %vm1357_vm15 = vcmp.ge.f32.partialorder %v2530_v46, 0.0  ;;  %vm1359_vm0 = vcmp.ge.f32.partialorder %v2533_v24, 0.0  ;;  %v2987_v24 = vld [vmem:[#allocation7_spill] sm:$0xff] }
 0x2b8   : > { %1498 = vst [vmem:[%s2433_s14 + $0x70] sm:$0xff] %v1470_v25  ;;  %v1385_v18 = vsub.f32 0.0, %v1329_v16  ;;  %v1331_v40 = vsub.f32 1.0, %v1303_v47  ;;  %v942_v11 = vmul.f32 1.0614054, %v2659_v6  ;;  %v857_v15 = vadd.f32 1.0, %v829_v42 }
 0x2b9   : > { %v1136_v48 = vadd.f32 0.2548296, %v1108_v4  ;;  %v859_v19 = vadd.f32 1.0, %v831_v55  ;;  %v1268_v2 = vmul.f32 1.442695, %v1222_v9  ;;  %v743_v60 = vmul.f32 0.5, %v2518_v32 }
 0x2ba   : > { %v1413_v58 = vsel %vm1357_vm15, %v1329_v16, %v1385_v18  ;;  %v1387_v7 = vsub.f32 0.0, %v1331_v40  ;;  %v970_v10 = vadd.f32 -1.4531521, %v942_v11  ;;  %1896 = vrcp.f32 %v857_v15  ;;  %v2988_v32 = vld [vmem:[#allocation8_spill] sm:$0xff]  ;;  %v2990_v25 = vld [vmem:[#allocation10_spill] sm:$0xff] }
 0x2bb   : > { %v1895_v29 = vpop.eup %1894  ;;  %v1441_v45 = vadd.f32 1.0, %v1413_v58  ;;  %v1164_v53 = vmul.f32 %v2620_v31, %v1136_v48  ;;  %1898 = vrcp.f32 %v859_v19  ;;  %v2674_v62 = vadd.f32 %v2987_v24, %v2237_v20 }
 0x2bc   : > { %v1415_v37 = vsel %vm1359_vm0, %v1331_v40, %v1387_v7  ;;  %v998_v46 = vmul.f32 %v2659_v6, %v970_v10  ;;  %v1193_v49 = vsub.f32 0.0, %v801_v61  ;;  %1900 = vpow2.f32 %v1268_v2 }
 0x2bd   : > { %v1469_v33 = vmul.f32 %v1441_v45, %v741_v1  ;;  %v1443_v17 = vadd.f32 1.0, %v1415_v37  ;;  %v1304_v63 = vmul.f32 %v1895_v29, %v1164_v53  ;;  %v2677_v28 = vmul.f32 0.70710677, %v2674_v62 }
 0x2be   : > { %v1026_v13 = vadd.f32 1.4214138, %v998_v46  ;;  %v2682_v50 = vadd.f32 %v2988_v32, %v2239_v21  ;;  %v2688_v52 = vadd.f32 %v2989_v43, %v2241_v22  ;;  %v1221_v30 = vmul.f32 %v1193_v49, %v801_v61 }
 0x2bf   : > { %1497 = vst [vmem:[%s2433_s14 + $0x68] sm:$0xff] %v1469_v33  ;;  %v1471_v31 = vmul.f32 %v1443_v17, %v743_v60  ;;  %v1332_v5 = vsub.f32 1.0, %v1304_v63  ;;  %v804_v54 = vand.u32 2147483647, %v2677_v28  ;;  %v1195_v3 = vsub.f32 0.0, %v2656_v44 }
 0x2c0   : > { %v1054_v57 = vmul.f32 %v2659_v6, %v1026_v13  ;;  %v2693_v39 = vmul.f32 0.70710677, %v2682_v50  ;;  %vm1360_vm1 = vcmp.ge.f32.partialorder %v2556_v8, 0.0  ;;  %v744_v56 = vmul.f32 0.5, %v2541_v35  ;;  %v2991_v13 = vld [vmem:[#allocation11_spill] sm:$0xff] }
 0x2c1   : > { %1499 = vst [vmem:[%s2433_s14 + $0x78] sm:$0xff] %v1471_v31  ;;  %v1388_v14 = vsub.f32 0.0, %v1332_v5  ;;  %v832_v51 = vmul.f32 0.3275911, %v804_v54  ;;  %v2700_v16 = vadd.f32 %v2990_v25, %v2243_v23  ;;  %v2706_v8 = vmul.f32 0.70710677, %v2688_v52 }
 0x2c2   : > { %v1082_v38 = vadd.f32 -0.28449672, %v1054_v57  ;;  %v806_v36 = vand.u32 2147483647, %v2693_v39  ;;  %v1266_v9 = vmul.f32 1.442695, %v1221_v30  ;;  %v1223_v55 = vmul.f32 %v1195_v3, %v2656_v44 }
 0x2c3   : > { %v1416_v34 = vsel %vm1360_vm1, %v1332_v5, %v1388_v14  ;;  %v860_v1 = vadd.f32 1.0, %v832_v51  ;;  %v746_v48 = vmul.f32 0.5, %v2580_v59  ;;  %v805_v29 = vand.u32 2147483647, %v2706_v8 }
 0x2c4   : > { %v2702_v47 = vpop.eup %1896  ;;  %v1444_v61 = vadd.f32 1.0, %v1416_v34  ;;  %v1110_v42 = vmul.f32 %v2659_v6, %v1082_v38  ;;  %v834_v18 = vmul.f32 0.3275911, %v806_v36  ;;  %v2718_v45 = vmul.f32 0.70710677, %v2700_v16 }
 0x2c5   : > { %v2708_v4 = vpop.eup %1898  ;;  %v941_v35 = vmul.f32 1.0614054, %v2702_v47  ;;  %1902 = vrcp.f32 %v860_v1  ;;  %vm1362_vm2 = vcmp.ge.f32.partialorder %v2595_v41, 0.0  ;;  %v1270_v2 = vmul.f32 1.442695, %v1223_v55  ;;  %v2992_v41 = vld [vmem:[#allocation12_spill] sm:$0xff] }
 0x2c6   : > { %v1472_v40 = vmul.f32 %v1444_v61, %v744_v56  ;;  %v1138_v11 = vadd.f32 0.2548296, %v1110_v42  ;;  %v943_v15 = vmul.f32 1.0614054, %v2708_v4  ;;  %v862_v58 = vadd.f32 1.0, %v834_v18  ;;  %v1901_v44 = vpop.eup %1900 }
 0x2c7   : > { %v969_v19 = vadd.f32 -1.4531521, %v941_v35  ;;  %1904 = vpow2.f32 %v1266_v9  ;;  %v833_v37 = vmul.f32 0.3275911, %v805_v29  ;;  %v1198_v24 = vsub.f32 0.0, %v806_v36 }
 0x2c8   : > { %1500 = vst [vmem:[%s2433_s14 + $0x80] sm:$0xff] %v1472_v40  ;;  %v1166_v7 = vmul.f32 %v2659_v6, %v1138_v11  ;;  %v971_v10 = vadd.f32 -1.4531521, %v943_v15  ;;  %1906 = vrcp.f32 %v862_v58  ;;  %v1196_v6 = vsub.f32 0.0, %v804_v54 }
 0x2c9   : > { %v997_v53 = vmul.f32 %v2702_v47, %v969_v19  ;;  %v807_v33 = vand.u32 2147483647, %v2718_v45  ;;  %v861_v49 = vadd.f32 1.0, %v833_v37  ;;  %v2726_v31 = vadd.f32 %v2991_v13, %v2237_v20 }
 0x2ca   : > { %v1306_v60 = vmul.f32 %v1901_v44, %v1166_v7  ;;  %v999_v59 = vmul.f32 %v2708_v4, %v971_v10  ;;  %v2729_v5 = vmul.f32 0.5, %v2618_v0  ;;  %1908 = vpow2.f32 %v1270_v2 }
 0x2cb   : > { %v1025_v46 = vadd.f32 1.4214138, %v997_v53  ;;  %v835_v57 = vmul.f32 0.3275911, %v807_v33  ;;  %v2733_v14 = vmul.f32 0.5, %v2633_v12  ;;  %1910 = vrcp.f32 %v861_v49 }
 0x2cc   : > { %v1334_v17 = vsub.f32 1.0, %v1306_v60  ;;  %v1027_v63 = vadd.f32 1.4214138, %v999_v59  ;;  %v1224_v38 = vmul.f32 %v1196_v6, %v804_v54  ;;  %v1226_v51 = vmul.f32 %v1198_v24, %v806_v36 }
 0x2cd   : > { %v1053_v32 = vmul.f32 %v2702_v47, %v1025_v46  ;;  %v863_v56 = vadd.f32 1.0, %v835_v57  ;;  %v1197_v25 = vsub.f32 0.0, %v805_v29  ;;  %v2741_v61 = vmul.f32 0.70710677, %v2726_v31 }
 0x2ce   : > { %v1390_v43 = vsub.f32 0.0, %v1334_v17  ;;  %v1055_v30 = vmul.f32 %v2708_v4, %v1027_v63  ;;  %v1199_v35 = vsub.f32 0.0, %v807_v33  ;;  %v2751_v9 = vadd.f32 %v2992_v41, %v2239_v21 }
 0x2cf   : > { %v1081_v3 = vadd.f32 -0.28449672, %v1053_v32  ;;  %v2736_v20 = vpop.eup %1902  ;;  %1912 = vrcp.f32 %v863_v56  ;;  %v2747_v36 = vand.u32 2147483647, %v2741_v61  ;;  %v1272_v15 = vmul.f32 1.442695, %v1224_v38 }
 0x2d0   : > { %v1418_v0 = vsel %vm1362_vm2, %v1334_v17, %v1390_v43  ;;  %v1083_v34 = vadd.f32 -0.28449672, %v1055_v30  ;;  %v944_v1 = vmul.f32 1.0614054, %v2736_v20  ;;  %vm1361_vm3 = vcmp.ge.f32.partialorder %v2644_v26, 0.0 }
 0x2d1   : > { %v1446_v42 = vadd.f32 1.0, %v1418_v0  ;;  %v1109_v12 = vmul.f32 %v2702_v47, %v1081_v3  ;;  %v1905_v55 = vpop.eup %1904  ;;  %v2757_v7 = vmul.f32 0.5, %v2674_v62  ;;  %v1225_v10 = vmul.f32 %v1197_v25, %v805_v29 }
 0x2d2   : > { %v1111_v54 = vmul.f32 %v2708_v4, %v1083_v34  ;;  %v972_v11 = vadd.f32 -1.4531521, %v944_v1  ;;  %v2753_v19 = vpop.eup %1906  ;;  %v836_v44 = vmul.f32 0.3275911, %v2747_v36  ;;  %vm1363_vm4 = vcmp.ge.f32.partialorder %v2650_v27, 0.0 }
 0x2d3   : > { %v1474_v18 = vmul.f32 %v1446_v42, %v746_v48  ;;  %v1137_v40 = vadd.f32 0.2548296, %v1109_v12  ;;  %v946_v53 = vmul.f32 1.0614054, %v2753_v19  ;;  %v1276_v2 = vmul.f32 1.442695, %v1226_v51 }
 0x2d4   : > { %v1139_v58 = vadd.f32 0.2548296, %v1111_v54  ;;  %v1000_v48 = vmul.f32 %v2736_v20, %v972_v11  ;;  %v1227_v59 = vmul.f32 %v1199_v35, %v807_v33  ;;  %v864_v37 = vadd.f32 1.0, %v836_v44  ;;  %v1909_v29 = vpop.eup %1908  ;;  %v2993_v12 = vld [vmem:[#allocation13_spill] sm:$0xff] }
 0x2d5   : > { %1502 = vst [vmem:[%s2433_s14 + $0x90] sm:$0xff] %v1474_v18  ;;  %v1165_v21 = vmul.f32 %v2702_v47, %v1137_v40  ;;  %v2767_v62 = vmul.f32 0.70710677, %v2751_v9  ;;  %1914 = vpow2.f32 %v1272_v15  ;;  %v974_v24 = vadd.f32 -1.4531521, %v946_v53  ;;  %v2769_v47 = vpop.eup %1910 }
 0x2d6   : > { %v1167_v60 = vmul.f32 %v2708_v4, %v1139_v58  ;;  %v1028_v6 = vadd.f32 1.4214138, %v1000_v48  ;;  %v1274_v63 = vmul.f32 1.442695, %v1225_v10  ;;  %1916 = vrcp.f32 %v864_v37 }
 0x2d7   : > { %v1305_v46 = vmul.f32 %v1905_v55, %v1165_v21  ;;  %v2772_v49 = vand.u32 2147483647, %v2767_v62  ;;  %v1002_v33 = vmul.f32 %v2753_v19, %v974_v24  ;;  %v945_v32 = vmul.f32 1.0614054, %v2769_v47 }
 0x2d8   : > { %v1307_v17 = vmul.f32 %v1909_v29, %v1167_v60  ;;  %v1056_v4 = vmul.f32 %v2736_v20, %v1028_v6  ;;  %1918 = vpow2.f32 %v1276_v2  ;;  %v1278_v43 = vmul.f32 1.442695, %v1227_v59 }
 0x2d9   : > { %v1333_v13 = vsub.f32 1.0, %v1305_v46  ;;  %v838_v30 = vmul.f32 0.3275911, %v2772_v49  ;;  %v1030_v51 = vadd.f32 1.4214138, %v1002_v33  ;;  %v1200_v56 = vsub.f32 0.0, %v2747_v36  ;;  %v2779_v0 = vpop.eup %1912 }
 0x2da   : > { %v1335_v57 = vsub.f32 1.0, %v1307_v17  ;;  %v1084_v38 = vadd.f32 -0.28449672, %v1056_v4  ;;  %v973_v25 = vadd.f32 -1.4531521, %v945_v32  ;;  %v2783_v1 = vadd.f32 %v2993_v12, %v2241_v22 }
 0x2db   : > { %v1389_v3 = vsub.f32 0.0, %v1333_v13  ;;  %v866_v42 = vadd.f32 1.0, %v838_v30  ;;  %v1058_v41 = vmul.f32 %v2753_v19, %v1030_v51  ;;  %v947_v55 = vmul.f32 1.0614054, %v2779_v0 }
 0x2dc   : > { %v1391_v34 = vsub.f32 0.0, %v1335_v57  ;;  %v1112_v54 = vmul.f32 %v2736_v20, %v1084_v38  ;;  %v1001_v11 = vmul.f32 %v2769_v47, %v973_v25  ;;  %vm1364_vm5 = vcmp.ge.f32.partialorder %v2677_v28, 0.0 }
 0x2dd   : > { %v1417_v35 = vsel %vm1361_vm3, %v1333_v13, %v1389_v3  ;;  %1920 = vrcp.f32 %v866_v42  ;;  %v1086_v58 = vadd.f32 -0.28449672, %v1058_v41  ;;  %v975_v44 = vadd.f32 -1.4531521, %v947_v55 }
 0x2de   : > { %v1445_v18 = vadd.f32 1.0, %v1417_v35  ;;  %v1419_v40 = vsel %vm1363_vm4, %v1335_v57, %v1391_v34  ;;  %v1140_v22 = vadd.f32 0.2548296, %v1112_v54  ;;  %1922 = vpow2.f32 %v1274_v63 }
 0x2df   : > { %v1447_v15 = vadd.f32 1.0, %v1419_v40  ;;  %v1029_v10 = vadd.f32 1.4214138, %v1001_v11  ;;  %v1228_v21 = vmul.f32 %v1200_v56, %v2747_v36  ;;  %v1915_v48 = vpop.eup %1914  ;;  %v1114_v2 = vmul.f32 %v2753_v19, %v1086_v58  ;;  %v2994_v36 = vld [vmem:[#allocation14_spill] sm:$0xff] }
 0x2e0   : > { %v1473_v26 = vmul.f32 %v1445_v18, %v2729_v5  ;;  %v1168_v53 = vmul.f32 %v2736_v20, %v1140_v22  ;;  %v2800_v60 = vmul.f32 0.70710677, %v2783_v1  ;;  %v2802_v59 = vpop.eup %1916  ;;  %v1003_v37 = vmul.f32 %v2779_v0, %v975_v44 }
 0x2e1   : > { %v1475_v27 = vmul.f32 %v1447_v15, %v2733_v14  ;;  %v1057_v5 = vmul.f32 %v2769_v47, %v1029_v10  ;;  %v1202_v29 = vsub.f32 0.0, %v2772_v49  ;;  %v2810_v46 = vadd.f32 %v2994_v36, %v2243_v23 }
 0x2e2   : > { %1501 = vst [vmem:[%s2433_s14 + $0x88] sm:$0xff] %v1473_v26  ;;  %v1308_v14 = vmul.f32 %v1915_v48, %v1168_v53  ;;  %v1142_v20 = vadd.f32 0.2548296, %v1114_v2  ;;  %v948_v6 = vmul.f32 1.0614054, %v2802_v59  ;;  %v1919_v17 = vpop.eup %1918  ;;  %vm1366_vm6 = vcmp.ge.f32.partialorder %v2693_v39, 0.0 }
 0x2e3   : > { %1503 = vst [vmem:[%s2433_s14 + $0x98] sm:$0xff] %v1475_v27  ;;  %v2815_v24 = vand.u32 2147483647, %v2800_v60  ;;  %v1085_v63 = vadd.f32 -0.28449672, %v1057_v5  ;;  %1924 = vpow2.f32 %v1278_v43  ;;  %v1230_v38 = vmul.f32 %v1202_v29, %v2772_v49 }
 0x2e4   : > { %v1031_v13 = vadd.f32 1.4214138, %v1003_v37  ;;  %v1280_v4 = vmul.f32 1.442695, %v1228_v21  ;;  %v1336_v33 = vsub.f32 1.0, %v1308_v14  ;;  %v1170_v32 = vmul.f32 %v2753_v19, %v1142_v20 }
 0x2e5   : > { %v976_v23 = vadd.f32 -1.4531521, %v948_v6  ;;  %v837_v57 = vmul.f32 0.3275911, %v2815_v24  ;;  %v1113_v30 = vmul.f32 %v2769_v47, %v1085_v63  ;;  %v2824_v51 = vmul.f32 0.70710677, %v2810_v46 }
 0x2e6   : > { %v1059_v3 = vmul.f32 %v2779_v0, %v1031_v13  ;;  %v1392_v56 = vsub.f32 0.0, %v1336_v33  ;;  %v1310_v34 = vmul.f32 %v1919_v17, %v1170_v32  ;;  %1926 = vpow2.f32 %v1280_v4 }
 0x2e7   : > { %v1004_v43 = vmul.f32 %v2802_v59, %v976_v23  ;;  %v865_v25 = vadd.f32 1.0, %v837_v57  ;;  %v2827_v42 = vpop.eup %1920  ;;  %v1141_v19 = vadd.f32 0.2548296, %v1113_v30  ;;  %v2830_v35 = vand.u32 2147483647, %v2824_v51 }
 0x2e8   : > { %v1087_v12 = vadd.f32 -0.28449672, %v1059_v3  ;;  %v1923_v54 = vpop.eup %1922  ;;  %v1420_v49 = vsel %vm1364_vm5, %v1336_v33, %v1392_v56  ;;  %v1338_v41 = vsub.f32 1.0, %v1310_v34  ;;  %v950_v18 = vmul.f32 1.0614054, %v2827_v42 }
 0x2e9   : > { %v1032_v55 = vadd.f32 1.4214138, %v1004_v43  ;;  %v1448_v40 = vadd.f32 1.0, %v1420_v49  ;;  %v1169_v11 = vmul.f32 %v2769_v47, %v1141_v19  ;;  %1928 = vrcp.f32 %v865_v25 }
 0x2ea   : > { %v1115_v15 = vmul.f32 %v2779_v0, %v1087_v12  ;;  %v1394_v22 = vsub.f32 0.0, %v1338_v41  ;;  %v978_v26 = vadd.f32 -1.4531521, %v950_v18  ;;  %v1284_v10 = vmul.f32 1.442695, %v1230_v38 }
 0x2eb   : > { %v1060_v58 = vmul.f32 %v2802_v59, %v1032_v55  ;;  %v1476_v44 = vmul.f32 %v1448_v40, %v2757_v7  ;;  %v1309_v28 = vmul.f32 %v1923_v54, %v1169_v11  ;;  %v839_v48 = vmul.f32 0.3275911, %v2830_v35 }
 0x2ec   : > { %v1143_v21 = vadd.f32 0.2548296, %v1115_v15  ;;  %v750_v27 = vmul.f32 0.5, %v2682_v50  ;;  %v1422_v47 = vsel %vm1366_vm6, %v1338_v41, %v1394_v22  ;;  %v1006_v2 = vmul.f32 %v2827_v42, %v978_v26 }
 0x2ed   : > { %v1088_v53 = vadd.f32 -0.28449672, %v1060_v58  ;;  %v1925_v5 = vpop.eup %1924  ;;  %1504 = vst [vmem:[%s2433_s14 + $0xa0] sm:$0xff] %v1476_v44  ;;  %v1450_v37 = vadd.f32 1.0, %v1422_v47  ;;  %v1337_v29 = vsub.f32 1.0, %v1309_v28  ;;  %v867_v7 = vadd.f32 1.0, %v839_v48 }
 0x2ee   : > { %v1171_v36 = vmul.f32 %v2779_v0, %v1143_v21  ;;  %v1034_v20 = vadd.f32 1.4214138, %v1006_v2  ;;  %1930 = vpow2.f32 %v1284_v10  ;;  %v1201_v50 = vsub.f32 0.0, %v2815_v24 }
 0x2ef   : > { %v1116_v14 = vmul.f32 %v2802_v59, %v1088_v53  ;;  %v1478_v6 = vmul.f32 %v1450_v37, %v750_v27  ;;  %v1393_v39 = vsub.f32 0.0, %v1337_v29  ;;  %1932 = vrcp.f32 %v867_v7 }
 0x2f0   : > { %v1311_v17 = vmul.f32 %v1925_v5, %v1171_v36  ;;  %vm1365_vm7 = vcmp.ge.f32.partialorder %v2706_v8, 0.0  ;;  %v1062_v13 = vmul.f32 %v2827_v42, %v1034_v20  ;;  %v1927_v4 = vpop.eup %1926  ;;  %v749_v32 = vmul.f32 0.5, %v2688_v52 }
 0x2f1   : > { %v1144_v63 = vadd.f32 0.2548296, %v1116_v14  ;;  %1506 = vst [vmem:[%s2433_s14 + $0xb0] sm:$0xff] %v1478_v6  ;;  %v1421_v33 = vsel %vm1365_vm7, %v1337_v29, %v1393_v39  ;;  %vm1367_vm8 = vcmp.ge.f32.partialorder %v2718_v45, 0.0  ;;  %v1229_v8 = vmul.f32 %v1201_v50, %v2815_v24 }
 0x2f2   : > { %v1339_v0 = vsub.f32 1.0, %v1311_v17  ;;  %v1449_v23 = vadd.f32 1.0, %v1421_v33  ;;  %v1090_v30 = vadd.f32 -0.28449672, %v1062_v13  ;;  %v751_v19 = vmul.f32 0.5, %v2700_v16 }
 0x2f3   : > { %v1172_v57 = vmul.f32 %v2802_v59, %v1144_v63  ;;  %v1929_v3 = vpop.eup %1928  ;;  %v1203_v52 = vsub.f32 0.0, %v2830_v35  ;;  %v1282_v45 = vmul.f32 1.442695, %v1229_v8  ;;  %vm1368_vm9 = vcmp.ge.f32.partialorder %v2741_v61, 0.0 }
 0x2f4   : > { %v1395_v38 = vsub.f32 0.0, %v1339_v0  ;;  %v1477_v56 = vmul.f32 %v1449_v23, %v749_v32  ;;  %v1118_v43 = vmul.f32 %v2827_v42, %v1090_v30  ;;  %v949_v25 = vmul.f32 1.0614054, %v1929_v3 }
 0x2f5   : > { %v1312_v34 = vmul.f32 %v1927_v4, %v1172_v57  ;;  %v1231_v16 = vmul.f32 %v1203_v52, %v2830_v35  ;;  %v752_v44 = vmul.f32 0.5, %v2726_v31  ;;  %1934 = vpow2.f32 %v1282_v45  ;;  %v1553_v52 = vld [vmem:[%s2433_s14 + $0x40] sm:$0xff] (%p2108_p9)  ;;  %v1563_v45 = vld [vmem:[%s2433_s14 + $0x68] sm:$0xff] (%p2108_p9) }
 0x2f6   : > { %v1423_v12 = vsel %vm1367_vm8, %v1339_v0, %v1395_v38  ;;  %1505 = vst [vmem:[%s2433_s14 + $0xa8] sm:$0xff] %v1477_v56  ;;  %v1146_v49 = vadd.f32 0.2548296, %v1118_v43  ;;  %v977_v41 = vadd.f32 -1.4531521, %v949_v25  ;;  %vm1370_vm10 = vcmp.ge.f32.partialorder %v2767_v62, 0.0 }
 0x2f7   : > { %v1451_v59 = vadd.f32 1.0, %v1423_v12  ;;  %v1340_v54 = vsub.f32 1.0, %v1312_v34  ;;  %v1286_v47 = vmul.f32 1.442695, %v1231_v16  ;;  %v754_v29 = vmul.f32 0.5, %v2751_v9  ;;  %v1545_v43 = vld [vmem:[%s2433_s14 + $0x20] sm:$0xff] (%p2108_p9) }
 0x2f8   : > { %v1931_v55 = vpop.eup %1930  ;;  %v1174_v40 = vmul.f32 %v2827_v42, %v1146_v49  ;;  %v1005_v11 = vmul.f32 %v1929_v3, %v977_v41  ;;  %vm1369_vm11 = vcmp.ge.f32.partialorder %v2800_v60, 0.0  ;;  %v753_v32 = vmul.f32 0.5, %v2783_v1  ;;  %v1537_v1 = vld [vmem:[%s2433_s14] sm:$0xff] (%p2108_p9)  ;;  %v1539_v60 = vld [vmem:[%s2433_s14 + $0x8] sm:$0xff] (%p2108_p9)  ;;  %v1551_v12 = vld [vmem:[%s2433_s14 + $0x38] sm:$0xff] (%p2108_p9)  ;;  %1546 = vst [vmem:[%s2893_s23 + $0xc0] sm:$0xff] (%p2108_p9), %v1545_v43 }
 0x2f9   : > { %v1479_v18 = vmul.f32 %v1451_v59, %v751_v19  ;;  %v1396_v24 = vsub.f32 0.0, %v1340_v54  ;;  %v1933_v15 = vpop.eup %1932  ;;  %1936 = vpow2.f32 %v1286_v47  ;;  %vm1371_vm12 = vcmp.ge.f32.partialorder %v2824_v51, 0.0  ;;  %v1543_v51 = vld [vmem:[%s2433_s14 + $0x18] sm:$0xff] (%p2108_p9)  ;;  %v1547_v25 = vld [vmem:[%s2433_s14 + $0x28] sm:$0xff] (%p2108_p9)  ;;  %v1549_v19 = vld [vmem:[%s2433_s14 + $0x30] sm:$0xff] (%p2108_p9)  ;;  %1538 = vst [vmem:[%s2893_s23] sm:$0xff] (%p2108_p9), %v1537_v1 }
 0x2fa   : > { %v1314_v58 = vmul.f32 %v1931_v55, %v1174_v40  ;;  %v1033_v26 = vadd.f32 1.4214138, %v1005_v11  ;;  %v951_v10 = vmul.f32 1.0614054, %v1933_v15  ;;  %v755_v8 = vmul.f32 0.5, %v2810_v46  ;;  %v1541_v46 = vld [vmem:[%s2433_s14 + $0x10] sm:$0xff] (%p2108_p9) }
 0x2fb   : > { %1507 = vst [vmem:[%s2433_s14 + $0xb8] sm:$0xff] %v1479_v18  ;;  %v1424_v22 = vsel %vm1368_vm9, %v1340_v54, %v1396_v24  ;;  %v1555_v59 = vld [vmem:[%s2433_s14 + $0x48] sm:$0xff] (%p2108_p9)  ;;  %v1557_v54 = vld [vmem:[%s2433_s14 + $0x50] sm:$0xff] (%p2108_p9)  ;;  %v1559_v49 = vld [vmem:[%s2433_s14 + $0x58] sm:$0xff] (%p2108_p9) }
 0x2fc   : > { %v1452_v28 = vadd.f32 1.0, %v1424_v22  ;;  %v1342_v21 = vsub.f32 1.0, %v1314_v58  ;;  %v1061_v48 = vmul.f32 %v1929_v3, %v1033_v26  ;;  %v979_v27 = vadd.f32 -1.4531521, %v951_v10  ;;  %v1561_v41 = vld [vmem:[%s2433_s14 + $0x60] sm:$0xff] (%p2108_p9)  ;;  %v1565_v55 = vld [vmem:[%s2433_s14 + $0x70] sm:$0xff] (%p2108_p9) }
 0x2fd   : > { %1540 = vst [vmem:[%s2893_s23 + $0x8] sm:$0xff] (%p2108_p9), %v1539_v60  ;;  %1542 = vst [vmem:[%s2893_s23 + $0x10] sm:$0xff] (%p2108_p9), %v1541_v46  ;;  %v1567_v18 = vld [vmem:[%s2433_s14 + $0x78] sm:$0xff] (%p2108_p9)  ;;  %v1569_v24 = vld [vmem:[%s2433_s14 + $0x80] sm:$0xff] (%p2108_p9) }
 0x2fe   : > { %v1480_v42 = vmul.f32 %v1452_v28, %v752_v44  ;;  %v1398_v53 = vsub.f32 0.0, %v1342_v21  ;;  %v1089_v2 = vadd.f32 -0.28449672, %v1061_v48  ;;  %v1007_v61 = vmul.f32 %v1933_v15, %v979_v27  ;;  %1544 = vst [vmem:[%s2893_s23 + $0x18] sm:$0xff] (%p2108_p9), %v1543_v51  ;;  %1548 = vst [vmem:[%s2893_s23 + $0xc8] sm:$0xff] (%p2108_p9), %v1547_v25  ;;  %v1571_v40 = vld [vmem:[%s2433_s14 + $0x88] sm:$0xff] (%p2108_p9) }
 0x2ff   : > { %v1935_v6 = vpop.eup %1934  ;;  %1550 = vst [vmem:[%s2893_s23 + $0xd0] sm:$0xff] (%p2108_p9), %v1549_v19  ;;  %1552 = vst [vmem:[%s2893_s23 + $0xd8] sm:$0xff] (%p2108_p9), %v1551_v12  ;;  %v1573_v11 = vld [vmem:[%s2433_s14 + $0x90] sm:$0xff] (%p2108_p9)  ;;  %v1577_v16 = vld [vmem:[%s2433_s14 + $0xa0] sm:$0xff] (%p2108_p9) }
 0x300   : > { %1508 = vst [vmem:[%s2433_s14 + $0xc0] sm:$0xff] %v1480_v42  ;;  %v1426_v35 = vsel %vm1370_vm10, %v1342_v21, %v1398_v53  ;;  %v1117_v5 = vmul.f32 %v1929_v3, %v1089_v2  ;;  %v1035_v37 = vadd.f32 1.4214138, %v1007_v61  ;;  %1554 = vst [vmem:[%s2893_s23 + $0x180] sm:$0xff] (%p2108_p9), %v1553_v52  ;;  %v1579_v22 = vld [vmem:[%s2433_s14 + $0xa8] sm:$0xff] (%p2108_p9)  ;;  %v1581_v58 = vld [vmem:[%s2433_s14 + $0xb0] sm:$0xff] (%p2108_p9) }
 0x301   : > { %v1454_v31 = vadd.f32 1.0, %v1426_v35  ;;  %1556 = vst [vmem:[%s2893_s23 + $0x188] sm:$0xff] (%p2108_p9), %v1555_v59  ;;  %1558 = vst [vmem:[%s2893_s23 + $0x190] sm:$0xff] (%p2108_p9), %v1557_v54 }
 0x302   : > { %v1145_v36 = vadd.f32 0.2548296, %v1117_v5  ;;  %v1063_v7 = vmul.f32 %v1933_v15, %v1035_v37  ;;  %1560 = vst [vmem:[%s2893_s23 + $0x198] sm:$0xff] (%p2108_p9), %v1559_v49  ;;  %1562 = vst [vmem:[%s2893_s23 + $0x240] sm:$0xff] (%p2108_p9), %v1561_v41  ;;  %v1583_v26 = vld [vmem:[%s2433_s14 + $0xb8] sm:$0xff] (%p2108_p9) }
 0x303   : > { %v1482_v14 = vmul.f32 %v1454_v31, %v754_v29  ;;  %v1937_v33 = vpop.eup %1936  ;;  %1564 = vst [vmem:[%s2893_s23 + $0x248] sm:$0xff] (%p2108_p9), %v1563_v45  ;;  %1566 = vst [vmem:[%s2893_s23 + $0x250] sm:$0xff] (%p2108_p9), %v1565_v55 }
 0x304   : > { %v1173_v20 = vmul.f32 %v1929_v3, %v1145_v36  ;;  %v1091_v50 = vadd.f32 -0.28449672, %v1063_v7  ;;  %1568 = vst [vmem:[%s2893_s23 + $0x258] sm:$0xff] (%p2108_p9), %v1567_v18  ;;  %1570 = vst [vmem:[%s2893_s23 + $0x300] sm:$0xff] (%p2108_p9), %v1569_v24 }
 0x305   : > { %1510 = vst [vmem:[%s2433_s14 + $0xd0] sm:$0xff] %v1482_v14  ;;  %1572 = vst [vmem:[%s2893_s23 + $0x308] sm:$0xff] (%p2108_p9), %v1571_v40 }
 0x306   : > { %v1313_v39 = vmul.f32 %v1935_v6, %v1173_v20  ;;  %v1119_v17 = vmul.f32 %v1933_v15, %v1091_v50  ;;  %1574 = vst [vmem:[%s2893_s23 + $0x310] sm:$0xff] (%p2108_p9), %v1573_v11  ;;  %1578 = vst [vmem:[%s2893_s23 + $0x3c0] sm:$0xff] (%p2108_p9), %v1577_v16 }
 0x307   : > { %1580 = vst [vmem:[%s2893_s23 + $0x3c8] sm:$0xff] (%p2108_p9), %v1579_v22  ;;  %1582 = vst [vmem:[%s2893_s23 + $0x3d0] sm:$0xff] (%p2108_p9), %v1581_v58  ;;  %v1585_v10 = vld [vmem:[%s2433_s14 + $0xc0] sm:$0xff] (%p2108_p9) }
 0x308   : > { %v1341_v63 = vsub.f32 1.0, %v1313_v39  ;;  %v1147_v13 = vadd.f32 0.2548296, %v1119_v17  ;;  %1584 = vst [vmem:[%s2893_s23 + $0x3d8] sm:$0xff] (%p2108_p9), %v1583_v26  ;;  %1586 = vst [vmem:[%s2893_s23 + $0x480] sm:$0xff] (%p2108_p9), %v1585_v10 }
 0x30a   : > { %v1397_v62 = vsub.f32 0.0, %v1341_v63  ;;  %v1175_v4 = vmul.f32 %v1933_v15, %v1147_v13  ;;  %v1575_v15 = vld [vmem:[%s2433_s14 + $0x98] sm:$0xff] (%p2108_p9) }
 0x30b   : > { %1576 = vst [vmem:[%s2893_s23 + $0x318] sm:$0xff] (%p2108_p9), %v1575_v15 }
 0x30c   : > { %v1425_v9 = vsel %vm1369_vm11, %v1341_v63, %v1397_v62  ;;  %v1315_v0 = vmul.f32 %v1937_v33, %v1175_v4  ;;  %v1589_v28 = vld [vmem:[%s2433_s14 + $0xd0] sm:$0xff] (%p2108_p9) }
 0x30d   : > { %v1453_v23 = vadd.f32 1.0, %v1425_v9  ;;  %1590 = vst [vmem:[%s2893_s23 + $0x490] sm:$0xff] (%p2108_p9), %v1589_v28 }
 0x30e   : > { %v1343_v57 = vsub.f32 1.0, %v1315_v0 }
 0x30f   : > { %v1481_v30 = vmul.f32 %v1453_v23, %v753_v32 }
 0x310   : > { %v1399_v3 = vsub.f32 0.0, %v1343_v57 }
 0x311   : > { %1509 = vst [vmem:[%s2433_s14 + $0xc8] sm:$0xff] %v1481_v30  ;;  %1518 = sbr.rel (!%p2108_p9) target bundleno = 800 (0x320), region = 67 }
 0x312   : > { %v1427_v38 = vsel %vm1371_vm12, %v1343_v57, %v1399_v3 }
 0x313   : > { %v1455_v56 = vadd.f32 1.0, %v1427_v38 }
 0x315   : > { %v1483_v34 = vmul.f32 %v1455_v56, %v755_v8 }
 0x317   : > { %1511 = vst [vmem:[%s2433_s14 + $0xd8] sm:$0xff] %v1483_v34 }
 0x318   : > { %v1587_v44 = vld [vmem:[%s2433_s14 + $0xc8] sm:$0xff] }
 0x319   : > { %1588 = vst [vmem:[%s2893_s23 + $0x488] sm:$0xff] %v1587_v44 }
 0x31e   : > { %v1591_v21 = vld [vmem:[%s2433_s14 + $0xd8] sm:$0xff] }
 0x31f   : > { %1592 = vst [vmem:[%s2893_s23 + $0x498] sm:$0xff] %v1591_v21 }
 0x320 PF: > { %s15_s26 = sadd.s32 1, %s2008_s26   ;;  %s2995_s18 = smov %s1980_s19 }
 0x321   : > { %p12_p2 = scmp.ge.s32.totalorder %s15_s26, 14   ;;  %s2996_s19 = smov %s2113_s12 }
 0x322   : > { %s2997_s20 = smov %s1988_s21  ;;  %s2998_s21 = smov %s2102_s8 }
 0x323   : > { %s2999_s22 = smov %s2000_s24  ;;  %s3000_s23 = smov %s2004_s25 }
 0x324   : > { %s3001_s24 = smov %s3004_s28  ;;  %s3002_s25 = smov %s3008_s29 }
 0x325   :  { %14 = sbr.rel (!%p12_p2) target bundleno = 5 (0x5), region = 127 }

// kernel: _lambda_.27
= control target key start
LH: loop header
LB: loop body
LE: loop exit
PB: predicated region body
PF: predicated region fallthrough
CT: control target
= control target key end

     0   :  { %s1739_s15 = smov 0   ;;  %s1741_s16 = smov 0   ;;  %s2184_s0 = inlined_call_operand.vmem [shape: f32[112,3072], index: 0, kind: input, shape index: {}]   ;;  %s2185_s1 = inlined_call_operand.vmem [shape: f32[3072,32], index: 1, kind: input, shape index: {}]   ;;  %s2186_s2 = inlined_call_operand.vmem [shape: f32[1,32], index: 2, kind: input, shape index: {}]   ;;  %s2187_s3 = inlined_call_operand.vmem [shape: f32[112,32], index: 3, kind: input, shape index: {}]   ;;  %s2188_s4 = inlined_call_operand.vmem [shape: f32[112,32], index: 4, kind: output, shape index: {}]  }
   0x1   :  { %s1743_s17 = smov 0   ;;  %s1745_s18 = smov 0  }
   0x2   :  { %s1747_s19 = smov 0   ;;  %s1749_s20 = smov 0  }
   0x3   :  { %s1751_s21 = smov 0  }
   0x4 LB: > { %s26_s22 = sadd.s32 1, %s1703_s19  ;;  %s33_s23 = sadd.s32 1, %s1707_s20  ;;  %s1711_s21 = sphi %s1751_s21, %s14_s21   ;;  %s1707_s20 = sphi %s1749_s20, %s2194_s20   ;;  %s1703_s19 = sphi %s1747_s19, %s2193_s19   ;;  %s1699_s18 = sphi %s1745_s18, %s2192_s18   ;;  %s1695_s17 = sphi %s1743_s17, %s2191_s17   ;;  %s1691_s16 = sphi %s1741_s16, %s2190_s16   ;;  %s1687_s15 = sphi %s1739_s15, %s2189_s15  }
   0x5   : > { %p27_p0 = scmp.ge.s32.totalorder %s26_s22, 3  ;;  %p49_p1 = scmp.ne.s32.totalorder %s1691_s16, %s1687_s15 }
   0x6   : > { %p50_p2 = scmp.eq.s32.totalorder %s1711_s21, 0  ;;  %s42_s27 = sadd.s32 1, %s1691_s16 }
   0x7   : > { %s2196_s22 = smov (%p27_p0, %s26_s22), 0  ;;  %s2198_s23 = smov (!%p27_p0, %s33_s23), %s1707_s20 }
   0x8   : > { %p51_p3 = por %p50_p2, %p49_p1  ;;  %p35_p4 = scmp.ge.s32.totalorder %s2198_s23, 2 }
   0x9   : > { %s38_s24 = ssub.s32 %s1703_s19, %s2196_s22  ;;  %p1243_p6 = scmp.ge.s32.totalorder %s1711_s21, 6 }
   0xa   : > { %s2200_s23 = smov (%p35_p4, %s2198_s23), 0 }
   0xb   : > { %s37_s25 = ssub.s32 %s1707_s20, %s2200_s23  ;;  %191 = sbr.rel (%p1243_p6) target bundleno = 54 (0x36), region = 20 }
   0xc   : > { %s39_s26 = sor.u32 %s38_s24, %s37_s25 }
   0xd   : > { %p40_p5 = scmp.eq.s32.totalorder %s39_s26, 0 }
   0xf   : > { %s1790_s28 = scalar_select %p40_p5, %s1691_s16, %s42_s27  }
  0x12   : > { %194 = sbr.rel (!%p51_p3) target bundleno = 54 (0x36), region = 24  ;;  %s196_s29 = sand.u32 (%p51_p3), 1, %s1691_s16  }
  0x13   : > { %s1596_s30 = smul.u32 (%p51_p3), 448, %s196_s29  ;;  %s1244_s5 = sshll.u32 (%p51_p3), %s1703_s19, 3 }
  0x14   : > { %s1599_s6 = smul.u32 (%p51_p3), 168, %s1707_s20 }
  0x15   : > { %s1804_s12 = scalar_lea.vmem (%p51_p3), [#allocation3], %s1596_s30 }
  0x16   : > { %s202_s7 = sadd.s32 (%p51_p3), %s1599_s6, %s1244_s5 }
  0x17   : > { %s1245_s8 = sshll.u32 (%p51_p3), %s202_s7, 3 }
  0x18   : > { %s1799_s11 = scalar_lea.vmem (%p51_p3), %s2184_s0, %s1245_s8 }
  0x19   : > { %v217_v0 = vld [vmem:[%s1799_s11] sm:$0xff]  ;;  %v219_v1 = vld [vmem:[%s1799_s11 + $0x8] sm:$0xff]  ;;  %v221_v2 = vld [vmem:[%s1799_s11 + $0x10] sm:$0xff] }
  0x1a   : > { %218 = vst [vmem:[%s1804_s12] sm:$0xff] %v217_v0  ;;  %220 = vst [vmem:[%s1804_s12 + $0x8] sm:$0xff] %v219_v1  ;;  %v223_v3 = vld [vmem:[%s1799_s11 + $0x18] sm:$0xff]  ;;  %v225_v4 = vld [vmem:[%s1799_s11 + $0x20] sm:$0xff] }
  0x1b   : > { %222 = vst [vmem:[%s1804_s12 + $0x10] sm:$0xff] %v221_v2  ;;  %v227_v5 = vld [vmem:[%s1799_s11 + $0x28] sm:$0xff]  ;;  %224 = vst [vmem:[%s1804_s12 + $0x18] sm:$0xff] %v223_v3  ;;  %v229_v6 = vld [vmem:[%s1799_s11 + $0x30] sm:$0xff] }
  0x1c   : > { %226 = vst [vmem:[%s1804_s12 + $0x20] sm:$0xff] %v225_v4  ;;  %228 = vst [vmem:[%s1804_s12 + $0x28] sm:$0xff] %v227_v5  ;;  %v231_v7 = vld [vmem:[%s1799_s11 + $0x38] sm:$0xff]  ;;  %v233_v8 = vld [vmem:[%s1799_s11 + $0xc0] sm:$0xff] }
  0x1d   : > { %230 = vst [vmem:[%s1804_s12 + $0x30] sm:$0xff] %v229_v6  ;;  %232 = vst [vmem:[%s1804_s12 + $0x38] sm:$0xff] %v231_v7  ;;  %v235_v9 = vld [vmem:[%s1799_s11 + $0xc8] sm:$0xff]  ;;  %v237_v10 = vld [vmem:[%s1799_s11 + $0xd0] sm:$0xff] }
  0x1e   : > { %234 = vst [vmem:[%s1804_s12 + $0x40] sm:$0xff] %v233_v8  ;;  %v239_v11 = vld [vmem:[%s1799_s11 + $0xd8] sm:$0xff]  ;;  %236 = vst [vmem:[%s1804_s12 + $0x48] sm:$0xff] %v235_v9  ;;  %v241_v12 = vld [vmem:[%s1799_s11 + $0xe0] sm:$0xff] }
  0x1f   : > { %238 = vst [vmem:[%s1804_s12 + $0x50] sm:$0xff] %v237_v10  ;;  %240 = vst [vmem:[%s1804_s12 + $0x58] sm:$0xff] %v239_v11  ;;  %v243_v13 = vld [vmem:[%s1799_s11 + $0xe8] sm:$0xff]  ;;  %v245_v14 = vld [vmem:[%s1799_s11 + $0xf0] sm:$0xff] }
  0x20   : > { %242 = vst [vmem:[%s1804_s12 + $0x60] sm:$0xff] %v241_v12  ;;  %244 = vst [vmem:[%s1804_s12 + $0x68] sm:$0xff] %v243_v13  ;;  %v247_v15 = vld [vmem:[%s1799_s11 + $0xf8] sm:$0xff]  ;;  %v249_v16 = vld [vmem:[%s1799_s11 + $0x180] sm:$0xff] }
  0x21   : > { %246 = vst [vmem:[%s1804_s12 + $0x70] sm:$0xff] %v245_v14  ;;  %v251_v17 = vld [vmem:[%s1799_s11 + $0x188] sm:$0xff]  ;;  %248 = vst [vmem:[%s1804_s12 + $0x78] sm:$0xff] %v247_v15  ;;  %v253_v18 = vld [vmem:[%s1799_s11 + $0x190] sm:$0xff] }
  0x22   : > { %250 = vst [vmem:[%s1804_s12 + $0x80] sm:$0xff] %v249_v16  ;;  %252 = vst [vmem:[%s1804_s12 + $0x88] sm:$0xff] %v251_v17  ;;  %v255_v19 = vld [vmem:[%s1799_s11 + $0x198] sm:$0xff]  ;;  %v257_v20 = vld [vmem:[%s1799_s11 + $0x1a0] sm:$0xff] }
  0x23   : > { %254 = vst [vmem:[%s1804_s12 + $0x90] sm:$0xff] %v253_v18  ;;  %256 = vst [vmem:[%s1804_s12 + $0x98] sm:$0xff] %v255_v19  ;;  %v259_v21 = vld [vmem:[%s1799_s11 + $0x1a8] sm:$0xff]  ;;  %v261_v22 = vld [vmem:[%s1799_s11 + $0x1b0] sm:$0xff] }
  0x24   : > { %258 = vst [vmem:[%s1804_s12 + $0xa0] sm:$0xff] %v257_v20  ;;  %v263_v23 = vld [vmem:[%s1799_s11 + $0x1b8] sm:$0xff]  ;;  %260 = vst [vmem:[%s1804_s12 + $0xa8] sm:$0xff] %v259_v21  ;;  %v265_v24 = vld [vmem:[%s1799_s11 + $0x240] sm:$0xff] }
  0x25   : > { %262 = vst [vmem:[%s1804_s12 + $0xb0] sm:$0xff] %v261_v22  ;;  %264 = vst [vmem:[%s1804_s12 + $0xb8] sm:$0xff] %v263_v23  ;;  %v267_v25 = vld [vmem:[%s1799_s11 + $0x248] sm:$0xff]  ;;  %v269_v26 = vld [vmem:[%s1799_s11 + $0x250] sm:$0xff] }
  0x26   : > { %266 = vst [vmem:[%s1804_s12 + $0xc0] sm:$0xff] %v265_v24  ;;  %268 = vst [vmem:[%s1804_s12 + $0xc8] sm:$0xff] %v267_v25  ;;  %v271_v27 = vld [vmem:[%s1799_s11 + $0x258] sm:$0xff]  ;;  %v273_v28 = vld [vmem:[%s1799_s11 + $0x260] sm:$0xff] }
  0x27   : > { %270 = vst [vmem:[%s1804_s12 + $0xd0] sm:$0xff] %v269_v26  ;;  %v275_v29 = vld [vmem:[%s1799_s11 + $0x268] sm:$0xff]  ;;  %272 = vst [vmem:[%s1804_s12 + $0xd8] sm:$0xff] %v271_v27  ;;  %v277_v30 = vld [vmem:[%s1799_s11 + $0x270] sm:$0xff] }
  0x28   : > { %274 = vst [vmem:[%s1804_s12 + $0xe0] sm:$0xff] %v273_v28  ;;  %276 = vst [vmem:[%s1804_s12 + $0xe8] sm:$0xff] %v275_v29  ;;  %v279_v31 = vld [vmem:[%s1799_s11 + $0x278] sm:$0xff]  ;;  %v281_v32 = vld [vmem:[%s1799_s11 + $0x300] sm:$0xff] }
  0x29   : > { %278 = vst [vmem:[%s1804_s12 + $0xf0] sm:$0xff] %v277_v30  ;;  %280 = vst [vmem:[%s1804_s12 + $0xf8] sm:$0xff] %v279_v31  ;;  %v283_v33 = vld [vmem:[%s1799_s11 + $0x308] sm:$0xff]  ;;  %v285_v34 = vld [vmem:[%s1799_s11 + $0x310] sm:$0xff] }
  0x2a   : > { %282 = vst [vmem:[%s1804_s12 + $0x100] sm:$0xff] %v281_v32  ;;  %v287_v35 = vld [vmem:[%s1799_s11 + $0x318] sm:$0xff]  ;;  %284 = vst [vmem:[%s1804_s12 + $0x108] sm:$0xff] %v283_v33  ;;  %v289_v36 = vld [vmem:[%s1799_s11 + $0x320] sm:$0xff] }
  0x2b   : > { %286 = vst [vmem:[%s1804_s12 + $0x110] sm:$0xff] %v285_v34  ;;  %288 = vst [vmem:[%s1804_s12 + $0x118] sm:$0xff] %v287_v35  ;;  %v291_v37 = vld [vmem:[%s1799_s11 + $0x328] sm:$0xff]  ;;  %v293_v38 = vld [vmem:[%s1799_s11 + $0x330] sm:$0xff] }
  0x2c   : > { %290 = vst [vmem:[%s1804_s12 + $0x120] sm:$0xff] %v289_v36  ;;  %292 = vst [vmem:[%s1804_s12 + $0x128] sm:$0xff] %v291_v37  ;;  %v295_v39 = vld [vmem:[%s1799_s11 + $0x338] sm:$0xff]  ;;  %v297_v40 = vld [vmem:[%s1799_s11 + $0x3c0] sm:$0xff] }
  0x2d   : > { %294 = vst [vmem:[%s1804_s12 + $0x130] sm:$0xff] %v293_v38  ;;  %v299_v41 = vld [vmem:[%s1799_s11 + $0x3c8] sm:$0xff]  ;;  %296 = vst [vmem:[%s1804_s12 + $0x138] sm:$0xff] %v295_v39  ;;  %v301_v42 = vld [vmem:[%s1799_s11 + $0x3d0] sm:$0xff] }
  0x2e   : > { %298 = vst [vmem:[%s1804_s12 + $0x140] sm:$0xff] %v297_v40  ;;  %300 = vst [vmem:[%s1804_s12 + $0x148] sm:$0xff] %v299_v41  ;;  %v303_v43 = vld [vmem:[%s1799_s11 + $0x3d8] sm:$0xff]  ;;  %v305_v44 = vld [vmem:[%s1799_s11 + $0x3e0] sm:$0xff] }
  0x2f   : > { %302 = vst [vmem:[%s1804_s12 + $0x150] sm:$0xff] %v301_v42  ;;  %304 = vst [vmem:[%s1804_s12 + $0x158] sm:$0xff] %v303_v43  ;;  %v307_v45 = vld [vmem:[%s1799_s11 + $0x3e8] sm:$0xff]  ;;  %v309_v46 = vld [vmem:[%s1799_s11 + $0x3f0] sm:$0xff] }
  0x30   : > { %306 = vst [vmem:[%s1804_s12 + $0x160] sm:$0xff] %v305_v44  ;;  %v311_v47 = vld [vmem:[%s1799_s11 + $0x3f8] sm:$0xff]  ;;  %308 = vst [vmem:[%s1804_s12 + $0x168] sm:$0xff] %v307_v45  ;;  %v313_v48 = vld [vmem:[%s1799_s11 + $0x480] sm:$0xff] }
  0x31   : > { %310 = vst [vmem:[%s1804_s12 + $0x170] sm:$0xff] %v309_v46  ;;  %312 = vst [vmem:[%s1804_s12 + $0x178] sm:$0xff] %v311_v47  ;;  %v315_v49 = vld [vmem:[%s1799_s11 + $0x488] sm:$0xff]  ;;  %v317_v50 = vld [vmem:[%s1799_s11 + $0x490] sm:$0xff] }
  0x32   : > { %314 = vst [vmem:[%s1804_s12 + $0x180] sm:$0xff] %v313_v48  ;;  %316 = vst [vmem:[%s1804_s12 + $0x188] sm:$0xff] %v315_v49  ;;  %v319_v51 = vld [vmem:[%s1799_s11 + $0x498] sm:$0xff]  ;;  %v321_v52 = vld [vmem:[%s1799_s11 + $0x4a0] sm:$0xff] }
  0x33   : > { %318 = vst [vmem:[%s1804_s12 + $0x190] sm:$0xff] %v317_v50  ;;  %v323_v53 = vld [vmem:[%s1799_s11 + $0x4a8] sm:$0xff]  ;;  %320 = vst [vmem:[%s1804_s12 + $0x198] sm:$0xff] %v319_v51  ;;  %v325_v54 = vld [vmem:[%s1799_s11 + $0x4b0] sm:$0xff] }
  0x34   : > { %322 = vst [vmem:[%s1804_s12 + $0x1a0] sm:$0xff] %v321_v52  ;;  %324 = vst [vmem:[%s1804_s12 + $0x1a8] sm:$0xff] %v323_v53  ;;  %v327_v55 = vld [vmem:[%s1799_s11 + $0x4b8] sm:$0xff] }
  0x35   : > { %326 = vst [vmem:[%s1804_s12 + $0x1b0] sm:$0xff] %v325_v54  ;;  %328 = vst [vmem:[%s1804_s12 + $0x1b8] sm:$0xff] %v327_v55 }
  0x36 PF: > { %p1246_p7 = scmp.ge.s32.totalorder %s1711_s21, 1  ;;  %p357_p8 = scmp.lt.s32.totalorder %s1711_s21, 7 }
  0x38   : > { %p358_p9 = pnand %p1246_p7, %p357_p8 }
  0x39   : > { %s364_s13 = sand.u32 (!%p358_p9), 1, %s1687_s15   ;;  %s1247_s14 = sshll.u32 (!%p358_p9), %s1695_s17, 7 }
  0x3a   : > { %361 = sbr.rel (%p358_p9) target bundleno = 401 (0x191), region = 55  ;;  %p414_p10 = scmp.lt.s32.totalorder (!%p358_p9), %s1247_s14, 383 }
  0x3b   : > { %s1598_s24 = smul.u32 (!%p358_p9), 448, %s364_s13  ;;  %p1251_p12 = scmp.ne.s32.totalorder (!%p358_p9), %s1695_s17, 0 }
  0x3c   : > { %s425_s25 = smul.u32 (!%p358_p9), 7, %s1699_s18 }
  0x3d   : > { %s1935_s18 = scalar_lea.vmem (!%p358_p9), [#allocation3], %s1598_s24 }
  0x3e   : > { %p426_p11 = scmp.lt.s32.totalorder (!%p358_p9), %s425_s25, 13 }
  0x41   : > { %s2202_s14 = smov (!%p414_p10, %s1247_s14), 383  ;;  %s2204_s25 = smov (!%p426_p11, %s425_s25), 13 }
  0x42   : > { %s1248_s26 = sshll.u32 %s2202_s14, 3  ;;  %s1249_s5 = sshll.u32 %s2204_s25, 3  ;;  %vm447_vm0 = vcmask (!%p1251_p12), 261120   ;;  %v1713_v56 = vmov (!%p1251_p12), 0.0  }
  0x43   : > { %s1923_s30 = scalar_lea.vmem %s2185_s1, %s1248_s26  ;;  %s1928_s8 = scalar_lea.vmem %s2187_s3, %s1249_s5  ;;  %448 = vst.msk [vmem:[#allocation2] sm:$0xff] (!%p1251_p12), %vm447_vm0, %v1713_v56  ;;  %449 = vst.msk [vmem:[#allocation2 + $0x8] sm:$0xff] (!%p1251_p12), %vm447_vm0, %v1713_v56 }
  0x44   : > { %s1933_s10 = scalar_lea.vmem %s2188_s4, %s1249_s5  ;;  %446 = sbr.rel (%p1251_p12) target bundleno = 75 (0x4b), region = 63  ;;  %450 = vst.msk [vmem:[#allocation2 + $0x10] sm:$0xff] (!%p1251_p12), %vm447_vm0, %v1713_v56  ;;  %451 = vst.msk [vmem:[#allocation2 + $0x18] sm:$0xff] (!%p1251_p12), %vm447_vm0, %v1713_v56 }
  0x45   : > { %452 = vst.msk [vmem:[#allocation2 + $0x20] sm:$0xff] (!%p1251_p12), %vm447_vm0, %v1713_v56  ;;  %453 = vst.msk [vmem:[#allocation2 + $0x28] sm:$0xff] (!%p1251_p12), %vm447_vm0, %v1713_v56 }
  0x46   : > { %454 = vst.msk [vmem:[#allocation2 + $0x30] sm:$0xff] (!%p1251_p12), %vm447_vm0, %v1713_v56 }
  0x4b PF: > { %v534_v57 = vld [vmem:[%s1923_s30 + $0x80] sm:$0xff]  ;;  %v535_v58 = vld [vmem:[%s1923_s30 + $0x88] sm:$0xff]  ;;  %v536_v4 = vld [vmem:[%s1923_s30 + $0x90] sm:$0xff]  ;;  %vm1053_vm1 = vcmask 261120   ;;  %p1252_p13 = scmp.ne.s32.totalorder %s1695_s17, 2 }
  0x4c   : > { %v566_v59 = vld [vmem:[%s1923_s30 + $0x180] sm:$0xff]  ;;  %v1468_v60 = vpack.c.bf16 %v535_v58, %v534_v57  ;;  %v567_v61 = vld [vmem:[%s1923_s30 + $0x188] sm:$0xff]  ;;  %v537_v6 = vld [vmem:[%s1923_s30 + $0x98] sm:$0xff] }
  0x4d   : > { %v518_v62 = vld [vmem:[%s1923_s30] sm:$0xff]  ;;  %v519_v63 = vld [vmem:[%s1923_s30 + $0x8] sm:$0xff]  ;;  %v1500_v0 = vpack.c.bf16 %v567_v61, %v566_v59  ;;  %v568_v7 = vld [vmem:[%s1923_s30 + $0x190] sm:$0xff]  ;;  %v1472_v9 = vpack.c.bf16 %v537_v6, %v536_v4 }
  0x4e   : > { %v1470_v1 = vpack.c.bf16 %v519_v63, %v518_v62  ;;  %v550_v2 = vld [vmem:[%s1923_s30 + $0x100] sm:$0xff]  ;;  %v551_v3 = vld [vmem:[%s1923_s30 + $0x108] sm:$0xff]  ;;  %1469 = vmatprep.subr.bf16.mxu0 %v1468_v60  ;;  %v569_v8 = vld [vmem:[%s1923_s30 + $0x198] sm:$0xff] }
  0x4f   : > { %v1502_v5 = vpack.c.bf16 %v551_v3, %v550_v2  ;;  %1501 = vmatprep.subr.bf16.mxu1 %v1500_v0  ;;  %v1504_v10 = vpack.c.bf16 %v569_v8, %v568_v7  ;;  %v520_v11 = vld [vmem:[%s1923_s30 + $0x10] sm:$0xff]  ;;  %v521_v12 = vld [vmem:[%s1923_s30 + $0x18] sm:$0xff]  ;;  %v538_v16 = vld [vmem:[%s1923_s30 + $0xa0] sm:$0xff] }
  0x50   : > { %1471 = vmatpush3.bf16.msra.mxu0 %v1470_v1  ;;  %v552_v13 = vld [vmem:[%s1923_s30 + $0x110] sm:$0xff]  ;;  %v1474_v14 = vpack.c.bf16 %v521_v12, %v520_v11  ;;  %v553_v15 = vld [vmem:[%s1923_s30 + $0x118] sm:$0xff]  ;;  %v539_v17 = vld [vmem:[%s1923_s30 + $0xa8] sm:$0xff] }
  0x51   : > { %1503 = vmatpush3.bf16.msra.mxu1 %v1502_v5  ;;  %1473 = vmatprep.subr.bf16.mxu0 %v1472_v9  ;;  %v1506_v18 = vpack.c.bf16 %v553_v15, %v552_v13  ;;  %v1476_v19 = vpack.c.bf16 %v539_v17, %v538_v16  ;;  %v570_v20 = vld [vmem:[%s1923_s30 + $0x1a0] sm:$0xff]  ;;  %v571_v21 = vld [vmem:[%s1923_s30 + $0x1a8] sm:$0xff]  ;;  %v540_v28 = vld [vmem:[%s1923_s30 + $0xb0] sm:$0xff] }
  0x52   : > { %1505 = vmatprep.subr.bf16.mxu1 %v1504_v10  ;;  %v522_v22 = vld [vmem:[%s1923_s30 + $0x20] sm:$0xff]  ;;  %v1508_v23 = vpack.c.bf16 %v571_v21, %v570_v20  ;;  %v523_v24 = vld [vmem:[%s1923_s30 + $0x28] sm:$0xff]  ;;  %v541_v29 = vld [vmem:[%s1923_s30 + $0xb8] sm:$0xff] }
  0x53   : > { %v554_v25 = vld [vmem:[%s1923_s30 + $0x120] sm:$0xff]  ;;  %v555_v26 = vld [vmem:[%s1923_s30 + $0x128] sm:$0xff]  ;;  %v1478_v27 = vpack.c.bf16 %v523_v24, %v522_v22  ;;  %v572_v30 = vld [vmem:[%s1923_s30 + $0x1b0] sm:$0xff]  ;;  %v1480_v32 = vpack.c.bf16 %v541_v29, %v540_v28 }
  0x54   : > { %1475 = vmatpush3.bf16.msra.mxu0 %v1474_v14  ;;  %v1510_v31 = vpack.c.bf16 %v555_v26, %v554_v25  ;;  %v573_v33 = vld [vmem:[%s1923_s30 + $0x1b8] sm:$0xff]  ;;  %v524_v34 = vld [vmem:[%s1923_s30 + $0x30] sm:$0xff]  ;;  %v542_v39 = vld [vmem:[%s1923_s30 + $0xc0] sm:$0xff] }
  0x55   : > { %1507 = vmatpush3.bf16.msra.mxu1 %v1506_v18  ;;  %1477 = vmatprep.subr.bf16.mxu0 %v1476_v19  ;;  %v525_v35 = vld [vmem:[%s1923_s30 + $0x38] sm:$0xff]  ;;  %v1512_v36 = vpack.c.bf16 %v573_v33, %v572_v30  ;;  %v556_v37 = vld [vmem:[%s1923_s30 + $0x130] sm:$0xff]  ;;  %v543_v40 = vld [vmem:[%s1923_s30 + $0xc8] sm:$0xff] }
  0x56   : > { %1509 = vmatprep.subr.bf16.mxu1 %v1508_v23  ;;  %v557_v38 = vld [vmem:[%s1923_s30 + $0x138] sm:$0xff]  ;;  %v574_v41 = vld [vmem:[%s1923_s30 + $0x1c0] sm:$0xff]  ;;  %v575_v42 = vld [vmem:[%s1923_s30 + $0x1c8] sm:$0xff]  ;;  %v1482_v43 = vpack.c.bf16 %v525_v35, %v524_v34  ;;  %v1484_v45 = vpack.c.bf16 %v543_v40, %v542_v39 }
  0x57   : > { %v1514_v44 = vpack.c.bf16 %v557_v38, %v556_v37  ;;  %v526_v46 = vld [vmem:[%s1923_s30 + $0x40] sm:$0xff]  ;;  %v527_v47 = vld [vmem:[%s1923_s30 + $0x48] sm:$0xff]  ;;  %v1516_v49 = vpack.c.bf16 %v575_v42, %v574_v41  ;;  %v544_v51 = vld [vmem:[%s1923_s30 + $0xd0] sm:$0xff] }
  0x58   : > { %1479 = vmatpush3.bf16.msra.mxu0 %v1478_v27  ;;  %v558_v48 = vld [vmem:[%s1923_s30 + $0x140] sm:$0xff]  ;;  %v559_v50 = vld [vmem:[%s1923_s30 + $0x148] sm:$0xff]  ;;  %v545_v52 = vld [vmem:[%s1923_s30 + $0xd8] sm:$0xff]  ;;  %v1486_v55 = vpack.c.bf16 %v527_v47, %v526_v46 }
  0x59   : > { %1511 = vmatpush3.bf16.msra.mxu1 %v1510_v31  ;;  %1481 = vmatprep.subr.bf16.mxu0 %v1480_v32  ;;  %v576_v53 = vld [vmem:[%s1923_s30 + $0x1d0] sm:$0xff]  ;;  %v577_v54 = vld [vmem:[%s1923_s30 + $0x1d8] sm:$0xff]  ;;  %v1518_v56 = vpack.c.bf16 %v559_v50, %v558_v48  ;;  %v1488_v57 = vpack.c.bf16 %v545_v52, %v544_v51  ;;  %v546_v63 = vld [vmem:[%s1923_s30 + $0xe0] sm:$0xff] }
  0x5a   : > { %1513 = vmatprep.subr.bf16.mxu1 %v1512_v36  ;;  %v528_v58 = vld [vmem:[%s1923_s30 + $0x50] sm:$0xff]  ;;  %v529_v59 = vld [vmem:[%s1923_s30 + $0x58] sm:$0xff]  ;;  %v1520_v61 = vpack.c.bf16 %v577_v54, %v576_v53  ;;  %v547_v0 = vld [vmem:[%s1923_s30 + $0xe8] sm:$0xff] }
  0x5b   : > { %v560_v60 = vld [vmem:[%s1923_s30 + $0x150] sm:$0xff]  ;;  %v561_v62 = vld [vmem:[%s1923_s30 + $0x158] sm:$0xff]  ;;  %v578_v1 = vld [vmem:[%s1923_s30 + $0x1e0] sm:$0xff]  ;;  %v1490_v3 = vpack.c.bf16 %v529_v59, %v528_v58  ;;  %v1492_v7 = vpack.c.bf16 %v547_v0, %v546_v63 }
  0x5c   : > { %1483 = vmatpush3.bf16.msra.mxu0 %v1482_v43  ;;  %v579_v2 = vld [vmem:[%s1923_s30 + $0x1e8] sm:$0xff]  ;;  %v530_v4 = vld [vmem:[%s1923_s30 + $0x60] sm:$0xff]  ;;  %v1522_v6 = vpack.c.bf16 %v561_v62, %v560_v60  ;;  %v465_v10 = vld [vmem:[%s1935_s18 + $0x18] sm:$0xff] }
  0x5d   : > { %1515 = vmatpush3.bf16.msra.mxu1 %v1514_v44  ;;  %1485 = vmatprep.subr.bf16.mxu0 %v1484_v45  ;;  %v531_v5 = vld [vmem:[%s1923_s30 + $0x68] sm:$0xff]  ;;  %v562_v8 = vld [vmem:[%s1923_s30 + $0x160] sm:$0xff]  ;;  %v1524_v11 = vpack.c.bf16 %v579_v2, %v578_v1  ;;  %v548_v13 = vld [vmem:[%s1923_s30 + $0xf0] sm:$0xff] }
  0x5e   : > { %1517 = vmatprep.subr.bf16.mxu1 %v1516_v49  ;;  %v463_v9 = vld [vmem:[%s1935_s18 + $0x8] sm:$0xff]  ;;  %v563_v12 = vld [vmem:[%s1923_s30 + $0x168] sm:$0xff]  ;;  %v549_v14 = vld [vmem:[%s1923_s30 + $0xf8] sm:$0xff]  ;;  %810 = vmatprep.mubr.f32.mxu1 %v465_v10  ;;  %v1494_v17 = vpack.c.bf16 %v531_v5, %v530_v4 }
  0x5f   : > { %710 = vmatprep.mubr.f32.mxu0 %v463_v9  ;;  %v580_v15 = vld [vmem:[%s1923_s30 + $0x1f0] sm:$0xff]  ;;  %v581_v16 = vld [vmem:[%s1923_s30 + $0x1f8] sm:$0xff]  ;;  %v1526_v18 = vpack.c.bf16 %v563_v12, %v562_v8  ;;  %v1496_v19 = vpack.c.bf16 %v549_v14, %v548_v13  ;;  %v598_v25 = vld [vmem:[%s1923_s30 + $0x280] sm:$0xff] }
  0x60   : > { %1487 = vmatpush3.bf16.msra.mxu0 %v1486_v55  ;;  %v532_v20 = vld [vmem:[%s1923_s30 + $0x70] sm:$0xff]  ;;  %v533_v21 = vld [vmem:[%s1923_s30 + $0x78] sm:$0xff]  ;;  %v1528_v23 = vpack.c.bf16 %v581_v16, %v580_v15  ;;  %v599_v26 = vld [vmem:[%s1923_s30 + $0x288] sm:$0xff] }
  0x61   : > { %1519 = vmatpush3.bf16.msra.mxu1 %v1518_v56  ;;  %1489 = vmatprep.subr.bf16.mxu0 %v1488_v57  ;;  %v564_v22 = vld [vmem:[%s1923_s30 + $0x170] sm:$0xff]  ;;  %v565_v24 = vld [vmem:[%s1923_s30 + $0x178] sm:$0xff]  ;;  %v630_v27 = vld [vmem:[%s1923_s30 + $0x380] sm:$0xff]  ;;  %v1498_v29 = vpack.c.bf16 %v533_v21, %v532_v20  ;;  %v1532_v31 = vpack.c.bf16 %v599_v26, %v598_v25 }
  0x62   : > { %1521 = vmatprep.subr.bf16.mxu1 %v1520_v61  ;;  %v631_v28 = vld [vmem:[%s1923_s30 + $0x388] sm:$0xff]  ;;  %v1530_v30 = vpack.c.bf16 %v565_v24, %v564_v22  ;;  %v582_v32 = vld [vmem:[%s1923_s30 + $0x200] sm:$0xff]  ;;  %v600_v37 = vld [vmem:[%s1923_s30 + $0x290] sm:$0xff] }
  0x63   : > { %v583_v33 = vld [vmem:[%s1923_s30 + $0x208] sm:$0xff]  ;;  %v614_v34 = vld [vmem:[%s1923_s30 + $0x300] sm:$0xff]  ;;  %v1564_v35 = vpack.c.bf16 %v631_v28, %v630_v27  ;;  %v601_v38 = vld [vmem:[%s1923_s30 + $0x298] sm:$0xff] }
  0x64   : > { %1491 = vmatpush3.bf16.msra.mxu0 %v1490_v3  ;;  %v615_v36 = vld [vmem:[%s1923_s30 + $0x308] sm:$0xff]  ;;  %v632_v39 = vld [vmem:[%s1923_s30 + $0x390] sm:$0xff]  ;;  %v633_v40 = vld [vmem:[%s1923_s30 + $0x398] sm:$0xff]  ;;  %v1534_v43 = vpack.c.bf16 %v583_v33, %v582_v32  ;;  %v1536_v45 = vpack.c.bf16 %v601_v38, %v600_v37 }
  0x65   : > { %1523 = vmatpush3.bf16.msra.mxu1 %v1522_v6  ;;  %1493 = vmatprep.subr.bf16.mxu0 %v1492_v7  ;;  %v462_v41 = vld [vmem:[%s1935_s18] sm:$0xff]  ;;  %v464_v42 = vld [vmem:[%s1935_s18 + $0x10] sm:$0xff]  ;;  %v1566_v44 = vpack.c.bf16 %v615_v36, %v614_v34  ;;  %v584_v46 = vld [vmem:[%s1923_s30 + $0x210] sm:$0xff]  ;;  %v1568_v49 = vpack.c.bf16 %v633_v40, %v632_v39 }
  0x66   : > { %1525 = vmatprep.subr.bf16.mxu1 %v1524_v11  ;;  %v585_v47 = vld [vmem:[%s1923_s30 + $0x218] sm:$0xff]  ;;  %v616_v48 = vld [vmem:[%s1923_s30 + $0x310] sm:$0xff]  ;;  %v602_v51 = vld [vmem:[%s1923_s30 + $0x2a0] sm:$0xff] }
  0x67   : > { %v617_v50 = vld [vmem:[%s1923_s30 + $0x318] sm:$0xff]  ;;  %v603_v52 = vld [vmem:[%s1923_s30 + $0x2a8] sm:$0xff]  ;;  %v471_v53 = vld [vmem:[%s1935_s18 + $0x48] sm:$0xff]  ;;  %v1538_v56 = vpack.c.bf16 %v585_v47, %v584_v46 }
  0x68   : > { %1495 = vmatpush3.bf16.msra.mxu0 %v1494_v17  ;;  %v634_v54 = vld [vmem:[%s1923_s30 + $0x3a0] sm:$0xff]  ;;  %v635_v55 = vld [vmem:[%s1923_s30 + $0x3a8] sm:$0xff]  ;;  %v473_v57 = vld [vmem:[%s1935_s18 + $0x58] sm:$0xff]  ;;  %v1570_v60 = vpack.c.bf16 %v617_v50, %v616_v48  ;;  %v1540_v61 = vpack.c.bf16 %v603_v52, %v602_v51 }
  0x69   : > { %1527 = vmatpush3.bf16.msra.mxu1 %v1526_v18  ;;  %1497 = vmatprep.subr.bf16.mxu0 %v1496_v19  ;;  %v470_v58 = vld [vmem:[%s1935_s18 + $0x40] sm:$0xff]  ;;  %v472_v59 = vld [vmem:[%s1935_s18 + $0x50] sm:$0xff]  ;;  %v586_v62 = vld [vmem:[%s1923_s30 + $0x220] sm:$0xff]  ;;  %v1572_v1 = vpack.c.bf16 %v635_v55, %v634_v54 }
  0x6a   : > { %1529 = vmatprep.subr.bf16.mxu1 %v1528_v23  ;;  %v587_v63 = vld [vmem:[%s1923_s30 + $0x228] sm:$0xff]  ;;  %v618_v0 = vld [vmem:[%s1923_s30 + $0x320] sm:$0xff]  ;;  %v604_v3 = vld [vmem:[%s1923_s30 + $0x2b0] sm:$0xff] }
  0x6b   : > { %v619_v2 = vld [vmem:[%s1923_s30 + $0x328] sm:$0xff]  ;;  %v605_v4 = vld [vmem:[%s1923_s30 + $0x2b8] sm:$0xff]  ;;  %v479_v5 = vld [vmem:[%s1935_s18 + $0x88] sm:$0xff]  ;;  %v1542_v8 = vpack.c.bf16 %v587_v63, %v586_v62 }
  0x6c   : > { %1499 = vmatpush3.bf16.msra.mxu0 %v1498_v29  ;;  %v636_v6 = vld [vmem:[%s1923_s30 + $0x3b0] sm:$0xff]  ;;  %v637_v7 = vld [vmem:[%s1923_s30 + $0x3b8] sm:$0xff]  ;;  %v480_v11 = vld [vmem:[%s1935_s18 + $0x90] sm:$0xff]  ;;  %v1574_v12 = vpack.c.bf16 %v619_v2, %v618_v0  ;;  %v1544_v13 = vpack.c.bf16 %v605_v4, %v604_v3 }
  0x6d   : > { %1531 = vmatpush3.bf16.msra.mxu1 %v1530_v30  ;;  %1533 = vmatprep.subr.bf16.mxu0 %v1532_v31  ;;  %v481_v9 = vld [vmem:[%s1935_s18 + $0x98] sm:$0xff]  ;;  %v478_v10 = vld [vmem:[%s1935_s18 + $0x80] sm:$0xff]  ;;  %v1576_v17 = vpack.c.bf16 %v637_v7, %v636_v6  ;;  %v606_v19 = vld [vmem:[%s1923_s30 + $0x2c0] sm:$0xff] }
  0x6e   : > { %1565 = vmatprep.subr.bf16.mxu1 %v1564_v35  ;;  %v588_v14 = vld [vmem:[%s1923_s30 + $0x230] sm:$0xff]  ;;  %v589_v15 = vld [vmem:[%s1923_s30 + $0x238] sm:$0xff]  ;;  %v607_v20 = vld [vmem:[%s1923_s30 + $0x2c8] sm:$0xff] }
  0x6f   : > { %711 = vmatmul.mubr.f32.vlgmr.msra.gmra.mrb[0].mxu0 %v462_v41  ;;  %v620_v16 = vld [vmem:[%s1923_s30 + $0x330] sm:$0xff]  ;;  %v621_v18 = vld [vmem:[%s1923_s30 + $0x338] sm:$0xff]  ;;  %v487_v21 = vld [vmem:[%s1935_s18 + $0xc8] sm:$0xff]  ;;  %v1546_v24 = vpack.c.bf16 %v589_v15, %v588_v14  ;;  %v1548_v29 = vpack.c.bf16 %v607_v20, %v606_v19 }
  0x70   : > { %811 = vmatmul.mubr.f32.vlgmr.msra.gmra.mrb[0].mxu1 %v464_v42  ;;  %1535 = vmatpush3.bf16.msra.mxu0 %v1534_v43  ;;  %v638_v22 = vld [vmem:[%s1923_s30 + $0x3c0] sm:$0xff]  ;;  %v639_v23 = vld [vmem:[%s1923_s30 + $0x3c8] sm:$0xff]  ;;  %v489_v25 = vld [vmem:[%s1935_s18 + $0xd8] sm:$0xff]  ;;  %v1578_v28 = vpack.c.bf16 %v621_v18, %v620_v16 }
  0x71   : > { %1567 = vmatpush3.bf16.msra.mxu1 %v1566_v44  ;;  %1537 = vmatprep.subr.bf16.mxu0 %v1536_v45  ;;  %v486_v26 = vld [vmem:[%s1935_s18 + $0xc0] sm:$0xff]  ;;  %v488_v27 = vld [vmem:[%s1935_s18 + $0xd0] sm:$0xff]  ;;  %v590_v30 = vld [vmem:[%s1923_s30 + $0x240] sm:$0xff]  ;;  %v1580_v33 = vpack.c.bf16 %v639_v23, %v638_v22 }
  0x72   : > { %1569 = vmatprep.subr.bf16.mxu1 %v1568_v49  ;;  %715 = vmatprep.mubr.f32.mxu0 %v471_v53  ;;  %v591_v31 = vld [vmem:[%s1923_s30 + $0x248] sm:$0xff]  ;;  %v622_v32 = vld [vmem:[%s1923_s30 + $0x340] sm:$0xff]  ;;  %v608_v35 = vld [vmem:[%s1923_s30 + $0x2d0] sm:$0xff] }
  0x73   : > { %815 = vmatprep.mubr.f32.mxu1 %v473_v57  ;;  %716 = vmatmul.mubr.f32.gmra.mrb[2].mxu0 %v470_v58  ;;  %v623_v34 = vld [vmem:[%s1923_s30 + $0x348] sm:$0xff]  ;;  %v609_v36 = vld [vmem:[%s1923_s30 + $0x2d8] sm:$0xff]  ;;  %v495_v37 = vld [vmem:[%s1935_s18 + $0x108] sm:$0xff]  ;;  %v1550_v40 = vpack.c.bf16 %v591_v31, %v590_v30 }
  0x74   : > { %1539 = vmatpush3.bf16.msra.mxu0 %v1538_v56  ;;  %816 = vmatmul.mubr.f32.gmra.mrb[2].mxu1 %v472_v59  ;;  %v640_v38 = vld [vmem:[%s1923_s30 + $0x3d0] sm:$0xff]  ;;  %v641_v39 = vld [vmem:[%s1923_s30 + $0x3d8] sm:$0xff]  ;;  %v496_v43 = vld [vmem:[%s1935_s18 + $0x110] sm:$0xff]  ;;  %v1582_v44 = vpack.c.bf16 %v623_v34, %v622_v32  ;;  %v1552_v45 = vpack.c.bf16 %v609_v36, %v608_v35 }
  0x75   : > { %1571 = vmatpush3.bf16.msra.mxu1 %v1570_v60  ;;  %1541 = vmatprep.subr.bf16.mxu0 %v1540_v61  ;;  %v497_v41 = vld [vmem:[%s1935_s18 + $0x118] sm:$0xff]  ;;  %v494_v42 = vld [vmem:[%s1935_s18 + $0x100] sm:$0xff]  ;;  %v1584_v49 = vpack.c.bf16 %v641_v39, %v640_v38  ;;  %v610_v51 = vld [vmem:[%s1923_s30 + $0x2e0] sm:$0xff] }
  0x76   : > { %1573 = vmatprep.subr.bf16.mxu1 %v1572_v1  ;;  %720 = vmatprep.mubr.f32.mxu0 %v479_v5  ;;  %v592_v46 = vld [vmem:[%s1923_s30 + $0x250] sm:$0xff]  ;;  %v593_v47 = vld [vmem:[%s1923_s30 + $0x258] sm:$0xff]  ;;  %v611_v52 = vld [vmem:[%s1923_s30 + $0x2e8] sm:$0xff] }
  0x77   : > { %820 = vmatprep.mubr.f32.mxu1 %v481_v9  ;;  %721 = vmatmul.mubr.f32.gmra.mrb[4].mxu0 %v478_v10  ;;  %v624_v48 = vld [vmem:[%s1923_s30 + $0x350] sm:$0xff]  ;;  %v625_v50 = vld [vmem:[%s1923_s30 + $0x358] sm:$0xff]  ;;  %v503_v53 = vld [vmem:[%s1935_s18 + $0x148] sm:$0xff]  ;;  %v1554_v56 = vpack.c.bf16 %v593_v47, %v592_v46  ;;  %v1556_v61 = vpack.c.bf16 %v611_v52, %v610_v51 }
  0x78   : > { %1543 = vmatpush3.bf16.msra.mxu0 %v1542_v8  ;;  %821 = vmatmul.mubr.f32.gmra.mrb[4].mxu1 %v480_v11  ;;  %v642_v54 = vld [vmem:[%s1923_s30 + $0x3e0] sm:$0xff]  ;;  %v643_v55 = vld [vmem:[%s1923_s30 + $0x3e8] sm:$0xff]  ;;  %v505_v57 = vld [vmem:[%s1935_s18 + $0x158] sm:$0xff]  ;;  %v1586_v60 = vpack.c.bf16 %v625_v50, %v624_v48 }
  0x79   : > { %1575 = vmatpush3.bf16.msra.mxu1 %v1574_v12  ;;  %1545 = vmatprep.subr.bf16.mxu0 %v1544_v13  ;;  %v502_v58 = vld [vmem:[%s1935_s18 + $0x140] sm:$0xff]  ;;  %v504_v59 = vld [vmem:[%s1935_s18 + $0x150] sm:$0xff]  ;;  %v594_v62 = vld [vmem:[%s1923_s30 + $0x260] sm:$0xff]  ;;  %v1588_v1 = vpack.c.bf16 %v643_v55, %v642_v54 }
  0x7a   : > { %1577 = vmatprep.subr.bf16.mxu1 %v1576_v17  ;;  %725 = vmatprep.mubr.f32.mxu0 %v487_v21  ;;  %v595_v63 = vld [vmem:[%s1923_s30 + $0x268] sm:$0xff]  ;;  %v626_v0 = vld [vmem:[%s1923_s30 + $0x360] sm:$0xff]  ;;  %v612_v3 = vld [vmem:[%s1923_s30 + $0x2f0] sm:$0xff] }
  0x7b   : > { %825 = vmatprep.mubr.f32.mxu1 %v489_v25  ;;  %726 = vmatmul.mubr.f32.gmra.mrb[6].mxu0 %v486_v26  ;;  %v627_v2 = vld [vmem:[%s1923_s30 + $0x368] sm:$0xff]  ;;  %v613_v4 = vld [vmem:[%s1923_s30 + $0x2f8] sm:$0xff]  ;;  %v511_v5 = vld [vmem:[%s1935_s18 + $0x188] sm:$0xff]  ;;  %v1558_v8 = vpack.c.bf16 %v595_v63, %v594_v62 }
  0x7c   : > { %1547 = vmatpush3.bf16.msra.mxu0 %v1546_v24  ;;  %826 = vmatmul.mubr.f32.gmra.mrb[6].mxu1 %v488_v27  ;;  %v644_v6 = vld [vmem:[%s1923_s30 + $0x3f0] sm:$0xff]  ;;  %v645_v7 = vld [vmem:[%s1923_s30 + $0x3f8] sm:$0xff]  ;;  %v1590_v11 = vpack.c.bf16 %v627_v2, %v626_v0  ;;  %v512_v12 = vld [vmem:[%s1935_s18 + $0x190] sm:$0xff]  ;;  %v1560_v13 = vpack.c.bf16 %v613_v4, %v612_v3 }
  0x7d   : > { %1579 = vmatpush3.bf16.msra.mxu1 %v1578_v28  ;;  %1549 = vmatprep.subr.bf16.mxu0 %v1548_v29  ;;  %v513_v9 = vld [vmem:[%s1935_s18 + $0x198] sm:$0xff]  ;;  %v510_v10 = vld [vmem:[%s1935_s18 + $0x180] sm:$0xff]  ;;  %v1592_v16 = vpack.c.bf16 %v645_v7, %v644_v6  ;;  %v467_v19 = vld [vmem:[%s1935_s18 + $0x28] sm:$0xff] }
  0x7e   : > { %1581 = vmatprep.subr.bf16.mxu1 %v1580_v33  ;;  %730 = vmatprep.mubr.f32.mxu0 %v495_v37  ;;  %v596_v14 = vld [vmem:[%s1923_s30 + $0x270] sm:$0xff]  ;;  %v597_v15 = vld [vmem:[%s1923_s30 + $0x278] sm:$0xff]  ;;  %v468_v24 = vld [vmem:[%s1935_s18 + $0x30] sm:$0xff] }
  0x7f   : > { %830 = vmatprep.mubr.f32.mxu1 %v497_v41  ;;  %731 = vmatmul.mubr.f32.gmra.mrb[8].mxu0 %v494_v42  ;;  %v628_v17 = vld [vmem:[%s1923_s30 + $0x370] sm:$0xff]  ;;  %v629_v18 = vld [vmem:[%s1923_s30 + $0x378] sm:$0xff]  ;;  %v1562_v20 = vpack.c.bf16 %v597_v15, %v596_v14  ;;  %v475_v25 = vld [vmem:[%s1935_s18 + $0x68] sm:$0xff] }
  0x80   : > { %1551 = vmatpush3.bf16.msra.mxu0 %v1550_v40  ;;  %831 = vmatmul.mubr.f32.gmra.mrb[8].mxu1 %v496_v43  ;;  %v469_v21 = vld [vmem:[%s1935_s18 + $0x38] sm:$0xff]  ;;  %v1594_v22 = vpack.c.bf16 %v629_v18, %v628_v17  ;;  %v466_v23 = vld [vmem:[%s1935_s18 + $0x20] sm:$0xff]  ;;  %v476_v28 = vld [vmem:[%s1935_s18 + $0x70] sm:$0xff] }
  0x81   : > { %1583 = vmatpush3.bf16.msra.mxu1 %v1582_v44  ;;  %1553 = vmatprep.subr.bf16.mxu0 %v1552_v45  ;;  %v477_v26 = vld [vmem:[%s1935_s18 + $0x78] sm:$0xff]  ;;  %v474_v27 = vld [vmem:[%s1935_s18 + $0x60] sm:$0xff]  ;;  %v483_v29 = vld [vmem:[%s1935_s18 + $0xa8] sm:$0xff] }
  0x82   : > { %1585 = vmatprep.subr.bf16.mxu1 %v1584_v49  ;;  %735 = vmatprep.mubr.f32.mxu0 %v503_v53  ;;  %v485_v30 = vld [vmem:[%s1935_s18 + $0xb8] sm:$0xff]  ;;  %v482_v31 = vld [vmem:[%s1935_s18 + $0xa0] sm:$0xff]  ;;  %v484_v32 = vld [vmem:[%s1935_s18 + $0xb0] sm:$0xff] }
  0x83   : > { %835 = vmatprep.mubr.f32.mxu1 %v505_v57  ;;  %736 = vmatmul.mubr.f32.gmra.mrb[10].mxu0 %v502_v58  ;;  %v491_v33 = vld [vmem:[%s1935_s18 + $0xe8] sm:$0xff]  ;;  %v493_v34 = vld [vmem:[%s1935_s18 + $0xf8] sm:$0xff]  ;;  %v490_v35 = vld [vmem:[%s1935_s18 + $0xe0] sm:$0xff] }
  0x84   : > { %1555 = vmatpush3.bf16.msra.mxu0 %v1554_v56  ;;  %836 = vmatmul.mubr.f32.gmra.mrb[10].mxu1 %v504_v59  ;;  %v492_v36 = vld [vmem:[%s1935_s18 + $0xf0] sm:$0xff]  ;;  %v499_v37 = vld [vmem:[%s1935_s18 + $0x128] sm:$0xff]  ;;  %v501_v38 = vld [vmem:[%s1935_s18 + $0x138] sm:$0xff] }
  0x85   : > { %1587 = vmatpush3.bf16.msra.mxu1 %v1586_v60  ;;  %1557 = vmatprep.subr.bf16.mxu0 %v1556_v61  ;;  %v498_v39 = vld [vmem:[%s1935_s18 + $0x120] sm:$0xff]  ;;  %v500_v40 = vld [vmem:[%s1935_s18 + $0x130] sm:$0xff]  ;;  %v507_v41 = vld [vmem:[%s1935_s18 + $0x168] sm:$0xff] }
  0x86   : > { %1589 = vmatprep.subr.bf16.mxu1 %v1588_v1  ;;  %740 = vmatprep.mubr.f32.mxu0 %v511_v5  ;;  %v509_v42 = vld [vmem:[%s1935_s18 + $0x178] sm:$0xff]  ;;  %v506_v43 = vld [vmem:[%s1935_s18 + $0x160] sm:$0xff]  ;;  %v508_v44 = vld [vmem:[%s1935_s18 + $0x170] sm:$0xff] }
  0x87   : > { %840 = vmatprep.mubr.f32.mxu1 %v513_v9  ;;  %741 = vmatmul.mubr.f32.gmra.mrb[12].mxu0 %v510_v10  ;;  %v515_v45 = vld [vmem:[%s1935_s18 + $0x1a8] sm:$0xff]  ;;  %v517_v46 = vld [vmem:[%s1935_s18 + $0x1b8] sm:$0xff]  ;;  %v514_v47 = vld [vmem:[%s1935_s18 + $0x1a0] sm:$0xff] }
  0x88   : > { %1559 = vmatpush3.bf16.msra.mxu0 %v1558_v8  ;;  %841 = vmatmul.mubr.f32.gmra.mrb[12].mxu1 %v512_v12  ;;  %v516_v48 = vld [vmem:[%s1935_s18 + $0x1b0] sm:$0xff] }
  0x89   : > { %1591 = vmatpush3.bf16.msra.mxu1 %v1590_v11  ;;  %1561 = vmatprep.subr.bf16.mxu0 %v1560_v13 }
  0x8a   : > { %1593 = vmatprep.subr.bf16.mxu1 %v1592_v16  ;;  %910 = vmatprep.mubr.f32.mxu0 %v467_v19 }
  0x8b   : > { %1010 = vmatprep.mubr.f32.mxu1 %v469_v21 }
  0x8c   : > { %1563 = vmatpush3.bf16.msra.mxu0 %v1562_v20 }
  0x8d   : > { %1595 = vmatpush3.bf16.msra.mxu1 %v1594_v22 }
  0x8f   : > { %911 = vmatmul.mubr.f32.vlgmr.msra.gmra.mrb[14].mxu0 %v466_v23 }
  0x90   : > { %1011 = vmatmul.mubr.f32.vlgmr.msra.gmra.mrb[14].mxu1 %v468_v24  ;;  %915 = vmatprep.mubr.f32.mxu0 %v475_v25 }
  0x91   : > { %1015 = vmatprep.mubr.f32.mxu1 %v477_v26 }
  0x93   : > { %916 = vmatmul.mubr.f32.gmra.mrb[16].mxu0 %v474_v27 }
  0x94   : > { %1016 = vmatmul.mubr.f32.gmra.mrb[16].mxu1 %v476_v28  ;;  %920 = vmatprep.mubr.f32.mxu0 %v483_v29 }
  0x95   : > { %1020 = vmatprep.mubr.f32.mxu1 %v485_v30 }
  0x97   : > { %921 = vmatmul.mubr.f32.gmra.mrb[18].mxu0 %v482_v31 }
  0x98   : > { %1021 = vmatmul.mubr.f32.gmra.mrb[18].mxu1 %v484_v32  ;;  %925 = vmatprep.mubr.f32.mxu0 %v491_v33 }
  0x99   : > { %1025 = vmatprep.mubr.f32.mxu1 %v493_v34 }
  0x9b   : > { %926 = vmatmul.mubr.f32.gmra.mrb[20].mxu0 %v490_v35 }
  0x9c   : > { %1026 = vmatmul.mubr.f32.gmra.mrb[20].mxu1 %v492_v36  ;;  %930 = vmatprep.mubr.f32.mxu0 %v499_v37 }
  0x9d   : > { %1030 = vmatprep.mubr.f32.mxu1 %v501_v38 }
  0x9f   : > { %931 = vmatmul.mubr.f32.gmra.mrb[22].mxu0 %v498_v39 }
  0xa0   : > { %1031 = vmatmul.mubr.f32.gmra.mrb[22].mxu1 %v500_v40  ;;  %935 = vmatprep.mubr.f32.mxu0 %v507_v41 }
  0xa1   : > { %1035 = vmatprep.mubr.f32.mxu1 %v509_v42  ;;  %v455_v42 = vld [vmem:[#allocation2] sm:$0xff] }
  0xa3   : > { %936 = vmatmul.mubr.f32.gmra.mrb[24].mxu0 %v506_v43 }
  0xa4   : > { %1036 = vmatmul.mubr.f32.gmra.mrb[24].mxu1 %v508_v44  ;;  %940 = vmatprep.mubr.f32.mxu0 %v515_v45 }
  0xa5   : > { %1040 = vmatprep.mubr.f32.mxu1 %v517_v46 }
  0xa7   : > { %941 = vmatmul.mubr.f32.gmra.mrb[26].mxu0 %v514_v47 }
  0xa8   : > { %1041 = vmatmul.mubr.f32.gmra.mrb[26].mxu1 %v516_v48 }
 0x142   : > { %v1288_v49 = vpop.f32.mrb[0].mxu0 }
 0x143   : > { %v1341_v50 = vpop.f32.mrb[0].mxu1  ;;  %v1289_v51 = vpop.f32.mrb[1].mxu0 }
 0x144   : > { %v1290_v52 = vadd.f32 %v1289_v51, %v1288_v49  ;;  %v1342_v53 = vpop.f32.mrb[1].mxu1 }
 0x145   : > { %v1343_v54 = vadd.f32 %v1342_v53, %v1341_v50 }
 0x146   : > { %v1291_v55 = vpop.f32.mrb[2].mxu0 }
 0x147   : > { %v813_v56 = vadd.f32 %v1343_v54, %v1290_v52  ;;  %v1344_v57 = vpop.f32.mrb[2].mxu1  ;;  %v1292_v58 = vpop.f32.mrb[3].mxu0  ;;  %v456_v52 = vld [vmem:[#allocation2 + $0x8] sm:$0xff] }
 0x148   : > { %v1293_v59 = vadd.f32 %v1292_v58, %v1291_v55  ;;  %v1345_v60 = vpop.f32.mrb[3].mxu1 }
 0x149   : > { %v1346_v61 = vadd.f32 %v1345_v60, %v1344_v57 }
 0x14a   : > { %v1294_v62 = vpop.f32.mrb[4].mxu0 }
 0x14b   : > { %v818_v63 = vadd.f32 %v1346_v61, %v1293_v59  ;;  %v1347_v0 = vpop.f32.mrb[4].mxu1  ;;  %v1295_v1 = vpop.f32.mrb[5].mxu0 }
 0x14c   : > { %v1296_v2 = vadd.f32 %v1295_v1, %v1294_v62  ;;  %v1348_v3 = vpop.f32.mrb[5].mxu1  ;;  %v457_v62 = vld [vmem:[#allocation2 + $0x10] sm:$0xff] }
 0x14d   : > { %v1349_v4 = vadd.f32 %v1348_v3, %v1347_v0 }
 0x14e   : > { %v1297_v5 = vpop.f32.mrb[6].mxu0 }
 0x14f   : > { %v823_v6 = vadd.f32 %v1349_v4, %v1296_v2  ;;  %v1350_v7 = vpop.f32.mrb[6].mxu1  ;;  %v1298_v8 = vpop.f32.mrb[7].mxu0 }
 0x150   : > { %v1299_v9 = vadd.f32 %v1298_v8, %v1297_v5  ;;  %v1351_v10 = vpop.f32.mrb[7].mxu1 }
 0x151   : > { %v1352_v11 = vadd.f32 %v1351_v10, %v1350_v7 }
 0x152   : > { %v1300_v12 = vpop.f32.mrb[8].mxu0 }
 0x153   : > { %v828_v13 = vadd.f32 %v1352_v11, %v1299_v9  ;;  %v1353_v14 = vpop.f32.mrb[8].mxu1  ;;  %v1301_v15 = vpop.f32.mrb[9].mxu0  ;;  %v458_v9 = vld [vmem:[#allocation2 + $0x18] sm:$0xff] }
 0x154   : > { %v1302_v16 = vadd.f32 %v1301_v15, %v1300_v12  ;;  %v1354_v17 = vpop.f32.mrb[9].mxu1 }
 0x155   : > { %v1355_v18 = vadd.f32 %v1354_v17, %v1353_v14 }
 0x156   : > { %v1303_v19 = vpop.f32.mrb[10].mxu0 }
 0x157   : > { %v2122_v20 = vadd.f32 %v1355_v18, %v1302_v16  ;;  %v1356_v21 = vpop.f32.mrb[10].mxu1  ;;  %v1304_v22 = vpop.f32.mrb[11].mxu0 }
 0x158   : > { %v1305_v23 = vadd.f32 %v1304_v22, %v1303_v19  ;;  %v1357_v24 = vpop.f32.mrb[11].mxu1  ;;  %v459_v19 = vld [vmem:[#allocation2 + $0x20] sm:$0xff] }
 0x159   : > { %v1358_v25 = vadd.f32 %v1357_v24, %v1356_v21 }
 0x15a   : > { %v1306_v26 = vpop.f32.mrb[12].mxu0 }
 0x15b   : > { %v2124_v27 = vadd.f32 %v1358_v25, %v1305_v23  ;;  %v1359_v28 = vpop.f32.mrb[12].mxu1  ;;  %v1307_v29 = vpop.f32.mrb[13].mxu0 }
 0x15c   : > { %v1308_v30 = vadd.f32 %v1307_v29, %v1306_v26  ;;  %v1360_v31 = vpop.f32.mrb[13].mxu1 }
 0x15d   : > { %v1361_v32 = vadd.f32 %v1360_v31, %v1359_v28 }
 0x15f   : > { %v2126_v33 = vadd.f32 %v1361_v32, %v1308_v30  ;;  %v460_v30 = vld [vmem:[#allocation2 + $0x28] sm:$0xff] }
 0x162   : > { %v1394_v34 = vpop.f32.mrb[14].mxu0 }
 0x163   : > { %v1395_v35 = vpop.f32.mrb[15].mxu0  ;;  %v1447_v36 = vpop.f32.mrb[14].mxu1 }
 0x164   : > { %v1396_v37 = vadd.f32 %v1395_v35, %v1394_v34  ;;  %v1448_v38 = vpop.f32.mrb[15].mxu1 }
 0x165   : > { %v1449_v39 = vadd.f32 %v1448_v38, %v1447_v36 }
 0x166   : > { %v913_v40 = vadd.f32 %v1396_v37, %v813_v56  ;;  %v1397_v41 = vpop.f32.mrb[16].mxu0 }
 0x167   : > { %v1398_v43 = vpop.f32.mrb[17].mxu0  ;;  %v1450_v44 = vpop.f32.mrb[16].mxu1 }
 0x168   : > { %v1013_v45 = vadd.f32 %v1449_v39, %v913_v40  ;;  %v1399_v46 = vadd.f32 %v1398_v43, %v1397_v41  ;;  %v1451_v47 = vpop.f32.mrb[17].mxu1  ;;  %v461_v39 = vld [vmem:[#allocation2 + $0x30] sm:$0xff] }
 0x169   : > { %v1452_v48 = vadd.f32 %v1451_v47, %v1450_v44 }
 0x16a   : > { %v1046_v49 = vadd.f32 %v1013_v45, %v455_v42  ;;  %v918_v50 = vadd.f32 %v1399_v46, %v818_v63  ;;  %v1400_v51 = vpop.f32.mrb[18].mxu0  ;;  %v1086_v42 = vld [vmem:[%s1928_s8] sm:$0xff] (!%p1252_p13)  ;;  %v1087_v45 = vld [vmem:[%s1928_s8 + $0x8] sm:$0xff] (!%p1252_p13) }
 0x16b   : > { %v1401_v53 = vpop.f32.mrb[19].mxu0  ;;  %v1453_v54 = vpop.f32.mrb[18].mxu1 }
 0x16c   : > { %1054 = vst.msk [vmem:[#allocation2] sm:$0xff] %vm1053_vm1, %v1046_v49  ;;  %v1018_v55 = vadd.f32 %v1452_v48, %v918_v50  ;;  %v1402_v57 = vadd.f32 %v1401_v53, %v1400_v51  ;;  %v1454_v56 = vpop.f32.mrb[19].mxu1  ;;  %v1088_v49 = vld [vmem:[%s1928_s8 + $0x10] sm:$0xff] (!%p1252_p13)  ;;  %v1089_v51 = vld [vmem:[%s1928_s8 + $0x18] sm:$0xff] (!%p1252_p13) }
 0x16d   : > { %v1455_v58 = vadd.f32 %v1454_v56, %v1453_v54 }
 0x16e   : > { %v1047_v59 = vadd.f32 %v1018_v55, %v456_v52  ;;  %v923_v60 = vadd.f32 %v1402_v57, %v823_v6  ;;  %v1403_v61 = vpop.f32.mrb[20].mxu0  ;;  %v1090_v55 = vld [vmem:[%s1928_s8 + $0x20] sm:$0xff] (!%p1252_p13) }
 0x16f   : > { %v1404_v0 = vpop.f32.mrb[21].mxu0  ;;  %v1456_v1 = vpop.f32.mrb[20].mxu1 }
 0x170   : > { %1055 = vst.msk [vmem:[#allocation2 + $0x8] sm:$0xff] %vm1053_vm1, %v1047_v59  ;;  %v1023_v2 = vadd.f32 %v1455_v58, %v923_v60  ;;  %v1405_v63 = vadd.f32 %v1404_v0, %v1403_v61  ;;  %v1457_v3 = vpop.f32.mrb[21].mxu1  ;;  %v1091_v61 = vld [vmem:[%s1928_s8 + $0x28] sm:$0xff] (!%p1252_p13)  ;;  %v1092_v0 = vld [vmem:[%s1928_s8 + $0x30] sm:$0xff] (!%p1252_p13) }
 0x171   : > { %v1458_v4 = vadd.f32 %v1457_v3, %v1456_v1 }
 0x172   : > { %v1048_v5 = vadd.f32 %v1023_v2, %v457_v62  ;;  %v928_v7 = vadd.f32 %v1405_v63, %v828_v13  ;;  %v1406_v8 = vpop.f32.mrb[22].mxu0 }
 0x173   : > { %v1407_v10 = vpop.f32.mrb[23].mxu0  ;;  %v1459_v11 = vpop.f32.mrb[22].mxu1 }
 0x174   : > { %1056 = vst.msk [vmem:[#allocation2 + $0x10] sm:$0xff] %vm1053_vm1, %v1048_v5  ;;  %v1028_v12 = vadd.f32 %v1458_v4, %v928_v7  ;;  %v1408_v6 = vadd.f32 %v1407_v10, %v1406_v8  ;;  %v1460_v14 = vpop.f32.mrb[23].mxu1 }
 0x175   : > { %v1461_v15 = vadd.f32 %v1460_v14, %v1459_v11 }
 0x176   : > { %v1049_v16 = vadd.f32 %v1028_v12, %v458_v9  ;;  %v933_v17 = vadd.f32 %v1408_v6, %v2122_v20  ;;  %v1409_v18 = vpop.f32.mrb[24].mxu0 }
 0x177   : > { %v1410_v21 = vpop.f32.mrb[25].mxu0  ;;  %v1462_v22 = vpop.f32.mrb[24].mxu1  ;;  %v1066_v44 = vld [vmem:[#allocation2 + $0x8] sm:$0xff] (!%p1252_p13) }
 0x178   : > { %1057 = vst.msk [vmem:[#allocation2 + $0x18] sm:$0xff] %vm1053_vm1, %v1049_v16  ;;  %v1033_v13 = vadd.f32 %v1461_v15, %v933_v17  ;;  %v1411_v23 = vadd.f32 %v1410_v21, %v1409_v18  ;;  %v1463_v24 = vpop.f32.mrb[25].mxu1 }
 0x179   : > { %v1464_v25 = vadd.f32 %v1463_v24, %v1462_v22 }
 0x17a   : > { %v1050_v26 = vadd.f32 %v1033_v13, %v459_v19  ;;  %v938_v28 = vadd.f32 %v1411_v23, %v2124_v27  ;;  %v1412_v29 = vpop.f32.mrb[26].mxu0  ;;  %v1065_v27 = vld [vmem:[#allocation2] sm:$0xff] (!%p1252_p13) }
 0x17b   : > { %v1413_v31 = vpop.f32.mrb[27].mxu0  ;;  %v1465_v32 = vpop.f32.mrb[26].mxu1  ;;  %v1067_v46 = vld [vmem:[#allocation2 + $0x10] sm:$0xff] (!%p1252_p13) }
 0x17c   : > { %1058 = vst.msk [vmem:[#allocation2 + $0x20] sm:$0xff] %vm1053_vm1, %v1050_v26  ;;  %v1038_v20 = vadd.f32 %v1464_v25, %v938_v28  ;;  %v1414_v34 = vadd.f32 %v1413_v31, %v1412_v29  ;;  %v1466_v35 = vpop.f32.mrb[27].mxu1 }
 0x17d   : > { %v1467_v36 = vadd.f32 %v1466_v35, %v1465_v32 }
 0x17e   : > { %v1051_v37 = vadd.f32 %v1038_v20, %v460_v30  ;;  %v943_v38 = vadd.f32 %v1414_v34, %v2126_v33  ;;  %1064 = sbr.rel (%p1252_p13) target bundleno = 401 (0x191), region = 67  ;;  %v1253_v33 = vld [vmem:[%s2186_s2] ss:$0 sm:$0xff] (!%p1252_p13) }
 0x17f   : > { %v1079_v43 = vadd.f32 (!%p1252_p13), %v1253_v33, %v1065_v27  ;;  %v1080_v47 = vadd.f32 (!%p1252_p13), %v1253_v33, %v1066_v44  ;;  %v1081_v48 = vadd.f32 (!%p1252_p13), %v1253_v33, %v1067_v46  ;;  %v1068_v50 = vld [vmem:[#allocation2 + $0x18] sm:$0xff] (!%p1252_p13) }
 0x180   : > { %1059 = vst.msk [vmem:[#allocation2 + $0x28] sm:$0xff] %vm1053_vm1, %v1051_v37  ;;  %v1043_v40 = vadd.f32 %v1467_v36, %v943_v38  ;;  %v1082_v53 = vadd.f32 (!%p1252_p13), %v1253_v33, %v1068_v50 }
 0x181   : > { %v1093_v52 = vadd.f32 (!%p1252_p13), %v1086_v42, %v1079_v43  ;;  %v1094_v56 = vadd.f32 (!%p1252_p13), %v1087_v45, %v1080_v47  ;;  %v1095_v58 = vadd.f32 (!%p1252_p13), %v1088_v49, %v1081_v48 }
 0x182   : > { %v1052_v41 = vadd.f32 %v1043_v40, %v461_v39  ;;  %v1096_v1 = vadd.f32 (!%p1252_p13), %v1089_v51, %v1082_v53 }
 0x183   : > { %v1069_v54 = vld [vmem:[#allocation2 + $0x20] sm:$0xff] (!%p1252_p13)  ;;  %1100 = vst.msk [vmem:[%s1933_s10] sm:$0xff] (!%p1252_p13), %vm1053_vm1, %v1093_v52  ;;  %1101 = vst.msk [vmem:[%s1933_s10 + $0x8] sm:$0xff] (!%p1252_p13), %vm1053_vm1, %v1094_v56 }
 0x184   : > { %1060 = vst.msk [vmem:[#allocation2 + $0x30] sm:$0xff] %vm1053_vm1, %v1052_v41  ;;  %v1083_v59 = vadd.f32 (!%p1252_p13), %v1253_v33, %v1069_v54  ;;  %1102 = vst.msk [vmem:[%s1933_s10 + $0x10] sm:$0xff] (!%p1252_p13), %vm1053_vm1, %v1095_v58 }
 0x185   : > { %1103 = vst.msk [vmem:[%s1933_s10 + $0x18] sm:$0xff] %vm1053_vm1, %v1096_v1 }
 0x186   : > { %v1097_v63 = vadd.f32 %v1090_v55, %v1083_v59 }
 0x187   : > { %v1070_v57 = vld [vmem:[#allocation2 + $0x28] sm:$0xff] }
 0x188   : > { %v1084_v60 = vadd.f32 %v1253_v33, %v1070_v57  ;;  %1104 = vst.msk [vmem:[%s1933_s10 + $0x20] sm:$0xff] %vm1053_vm1, %v1097_v63 }
 0x18a   : > { %v1098_v3 = vadd.f32 %v1091_v61, %v1084_v60 }
 0x18b   : > { %v1071_v62 = vld [vmem:[#allocation2 + $0x30] sm:$0xff] }
 0x18c   : > { %v1085_v2 = vadd.f32 %v1253_v33, %v1071_v62  ;;  %1105 = vst.msk [vmem:[%s1933_s10 + $0x28] sm:$0xff] %vm1053_vm1, %v1098_v3 }
 0x18e   : > { %v1099_v4 = vadd.f32 %v1092_v0, %v1085_v2 }
 0x190   : > { %1106 = vst.msk [vmem:[%s1933_s10 + $0x30] sm:$0xff] %vm1053_vm1, %v1099_v4 }
 0x191 PF: > { %s14_s21 = sadd.s32 1, %s1711_s21   ;;  %s2189_s15 = smov %s1691_s16 }
 0x192   : > { %p11_p0 = scmp.ge.s32.totalorder %s14_s21, 8   ;;  %s2190_s16 = smov %s1790_s28 }
 0x193   : > { %s2191_s17 = smov %s1703_s19  ;;  %s2192_s18 = smov %s1707_s20 }
 0x194   : > { %s2193_s19 = smov %s2196_s22  ;;  %s2194_s20 = smov %s2200_s23 }
 0x195   :  { %13 = sbr.rel (!%p11_p0) target bundleno = 4 (0x4), region = 111 }

// kernel: _lambda_.32
= control target key start
LH: loop header
LB: loop body
LE: loop exit
PB: predicated region body
PF: predicated region fallthrough
CT: control target
= control target key end

     0   :  { %vm22_vm0 = vcmask 261120   ;;  %vm160_vm1 = vcmask 64512   ;;  %s270_s0 = inlined_call_operand.vmem [shape: f32[16,32], index: 0, kind: input, shape index: {}]   ;;  %s271_s3 = inlined_call_operand.vmem [shape: f32[32,8], index: 3, kind: input, shape index: {}]   ;;  %s272_s1 = inlined_call_operand.vmem [shape: f32[1,32], index: 1, kind: input, shape index: {}]   ;;  %s273_s2 = inlined_call_operand.vmem [shape: f32[1,32], index: 2, kind: input, shape index: {}]   ;;  %s274_s4 = inlined_call_operand.vmem [shape: f32[1,8], index: 4, kind: input, shape index: {}]   ;;  %s275_s5 = inlined_call_operand.vmem [shape: f32[16,8], index: 5, kind: output, shape index: {}]  }
   0x1   :  { %v20_v0 = vld [vmem:[%s270_s0] sm:$0xff]  ;;  %v21_v1 = vld [vmem:[%s270_s0 + $0x8] sm:$0xff]  ;;  %v70_v16 = vld [vmem:[%s271_s3 + $0x10] sm:$0xff] }
   0x2   :  { %v23_v2 = vsel %vm22_vm0, %v20_v0, 0.0  ;;  %v26_v3 = vsel %vm22_vm0, %v21_v1, 0.0  ;;  %v68_v14 = vld [vmem:[%s271_s3] sm:$0xff]  ;;  %v69_v15 = vld [vmem:[%s271_s3 + $0x8] sm:$0xff]  ;;  %v71_v18 = vld [vmem:[%s271_s3 + $0x18] sm:$0xff] }
   0x3   :  { %24 = vadd.xlane.f32.xlu0 %v23_v2  ;;  %v189_v17 = vpack.c.bf16 %v69_v15, %v68_v14  ;;  %v193_v19 = vpack.c.bf16 %v71_v18, %v70_v16  ;;  %v167_v27 = vld [vmem:[%s272_s1] ss:$0 sm:$0xff] }
   0x4   :  { %v168_v29 = vld [vmem:[%s273_s2] ss:$0 sm:$0xff] }
   0x5   :  { %190 = vmatprep.subr.bf16.mxu0 %v189_v17  ;;  %v169_v36 = vld [vmem:[%s274_s4] ss:$0 sm:$0xff] }
   0x6   :  { %192 = vmatpush3.bf16.msra.mxu0 %v189_v17 }
   0x7   :  { %27 = vadd.xlane.f32.xlu0 %v26_v3  ;;  %194 = vmatprep.subr.bf16.mxu0 %v193_v19 }
   0xa   :  { %196 = vmatpush3.bf16.msra.mxu0 %v193_v19 }
  0x90   :  { %v25_v4 = vpop.xlane.xlu0 %24 }
  0x91   :  { %v30_v5 = vmul.f32 0.03125, %v25_v4 }
  0x93   :  { %v32_v6 = vsub.f32 %v20_v0, %v30_v5 }
  0x94   :  { %v28_v7 = vpop.xlane.xlu0 %27 }
  0x95   :  { %v31_v8 = vmul.f32 0.03125, %v28_v7  ;;  %v34_v9 = vmul.f32 %v32_v6, %v32_v6 }
  0x97   :  { %v33_v10 = vsub.f32 %v21_v1, %v31_v8  ;;  %v36_v11 = vsel %vm22_vm0, %v34_v9, 0.0 }
  0x98   :  { %37 = vadd.xlane.f32.xlu1 %v36_v11 }
  0x99   :  { %v35_v12 = vmul.f32 %v33_v10, %v33_v10 }
  0x9b   :  { %v39_v13 = vsel %vm22_vm0, %v35_v12, 0.0 }
  0x9c   :  { %40 = vadd.xlane.f32.xlu1 %v39_v13 }
 0x125   :  { %v38_v20 = vpop.xlane.xlu1 %37 }
 0x126   :  { %v42_v21 = vmul.f32 0.03125, %v38_v20 }
 0x128   :  { %v44_v22 = vadd.f32 1e-06, %v42_v21 }
 0x129   :  { %v41_v23 = vpop.xlane.xlu1 %40 }
 0x12a   :  { %197 = vrsqrt.f32 %v44_v22  ;;  %v43_v24 = vmul.f32 0.03125, %v41_v23 }
 0x12c   :  { %v45_v25 = vadd.f32 1e-06, %v43_v24 }
 0x12e   :  { %199 = vrsqrt.f32 %v45_v25 }
 0x134   :  { %v198_v26 = vpop.eup %197 }
 0x135   :  { %v48_v28 = vmul.f32 %v198_v26, %v32_v6 }
 0x137   :  { %v57_v30 = vmul.f32 %v167_v27, %v48_v28 }
 0x138   :  { %v200_v31 = vpop.eup %199 }
 0x139   :  { %v49_v32 = vmul.f32 %v200_v31, %v33_v10  ;;  %v66_v33 = vadd.f32 %v168_v29, %v57_v30 }
 0x13b   :  { %v58_v34 = vmul.f32 %v167_v27, %v49_v32  ;;  %186 = vmatprep.mubr.msk.f32.mxu0 %vm22_vm0, %v66_v33 }
 0x13d   :  { %v67_v35 = vadd.f32 %v168_v29, %v58_v34 }
 0x13f   :  { %187 = vmatmul.mubr.msk.f32.vlgmr.msra.gmra.mrb[0].mxu0 %vm22_vm0, %v67_v35 }
 0x212   :  { %v188_v37 = vpop.f32.mrb[0].mxu0 }
 0x213   :  { %v157_v38 = vadd.f32 %v188_v37, %v169_v36  ;;  %v151_v39 = vpop.f32.mrb[1].mxu0 }
 0x214   :  { %v152_v40 = vadd.f32 %v169_v36, %v151_v39 }
 0x215   :  { %162 = vst.msk [vmem:[%s275_s5 + $0x8] sm:$0xff] %vm160_vm1, %v157_v38 }
 0x216   :  { %161 = vst.msk [vmem:[%s275_s5] sm:$0xff] %vm160_vm1, %v152_v40 }

// kernel: _lambda_.33
= control target key start
LH: loop header
LB: loop body
LE: loop exit
PB: predicated region body
PF: predicated region fallthrough
CT: control target
= control target key end

     0   :  { %vm26_vm0 = vcmask 64512   ;;  %vm18_vm1 = vcmask 261120   ;;  %v145_v3 = vmov 0.0   ;;  %s190_s1 = inlined_call_operand.vmem [shape: f32[8,32], index: 1, kind: input, shape index: {}]   ;;  %s191_s0 = inlined_call_operand.vmem [shape: f32[16,8], index: 0, kind: input, shape index: {}]   ;;  %s192_s2 = inlined_call_operand.vmem [shape: f32[1,32], index: 2, kind: input, shape index: {}]   ;;  %s193_s3 = inlined_call_operand.vmem [shape: f32[16,32], index: 3, kind: output, shape index: {}]  }
   0x1   :  { %v25_v0 = vld [vmem:[%s190_s1] sm:$0xff]  ;;  %v24_v2 = vld [vmem:[%s191_s0 + $0x8] sm:$0xff]  ;;  %20 = vst.msk [vmem:[#allocation2 + $0x8] sm:$0xff] %vm18_vm1, %v145_v3  ;;  %19 = vst.msk [vmem:[#allocation2] sm:$0xff] %vm18_vm1, %v145_v3 }
   0x2   :  { %v23_v1 = vld [vmem:[%s191_s0] sm:$0xff]  ;;  %139 = vmatprep.subr.mxu0 %v25_v0 }
   0x3   :  { %141 = vmatprep.mubr.msk.f32.mxu0 %vm26_vm0, %v23_v1  ;;  %140 = vmatpush3.msra.mxu0 %v25_v0  ;;  %v135_v10 = vld [vmem:[%s192_s2] ss:$0 sm:$0xff] }
   0x4   :  { %142 = vmatmul.mubr.msk.f32.vlgmr.msra.gmra.mrb[0].mxu0 %vm26_vm0, %v24_v2 }
   0x8   :  { %v22_v4 = vld [vmem:[#allocation2 + $0x8] sm:$0xff]  ;;  %v21_v5 = vld [vmem:[#allocation2] sm:$0xff] }
  0xd7   :  { %v143_v6 = vpop.f32.mrb[0].mxu0 }
  0xd8   :  { %v109_v7 = vadd.f32 %v143_v6, %v22_v4  ;;  %v99_v8 = vpop.f32.mrb[1].mxu0 }
  0xd9   :  { %v108_v9 = vadd.f32 %v99_v8, %v21_v5 }
  0xda   :  { %112 = vst.msk [vmem:[#allocation2 + $0x8] sm:$0xff] %vm18_vm1, %v109_v7 }
  0xdb   :  { %111 = vst.msk [vmem:[#allocation2] sm:$0xff] %vm18_vm1, %v108_v9 }
  0xe1   :  { %v117_v11 = vld [vmem:[#allocation2 + $0x8] sm:$0xff] }
  0xe2   :  { %v126_v12 = vadd.f32 %v135_v10, %v117_v11  ;;  %v116_v13 = vld [vmem:[#allocation2] sm:$0xff] }
  0xe3   :  { %v125_v14 = vadd.f32 %v135_v10, %v116_v13 }
  0xe4   :  { %128 = vst.msk [vmem:[%s193_s3 + $0x8] sm:$0xff] %vm18_vm1, %v126_v12 }
  0xe5   :  { %127 = vst.msk [vmem:[%s193_s3] sm:$0xff] %vm18_vm1, %v125_v14 }

// kernel: _lambda_.43
= control target key start
LH: loop header
LB: loop body
LE: loop exit
PB: predicated region body
PF: predicated region fallthrough
CT: control target
= control target key end

     0   :  { %vm24_vm0 = vcmask 261120   ;;  %vm208_vm1 = vcmask 392192   ;;  %s353_s0 = inlined_call_operand.vmem [shape: f32[32,32], index: 0, kind: input, shape index: {}]   ;;  %s354_s3 = inlined_call_operand.vmem [shape: f32[32,48], index: 3, kind: input, shape index: {}]   ;;  %s355_s1 = inlined_call_operand.vmem [shape: f32[1,32], index: 1, kind: input, shape index: {}]   ;;  %s356_s2 = inlined_call_operand.vmem [shape: f32[1,32], index: 2, kind: input, shape index: {}]   ;;  %s357_s4 = inlined_call_operand.vmem [shape: f32[1,48], index: 4, kind: input, shape index: {}]   ;;  %s358_s5 = inlined_call_operand.vmem [shape: f32[32,48], index: 5, kind: output, shape index: {}]  }
   0x1   :  { %v20_v0 = vld [vmem:[%s353_s0] sm:$0xff]  ;;  %v21_v1 = vld [vmem:[%s353_s0 + $0x8] sm:$0xff]  ;;  %v22_v2 = vld [vmem:[%s353_s0 + $0x10] sm:$0xff] }
   0x2   :  { %v25_v3 = vsel %vm24_vm0, %v20_v0, 0.0  ;;  %v28_v4 = vsel %vm24_vm0, %v21_v1, 0.0  ;;  %v23_v5 = vld [vmem:[%s353_s0 + $0x18] sm:$0xff]  ;;  %v31_v6 = vsel %vm24_vm0, %v22_v2, 0.0  ;;  %v100_v28 = vld [vmem:[%s354_s3] sm:$0xff]  ;;  %v101_v29 = vld [vmem:[%s354_s3 + $0x8] sm:$0xff] }
   0x3   :  { %26 = vadd.xlane.f32.xlu0 %v25_v3  ;;  %29 = vadd.xlane.f32.xlu1 %v28_v4  ;;  %v34_v7 = vsel %vm24_vm0, %v23_v5, 0.0  ;;  %v102_v30 = vld [vmem:[%s354_s3 + $0x10] sm:$0xff]  ;;  %v246_v31 = vpack.c.bf16 %v101_v29, %v100_v28  ;;  %v103_v32 = vld [vmem:[%s354_s3 + $0x18] sm:$0xff]  ;;  %v217_v47 = vld [vmem:[%s355_s1] ss:$0 sm:$0xff] }
   0x4   :  { %v250_v33 = vpack.c.bf16 %v103_v32, %v102_v30  ;;  %v218_v49 = vld [vmem:[%s356_s2] ss:$0 sm:$0xff] }
   0x5   :  { %247 = vmatprep.subr.bf16.mxu0 %v246_v31  ;;  %254 = vmatprep.subr.bf16.mxu1 %v246_v31 }
   0x6   :  { %249 = vmatpush3.bf16.msra.mxu0 %v246_v31  ;;  %256 = vmatpush3.bf16.msra.mxu1 %v246_v31 }
   0x7   :  { %32 = vadd.xlane.f32.xlu0 %v31_v6  ;;  %35 = vadd.xlane.f32.xlu1 %v34_v7 }
   0x8   :  { %251 = vmatprep.subr.bf16.mxu0 %v250_v33  ;;  %255 = vmatprep.subr.bf16.mxu1 %v250_v33 }
   0xa   :  { %253 = vmatpush3.bf16.msra.mxu0 %v250_v33  ;;  %257 = vmatpush3.bf16.msra.mxu1 %v250_v33 }
  0x90   :  { %v27_v8 = vpop.xlane.xlu0 %26  ;;  %v30_v9 = vpop.xlane.xlu1 %29 }
  0x91   :  { %v38_v10 = vmul.f32 0.03125, %v27_v8  ;;  %v39_v11 = vmul.f32 0.03125, %v30_v9 }
  0x93   :  { %v42_v12 = vsub.f32 %v20_v0, %v38_v10  ;;  %v43_v13 = vsub.f32 %v21_v1, %v39_v11  ;;  %v219_v0 = vld [vmem:[%s357_s4] ss:$0 sm:$0xff] }
  0x94   :  { %v33_v14 = vpop.xlane.xlu0 %32  ;;  %v36_v15 = vpop.xlane.xlu1 %35 }
  0x95   :  { %v40_v16 = vmul.f32 0.03125, %v33_v14  ;;  %v41_v17 = vmul.f32 0.03125, %v36_v15  ;;  %v46_v18 = vmul.f32 %v42_v12, %v42_v12  ;;  %v47_v19 = vmul.f32 %v43_v13, %v43_v13 }
  0x97   :  { %v44_v20 = vsub.f32 %v22_v2, %v40_v16  ;;  %v45_v21 = vsub.f32 %v23_v5, %v41_v17  ;;  %v50_v22 = vsel %vm24_vm0, %v46_v18, 0.0  ;;  %v53_v23 = vsel %vm24_vm0, %v47_v19, 0.0 }
  0x98   :  { %51 = vadd.xlane.f32.xlu0 %v50_v22 }
  0x99   :  { %v48_v24 = vmul.f32 %v44_v20, %v44_v20  ;;  %v49_v25 = vmul.f32 %v45_v21, %v45_v21 }
  0x9b   :  { %v56_v26 = vsel %vm24_vm0, %v48_v24, 0.0  ;;  %v59_v27 = vsel %vm24_vm0, %v49_v25, 0.0 }
  0x9c   :  { %54 = vadd.xlane.f32.xlu0 %v53_v23  ;;  %57 = vadd.xlane.f32.xlu1 %v56_v26 }
  0xa0   :  { %60 = vadd.xlane.f32.xlu1 %v59_v27 }
 0x125   :  { %v52_v34 = vpop.xlane.xlu0 %51 }
 0x126   :  { %v62_v35 = vmul.f32 0.03125, %v52_v34 }
 0x128   :  { %v66_v36 = vadd.f32 1e-06, %v62_v35 }
 0x129   :  { %v58_v37 = vpop.xlane.xlu1 %57  ;;  %v55_v38 = vpop.xlane.xlu0 %54 }
 0x12a   :  { %258 = vrsqrt.f32 %v66_v36  ;;  %v64_v39 = vmul.f32 0.03125, %v58_v37  ;;  %v63_v40 = vmul.f32 0.03125, %v55_v38 }
 0x12c   :  { %v68_v41 = vadd.f32 1e-06, %v64_v39  ;;  %v67_v42 = vadd.f32 1e-06, %v63_v40 }
 0x12d   :  { %v61_v43 = vpop.xlane.xlu1 %60 }
 0x12e   :  { %260 = vrsqrt.f32 %v68_v41  ;;  %v65_v44 = vmul.f32 0.03125, %v61_v43 }
 0x12f   :  { %262 = vrsqrt.f32 %v67_v42 }
 0x130   :  { %v69_v45 = vadd.f32 1e-06, %v65_v44 }
 0x132   :  { %264 = vrsqrt.f32 %v69_v45 }
 0x134   :  { %v259_v46 = vpop.eup %258 }
 0x135   :  { %v74_v48 = vmul.f32 %v259_v46, %v42_v12 }
 0x137   :  { %v85_v50 = vmul.f32 %v217_v47, %v74_v48 }
 0x138   :  { %v261_v51 = vpop.eup %260 }
 0x139   :  { %v263_v52 = vpop.eup %262  ;;  %v96_v53 = vadd.f32 %v218_v49, %v85_v50  ;;  %v76_v54 = vmul.f32 %v261_v51, %v44_v20 }
 0x13a   :  { %v75_v55 = vmul.f32 %v263_v52, %v43_v13 }
 0x13b   :  { %240 = vmatprep.mubr.msk.f32.mxu0 %vm24_vm0, %v96_v53  ;;  %v87_v56 = vmul.f32 %v217_v47, %v76_v54 }
 0x13c   :  { %v265_v57 = vpop.eup %264  ;;  %v86_v58 = vmul.f32 %v217_v47, %v75_v55 }
 0x13d   :  { %v98_v59 = vadd.f32 %v218_v49, %v87_v56  ;;  %v77_v60 = vmul.f32 %v265_v57, %v45_v21 }
 0x13e   :  { %v97_v61 = vadd.f32 %v218_v49, %v86_v58 }
 0x13f   :  { %243 = vmatprep.mubr.msk.f32.mxu1 %vm24_vm0, %v98_v59  ;;  %v88_v62 = vmul.f32 %v217_v47, %v77_v60 }
 0x140   :  { %241 = vmatmul.mubr.msk.f32.vlgmr.msra.gmra.mrb[0].mxu0 %vm24_vm0, %v97_v61 }
 0x141   :  { %v99_v63 = vadd.f32 %v218_v49, %v88_v62 }
 0x143   :  { %244 = vmatmul.mubr.msk.f32.vlgmr.msra.gmra.mrb[0].mxu1 %vm24_vm0, %v99_v63 }
 0x213   :  { %v242_v1 = vpop.f32.mrb[0].mxu0 }
 0x214   :  { %v195_v2 = vadd.f32 %v242_v1, %v219_v0  ;;  %v189_v3 = vpop.f32.mrb[1].mxu0 }
 0x215   :  { %v190_v4 = vadd.f32 %v219_v0, %v189_v3 }
 0x216   :  { %210 = vst.msk [vmem:[%s358_s5 + $0x8] sm:$0xff] %vm208_vm1, %v195_v2  ;;  %v245_v5 = vpop.f32.mrb[0].mxu1 }
 0x217   :  { %209 = vst.msk [vmem:[%s358_s5] sm:$0xff] %vm208_vm1, %v190_v4  ;;  %v205_v6 = vadd.f32 %v245_v5, %v219_v0  ;;  %v199_v7 = vpop.f32.mrb[1].mxu1 }
 0x218   :  { %v200_v8 = vadd.f32 %v219_v0, %v199_v7 }
 0x219   :  { %212 = vst.msk [vmem:[%s358_s5 + $0x18] sm:$0xff] %vm208_vm1, %v205_v6 }
 0x21a   :  { %211 = vst.msk [vmem:[%s358_s5 + $0x10] sm:$0xff] %vm208_vm1, %v200_v8 }

// kernel: _lambda_.34
= control target key start
LH: loop header
LB: loop body
LE: loop exit
PB: predicated region body
PF: predicated region fallthrough
CT: control target
= control target key end

     0   :  { %vm18_vm0 = vcmask 261120   ;;  %s944_s1 = inlined_call_operand.vmem [shape: f32[512,32], index: 1, kind: input, shape index: {}]   ;;  %s945_s0 = inlined_call_operand.vmem [shape: f32[64,512], index: 0, kind: input, shape index: {}]   ;;  %s946_s2 = inlined_call_operand.vmem [shape: f32[1,32], index: 2, kind: input, shape index: {}]   ;;  %s947_s3 = inlined_call_operand.vmem [shape: f32[64,32], index: 3, kind: output, shape index: {}]  }
   0x1   :  { %v83_v0 = vld [vmem:[%s944_s1 + $0x80] sm:$0xff]  ;;  %v84_v1 = vld [vmem:[%s944_s1 + $0x88] sm:$0xff]  ;;  %v85_v11 = vld [vmem:[%s944_s1 + $0x90] sm:$0xff] }
   0x2   :  { %v115_v2 = vld [vmem:[%s944_s1 + $0x180] sm:$0xff]  ;;  %v509_v3 = vpack.c.bf16 %v84_v1, %v83_v0  ;;  %v116_v4 = vld [vmem:[%s944_s1 + $0x188] sm:$0xff]  ;;  %v86_v13 = vld [vmem:[%s944_s1 + $0x98] sm:$0xff] }
   0x3   :  { %v67_v5 = vld [vmem:[%s944_s1] sm:$0xff]  ;;  %v68_v6 = vld [vmem:[%s944_s1 + $0x8] sm:$0xff]  ;;  %v541_v7 = vpack.c.bf16 %v116_v4, %v115_v2  ;;  %v117_v14 = vld [vmem:[%s944_s1 + $0x190] sm:$0xff]  ;;  %v513_v16 = vpack.c.bf16 %v86_v13, %v85_v11 }
   0x4   :  { %v511_v8 = vpack.c.bf16 %v68_v6, %v67_v5  ;;  %v99_v9 = vld [vmem:[%s944_s1 + $0x100] sm:$0xff]  ;;  %v100_v10 = vld [vmem:[%s944_s1 + $0x108] sm:$0xff]  ;;  %510 = vmatprep.subr.bf16.mxu0 %v509_v3  ;;  %v118_v15 = vld [vmem:[%s944_s1 + $0x198] sm:$0xff] }
   0x5   :  { %v543_v12 = vpack.c.bf16 %v100_v10, %v99_v9  ;;  %542 = vmatprep.subr.bf16.mxu1 %v541_v7  ;;  %v545_v17 = vpack.c.bf16 %v118_v15, %v117_v14  ;;  %v69_v18 = vld [vmem:[%s944_s1 + $0x10] sm:$0xff]  ;;  %v70_v19 = vld [vmem:[%s944_s1 + $0x18] sm:$0xff]  ;;  %v87_v23 = vld [vmem:[%s944_s1 + $0xa0] sm:$0xff] }
   0x6   :  { %512 = vmatpush3.bf16.msra.mxu0 %v511_v8  ;;  %v101_v20 = vld [vmem:[%s944_s1 + $0x110] sm:$0xff]  ;;  %v515_v21 = vpack.c.bf16 %v70_v19, %v69_v18  ;;  %v102_v22 = vld [vmem:[%s944_s1 + $0x118] sm:$0xff]  ;;  %v88_v24 = vld [vmem:[%s944_s1 + $0xa8] sm:$0xff] }
   0x7   :  { %544 = vmatpush3.bf16.msra.mxu1 %v543_v12  ;;  %514 = vmatprep.subr.bf16.mxu0 %v513_v16  ;;  %v547_v25 = vpack.c.bf16 %v102_v22, %v101_v20  ;;  %v517_v26 = vpack.c.bf16 %v88_v24, %v87_v23  ;;  %v119_v27 = vld [vmem:[%s944_s1 + $0x1a0] sm:$0xff]  ;;  %v120_v28 = vld [vmem:[%s944_s1 + $0x1a8] sm:$0xff]  ;;  %v89_v35 = vld [vmem:[%s944_s1 + $0xb0] sm:$0xff] }
   0x8   :  { %546 = vmatprep.subr.bf16.mxu1 %v545_v17  ;;  %v71_v29 = vld [vmem:[%s944_s1 + $0x20] sm:$0xff]  ;;  %v549_v30 = vpack.c.bf16 %v120_v28, %v119_v27  ;;  %v72_v31 = vld [vmem:[%s944_s1 + $0x28] sm:$0xff]  ;;  %v90_v36 = vld [vmem:[%s944_s1 + $0xb8] sm:$0xff] }
   0x9   :  { %v103_v32 = vld [vmem:[%s944_s1 + $0x120] sm:$0xff]  ;;  %v104_v33 = vld [vmem:[%s944_s1 + $0x128] sm:$0xff]  ;;  %v519_v34 = vpack.c.bf16 %v72_v31, %v71_v29  ;;  %v121_v37 = vld [vmem:[%s944_s1 + $0x1b0] sm:$0xff]  ;;  %v521_v39 = vpack.c.bf16 %v90_v36, %v89_v35 }
   0xa   :  { %516 = vmatpush3.bf16.msra.mxu0 %v515_v21  ;;  %v551_v38 = vpack.c.bf16 %v104_v33, %v103_v32  ;;  %v122_v40 = vld [vmem:[%s944_s1 + $0x1b8] sm:$0xff]  ;;  %v73_v41 = vld [vmem:[%s944_s1 + $0x30] sm:$0xff]  ;;  %v91_v46 = vld [vmem:[%s944_s1 + $0xc0] sm:$0xff] }
   0xb   :  { %548 = vmatpush3.bf16.msra.mxu1 %v547_v25  ;;  %518 = vmatprep.subr.bf16.mxu0 %v517_v26  ;;  %v74_v42 = vld [vmem:[%s944_s1 + $0x38] sm:$0xff]  ;;  %v553_v43 = vpack.c.bf16 %v122_v40, %v121_v37  ;;  %v105_v44 = vld [vmem:[%s944_s1 + $0x130] sm:$0xff]  ;;  %v92_v47 = vld [vmem:[%s944_s1 + $0xc8] sm:$0xff] }
   0xc   :  { %550 = vmatprep.subr.bf16.mxu1 %v549_v30  ;;  %v106_v45 = vld [vmem:[%s944_s1 + $0x138] sm:$0xff]  ;;  %v123_v48 = vld [vmem:[%s944_s1 + $0x1c0] sm:$0xff]  ;;  %v124_v49 = vld [vmem:[%s944_s1 + $0x1c8] sm:$0xff]  ;;  %v523_v50 = vpack.c.bf16 %v74_v42, %v73_v41  ;;  %v525_v52 = vpack.c.bf16 %v92_v47, %v91_v46 }
   0xd   :  { %v555_v51 = vpack.c.bf16 %v106_v45, %v105_v44  ;;  %v75_v53 = vld [vmem:[%s944_s1 + $0x40] sm:$0xff]  ;;  %v76_v54 = vld [vmem:[%s944_s1 + $0x48] sm:$0xff]  ;;  %v557_v56 = vpack.c.bf16 %v124_v49, %v123_v48  ;;  %v93_v58 = vld [vmem:[%s944_s1 + $0xd0] sm:$0xff] }
   0xe   :  { %520 = vmatpush3.bf16.msra.mxu0 %v519_v34  ;;  %v107_v55 = vld [vmem:[%s944_s1 + $0x140] sm:$0xff]  ;;  %v108_v57 = vld [vmem:[%s944_s1 + $0x148] sm:$0xff]  ;;  %v94_v59 = vld [vmem:[%s944_s1 + $0xd8] sm:$0xff]  ;;  %v527_v62 = vpack.c.bf16 %v76_v54, %v75_v53 }
   0xf   :  { %552 = vmatpush3.bf16.msra.mxu1 %v551_v38  ;;  %522 = vmatprep.subr.bf16.mxu0 %v521_v39  ;;  %v125_v60 = vld [vmem:[%s944_s1 + $0x1d0] sm:$0xff]  ;;  %v126_v61 = vld [vmem:[%s944_s1 + $0x1d8] sm:$0xff]  ;;  %v559_v63 = vpack.c.bf16 %v108_v57, %v107_v55  ;;  %v529_v0 = vpack.c.bf16 %v94_v59, %v93_v58  ;;  %v95_v6 = vld [vmem:[%s944_s1 + $0xe0] sm:$0xff] }
  0x10   :  { %554 = vmatprep.subr.bf16.mxu1 %v553_v43  ;;  %v77_v1 = vld [vmem:[%s944_s1 + $0x50] sm:$0xff]  ;;  %v78_v2 = vld [vmem:[%s944_s1 + $0x58] sm:$0xff]  ;;  %v561_v4 = vpack.c.bf16 %v126_v61, %v125_v60  ;;  %v96_v7 = vld [vmem:[%s944_s1 + $0xe8] sm:$0xff] }
  0x11   :  { %v109_v3 = vld [vmem:[%s944_s1 + $0x150] sm:$0xff]  ;;  %v110_v5 = vld [vmem:[%s944_s1 + $0x158] sm:$0xff]  ;;  %v127_v8 = vld [vmem:[%s944_s1 + $0x1e0] sm:$0xff]  ;;  %v531_v10 = vpack.c.bf16 %v78_v2, %v77_v1  ;;  %v533_v14 = vpack.c.bf16 %v96_v7, %v95_v6 }
  0x12   :  { %524 = vmatpush3.bf16.msra.mxu0 %v523_v50  ;;  %v128_v9 = vld [vmem:[%s944_s1 + $0x1e8] sm:$0xff]  ;;  %v79_v11 = vld [vmem:[%s944_s1 + $0x60] sm:$0xff]  ;;  %v563_v13 = vpack.c.bf16 %v110_v5, %v109_v3  ;;  %v38_v17 = vld [vmem:[%s945_s0 + $0x18] sm:$0xff] }
  0x13   :  { %556 = vmatpush3.bf16.msra.mxu1 %v555_v51  ;;  %526 = vmatprep.subr.bf16.mxu0 %v525_v52  ;;  %v80_v12 = vld [vmem:[%s944_s1 + $0x68] sm:$0xff]  ;;  %v111_v15 = vld [vmem:[%s944_s1 + $0x160] sm:$0xff]  ;;  %v565_v18 = vpack.c.bf16 %v128_v9, %v127_v8  ;;  %v97_v20 = vld [vmem:[%s944_s1 + $0xf0] sm:$0xff] }
  0x14   :  { %558 = vmatprep.subr.bf16.mxu1 %v557_v56  ;;  %v36_v16 = vld [vmem:[%s945_s0 + $0x8] sm:$0xff]  ;;  %v98_v21 = vld [vmem:[%s944_s1 + $0xf8] sm:$0xff]  ;;  %v129_v22 = vld [vmem:[%s944_s1 + $0x1f0] sm:$0xff]  ;;  %300 = vmatprep.mubr.f32.mxu1 %v38_v17  ;;  %v535_v24 = vpack.c.bf16 %v80_v12, %v79_v11 }
  0x15   :  { %v112_v19 = vld [vmem:[%s944_s1 + $0x168] sm:$0xff]  ;;  %195 = vmatprep.mubr.f32.mxu0 %v36_v16  ;;  %v130_v23 = vld [vmem:[%s944_s1 + $0x1f8] sm:$0xff]  ;;  %v537_v26 = vpack.c.bf16 %v98_v21, %v97_v20  ;;  %v81_v27 = vld [vmem:[%s944_s1 + $0x70] sm:$0xff] }
  0x16   :  { %528 = vmatpush3.bf16.msra.mxu0 %v527_v62  ;;  %v567_v25 = vpack.c.bf16 %v112_v19, %v111_v15  ;;  %v82_v28 = vld [vmem:[%s944_s1 + $0x78] sm:$0xff]  ;;  %v569_v29 = vpack.c.bf16 %v130_v23, %v129_v22  ;;  %v113_v30 = vld [vmem:[%s944_s1 + $0x170] sm:$0xff]  ;;  %v35_v34 = vld [vmem:[%s945_s0] sm:$0xff] }
  0x17   :  { %560 = vmatpush3.bf16.msra.mxu1 %v559_v63  ;;  %530 = vmatprep.subr.bf16.mxu0 %v529_v0  ;;  %v114_v31 = vld [vmem:[%s944_s1 + $0x178] sm:$0xff]  ;;  %v539_v32 = vpack.c.bf16 %v82_v28, %v81_v27  ;;  %v37_v35 = vld [vmem:[%s945_s0 + $0x10] sm:$0xff]  ;;  %v40_v36 = vld [vmem:[%s945_s0 + $0x28] sm:$0xff]  ;;  %v574_v0 = vmov 0.0  }
  0x18   :  { %562 = vmatprep.subr.bf16.mxu1 %v561_v4  ;;  %v571_v33 = vpack.c.bf16 %v114_v31, %v113_v30  ;;  %v42_v37 = vld [vmem:[%s945_s0 + $0x38] sm:$0xff]  ;;  %v39_v38 = vld [vmem:[%s945_s0 + $0x20] sm:$0xff]  ;;  %v41_v39 = vld [vmem:[%s945_s0 + $0x30] sm:$0xff]  ;;  %19 = vst.msk [vmem:[#allocation2] sm:$0xff] %vm18_vm0, %v574_v0 }
  0x19   :  { %v44_v40 = vld [vmem:[%s945_s0 + $0x48] sm:$0xff]  ;;  %v46_v41 = vld [vmem:[%s945_s0 + $0x58] sm:$0xff]  ;;  %v43_v42 = vld [vmem:[%s945_s0 + $0x40] sm:$0xff]  ;;  %20 = vst.msk [vmem:[#allocation2 + $0x8] sm:$0xff] %vm18_vm0, %v574_v0 }
  0x1a   :  { %532 = vmatpush3.bf16.msra.mxu0 %v531_v10  ;;  %v45_v43 = vld [vmem:[%s945_s0 + $0x50] sm:$0xff]  ;;  %v48_v44 = vld [vmem:[%s945_s0 + $0x68] sm:$0xff]  ;;  %v50_v45 = vld [vmem:[%s945_s0 + $0x78] sm:$0xff]  ;;  %21 = vst.msk [vmem:[#allocation2 + $0x10] sm:$0xff] %vm18_vm0, %v574_v0 }
  0x1b   :  { %564 = vmatpush3.bf16.msra.mxu1 %v563_v13  ;;  %534 = vmatprep.subr.bf16.mxu0 %v533_v14  ;;  %v47_v46 = vld [vmem:[%s945_s0 + $0x60] sm:$0xff]  ;;  %v49_v47 = vld [vmem:[%s945_s0 + $0x70] sm:$0xff]  ;;  %v52_v48 = vld [vmem:[%s945_s0 + $0x88] sm:$0xff]  ;;  %22 = vst.msk [vmem:[#allocation2 + $0x18] sm:$0xff] %vm18_vm0, %v574_v0 }
  0x1c   :  { %566 = vmatprep.subr.bf16.mxu1 %v565_v18  ;;  %v54_v49 = vld [vmem:[%s945_s0 + $0x98] sm:$0xff]  ;;  %v51_v50 = vld [vmem:[%s945_s0 + $0x80] sm:$0xff]  ;;  %v53_v51 = vld [vmem:[%s945_s0 + $0x90] sm:$0xff]  ;;  %23 = vst.msk [vmem:[#allocation2 + $0x20] sm:$0xff] %vm18_vm0, %v574_v0 }
  0x1d   :  { %v56_v52 = vld [vmem:[%s945_s0 + $0xa8] sm:$0xff]  ;;  %v58_v53 = vld [vmem:[%s945_s0 + $0xb8] sm:$0xff]  ;;  %v55_v54 = vld [vmem:[%s945_s0 + $0xa0] sm:$0xff]  ;;  %24 = vst.msk [vmem:[#allocation2 + $0x28] sm:$0xff] %vm18_vm0, %v574_v0 }
  0x1e   :  { %536 = vmatpush3.bf16.msra.mxu0 %v535_v24  ;;  %v57_v55 = vld [vmem:[%s945_s0 + $0xb0] sm:$0xff]  ;;  %v60_v56 = vld [vmem:[%s945_s0 + $0xc8] sm:$0xff]  ;;  %v62_v57 = vld [vmem:[%s945_s0 + $0xd8] sm:$0xff]  ;;  %25 = vst.msk [vmem:[#allocation2 + $0x30] sm:$0xff] %vm18_vm0, %v574_v0 }
  0x1f   :  { %568 = vmatpush3.bf16.msra.mxu1 %v567_v25  ;;  %538 = vmatprep.subr.bf16.mxu0 %v537_v26  ;;  %v59_v58 = vld [vmem:[%s945_s0 + $0xc0] sm:$0xff]  ;;  %v61_v59 = vld [vmem:[%s945_s0 + $0xd0] sm:$0xff]  ;;  %v64_v60 = vld [vmem:[%s945_s0 + $0xe8] sm:$0xff]  ;;  %26 = vst.msk [vmem:[#allocation2 + $0x38] sm:$0xff] %vm18_vm0, %v574_v0 }
  0x20   :  { %570 = vmatprep.subr.bf16.mxu1 %v569_v29  ;;  %v66_v61 = vld [vmem:[%s945_s0 + $0xf8] sm:$0xff]  ;;  %v63_v62 = vld [vmem:[%s945_s0 + $0xe0] sm:$0xff]  ;;  %v65_v63 = vld [vmem:[%s945_s0 + $0xf0] sm:$0xff] }
  0x21   :  { %v27_v7 = vld [vmem:[#allocation2] sm:$0xff]  ;;  %v28_v16 = vld [vmem:[#allocation2 + $0x8] sm:$0xff]  ;;  %v29_v25 = vld [vmem:[#allocation2 + $0x10] sm:$0xff] }
  0x22   :  { %540 = vmatpush3.bf16.msra.mxu0 %v539_v32  ;;  %v896_v30 = vld [vmem:[%s946_s2] ss:$0 sm:$0xff] }
  0x23   :  { %572 = vmatpush3.bf16.msra.mxu1 %v571_v33 }
  0x25   :  { %196 = vmatmul.mubr.f32.vlgmr.msra.gmra.mrb[0].mxu0 %v35_v34 }
  0x26   :  { %301 = vmatmul.mubr.f32.vlgmr.msra.gmra.mrb[0].mxu1 %v37_v35  ;;  %200 = vmatprep.mubr.f32.mxu0 %v40_v36  ;;  %v30_v36 = vld [vmem:[#allocation2 + $0x18] sm:$0xff] }
  0x27   :  { %305 = vmatprep.mubr.f32.mxu1 %v42_v37 }
  0x29   :  { %201 = vmatmul.mubr.f32.gmra.mrb[2].mxu0 %v39_v38 }
  0x2a   :  { %306 = vmatmul.mubr.f32.gmra.mrb[2].mxu1 %v41_v39  ;;  %205 = vmatprep.mubr.f32.mxu0 %v44_v40 }
  0x2b   :  { %310 = vmatprep.mubr.f32.mxu1 %v46_v41 }
  0x2d   :  { %206 = vmatmul.mubr.f32.gmra.mrb[4].mxu0 %v43_v42 }
  0x2e   :  { %311 = vmatmul.mubr.f32.gmra.mrb[4].mxu1 %v45_v43  ;;  %210 = vmatprep.mubr.f32.mxu0 %v48_v44 }
  0x2f   :  { %315 = vmatprep.mubr.f32.mxu1 %v50_v45 }
  0x31   :  { %211 = vmatmul.mubr.f32.gmra.mrb[6].mxu0 %v47_v46 }
  0x32   :  { %316 = vmatmul.mubr.f32.gmra.mrb[6].mxu1 %v49_v47  ;;  %215 = vmatprep.mubr.f32.mxu0 %v52_v48  ;;  %v31_v47 = vld [vmem:[#allocation2 + $0x20] sm:$0xff] }
  0x33   :  { %320 = vmatprep.mubr.f32.mxu1 %v54_v49 }
  0x35   :  { %216 = vmatmul.mubr.f32.gmra.mrb[8].mxu0 %v51_v50 }
  0x36   :  { %321 = vmatmul.mubr.f32.gmra.mrb[8].mxu1 %v53_v51  ;;  %220 = vmatprep.mubr.f32.mxu0 %v56_v52 }
  0x37   :  { %325 = vmatprep.mubr.f32.mxu1 %v58_v53 }
  0x39   :  { %221 = vmatmul.mubr.f32.gmra.mrb[10].mxu0 %v55_v54 }
  0x3a   :  { %326 = vmatmul.mubr.f32.gmra.mrb[10].mxu1 %v57_v55  ;;  %225 = vmatprep.mubr.f32.mxu0 %v60_v56 }
  0x3b   :  { %330 = vmatprep.mubr.f32.mxu1 %v62_v57 }
  0x3d   :  { %226 = vmatmul.mubr.f32.gmra.mrb[12].mxu0 %v59_v58  ;;  %v32_v58 = vld [vmem:[#allocation2 + $0x28] sm:$0xff] }
  0x3e   :  { %331 = vmatmul.mubr.f32.gmra.mrb[12].mxu1 %v61_v59  ;;  %230 = vmatprep.mubr.f32.mxu0 %v64_v60 }
  0x3f   :  { %335 = vmatprep.mubr.f32.mxu1 %v66_v61 }
  0x41   :  { %231 = vmatmul.mubr.f32.gmra.mrb[14].mxu0 %v63_v62 }
  0x42   :  { %336 = vmatmul.mubr.f32.gmra.mrb[14].mxu1 %v65_v63 }
  0xf8   :  { %v429_v1 = vpop.f32.mrb[0].mxu0 }
  0xf9   :  { %v485_v2 = vpop.f32.mrb[0].mxu1  ;;  %v430_v3 = vpop.f32.mrb[1].mxu0 }
  0xfa   :  { %v431_v4 = vadd.f32 %v430_v3, %v429_v1  ;;  %v486_v5 = vpop.f32.mrb[1].mxu1 }
  0xfb   :  { %v487_v6 = vadd.f32 %v486_v5, %v485_v2  ;;  %v33_v5 = vld [vmem:[#allocation2 + $0x30] sm:$0xff] }
  0xfc   :  { %v432_v8 = vpop.f32.mrb[2].mxu0 }
  0xfd   :  { %v303_v9 = vadd.f32 %v487_v6, %v431_v4  ;;  %v488_v10 = vpop.f32.mrb[2].mxu1  ;;  %v433_v11 = vpop.f32.mrb[3].mxu0 }
  0xfe   :  { %v434_v12 = vadd.f32 %v433_v11, %v432_v8  ;;  %v489_v13 = vpop.f32.mrb[3].mxu1 }
  0xff   :  { %v341_v14 = vadd.f32 %v303_v9, %v27_v7  ;;  %v490_v15 = vadd.f32 %v489_v13, %v488_v10 }
 0x100   :  { %v435_v17 = vpop.f32.mrb[4].mxu0 }
 0x101   :  { %350 = vst.msk [vmem:[#allocation2] sm:$0xff] %vm18_vm0, %v341_v14  ;;  %v308_v18 = vadd.f32 %v490_v15, %v434_v12  ;;  %v491_v19 = vpop.f32.mrb[4].mxu1  ;;  %v436_v20 = vpop.f32.mrb[5].mxu0 }
 0x102   :  { %v437_v21 = vadd.f32 %v436_v20, %v435_v17  ;;  %v492_v22 = vpop.f32.mrb[5].mxu1 }
 0x103   :  { %v342_v23 = vadd.f32 %v308_v18, %v28_v16  ;;  %v493_v24 = vadd.f32 %v492_v22, %v491_v19  ;;  %v34_v16 = vld [vmem:[#allocation2 + $0x38] sm:$0xff] }
 0x104   :  { %v438_v26 = vpop.f32.mrb[6].mxu0 }
 0x105   :  { %351 = vst.msk [vmem:[#allocation2 + $0x8] sm:$0xff] %vm18_vm0, %v342_v23  ;;  %v313_v27 = vadd.f32 %v493_v24, %v437_v21  ;;  %v494_v28 = vpop.f32.mrb[6].mxu1  ;;  %v439_v29 = vpop.f32.mrb[7].mxu0 }
 0x106   :  { %v440_v31 = vadd.f32 %v439_v29, %v438_v26  ;;  %v495_v32 = vpop.f32.mrb[7].mxu1 }
 0x107   :  { %v343_v33 = vadd.f32 %v313_v27, %v29_v25  ;;  %v496_v34 = vadd.f32 %v495_v32, %v494_v28 }
 0x108   :  { %v361_v35 = vld [vmem:[#allocation2] sm:$0xff]  ;;  %v441_v37 = vpop.f32.mrb[8].mxu0 }
 0x109   :  { %v376_v38 = vadd.f32 %v896_v30, %v361_v35  ;;  %352 = vst.msk [vmem:[#allocation2 + $0x10] sm:$0xff] %vm18_vm0, %v343_v33  ;;  %v318_v39 = vadd.f32 %v496_v34, %v440_v31  ;;  %v497_v40 = vpop.f32.mrb[8].mxu1  ;;  %v442_v41 = vpop.f32.mrb[9].mxu0 }
 0x10a   :  { %v443_v42 = vadd.f32 %v442_v41, %v441_v37  ;;  %v498_v43 = vpop.f32.mrb[9].mxu1 }
 0x10b   :  { %384 = vst.msk [vmem:[%s947_s3] sm:$0xff] %vm18_vm0, %v376_v38  ;;  %v344_v44 = vadd.f32 %v318_v39, %v30_v36  ;;  %v499_v45 = vadd.f32 %v498_v43, %v497_v40 }
 0x10c   :  { %v362_v46 = vld [vmem:[#allocation2 + $0x8] sm:$0xff]  ;;  %v444_v48 = vpop.f32.mrb[10].mxu0 }
 0x10d   :  { %v377_v49 = vadd.f32 %v896_v30, %v362_v46  ;;  %353 = vst.msk [vmem:[#allocation2 + $0x18] sm:$0xff] %vm18_vm0, %v344_v44  ;;  %v323_v50 = vadd.f32 %v499_v45, %v443_v42  ;;  %v500_v51 = vpop.f32.mrb[10].mxu1  ;;  %v445_v52 = vpop.f32.mrb[11].mxu0 }
 0x10e   :  { %v446_v53 = vadd.f32 %v445_v52, %v444_v48  ;;  %v501_v54 = vpop.f32.mrb[11].mxu1 }
 0x10f   :  { %385 = vst.msk [vmem:[%s947_s3 + $0x8] sm:$0xff] %vm18_vm0, %v377_v49  ;;  %v345_v55 = vadd.f32 %v323_v50, %v31_v47  ;;  %v502_v56 = vadd.f32 %v501_v54, %v500_v51 }
 0x110   :  { %v363_v57 = vld [vmem:[#allocation2 + $0x10] sm:$0xff]  ;;  %v447_v59 = vpop.f32.mrb[12].mxu0 }
 0x111   :  { %v378_v60 = vadd.f32 %v896_v30, %v363_v57  ;;  %354 = vst.msk [vmem:[#allocation2 + $0x20] sm:$0xff] %vm18_vm0, %v345_v55  ;;  %v328_v61 = vadd.f32 %v502_v56, %v446_v53  ;;  %v503_v62 = vpop.f32.mrb[12].mxu1  ;;  %v448_v63 = vpop.f32.mrb[13].mxu0 }
 0x112   :  { %v449_v0 = vadd.f32 %v448_v63, %v447_v59  ;;  %v504_v1 = vpop.f32.mrb[13].mxu1 }
 0x113   :  { %386 = vst.msk [vmem:[%s947_s3 + $0x10] sm:$0xff] %vm18_vm0, %v378_v60  ;;  %v346_v2 = vadd.f32 %v328_v61, %v32_v58  ;;  %v505_v3 = vadd.f32 %v504_v1, %v503_v62 }
 0x114   :  { %v364_v4 = vld [vmem:[#allocation2 + $0x18] sm:$0xff]  ;;  %v450_v6 = vpop.f32.mrb[14].mxu0 }
 0x115   :  { %v379_v7 = vadd.f32 %v896_v30, %v364_v4  ;;  %355 = vst.msk [vmem:[#allocation2 + $0x28] sm:$0xff] %vm18_vm0, %v346_v2  ;;  %v333_v8 = vadd.f32 %v505_v3, %v449_v0  ;;  %v506_v9 = vpop.f32.mrb[14].mxu1  ;;  %v451_v10 = vpop.f32.mrb[15].mxu0 }
 0x116   :  { %v452_v11 = vadd.f32 %v451_v10, %v450_v6  ;;  %v507_v12 = vpop.f32.mrb[15].mxu1 }
 0x117   :  { %387 = vst.msk [vmem:[%s947_s3 + $0x18] sm:$0xff] %vm18_vm0, %v379_v7  ;;  %v347_v13 = vadd.f32 %v333_v8, %v33_v5  ;;  %v508_v14 = vadd.f32 %v507_v12, %v506_v9 }
 0x118   :  { %v365_v15 = vld [vmem:[#allocation2 + $0x20] sm:$0xff] }
 0x119   :  { %v380_v17 = vadd.f32 %v896_v30, %v365_v15  ;;  %356 = vst.msk [vmem:[#allocation2 + $0x30] sm:$0xff] %vm18_vm0, %v347_v13  ;;  %v338_v18 = vadd.f32 %v508_v14, %v452_v11 }
 0x11b   :  { %388 = vst.msk [vmem:[%s947_s3 + $0x20] sm:$0xff] %vm18_vm0, %v380_v17  ;;  %v348_v19 = vadd.f32 %v338_v18, %v34_v16 }
 0x11c   :  { %v366_v20 = vld [vmem:[#allocation2 + $0x28] sm:$0xff] }
 0x11d   :  { %v381_v21 = vadd.f32 %v896_v30, %v366_v20  ;;  %357 = vst.msk [vmem:[#allocation2 + $0x38] sm:$0xff] %vm18_vm0, %v348_v19 }
 0x11f   :  { %389 = vst.msk [vmem:[%s947_s3 + $0x28] sm:$0xff] %vm18_vm0, %v381_v21 }
 0x120   :  { %v367_v22 = vld [vmem:[#allocation2 + $0x30] sm:$0xff] }
 0x121   :  { %v382_v23 = vadd.f32 %v896_v30, %v367_v22 }
 0x123   :  { %390 = vst.msk [vmem:[%s947_s3 + $0x30] sm:$0xff] %vm18_vm0, %v382_v23 }
 0x124   :  { %v368_v24 = vld [vmem:[#allocation2 + $0x38] sm:$0xff] }
 0x125   :  { %v383_v25 = vadd.f32 %v896_v30, %v368_v24 }
 0x127   :  { %391 = vst.msk [vmem:[%s947_s3 + $0x38] sm:$0xff] %vm18_vm0, %v383_v25 }

</bundles_post_ra>
